<compile_context>
chip_gen: v5e
topology: v5e:2x2
jax: 0.10.0
libtpu: 0.0.40
codegen_flags: <defaults>
</compile_context>

<pallas_src>
import functools
import math

import jax
import jax.numpy as jnp
import numpy as np
from jax import lax
from jax.experimental import pallas as pl
from jax.experimental.pallas import tpu as pltpu


# ----------------------------------------------------------------------------
# small in-kernel helpers
# ----------------------------------------------------------------------------
def _erf_poly(u):
    # Abramowitz & Stegun 7.1.26 erf (max abs err ~1.5e-7) - matches torch's
    # exact (erf-based) GELU well within the test tolerance.
    a1, a2, a3, a4, a5 = (0.254829592, -0.284496736, 1.421413741,
                          -1.453152027, 1.061405429)
    pp = 0.3275911
    sgn = jnp.where(u >= 0.0, 1.0, -1.0)
    au = jnp.abs(u)
    t = 1.0 / (1.0 + pp * au)
    poly = ((((a5 * t + a4) * t + a3) * t + a2) * t + a1) * t
    return sgn * (1.0 - poly * jnp.exp(-au * au))


def _gelu(u):
    # exact (erf-based) GELU == torch nn.GELU() default
    return 0.5 * u * (1.0 + _erf_poly(u * 0.7071067811865476))


def _layernorm(t, gamma, beta, eps=1e-5):
    mu = jnp.mean(t, axis=-1, keepdims=True)
    ctr = t - mu
    var = jnp.mean(ctr * ctr, axis=-1, keepdims=True)
    return ctr * lax.rsqrt(var + eps) * gamma + beta


# ----------------------------------------------------------------------------
# fused kernel: a single lane-dense program for the whole block
# ----------------------------------------------------------------------------
def _block_kernel(xp_ref, mask_ref, dww_ref, wqkv_ref, perm_ref,
                  ln1_g_ref, ln1_b_ref, w1_ref, b1_ref, w2_ref, b2_ref,
                  ln2_g_ref, ln2_b_ref, o_ref, *, B, head, d_k, H, W, lpad):
    f32 = jnp.float32
    N = H * W
    C = head * d_k
    m = N // d_k
    BN = B * N
    nchunk = BN // C

    xp = xp_ref[...]                        # (C, lpad + BN + lpad), zero-padded lanes
    x = xp[:, lpad:lpad + BN]               # (C, BN) original input (residual)
    masks = mask_ref[...]                   # (9, BN) boundary masks per tap
    dww = dww_ref[...]                      # (C, 9) depthwise tap weights

    # ---- depthwise 3x3 conv (stride 1, pad 1, groups=C): VPU only ----------
    # Each tap reads a statically shifted lane slice of the pre-padded input;
    # out-of-image neighbours (and cross-batch lanes) are killed by the mask.
    acc = jnp.zeros((C, BN), f32)
    for t in range(9):
        oy, ox = t // 3 - 1, t % 3 - 1
        sft = oy * W + ox
        seg = xp[:, lpad + sft:lpad + sft + BN]
        acc = acc + dww[:, t:t + 1] * (masks[t:t + 1, :] * seg)
    # (depthwise bias is folded into the QKV bias in the wrapper)

    # ---- merged Q/K/V 1x1 convs + bias: one MXU matmul over 128 lanes -------
    proj_aug = jnp.concatenate([acc, jnp.ones((1, BN), f32)], axis=0)     # (C+1, BN)
    qkv = jnp.dot(wqkv_ref[...], proj_aug, preferred_element_type=f32)    # (3C, BN)

    # ---- multi-head attention, reproducing torch .view(B, head, HW, d_k) ----
    # Per (batch, head) group:
    #   scores  = sum_q of the diagonal d_k x d_k blocks of the Gram matrix
    #             Qslab^T @ Kslab  (no Q/K view-matrix shuffles needed),
    #   context = probs @ Vview^T  (lanes in permuted order), then restored to
    #             flat-buffer lane order and placed in its batch half with one
    #             tiny constant selector matmul (rows of the perm constant).
    perm = perm_ref[...]                                                  # (BN, BN)
    head_rows = []
    for hd in range(head):
        r0 = hd * d_k
        row = jnp.zeros((d_k, BN), f32)
        for b in range(B):
            c0 = b * N
            qs = qkv[r0:r0 + d_k, c0:c0 + N]                              # (d_k, N)
            ks = qkv[C + r0:C + r0 + d_k, c0:c0 + N]
            vs = qkv[2 * C + r0:2 * C + r0 + d_k, c0:c0 + N]
            g = jnp.einsum('rn,rm->nm', qs, ks, preferred_element_type=f32)  # (N, N)
            sc = jnp.zeros((d_k, d_k), f32)
            for q in range(m):
                sc = sc + g[q * d_k:(q + 1) * d_k, q * d_k:(q + 1) * d_k]
            # 1/sqrt(d_k) was folded into the Q weights/bias in the wrapper.
            sc = sc - jnp.max(sc, axis=-1, keepdims=True)
            e = jnp.exp(sc)
            # TODO(synk): attention-prob dropout omitted (eval mode).
            pr = e * pl.reciprocal(jnp.sum(e, axis=-1, keepdims=True), approx=False)
            # V view matrix (rows in q-major/permuted order; order irrelevant
            # for the contraction, lane order fixed by the selector matmul).
            vv = jnp.concatenate(
                [vs[:, q * d_k:(q + 1) * d_k] for q in range(m)], axis=0)  # (N, d_k)
            piece = jnp.einsum('ij,nj->in', pr, vv,
                               preferred_element_type=f32)                 # (d_k, N)
            row = row + jnp.dot(piece, perm[c0:c0 + N, :],
                                preferred_element_type=f32)                # (d_k, BN)
        head_rows.append(row)
    ctx = jnp.concatenate(head_rows, axis=0)    # (C, BN): context.view flat layout

    # ---- msa_norm + residual  (context.view(B, HW, C) semantics) ------------
    # LayerNorm rows are the contiguous C-lane chunks of each (C, BN) row
    # (requires C | H*W); row order is irrelevant for row-wise LN/FFN.
    ctx_tok = jnp.concatenate(
        [ctx[:, i * C:(i + 1) * C] for i in range(nchunk)], axis=0)        # (BN, C)
    y = _layernorm(ctx_tok, ln1_g_ref[...], ln1_b_ref[...])
    x1_chunks = [x[:, i * C:(i + 1) * C] + y[i * C:(i + 1) * C, :]
                 for i in range(nchunk)]                                   # nchunk x (C, C)

    # ---- FFN + ffn_norm + residual  (x.reshape(B, -1, C) semantics) ---------
    # GELU is applied after BOTH linears, exactly as in the module's FFN.
    tmat = jnp.concatenate(x1_chunks, axis=0)                              # (BN, C), M=128
    h1 = _gelu(jnp.dot(tmat, w1_ref[...], preferred_element_type=f32) + b1_ref[...])
    h2 = _gelu(jnp.dot(h1, w2_ref[...], preferred_element_type=f32) + b2_ref[...])
    # TODO(synk): FFN dropout omitted (eval mode).
    z = _layernorm(h2, ln2_g_ref[...], ln2_b_ref[...])                     # (BN, C)

    # ---- assemble lane-dense result, single unmasked full-block store -------
    # Token-row blocks are scattered back to their lane blocks with identity-
    # selector matmuls (keeps everything on verified slice/matmul lowerings).
    ri = lax.broadcasted_iota(jnp.int32, (BN, BN), 0)
    ci = lax.broadcasted_iota(jnp.int32, (BN, BN), 1)
    eye = (ri == ci).astype(f32)
    out = jnp.zeros((C, BN), f32)
    for i in range(nchunk):
        out = out + jnp.dot(x1_chunks[i] + z[i * C:(i + 1) * C, :],
                            eye[i * C:(i + 1) * C, :],
                            preferred_element_type=f32)
    o_ref[...] = out


# ----------------------------------------------------------------------------
# wrapper (parameter repacking / layout plumbing is tiny one-time XLA glue)
# ----------------------------------------------------------------------------
def conv_transformer_block_forward(x_nchw, params, head):
    B, C, H, W = x_nchw.shape
    N = H * W
    if C % head != 0:
        raise ValueError("dim must be divisible by head")
    d_k = C // head
    if N % d_k != 0 or N % C != 0:
        raise ValueError("fused kernel layout requires d_k | H*W and C | H*W")
    m = N // d_k
    BN = B * N
    hidden = params["w_l1"].shape[0]
    scale = 1.0 / math.sqrt(d_k)
    lpad = ((W + 1 + 7) // 8) * 8          # lane padding for shifted conv slices
    f32 = jnp.float32

    # ---- parameter repacking ------------------------------------------------
    dw_w = params["w_dw"].reshape(C, 9).astype(f32)
    dw_b = params["b_dw"].astype(f32)
    w_qkv = jnp.concatenate([params["w_q"][:, :, 0, 0] * scale,
                             params["w_k"][:, :, 0, 0],
                             params["w_v"][:, :, 0, 0]], axis=0).astype(f32)   # (3C, C)
    b_qkv = jnp.concatenate([params["b_q"] * scale, params["b_k"],
                             params["b_v"]], axis=0).astype(f32)               # (3C,)
    # Fold the depthwise bias into the QKV bias; append the bias as an extra
    # weight column consumed by a ones row inside the kernel.
    b_eff = b_qkv + w_qkv @ dw_b
    w_qkv_aug = jnp.concatenate([w_qkv, b_eff[:, None]], axis=1)               # (3C, C+1)

    ln1_g = params["ln1_g"].reshape(1, C).astype(f32)
    ln1_b = params["ln1_b"].reshape(1, C).astype(f32)
    w1 = params["w_l1"].T.astype(f32)                         # (C, hidden)
    b1 = params["b_l1"].reshape(1, hidden).astype(f32)
    w2 = params["w_l2"].T.astype(f32)                         # (hidden, C)
    b2 = params["b_l2"].reshape(1, C).astype(f32)
    ln2_g = params["ln2_g"].reshape(1, C).astype(f32)
    ln2_b = params["ln2_b"].reshape(1, C).astype(f32)

    # ---- constant tables (static shapes, baked at trace time) ---------------
    lane = np.arange(BN)
    p = lane % N
    hh, ww = p // W, p % W
    masks = np.zeros((9, BN), np.float32)
    for t in range(9):
        oy, ox = t // 3 - 1, t % 3 - 1
        masks[t] = ((hh + oy >= 0) & (hh + oy < H) &
                    (ww + ox >= 0) & (ww + ox < W)).astype(np.float32)
    n_idx = np.arange(N)
    pi = (n_idx % m) * d_k + n_idx // m
    P = np.zeros((N, N), np.float32)
    P[pi, n_idx] = 1.0                                   # lane-order restore (per batch)
    perm = np.kron(np.eye(B, dtype=np.float32), P)       # (BN, BN) block-diagonal

    # ---- input layout: lane-dense (C, B*N), pre-padded for shifted slices ---
    x_cl = jnp.transpose(x_nchw.reshape(B, C, N), (1, 0, 2)).reshape(C, BN).astype(f32)
    x_pad = jnp.pad(x_cl, ((0, 0), (lpad, lpad)))

    def full(shape):
        return pl.BlockSpec(shape, lambda i: (0, 0))

    out = pl.pallas_call(
        functools.partial(_block_kernel, B=B, head=head, d_k=d_k, H=H, W=W, lpad=lpad),
        out_shape=jax.ShapeDtypeStruct((C, BN), f32),
        grid=(1,),
        in_specs=[
            full(x_pad.shape),
            full((9, BN)),
            full((C, 9)),
            full((3 * C, C + 1)),
            full((BN, BN)),
            full((1, C)), full((1, C)),
            full((C, hidden)), full((1, hidden)),
            full((hidden, C)), full((1, C)),
            full((1, C)), full((1, C)),
        ],
        out_specs=full((C, BN)),
        # Single program: on v7x this uses one TensorCore; fine at this size.
        compiler_params=pltpu.CompilerParams(dimension_semantics=("arbitrary",)),
    )(x_pad, jnp.asarray(masks), dw_w, w_qkv_aug, jnp.asarray(perm),
      ln1_g, ln1_b, w1, b1, w2, b2, ln2_g, ln2_b)

    return jnp.transpose(out.reshape(C, B, N), (1, 0, 2)).reshape(B, C, H, W)


# ----------------------------------------------------------------------------
# pure-JAX reference mirroring the PyTorch module (eval mode)
# ----------------------------------------------------------------------------
def reference_forward(x, params, head):
    B, C, H, W = x.shape
    N = H * W
    d_k = C // head
    xp = jnp.pad(x, ((0, 0), (0, 0), (1, 1), (1, 1)))
    proj = jnp.zeros_like(x)
    for dy in range(3):
        for dx in range(3):
            proj = proj + (xp[:, :, dy:dy + H, dx:dx + W] *
                           params["w_dw"][:, 0, dy, dx][None, :, None, None])
    proj = proj + params["b_dw"][None, :, None, None]

    def pconv(w, b):
        return jnp.einsum("oi,bihw->bohw", w[:, :, 0, 0], proj) + b[None, :, None, None]

    def heads(t):
        return jnp.transpose(t.reshape(B, head, N, d_k), (0, 1, 3, 2))

    Q = heads(pconv(params["w_q"], params["b_q"]))
    K = heads(pconv(params["w_k"], params["b_k"]))
    V = heads(pconv(params["w_v"], params["b_v"]))
    s = jnp.einsum("bhdn,bhen->bhde", Q, K) / math.sqrt(d_k)
    probs = jax.nn.softmax(s, axis=-1)
    ctx = jnp.einsum("bhde,bhen->bhdn", probs, V).reshape(B, N, C)

    def layernorm(t, g, b, eps=1e-5):
        mu = jnp.mean(t, axis=-1, keepdims=True)
        var = jnp.mean((t - mu) ** 2, axis=-1, keepdims=True)
        return (t - mu) / jnp.sqrt(var + eps) * g + b

    def gelu(u):  # exact erf-based GELU (torch nn.GELU() default)
        return 0.5 * u * (1.0 + jax.scipy.special.erf(u / np.sqrt(2.0)))

    x1 = x + layernorm(ctx, params["ln1_g"], params["ln1_b"]).reshape(B, C, H, W)
    t = x1.reshape(B, N, C)
    h = gelu(t @ params["w_l1"].T + params["b_l1"])
    h = gelu(h @ params["w_l2"].T + params["b_l2"])
    z = layernorm(h, params["ln2_g"], params["ln2_b"])
    return x1 + z.reshape(B, C, H, W)


if __name__ == "__main__":
    B, dim, head, H, W, expansion = 2, 32, 4, 8, 8, 2   # d_k=8, seq=H*W=64
    hidden = dim * expansion
    key = jax.random.PRNGKey(0)
    ks = jax.random.split(key, 20)
    x = jax.random.normal(ks[0], (B, dim, H, W), jnp.float32)
    params = {
        "w_dw": jax.random.normal(ks[1], (dim, 1, 3, 3), jnp.float32) * 0.1,
        "b_dw": jax.random.normal(ks[2], (dim,), jnp.float32) * 0.1,
        "w_q": jax.random.normal(ks[3], (dim, dim, 1, 1), jnp.float32) * 0.1,
        "b_q": jax.random.normal(ks[4], (dim,), jnp.float32) * 0.1,
        "w_k": jax.random.normal(ks[5], (dim, dim, 1, 1), jnp.float32) * 0.1,
        "b_k": jax.random.normal(ks[6], (dim,), jnp.float32) * 0.1,
        "w_v": jax.random.normal(ks[7], (dim, dim, 1, 1), jnp.float32) * 0.1,
        "b_v": jax.random.normal(ks[8], (dim,), jnp.float32) * 0.1,
        "ln1_g": 1.0 + 0.1 * jax.random.normal(ks[9], (dim,), jnp.float32),
        "ln1_b": 0.1 * jax.random.normal(ks[10], (dim,), jnp.float32),
        "w_l1": jax.random.normal(ks[11], (hidden, dim), jnp.float32) * 0.1,
        "b_l1": jax.random.normal(ks[12], (hidden,), jnp.float32) * 0.1,
        "w_l2": jax.random.normal(ks[13], (dim, hidden), jnp.float32) * 0.1,
        "b_l2": jax.random.normal(ks[14], (dim,), jnp.float32) * 0.1,
        "ln2_g": 1.0 + 0.1 * jax.random.normal(ks[15], (dim,), jnp.float32),
        "ln2_b": 0.1 * jax.random.normal(ks[16], (dim,), jnp.float32),
    }

    fwd = jax.jit(conv_transformer_block_forward, static_argnums=2)
    out = jax.block_until_ready(fwd(x, params, head))
    assert out.shape == (B, dim, H, W), out.shape

    ref = reference_forward(x, params, head)
    np.testing.assert_allclose(np.asarray(out), np.asarray(ref),
                               rtol=5e-4, atol=5e-4)
    print("KERNEL_OK")
</pallas_src>

<mosaic_0001>
module attributes {stable_mosaic.version = 11 : i64} {
  func.func @_block_kernel(%arg0: i32, %arg1: memref<32x160xf32, #tpu.memory_space<vmem>>, %arg2: memref<9x128xf32, #tpu.memory_space<vmem>>, %arg3: memref<32x9xf32, #tpu.memory_space<vmem>>, %arg4: memref<96x33xf32, #tpu.memory_space<vmem>>, %arg5: memref<128x128xf32, #tpu.memory_space<vmem>>, %arg6: memref<1x32xf32, #tpu.memory_space<vmem>>, %arg7: memref<1x32xf32, #tpu.memory_space<vmem>>, %arg8: memref<32x64xf32, #tpu.memory_space<vmem>>, %arg9: memref<1x64xf32, #tpu.memory_space<vmem>>, %arg10: memref<64x32xf32, #tpu.memory_space<vmem>>, %arg11: memref<1x32xf32, #tpu.memory_space<vmem>>, %arg12: memref<1x32xf32, #tpu.memory_space<vmem>>, %arg13: memref<1x32xf32, #tpu.memory_space<vmem>>, %arg14: memref<32x128xf32, #tpu.memory_space<vmem>>) attributes {dimension_semantics = [#tpu.dimension_semantics<arbitrary>], iteration_bounds = array<i64: 1>, scalar_prefetch = 0 : i64, scratch_operands = 0 : i64, tpu.core_type = #tpu.core_type<tc>, window_params = [{pipeline_mode = #tpu.pipeline_mode<synchronous>, transform_indices = @transform_0, window_bounds = array<i64: 32, 160>}, {pipeline_mode = #tpu.pipeline_mode<synchronous>, transform_indices = @transform_1, window_bounds = array<i64: 9, 128>}, {pipeline_mode = #tpu.pipeline_mode<synchronous>, transform_indices = @transform_2, window_bounds = array<i64: 32, 9>}, {pipeline_mode = #tpu.pipeline_mode<synchronous>, transform_indices = @transform_3, window_bounds = array<i64: 96, 33>}, {pipeline_mode = #tpu.pipeline_mode<synchronous>, transform_indices = @transform_4, window_bounds = array<i64: 128, 128>}, {pipeline_mode = #tpu.pipeline_mode<synchronous>, transform_indices = @transform_5, window_bounds = array<i64: 1, 32>}, {pipeline_mode = #tpu.pipeline_mode<synchronous>, transform_indices = @transform_6, window_bounds = array<i64: 1, 32>}, {pipeline_mode = #tpu.pipeline_mode<synchronous>, transform_indices = @transform_7, window_bounds = array<i64: 32, 64>}, {pipeline_mode = #tpu.pipeline_mode<synchronous>, transform_indices = @transform_8, window_bounds = array<i64: 1, 64>}, {pipeline_mode = #tpu.pipeline_mode<synchronous>, transform_indices = @transform_9, window_bounds = array<i64: 64, 32>}, {pipeline_mode = #tpu.pipeline_mode<synchronous>, transform_indices = @transform_10, window_bounds = array<i64: 1, 32>}, {pipeline_mode = #tpu.pipeline_mode<synchronous>, transform_indices = @transform_11, window_bounds = array<i64: 1, 32>}, {pipeline_mode = #tpu.pipeline_mode<synchronous>, transform_indices = @transform_12, window_bounds = array<i64: 1, 32>}, {pipeline_mode = #tpu.pipeline_mode<synchronous>, transform_indices = @transform_13, window_bounds = array<i64: 32, 128>}]} {
    %c0 = arith.constant 0 : index
    %c0_0 = arith.constant 0 : index
    %0 = vector.load %arg1[%c0, %c0_0] : memref<32x160xf32, #tpu.memory_space<vmem>>, vector<32x160xf32>
    %1 = vector.extract_strided_slice %0 {offsets = [0, 16], sizes = [32, 128], strides = [1, 1]} : vector<32x160xf32> to vector<32x128xf32>
    %c0_1 = arith.constant 0 : index
    %c0_2 = arith.constant 0 : index
    %2 = vector.load %arg2[%c0_1, %c0_2] : memref<9x128xf32, #tpu.memory_space<vmem>>, vector<9x128xf32>
    %c0_3 = arith.constant 0 : index
    %c0_4 = arith.constant 0 : index
    %3 = vector.load %arg3[%c0_3, %c0_4] : memref<32x9xf32, #tpu.memory_space<vmem>>, vector<32x9xf32>
    %cst = arith.constant 0.000000e+00 : f32
    %4 = vector.broadcast %cst : f32 to vector<32x128xf32>
    %5 = vector.extract_strided_slice %0 {offsets = [0, 7], sizes = [32, 128], strides = [1, 1]} : vector<32x160xf32> to vector<32x128xf32>
    %6 = vector.extract_strided_slice %3 {offsets = [0, 0], sizes = [32, 1], strides = [1, 1]} : vector<32x9xf32> to vector<32x1xf32>
    %7 = vector.extract_strided_slice %2 {offsets = [0, 0], sizes = [1, 128], strides = [1, 1]} : vector<9x128xf32> to vector<1x128xf32>
    %8 = vector.broadcast %7 : vector<1x128xf32> to vector<32x128xf32>
    %9 = arith.mulf %8, %5 : vector<32x128xf32>
    %10 = vector.broadcast %6 : vector<32x1xf32> to vector<32x128xf32>
    %11 = arith.mulf %10, %9 : vector<32x128xf32>
    %12 = arith.addf %4, %11 : vector<32x128xf32>
    %13 = vector.extract_strided_slice %0 {offsets = [0, 8], sizes = [32, 128], strides = [1, 1]} : vector<32x160xf32> to vector<32x128xf32>
    %14 = vector.extract_strided_slice %3 {offsets = [0, 1], sizes = [32, 1], strides = [1, 1]} : vector<32x9xf32> to vector<32x1xf32>
    %15 = vector.extract_strided_slice %2 {offsets = [1, 0], sizes = [1, 128], strides = [1, 1]} : vector<9x128xf32> to vector<1x128xf32>
    %16 = vector.broadcast %15 : vector<1x128xf32> to vector<32x128xf32>
    %17 = arith.mulf %16, %13 : vector<32x128xf32>
    %18 = vector.broadcast %14 : vector<32x1xf32> to vector<32x128xf32>
    %19 = arith.mulf %18, %17 : vector<32x128xf32>
    %20 = arith.addf %12, %19 : vector<32x128xf32>
    %21 = vector.extract_strided_slice %0 {offsets = [0, 9], sizes = [32, 128], strides = [1, 1]} : vector<32x160xf32> to vector<32x128xf32>
    %22 = vector.extract_strided_slice %3 {offsets = [0, 2], sizes = [32, 1], strides = [1, 1]} : vector<32x9xf32> to vector<32x1xf32>
    %23 = vector.extract_strided_slice %2 {offsets = [2, 0], sizes = [1, 128], strides = [1, 1]} : vector<9x128xf32> to vector<1x128xf32>
    %24 = vector.broadcast %23 : vector<1x128xf32> to vector<32x128xf32>
    %25 = arith.mulf %24, %21 : vector<32x128xf32>
    %26 = vector.broadcast %22 : vector<32x1xf32> to vector<32x128xf32>
    %27 = arith.mulf %26, %25 : vector<32x128xf32>
    %28 = arith.addf %20, %27 : vector<32x128xf32>
    %29 = vector.extract_strided_slice %0 {offsets = [0, 15], sizes = [32, 128], strides = [1, 1]} : vector<32x160xf32> to vector<32x128xf32>
    %30 = vector.extract_strided_slice %3 {offsets = [0, 3], sizes = [32, 1], strides = [1, 1]} : vector<32x9xf32> to vector<32x1xf32>
    %31 = vector.extract_strided_slice %2 {offsets = [3, 0], sizes = [1, 128], strides = [1, 1]} : vector<9x128xf32> to vector<1x128xf32>
    %32 = vector.broadcast %31 : vector<1x128xf32> to vector<32x128xf32>
    %33 = arith.mulf %32, %29 : vector<32x128xf32>
    %34 = vector.broadcast %30 : vector<32x1xf32> to vector<32x128xf32>
    %35 = arith.mulf %34, %33 : vector<32x128xf32>
    %36 = arith.addf %28, %35 : vector<32x128xf32>
    %37 = vector.extract_strided_slice %0 {offsets = [0, 16], sizes = [32, 128], strides = [1, 1]} : vector<32x160xf32> to vector<32x128xf32>
    %38 = vector.extract_strided_slice %3 {offsets = [0, 4], sizes = [32, 1], strides = [1, 1]} : vector<32x9xf32> to vector<32x1xf32>
    %39 = vector.extract_strided_slice %2 {offsets = [4, 0], sizes = [1, 128], strides = [1, 1]} : vector<9x128xf32> to vector<1x128xf32>
    %40 = vector.broadcast %39 : vector<1x128xf32> to vector<32x128xf32>
    %41 = arith.mulf %40, %37 : vector<32x128xf32>
    %42 = vector.broadcast %38 : vector<32x1xf32> to vector<32x128xf32>
    %43 = arith.mulf %42, %41 : vector<32x128xf32>
    %44 = arith.addf %36, %43 : vector<32x128xf32>
    %45 = vector.extract_strided_slice %0 {offsets = [0, 17], sizes = [32, 128], strides = [1, 1]} : vector<32x160xf32> to vector<32x128xf32>
    %46 = vector.extract_strided_slice %3 {offsets = [0, 5], sizes = [32, 1], strides = [1, 1]} : vector<32x9xf32> to vector<32x1xf32>
    %47 = vector.extract_strided_slice %2 {offsets = [5, 0], sizes = [1, 128], strides = [1, 1]} : vector<9x128xf32> to vector<1x128xf32>
    %48 = vector.broadcast %47 : vector<1x128xf32> to vector<32x128xf32>
    %49 = arith.mulf %48, %45 : vector<32x128xf32>
    %50 = vector.broadcast %46 : vector<32x1xf32> to vector<32x128xf32>
    %51 = arith.mulf %50, %49 : vector<32x128xf32>
    %52 = arith.addf %44, %51 : vector<32x128xf32>
    %53 = vector.extract_strided_slice %0 {offsets = [0, 23], sizes = [32, 128], strides = [1, 1]} : vector<32x160xf32> to vector<32x128xf32>
    %54 = vector.extract_strided_slice %3 {offsets = [0, 6], sizes = [32, 1], strides = [1, 1]} : vector<32x9xf32> to vector<32x1xf32>
    %55 = vector.extract_strided_slice %2 {offsets = [6, 0], sizes = [1, 128], strides = [1, 1]} : vector<9x128xf32> to vector<1x128xf32>
    %56 = vector.broadcast %55 : vector<1x128xf32> to vector<32x128xf32>
    %57 = arith.mulf %56, %53 : vector<32x128xf32>
    %58 = vector.broadcast %54 : vector<32x1xf32> to vector<32x128xf32>
    %59 = arith.mulf %58, %57 : vector<32x128xf32>
    %60 = arith.addf %52, %59 : vector<32x128xf32>
    %61 = vector.extract_strided_slice %0 {offsets = [0, 24], sizes = [32, 128], strides = [1, 1]} : vector<32x160xf32> to vector<32x128xf32>
    %62 = vector.extract_strided_slice %3 {offsets = [0, 7], sizes = [32, 1], strides = [1, 1]} : vector<32x9xf32> to vector<32x1xf32>
    %63 = vector.extract_strided_slice %2 {offsets = [7, 0], sizes = [1, 128], strides = [1, 1]} : vector<9x128xf32> to vector<1x128xf32>
    %64 = vector.broadcast %63 : vector<1x128xf32> to vector<32x128xf32>
    %65 = arith.mulf %64, %61 : vector<32x128xf32>
    %66 = vector.broadcast %62 : vector<32x1xf32> to vector<32x128xf32>
    %67 = arith.mulf %66, %65 : vector<32x128xf32>
    %68 = arith.addf %60, %67 : vector<32x128xf32>
    %69 = vector.extract_strided_slice %0 {offsets = [0, 25], sizes = [32, 128], strides = [1, 1]} : vector<32x160xf32> to vector<32x128xf32>
    %70 = vector.extract_strided_slice %3 {offsets = [0, 8], sizes = [32, 1], strides = [1, 1]} : vector<32x9xf32> to vector<32x1xf32>
    %71 = vector.extract_strided_slice %2 {offsets = [8, 0], sizes = [1, 128], strides = [1, 1]} : vector<9x128xf32> to vector<1x128xf32>
    %72 = vector.broadcast %71 : vector<1x128xf32> to vector<32x128xf32>
    %73 = arith.mulf %72, %69 : vector<32x128xf32>
    %74 = vector.broadcast %70 : vector<32x1xf32> to vector<32x128xf32>
    %75 = arith.mulf %74, %73 : vector<32x128xf32>
    %76 = arith.addf %68, %75 : vector<32x128xf32>
    %cst_5 = arith.constant 1.000000e+00 : f32
    %77 = vector.broadcast %cst_5 : f32 to vector<1x128xf32>
    %78 = tpu.concatenate %76, %77 in 0 : vector<32x128xf32>, vector<1x128xf32> -> vector<33x128xf32>
    %c0_6 = arith.constant 0 : index
    %c0_7 = arith.constant 0 : index
    %79 = vector.load %arg4[%c0_6, %c0_7] : memref<96x33xf32, #tpu.memory_space<vmem>>, vector<96x33xf32>
    %cst_8 = arith.constant dense<0.000000e+00> : vector<96x128xf32>
    %80 = tpu.matmul %79, %78, %cst_8 {dimension_numbers = #tpu.dot_dimension_numbers<[1], [0], [0], [1], [0, 0, 1, 1], [], []>} : vector<96x33xf32>, vector<33x128xf32>, vector<96x128xf32> -> vector<96x128xf32>
    %c0_9 = arith.constant 0 : index
    %c0_10 = arith.constant 0 : index
    %81 = vector.load %arg5[%c0_9, %c0_10] : memref<128x128xf32, #tpu.memory_space<vmem>>, vector<128x128xf32>
    %cst_11 = arith.constant 0.000000e+00 : f32
    %82 = vector.broadcast %cst_11 : f32 to vector<8x128xf32>
    %83 = vector.extract_strided_slice %80 {offsets = [0, 0], sizes = [8, 64], strides = [1, 1]} : vector<96x128xf32> to vector<8x64xf32>
    %84 = vector.extract_strided_slice %80 {offsets = [32, 0], sizes = [8, 64], strides = [1, 1]} : vector<96x128xf32> to vector<8x64xf32>
    %85 = vector.extract_strided_slice %80 {offsets = [64, 0], sizes = [8, 64], strides = [1, 1]} : vector<96x128xf32> to vector<8x64xf32>
    "tpu.trace_start"() <{level = 10 : i32, message = "rn,rm->nm"}> : () -> ()
    %cst_12 = arith.constant dense<0.000000e+00> : vector<64x64xf32>
    %86 = tpu.matmul %83, %84, %cst_12 {dimension_numbers = #tpu.dot_dimension_numbers<[0], [0], [1], [1], [0, 1, 1, 1], [], []>} : vector<8x64xf32>, vector<8x64xf32>, vector<64x64xf32> -> vector<64x64xf32>
    %cst_13 = arith.constant 0.000000e+00 : f32
    "tpu.trace_stop"() : () -> ()
    %87 = vector.broadcast %cst_13 : f32 to vector<8x8xf32>
    %88 = vector.extract_strided_slice %86 {offsets = [0, 0], sizes = [8, 8], strides = [1, 1]} : vector<64x64xf32> to vector<8x8xf32>
    %89 = arith.addf %87, %88 : vector<8x8xf32>
    %90 = vector.extract_strided_slice %86 {offsets = [8, 8], sizes = [8, 8], strides = [1, 1]} : vector<64x64xf32> to vector<8x8xf32>
    %91 = arith.addf %89, %90 : vector<8x8xf32>
    %92 = vector.extract_strided_slice %86 {offsets = [16, 16], sizes = [8, 8], strides = [1, 1]} : vector<64x64xf32> to vector<8x8xf32>
    %93 = arith.addf %91, %92 : vector<8x8xf32>
    %94 = vector.extract_strided_slice %86 {offsets = [24, 24], sizes = [8, 8], strides = [1, 1]} : vector<64x64xf32> to vector<8x8xf32>
    %95 = arith.addf %93, %94 : vector<8x8xf32>
    %96 = vector.extract_strided_slice %86 {offsets = [32, 32], sizes = [8, 8], strides = [1, 1]} : vector<64x64xf32> to vector<8x8xf32>
    %97 = arith.addf %95, %96 : vector<8x8xf32>
    %98 = vector.extract_strided_slice %86 {offsets = [40, 40], sizes = [8, 8], strides = [1, 1]} : vector<64x64xf32> to vector<8x8xf32>
    %99 = arith.addf %97, %98 : vector<8x8xf32>
    %100 = vector.extract_strided_slice %86 {offsets = [48, 48], sizes = [8, 8], strides = [1, 1]} : vector<64x64xf32> to vector<8x8xf32>
    %101 = arith.addf %99, %100 : vector<8x8xf32>
    %102 = vector.extract_strided_slice %86 {offsets = [56, 56], sizes = [8, 8], strides = [1, 1]} : vector<64x64xf32> to vector<8x8xf32>
    %103 = arith.addf %101, %102 : vector<8x8xf32>
    %cst_14 = arith.constant dense<0xFF800000> : vector<8xf32>
    %104 = vector.multi_reduction <maximumf>, %103, %cst_14 [1] : vector<8x8xf32> to vector<8xf32>
    %105 = vector.shape_cast %104 : vector<8xf32> to vector<8x1xf32>
    %106 = vector.broadcast %105 : vector<8x1xf32> to vector<8x8xf32>
    %107 = arith.subf %103, %106 : vector<8x8xf32>
    %108 = math.exp %107 : vector<8x8xf32>
    %cst_15 = arith.constant dense<0.000000e+00> : vector<8xf32>
    %109 = vector.multi_reduction <add>, %108, %cst_15 [1] : vector<8x8xf32> to vector<8xf32>
    %110 = vector.shape_cast %109 : vector<8xf32> to vector<8x1xf32>
    %111 = tpu.reciprocal %110 : vector<8x1xf32> -> vector<8x1xf32>
    %112 = vector.broadcast %111 : vector<8x1xf32> to vector<8x8xf32>
    %113 = arith.mulf %108, %112 : vector<8x8xf32>
    %114 = vector.extract_strided_slice %85 {offsets = [0, 0], sizes = [8, 8], strides = [1, 1]} : vector<8x64xf32> to vector<8x8xf32>
    %115 = vector.extract_strided_slice %85 {offsets = [0, 8], sizes = [8, 8], strides = [1, 1]} : vector<8x64xf32> to vector<8x8xf32>
    %116 = vector.extract_strided_slice %85 {offsets = [0, 16], sizes = [8, 8], strides = [1, 1]} : vector<8x64xf32> to vector<8x8xf32>
    %117 = vector.extract_strided_slice %85 {offsets = [0, 24], sizes = [8, 8], strides = [1, 1]} : vector<8x64xf32> to vector<8x8xf32>
    %118 = vector.extract_strided_slice %85 {offsets = [0, 32], sizes = [8, 8], strides = [1, 1]} : vector<8x64xf32> to vector<8x8xf32>
    %119 = vector.extract_strided_slice %85 {offsets = [0, 40], sizes = [8, 8], strides = [1, 1]} : vector<8x64xf32> to vector<8x8xf32>
    %120 = vector.extract_strided_slice %85 {offsets = [0, 48], sizes = [8, 8], strides = [1, 1]} : vector<8x64xf32> to vector<8x8xf32>
    %121 = vector.extract_strided_slice %85 {offsets = [0, 56], sizes = [8, 8], strides = [1, 1]} : vector<8x64xf32> to vector<8x8xf32>
    %122 = tpu.concatenate %114, %115, %116, %117, %118, %119, %120, %121 in 0 : vector<8x8xf32>, vector<8x8xf32>, vector<8x8xf32>, vector<8x8xf32>, vector<8x8xf32>, vector<8x8xf32>, vector<8x8xf32>, vector<8x8xf32> -> vector<64x8xf32>
    "tpu.trace_start"() <{level = 10 : i32, message = "ij,nj->in"}> : () -> ()
    %cst_16 = arith.constant dense<0.000000e+00> : vector<8x64xf32>
    %123 = tpu.matmul %113, %122, %cst_16 {dimension_numbers = #tpu.dot_dimension_numbers<[1], [1], [0], [0], [0, 0, 1, 0], [], []>} : vector<8x8xf32>, vector<64x8xf32>, vector<8x64xf32> -> vector<8x64xf32>
    "tpu.trace_stop"() : () -> ()
    %124 = vector.extract_strided_slice %81 {offsets = [0, 0], sizes = [64, 128], strides = [1, 1]} : vector<128x128xf32> to vector<64x128xf32>
    %cst_17 = arith.constant dense<0.000000e+00> : vector<8x128xf32>
    %125 = tpu.matmul %123, %124, %cst_17 {dimension_numbers = #tpu.dot_dimension_numbers<[1], [0], [0], [1], [0, 0, 1, 1], [], []>} : vector<8x64xf32>, vector<64x128xf32>, vector<8x128xf32> -> vector<8x128xf32>
    %126 = arith.addf %82, %125 : vector<8x128xf32>
    %127 = vector.extract_strided_slice %80 {offsets = [0, 64], sizes = [8, 64], strides = [1, 1]} : vector<96x128xf32> to vector<8x64xf32>
    %128 = vector.extract_strided_slice %80 {offsets = [32, 64], sizes = [8, 64], strides = [1, 1]} : vector<96x128xf32> to vector<8x64xf32>
    %129 = vector.extract_strided_slice %80 {offsets = [64, 64], sizes = [8, 64], strides = [1, 1]} : vector<96x128xf32> to vector<8x64xf32>
    "tpu.trace_start"() <{level = 10 : i32, message = "rn,rm->nm"}> : () -> ()
    %cst_18 = arith.constant dense<0.000000e+00> : vector<64x64xf32>
    %130 = tpu.matmul %127, %128, %cst_18 {dimension_numbers = #tpu.dot_dimension_numbers<[0], [0], [1], [1], [0, 1, 1, 1], [], []>} : vector<8x64xf32>, vector<8x64xf32>, vector<64x64xf32> -> vector<64x64xf32>
    %cst_19 = arith.constant 0.000000e+00 : f32
    "tpu.trace_stop"() : () -> ()
    %131 = vector.broadcast %cst_19 : f32 to vector<8x8xf32>
    %132 = vector.extract_strided_slice %130 {offsets = [0, 0], sizes = [8, 8], strides = [1, 1]} : vector<64x64xf32> to vector<8x8xf32>
    %133 = arith.addf %131, %132 : vector<8x8xf32>
    %134 = vector.extract_strided_slice %130 {offsets = [8, 8], sizes = [8, 8], strides = [1, 1]} : vector<64x64xf32> to vector<8x8xf32>
    %135 = arith.addf %133, %134 : vector<8x8xf32>
    %136 = vector.extract_strided_slice %130 {offsets = [16, 16], sizes = [8, 8], strides = [1, 1]} : vector<64x64xf32> to vector<8x8xf32>
    %137 = arith.addf %135, %136 : vector<8x8xf32>
    %138 = vector.extract_strided_slice %130 {offsets = [24, 24], sizes = [8, 8], strides = [1, 1]} : vector<64x64xf32> to vector<8x8xf32>
    %139 = arith.addf %137, %138 : vector<8x8xf32>
    %140 = vector.extract_strided_slice %130 {offsets = [32, 32], sizes = [8, 8], strides = [1, 1]} : vector<64x64xf32> to vector<8x8xf32>
    %141 = arith.addf %139, %140 : vector<8x8xf32>
    %142 = vector.extract_strided_slice %130 {offsets = [40, 40], sizes = [8, 8], strides = [1, 1]} : vector<64x64xf32> to vector<8x8xf32>
    %143 = arith.addf %141, %142 : vector<8x8xf32>
    %144 = vector.extract_strided_slice %130 {offsets = [48, 48], sizes = [8, 8], strides = [1, 1]} : vector<64x64xf32> to vector<8x8xf32>
    %145 = arith.addf %143, %144 : vector<8x8xf32>
    %146 = vector.extract_strided_slice %130 {offsets = [56, 56], sizes = [8, 8], strides = [1, 1]} : vector<64x64xf32> to vector<8x8xf32>
    %147 = arith.addf %145, %146 : vector<8x8xf32>
    %cst_20 = arith.constant dense<0xFF800000> : vector<8xf32>
    %148 = vector.multi_reduction <maximumf>, %147, %cst_20 [1] : vector<8x8xf32> to vector<8xf32>
    %149 = vector.shape_cast %148 : vector<8xf32> to vector<8x1xf32>
    %150 = vector.broadcast %149 : vector<8x1xf32> to vector<8x8xf32>
    %151 = arith.subf %147, %150 : vector<8x8xf32>
    %152 = math.exp %151 : vector<8x8xf32>
    %cst_21 = arith.constant dense<0.000000e+00> : vector<8xf32>
    %153 = vector.multi_reduction <add>, %152, %cst_21 [1] : vector<8x8xf32> to vector<8xf32>
    %154 = vector.shape_cast %153 : vector<8xf32> to vector<8x1xf32>
    %155 = tpu.reciprocal %154 : vector<8x1xf32> -> vector<8x1xf32>
    %156 = vector.broadcast %155 : vector<8x1xf32> to vector<8x8xf32>
    %157 = arith.mulf %152, %156 : vector<8x8xf32>
    %158 = vector.extract_strided_slice %129 {offsets = [0, 0], sizes = [8, 8], strides = [1, 1]} : vector<8x64xf32> to vector<8x8xf32>
    %159 = vector.extract_strided_slice %129 {offsets = [0, 8], sizes = [8, 8], strides = [1, 1]} : vector<8x64xf32> to vector<8x8xf32>
    %160 = vector.extract_strided_slice %129 {offsets = [0, 16], sizes = [8, 8], strides = [1, 1]} : vector<8x64xf32> to vector<8x8xf32>
    %161 = vector.extract_strided_slice %129 {offsets = [0, 24], sizes = [8, 8], strides = [1, 1]} : vector<8x64xf32> to vector<8x8xf32>
    %162 = vector.extract_strided_slice %129 {offsets = [0, 32], sizes = [8, 8], strides = [1, 1]} : vector<8x64xf32> to vector<8x8xf32>
    %163 = vector.extract_strided_slice %129 {offsets = [0, 40], sizes = [8, 8], strides = [1, 1]} : vector<8x64xf32> to vector<8x8xf32>
    %164 = vector.extract_strided_slice %129 {offsets = [0, 48], sizes = [8, 8], strides = [1, 1]} : vector<8x64xf32> to vector<8x8xf32>
    %165 = vector.extract_strided_slice %129 {offsets = [0, 56], sizes = [8, 8], strides = [1, 1]} : vector<8x64xf32> to vector<8x8xf32>
    %166 = tpu.concatenate %158, %159, %160, %161, %162, %163, %164, %165 in 0 : vector<8x8xf32>, vector<8x8xf32>, vector<8x8xf32>, vector<8x8xf32>, vector<8x8xf32>, vector<8x8xf32>, vector<8x8xf32>, vector<8x8xf32> -> vector<64x8xf32>
    "tpu.trace_start"() <{level = 10 : i32, message = "ij,nj->in"}> : () -> ()
    %cst_22 = arith.constant dense<0.000000e+00> : vector<8x64xf32>
    %167 = tpu.matmul %157, %166, %cst_22 {dimension_numbers = #tpu.dot_dimension_numbers<[1], [1], [0], [0], [0, 0, 1, 0], [], []>} : vector<8x8xf32>, vector<64x8xf32>, vector<8x64xf32> -> vector<8x64xf32>
    "tpu.trace_stop"() : () -> ()
    %168 = vector.extract_strided_slice %81 {offsets = [64, 0], sizes = [64, 128], strides = [1, 1]} : vector<128x128xf32> to vector<64x128xf32>
    %cst_23 = arith.constant dense<0.000000e+00> : vector<8x128xf32>
    %169 = tpu.matmul %167, %168, %cst_23 {dimension_numbers = #tpu.dot_dimension_numbers<[1], [0], [0], [1], [0, 0, 1, 1], [], []>} : vector<8x64xf32>, vector<64x128xf32>, vector<8x128xf32> -> vector<8x128xf32>
    %170 = arith.addf %126, %169 : vector<8x128xf32>
    %cst_24 = arith.constant 0.000000e+00 : f32
    %171 = vector.broadcast %cst_24 : f32 to vector<8x128xf32>
    %172 = vector.extract_strided_slice %80 {offsets = [8, 0], sizes = [8, 64], strides = [1, 1]} : vector<96x128xf32> to vector<8x64xf32>
    %173 = vector.extract_strided_slice %80 {offsets = [40, 0], sizes = [8, 64], strides = [1, 1]} : vector<96x128xf32> to vector<8x64xf32>
    %174 = vector.extract_strided_slice %80 {offsets = [72, 0], sizes = [8, 64], strides = [1, 1]} : vector<96x128xf32> to vector<8x64xf32>
    "tpu.trace_start"() <{level = 10 : i32, message = "rn,rm->nm"}> : () -> ()
    %cst_25 = arith.constant dense<0.000000e+00> : vector<64x64xf32>
    %175 = tpu.matmul %172, %173, %cst_25 {dimension_numbers = #tpu.dot_dimension_numbers<[0], [0], [1], [1], [0, 1, 1, 1], [], []>} : vector<8x64xf32>, vector<8x64xf32>, vector<64x64xf32> -> vector<64x64xf32>
    %cst_26 = arith.constant 0.000000e+00 : f32
    "tpu.trace_stop"() : () -> ()
    %176 = vector.broadcast %cst_26 : f32 to vector<8x8xf32>
    %177 = vector.extract_strided_slice %175 {offsets = [0, 0], sizes = [8, 8], strides = [1, 1]} : vector<64x64xf32> to vector<8x8xf32>
    %178 = arith.addf %176, %177 : vector<8x8xf32>
    %179 = vector.extract_strided_slice %175 {offsets = [8, 8], sizes = [8, 8], strides = [1, 1]} : vector<64x64xf32> to vector<8x8xf32>
    %180 = arith.addf %178, %179 : vector<8x8xf32>
    %181 = vector.extract_strided_slice %175 {offsets = [16, 16], sizes = [8, 8], strides = [1, 1]} : vector<64x64xf32> to vector<8x8xf32>
    %182 = arith.addf %180, %181 : vector<8x8xf32>
    %183 = vector.extract_strided_slice %175 {offsets = [24, 24], sizes = [8, 8], strides = [1, 1]} : vector<64x64xf32> to vector<8x8xf32>
    %184 = arith.addf %182, %183 : vector<8x8xf32>
    %185 = vector.extract_strided_slice %175 {offsets = [32, 32], sizes = [8, 8], strides = [1, 1]} : vector<64x64xf32> to vector<8x8xf32>
    %186 = arith.addf %184, %185 : vector<8x8xf32>
    %187 = vector.extract_strided_slice %175 {offsets = [40, 40], sizes = [8, 8], strides = [1, 1]} : vector<64x64xf32> to vector<8x8xf32>
    %188 = arith.addf %186, %187 : vector<8x8xf32>
    %189 = vector.extract_strided_slice %175 {offsets = [48, 48], sizes = [8, 8], strides = [1, 1]} : vector<64x64xf32> to vector<8x8xf32>
    %190 = arith.addf %188, %189 : vector<8x8xf32>
    %191 = vector.extract_strided_slice %175 {offsets = [56, 56], sizes = [8, 8], strides = [1, 1]} : vector<64x64xf32> to vector<8x8xf32>
    %192 = arith.addf %190, %191 : vector<8x8xf32>
    %cst_27 = arith.constant dense<0xFF800000> : vector<8xf32>
    %193 = vector.multi_reduction <maximumf>, %192, %cst_27 [1] : vector<8x8xf32> to vector<8xf32>
    %194 = vector.shape_cast %193 : vector<8xf32> to vector<8x1xf32>
    %195 = vector.broadcast %194 : vector<8x1xf32> to vector<8x8xf32>
    %196 = arith.subf %192, %195 : vector<8x8xf32>
    %197 = math.exp %196 : vector<8x8xf32>
    %cst_28 = arith.constant dense<0.000000e+00> : vector<8xf32>
    %198 = vector.multi_reduction <add>, %197, %cst_28 [1] : vector<8x8xf32> to vector<8xf32>
    %199 = vector.shape_cast %198 : vector<8xf32> to vector<8x1xf32>
    %200 = tpu.reciprocal %199 : vector<8x1xf32> -> vector<8x1xf32>
    %201 = vector.broadcast %200 : vector<8x1xf32> to vector<8x8xf32>
    %202 = arith.mulf %197, %201 : vector<8x8xf32>
    %203 = vector.extract_strided_slice %174 {offsets = [0, 0], sizes = [8, 8], strides = [1, 1]} : vector<8x64xf32> to vector<8x8xf32>
    %204 = vector.extract_strided_slice %174 {offsets = [0, 8], sizes = [8, 8], strides = [1, 1]} : vector<8x64xf32> to vector<8x8xf32>
    %205 = vector.extract_strided_slice %174 {offsets = [0, 16], sizes = [8, 8], strides = [1, 1]} : vector<8x64xf32> to vector<8x8xf32>
    %206 = vector.extract_strided_slice %174 {offsets = [0, 24], sizes = [8, 8], strides = [1, 1]} : vector<8x64xf32> to vector<8x8xf32>
    %207 = vector.extract_strided_slice %174 {offsets = [0, 32], sizes = [8, 8], strides = [1, 1]} : vector<8x64xf32> to vector<8x8xf32>
    %208 = vector.extract_strided_slice %174 {offsets = [0, 40], sizes = [8, 8], strides = [1, 1]} : vector<8x64xf32> to vector<8x8xf32>
    %209 = vector.extract_strided_slice %174 {offsets = [0, 48], sizes = [8, 8], strides = [1, 1]} : vector<8x64xf32> to vector<8x8xf32>
    %210 = vector.extract_strided_slice %174 {offsets = [0, 56], sizes = [8, 8], strides = [1, 1]} : vector<8x64xf32> to vector<8x8xf32>
    %211 = tpu.concatenate %203, %204, %205, %206, %207, %208, %209, %210 in 0 : vector<8x8xf32>, vector<8x8xf32>, vector<8x8xf32>, vector<8x8xf32>, vector<8x8xf32>, vector<8x8xf32>, vector<8x8xf32>, vector<8x8xf32> -> vector<64x8xf32>
    "tpu.trace_start"() <{level = 10 : i32, message = "ij,nj->in"}> : () -> ()
    %cst_29 = arith.constant dense<0.000000e+00> : vector<8x64xf32>
    %212 = tpu.matmul %202, %211, %cst_29 {dimension_numbers = #tpu.dot_dimension_numbers<[1], [1], [0], [0], [0, 0, 1, 0], [], []>} : vector<8x8xf32>, vector<64x8xf32>, vector<8x64xf32> -> vector<8x64xf32>
    "tpu.trace_stop"() : () -> ()
    %213 = vector.extract_strided_slice %81 {offsets = [0, 0], sizes = [64, 128], strides = [1, 1]} : vector<128x128xf32> to vector<64x128xf32>
    %cst_30 = arith.constant dense<0.000000e+00> : vector<8x128xf32>
    %214 = tpu.matmul %212, %213, %cst_30 {dimension_numbers = #tpu.dot_dimension_numbers<[1], [0], [0], [1], [0, 0, 1, 1], [], []>} : vector<8x64xf32>, vector<64x128xf32>, vector<8x128xf32> -> vector<8x128xf32>
    %215 = arith.addf %171, %214 : vector<8x128xf32>
    %216 = vector.extract_strided_slice %80 {offsets = [8, 64], sizes = [8, 64], strides = [1, 1]} : vector<96x128xf32> to vector<8x64xf32>
    %217 = vector.extract_strided_slice %80 {offsets = [40, 64], sizes = [8, 64], strides = [1, 1]} : vector<96x128xf32> to vector<8x64xf32>
    %218 = vector.extract_strided_slice %80 {offsets = [72, 64], sizes = [8, 64], strides = [1, 1]} : vector<96x128xf32> to vector<8x64xf32>
    "tpu.trace_start"() <{level = 10 : i32, message = "rn,rm->nm"}> : () -> ()
    %cst_31 = arith.constant dense<0.000000e+00> : vector<64x64xf32>
    %219 = tpu.matmul %216, %217, %cst_31 {dimension_numbers = #tpu.dot_dimension_numbers<[0], [0], [1], [1], [0, 1, 1, 1], [], []>} : vector<8x64xf32>, vector<8x64xf32>, vector<64x64xf32> -> vector<64x64xf32>
    %cst_32 = arith.constant 0.000000e+00 : f32
    "tpu.trace_stop"() : () -> ()
    %220 = vector.broadcast %cst_32 : f32 to vector<8x8xf32>
    %221 = vector.extract_strided_slice %219 {offsets = [0, 0], sizes = [8, 8], strides = [1, 1]} : vector<64x64xf32> to vector<8x8xf32>
    %222 = arith.addf %220, %221 : vector<8x8xf32>
    %223 = vector.extract_strided_slice %219 {offsets = [8, 8], sizes = [8, 8], strides = [1, 1]} : vector<64x64xf32> to vector<8x8xf32>
    %224 = arith.addf %222, %223 : vector<8x8xf32>
    %225 = vector.extract_strided_slice %219 {offsets = [16, 16], sizes = [8, 8], strides = [1, 1]} : vector<64x64xf32> to vector<8x8xf32>
    %226 = arith.addf %224, %225 : vector<8x8xf32>
    %227 = vector.extract_strided_slice %219 {offsets = [24, 24], sizes = [8, 8], strides = [1, 1]} : vector<64x64xf32> to vector<8x8xf32>
    %228 = arith.addf %226, %227 : vector<8x8xf32>
    %229 = vector.extract_strided_slice %219 {offsets = [32, 32], sizes = [8, 8], strides = [1, 1]} : vector<64x64xf32> to vector<8x8xf32>
    %230 = arith.addf %228, %229 : vector<8x8xf32>
    %231 = vector.extract_strided_slice %219 {offsets = [40, 40], sizes = [8, 8], strides = [1, 1]} : vector<64x64xf32> to vector<8x8xf32>
    %232 = arith.addf %230, %231 : vector<8x8xf32>
    %233 = vector.extract_strided_slice %219 {offsets = [48, 48], sizes = [8, 8], strides = [1, 1]} : vector<64x64xf32> to vector<8x8xf32>
    %234 = arith.addf %232, %233 : vector<8x8xf32>
    %235 = vector.extract_strided_slice %219 {offsets = [56, 56], sizes = [8, 8], strides = [1, 1]} : vector<64x64xf32> to vector<8x8xf32>
    %236 = arith.addf %234, %235 : vector<8x8xf32>
    %cst_33 = arith.constant dense<0xFF800000> : vector<8xf32>
    %237 = vector.multi_reduction <maximumf>, %236, %cst_33 [1] : vector<8x8xf32> to vector<8xf32>
    %238 = vector.shape_cast %237 : vector<8xf32> to vector<8x1xf32>
    %239 = vector.broadcast %238 : vector<8x1xf32> to vector<8x8xf32>
    %240 = arith.subf %236, %239 : vector<8x8xf32>
    %241 = math.exp %240 : vector<8x8xf32>
    %cst_34 = arith.constant dense<0.000000e+00> : vector<8xf32>
    %242 = vector.multi_reduction <add>, %241, %cst_34 [1] : vector<8x8xf32> to vector<8xf32>
    %243 = vector.shape_cast %242 : vector<8xf32> to vector<8x1xf32>
    %244 = tpu.reciprocal %243 : vector<8x1xf32> -> vector<8x1xf32>
    %245 = vector.broadcast %244 : vector<8x1xf32> to vector<8x8xf32>
    %246 = arith.mulf %241, %245 : vector<8x8xf32>
    %247 = vector.extract_strided_slice %218 {offsets = [0, 0], sizes = [8, 8], strides = [1, 1]} : vector<8x64xf32> to vector<8x8xf32>
    %248 = vector.extract_strided_slice %218 {offsets = [0, 8], sizes = [8, 8], strides = [1, 1]} : vector<8x64xf32> to vector<8x8xf32>
    %249 = vector.extract_strided_slice %218 {offsets = [0, 16], sizes = [8, 8], strides = [1, 1]} : vector<8x64xf32> to vector<8x8xf32>
    %250 = vector.extract_strided_slice %218 {offsets = [0, 24], sizes = [8, 8], strides = [1, 1]} : vector<8x64xf32> to vector<8x8xf32>
    %251 = vector.extract_strided_slice %218 {offsets = [0, 32], sizes = [8, 8], strides = [1, 1]} : vector<8x64xf32> to vector<8x8xf32>
    %252 = vector.extract_strided_slice %218 {offsets = [0, 40], sizes = [8, 8], strides = [1, 1]} : vector<8x64xf32> to vector<8x8xf32>
    %253 = vector.extract_strided_slice %218 {offsets = [0, 48], sizes = [8, 8], strides = [1, 1]} : vector<8x64xf32> to vector<8x8xf32>
    %254 = vector.extract_strided_slice %218 {offsets = [0, 56], sizes = [8, 8], strides = [1, 1]} : vector<8x64xf32> to vector<8x8xf32>
    %255 = tpu.concatenate %247, %248, %249, %250, %251, %252, %253, %254 in 0 : vector<8x8xf32>, vector<8x8xf32>, vector<8x8xf32>, vector<8x8xf32>, vector<8x8xf32>, vector<8x8xf32>, vector<8x8xf32>, vector<8x8xf32> -> vector<64x8xf32>
    "tpu.trace_start"() <{level = 10 : i32, message = "ij,nj->in"}> : () -> ()
    %cst_35 = arith.constant dense<0.000000e+00> : vector<8x64xf32>
    %256 = tpu.matmul %246, %255, %cst_35 {dimension_numbers = #tpu.dot_dimension_numbers<[1], [1], [0], [0], [0, 0, 1, 0], [], []>} : vector<8x8xf32>, vector<64x8xf32>, vector<8x64xf32> -> vector<8x64xf32>
    "tpu.trace_stop"() : () -> ()
    %257 = vector.extract_strided_slice %81 {offsets = [64, 0], sizes = [64, 128], strides = [1, 1]} : vector<128x128xf32> to vector<64x128xf32>
    %cst_36 = arith.constant dense<0.000000e+00> : vector<8x128xf32>
    %258 = tpu.matmul %256, %257, %cst_36 {dimension_numbers = #tpu.dot_dimension_numbers<[1], [0], [0], [1], [0, 0, 1, 1], [], []>} : vector<8x64xf32>, vector<64x128xf32>, vector<8x128xf32> -> vector<8x128xf32>
    %259 = arith.addf %215, %258 : vector<8x128xf32>
    %cst_37 = arith.constant 0.000000e+00 : f32
    %260 = vector.broadcast %cst_37 : f32 to vector<8x128xf32>
    %261 = vector.extract_strided_slice %80 {offsets = [16, 0], sizes = [8, 64], strides = [1, 1]} : vector<96x128xf32> to vector<8x64xf32>
    %262 = vector.extract_strided_slice %80 {offsets = [48, 0], sizes = [8, 64], strides = [1, 1]} : vector<96x128xf32> to vector<8x64xf32>
    %263 = vector.extract_strided_slice %80 {offsets = [80, 0], sizes = [8, 64], strides = [1, 1]} : vector<96x128xf32> to vector<8x64xf32>
    "tpu.trace_start"() <{level = 10 : i32, message = "rn,rm->nm"}> : () -> ()
    %cst_38 = arith.constant dense<0.000000e+00> : vector<64x64xf32>
    %264 = tpu.matmul %261, %262, %cst_38 {dimension_numbers = #tpu.dot_dimension_numbers<[0], [0], [1], [1], [0, 1, 1, 1], [], []>} : vector<8x64xf32>, vector<8x64xf32>, vector<64x64xf32> -> vector<64x64xf32>
    %cst_39 = arith.constant 0.000000e+00 : f32
    "tpu.trace_stop"() : () -> ()
    %265 = vector.broadcast %cst_39 : f32 to vector<8x8xf32>
    %266 = vector.extract_strided_slice %264 {offsets = [0, 0], sizes = [8, 8], strides = [1, 1]} : vector<64x64xf32> to vector<8x8xf32>
    %267 = arith.addf %265, %266 : vector<8x8xf32>
    %268 = vector.extract_strided_slice %264 {offsets = [8, 8], sizes = [8, 8], strides = [1, 1]} : vector<64x64xf32> to vector<8x8xf32>
    %269 = arith.addf %267, %268 : vector<8x8xf32>
    %270 = vector.extract_strided_slice %264 {offsets = [16, 16], sizes = [8, 8], strides = [1, 1]} : vector<64x64xf32> to vector<8x8xf32>
    %271 = arith.addf %269, %270 : vector<8x8xf32>
    %272 = vector.extract_strided_slice %264 {offsets = [24, 24], sizes = [8, 8], strides = [1, 1]} : vector<64x64xf32> to vector<8x8xf32>
    %273 = arith.addf %271, %272 : vector<8x8xf32>
    %274 = vector.extract_strided_slice %264 {offsets = [32, 32], sizes = [8, 8], strides = [1, 1]} : vector<64x64xf32> to vector<8x8xf32>
    %275 = arith.addf %273, %274 : vector<8x8xf32>
    %276 = vector.extract_strided_slice %264 {offsets = [40, 40], sizes = [8, 8], strides = [1, 1]} : vector<64x64xf32> to vector<8x8xf32>
    %277 = arith.addf %275, %276 : vector<8x8xf32>
    %278 = vector.extract_strided_slice %264 {offsets = [48, 48], sizes = [8, 8], strides = [1, 1]} : vector<64x64xf32> to vector<8x8xf32>
    %279 = arith.addf %277, %278 : vector<8x8xf32>
    %280 = vector.extract_strided_slice %264 {offsets = [56, 56], sizes = [8, 8], strides = [1, 1]} : vector<64x64xf32> to vector<8x8xf32>
    %281 = arith.addf %279, %280 : vector<8x8xf32>
    %cst_40 = arith.constant dense<0xFF800000> : vector<8xf32>
    %282 = vector.multi_reduction <maximumf>, %281, %cst_40 [1] : vector<8x8xf32> to vector<8xf32>
    %283 = vector.shape_cast %282 : vector<8xf32> to vector<8x1xf32>
    %284 = vector.broadcast %283 : vector<8x1xf32> to vector<8x8xf32>
    %285 = arith.subf %281, %284 : vector<8x8xf32>
    %286 = math.exp %285 : vector<8x8xf32>
    %cst_41 = arith.constant dense<0.000000e+00> : vector<8xf32>
    %287 = vector.multi_reduction <add>, %286, %cst_41 [1] : vector<8x8xf32> to vector<8xf32>
    %288 = vector.shape_cast %287 : vector<8xf32> to vector<8x1xf32>
    %289 = tpu.reciprocal %288 : vector<8x1xf32> -> vector<8x1xf32>
    %290 = vector.broadcast %289 : vector<8x1xf32> to vector<8x8xf32>
    %291 = arith.mulf %286, %290 : vector<8x8xf32>
    %292 = vector.extract_strided_slice %263 {offsets = [0, 0], sizes = [8, 8], strides = [1, 1]} : vector<8x64xf32> to vector<8x8xf32>
    %293 = vector.extract_strided_slice %263 {offsets = [0, 8], sizes = [8, 8], strides = [1, 1]} : vector<8x64xf32> to vector<8x8xf32>
    %294 = vector.extract_strided_slice %263 {offsets = [0, 16], sizes = [8, 8], strides = [1, 1]} : vector<8x64xf32> to vector<8x8xf32>
    %295 = vector.extract_strided_slice %263 {offsets = [0, 24], sizes = [8, 8], strides = [1, 1]} : vector<8x64xf32> to vector<8x8xf32>
    %296 = vector.extract_strided_slice %263 {offsets = [0, 32], sizes = [8, 8], strides = [1, 1]} : vector<8x64xf32> to vector<8x8xf32>
    %297 = vector.extract_strided_slice %263 {offsets = [0, 40], sizes = [8, 8], strides = [1, 1]} : vector<8x64xf32> to vector<8x8xf32>
    %298 = vector.extract_strided_slice %263 {offsets = [0, 48], sizes = [8, 8], strides = [1, 1]} : vector<8x64xf32> to vector<8x8xf32>
    %299 = vector.extract_strided_slice %263 {offsets = [0, 56], sizes = [8, 8], strides = [1, 1]} : vector<8x64xf32> to vector<8x8xf32>
    %300 = tpu.concatenate %292, %293, %294, %295, %296, %297, %298, %299 in 0 : vector<8x8xf32>, vector<8x8xf32>, vector<8x8xf32>, vector<8x8xf32>, vector<8x8xf32>, vector<8x8xf32>, vector<8x8xf32>, vector<8x8xf32> -> vector<64x8xf32>
    "tpu.trace_start"() <{level = 10 : i32, message = "ij,nj->in"}> : () -> ()
    %cst_42 = arith.constant dense<0.000000e+00> : vector<8x64xf32>
    %301 = tpu.matmul %291, %300, %cst_42 {dimension_numbers = #tpu.dot_dimension_numbers<[1], [1], [0], [0], [0, 0, 1, 0], [], []>} : vector<8x8xf32>, vector<64x8xf32>, vector<8x64xf32> -> vector<8x64xf32>
    "tpu.trace_stop"() : () -> ()
    %302 = vector.extract_strided_slice %81 {offsets = [0, 0], sizes = [64, 128], strides = [1, 1]} : vector<128x128xf32> to vector<64x128xf32>
    %cst_43 = arith.constant dense<0.000000e+00> : vector<8x128xf32>
    %303 = tpu.matmul %301, %302, %cst_43 {dimension_numbers = #tpu.dot_dimension_numbers<[1], [0], [0], [1], [0, 0, 1, 1], [], []>} : vector<8x64xf32>, vector<64x128xf32>, vector<8x128xf32> -> vector<8x128xf32>
    %304 = arith.addf %260, %303 : vector<8x128xf32>
    %305 = vector.extract_strided_slice %80 {offsets = [16, 64], sizes = [8, 64], strides = [1, 1]} : vector<96x128xf32> to vector<8x64xf32>
    %306 = vector.extract_strided_slice %80 {offsets = [48, 64], sizes = [8, 64], strides = [1, 1]} : vector<96x128xf32> to vector<8x64xf32>
    %307 = vector.extract_strided_slice %80 {offsets = [80, 64], sizes = [8, 64], strides = [1, 1]} : vector<96x128xf32> to vector<8x64xf32>
    "tpu.trace_start"() <{level = 10 : i32, message = "rn,rm->nm"}> : () -> ()
    %cst_44 = arith.constant dense<0.000000e+00> : vector<64x64xf32>
    %308 = tpu.matmul %305, %306, %cst_44 {dimension_numbers = #tpu.dot_dimension_numbers<[0], [0], [1], [1], [0, 1, 1, 1], [], []>} : vector<8x64xf32>, vector<8x64xf32>, vector<64x64xf32> -> vector<64x64xf32>
    %cst_45 = arith.constant 0.000000e+00 : f32
    "tpu.trace_stop"() : () -> ()
    %309 = vector.broadcast %cst_45 : f32 to vector<8x8xf32>
    %310 = vector.extract_strided_slice %308 {offsets = [0, 0], sizes = [8, 8], strides = [1, 1]} : vector<64x64xf32> to vector<8x8xf32>
    %311 = arith.addf %309, %310 : vector<8x8xf32>
    %312 = vector.extract_strided_slice %308 {offsets = [8, 8], sizes = [8, 8], strides = [1, 1]} : vector<64x64xf32> to vector<8x8xf32>
    %313 = arith.addf %311, %312 : vector<8x8xf32>
    %314 = vector.extract_strided_slice %308 {offsets = [16, 16], sizes = [8, 8], strides = [1, 1]} : vector<64x64xf32> to vector<8x8xf32>
    %315 = arith.addf %313, %314 : vector<8x8xf32>
    %316 = vector.extract_strided_slice %308 {offsets = [24, 24], sizes = [8, 8], strides = [1, 1]} : vector<64x64xf32> to vector<8x8xf32>
    %317 = arith.addf %315, %316 : vector<8x8xf32>
    %318 = vector.extract_strided_slice %308 {offsets = [32, 32], sizes = [8, 8], strides = [1, 1]} : vector<64x64xf32> to vector<8x8xf32>
    %319 = arith.addf %317, %318 : vector<8x8xf32>
    %320 = vector.extract_strided_slice %308 {offsets = [40, 40], sizes = [8, 8], strides = [1, 1]} : vector<64x64xf32> to vector<8x8xf32>
    %321 = arith.addf %319, %320 : vector<8x8xf32>
    %322 = vector.extract_strided_slice %308 {offsets = [48, 48], sizes = [8, 8], strides = [1, 1]} : vector<64x64xf32> to vector<8x8xf32>
    %323 = arith.addf %321, %322 : vector<8x8xf32>
    %324 = vector.extract_strided_slice %308 {offsets = [56, 56], sizes = [8, 8], strides = [1, 1]} : vector<64x64xf32> to vector<8x8xf32>
    %325 = arith.addf %323, %324 : vector<8x8xf32>
    %cst_46 = arith.constant dense<0xFF800000> : vector<8xf32>
    %326 = vector.multi_reduction <maximumf>, %325, %cst_46 [1] : vector<8x8xf32> to vector<8xf32>
    %327 = vector.shape_cast %326 : vector<8xf32> to vector<8x1xf32>
    %328 = vector.broadcast %327 : vector<8x1xf32> to vector<8x8xf32>
    %329 = arith.subf %325, %328 : vector<8x8xf32>
    %330 = math.exp %329 : vector<8x8xf32>
    %cst_47 = arith.constant dense<0.000000e+00> : vector<8xf32>
    %331 = vector.multi_reduction <add>, %330, %cst_47 [1] : vector<8x8xf32> to vector<8xf32>
    %332 = vector.shape_cast %331 : vector<8xf32> to vector<8x1xf32>
    %333 = tpu.reciprocal %332 : vector<8x1xf32> -> vector<8x1xf32>
    %334 = vector.broadcast %333 : vector<8x1xf32> to vector<8x8xf32>
    %335 = arith.mulf %330, %334 : vector<8x8xf32>
    %336 = vector.extract_strided_slice %307 {offsets = [0, 0], sizes = [8, 8], strides = [1, 1]} : vector<8x64xf32> to vector<8x8xf32>
    %337 = vector.extract_strided_slice %307 {offsets = [0, 8], sizes = [8, 8], strides = [1, 1]} : vector<8x64xf32> to vector<8x8xf32>
    %338 = vector.extract_strided_slice %307 {offsets = [0, 16], sizes = [8, 8], strides = [1, 1]} : vector<8x64xf32> to vector<8x8xf32>
    %339 = vector.extract_strided_slice %307 {offsets = [0, 24], sizes = [8, 8], strides = [1, 1]} : vector<8x64xf32> to vector<8x8xf32>
    %340 = vector.extract_strided_slice %307 {offsets = [0, 32], sizes = [8, 8], strides = [1, 1]} : vector<8x64xf32> to vector<8x8xf32>
    %341 = vector.extract_strided_slice %307 {offsets = [0, 40], sizes = [8, 8], strides = [1, 1]} : vector<8x64xf32> to vector<8x8xf32>
    %342 = vector.extract_strided_slice %307 {offsets = [0, 48], sizes = [8, 8], strides = [1, 1]} : vector<8x64xf32> to vector<8x8xf32>
    %343 = vector.extract_strided_slice %307 {offsets = [0, 56], sizes = [8, 8], strides = [1, 1]} : vector<8x64xf32> to vector<8x8xf32>
    %344 = tpu.concatenate %336, %337, %338, %339, %340, %341, %342, %343 in 0 : vector<8x8xf32>, vector<8x8xf32>, vector<8x8xf32>, vector<8x8xf32>, vector<8x8xf32>, vector<8x8xf32>, vector<8x8xf32>, vector<8x8xf32> -> vector<64x8xf32>
    "tpu.trace_start"() <{level = 10 : i32, message = "ij,nj->in"}> : () -> ()
    %cst_48 = arith.constant dense<0.000000e+00> : vector<8x64xf32>
    %345 = tpu.matmul %335, %344, %cst_48 {dimension_numbers = #tpu.dot_dimension_numbers<[1], [1], [0], [0], [0, 0, 1, 0], [], []>} : vector<8x8xf32>, vector<64x8xf32>, vector<8x64xf32> -> vector<8x64xf32>
    "tpu.trace_stop"() : () -> ()
    %346 = vector.extract_strided_slice %81 {offsets = [64, 0], sizes = [64, 128], strides = [1, 1]} : vector<128x128xf32> to vector<64x128xf32>
    %cst_49 = arith.constant dense<0.000000e+00> : vector<8x128xf32>
    %347 = tpu.matmul %345, %346, %cst_49 {dimension_numbers = #tpu.dot_dimension_numbers<[1], [0], [0], [1], [0, 0, 1, 1], [], []>} : vector<8x64xf32>, vector<64x128xf32>, vector<8x128xf32> -> vector<8x128xf32>
    %348 = arith.addf %304, %347 : vector<8x128xf32>
    %cst_50 = arith.constant 0.000000e+00 : f32
    %349 = vector.broadcast %cst_50 : f32 to vector<8x128xf32>
    %350 = vector.extract_strided_slice %80 {offsets = [24, 0], sizes = [8, 64], strides = [1, 1]} : vector<96x128xf32> to vector<8x64xf32>
    %351 = vector.extract_strided_slice %80 {offsets = [56, 0], sizes = [8, 64], strides = [1, 1]} : vector<96x128xf32> to vector<8x64xf32>
    %352 = vector.extract_strided_slice %80 {offsets = [88, 0], sizes = [8, 64], strides = [1, 1]} : vector<96x128xf32> to vector<8x64xf32>
    "tpu.trace_start"() <{level = 10 : i32, message = "rn,rm->nm"}> : () -> ()
    %cst_51 = arith.constant dense<0.000000e+00> : vector<64x64xf32>
    %353 = tpu.matmul %350, %351, %cst_51 {dimension_numbers = #tpu.dot_dimension_numbers<[0], [0], [1], [1], [0, 1, 1, 1], [], []>} : vector<8x64xf32>, vector<8x64xf32>, vector<64x64xf32> -> vector<64x64xf32>
    %cst_52 = arith.constant 0.000000e+00 : f32
    "tpu.trace_stop"() : () -> ()
    %354 = vector.broadcast %cst_52 : f32 to vector<8x8xf32>
    %355 = vector.extract_strided_slice %353 {offsets = [0, 0], sizes = [8, 8], strides = [1, 1]} : vector<64x64xf32> to vector<8x8xf32>
    %356 = arith.addf %354, %355 : vector<8x8xf32>
    %357 = vector.extract_strided_slice %353 {offsets = [8, 8], sizes = [8, 8], strides = [1, 1]} : vector<64x64xf32> to vector<8x8xf32>
    %358 = arith.addf %356, %357 : vector<8x8xf32>
    %359 = vector.extract_strided_slice %353 {offsets = [16, 16], sizes = [8, 8], strides = [1, 1]} : vector<64x64xf32> to vector<8x8xf32>
    %360 = arith.addf %358, %359 : vector<8x8xf32>
    %361 = vector.extract_strided_slice %353 {offsets = [24, 24], sizes = [8, 8], strides = [1, 1]} : vector<64x64xf32> to vector<8x8xf32>
    %362 = arith.addf %360, %361 : vector<8x8xf32>
    %363 = vector.extract_strided_slice %353 {offsets = [32, 32], sizes = [8, 8], strides = [1, 1]} : vector<64x64xf32> to vector<8x8xf32>
    %364 = arith.addf %362, %363 : vector<8x8xf32>
    %365 = vector.extract_strided_slice %353 {offsets = [40, 40], sizes = [8, 8], strides = [1, 1]} : vector<64x64xf32> to vector<8x8xf32>
    %366 = arith.addf %364, %365 : vector<8x8xf32>
    %367 = vector.extract_strided_slice %353 {offsets = [48, 48], sizes = [8, 8], strides = [1, 1]} : vector<64x64xf32> to vector<8x8xf32>
    %368 = arith.addf %366, %367 : vector<8x8xf32>
    %369 = vector.extract_strided_slice %353 {offsets = [56, 56], sizes = [8, 8], strides = [1, 1]} : vector<64x64xf32> to vector<8x8xf32>
    %370 = arith.addf %368, %369 : vector<8x8xf32>
    %cst_53 = arith.constant dense<0xFF800000> : vector<8xf32>
    %371 = vector.multi_reduction <maximumf>, %370, %cst_53 [1] : vector<8x8xf32> to vector<8xf32>
    %372 = vector.shape_cast %371 : vector<8xf32> to vector<8x1xf32>
    %373 = vector.broadcast %372 : vector<8x1xf32> to vector<8x8xf32>
    %374 = arith.subf %370, %373 : vector<8x8xf32>
    %375 = math.exp %374 : vector<8x8xf32>
    %cst_54 = arith.constant dense<0.000000e+00> : vector<8xf32>
    %376 = vector.multi_reduction <add>, %375, %cst_54 [1] : vector<8x8xf32> to vector<8xf32>
    %377 = vector.shape_cast %376 : vector<8xf32> to vector<8x1xf32>
    %378 = tpu.reciprocal %377 : vector<8x1xf32> -> vector<8x1xf32>
    %379 = vector.broadcast %378 : vector<8x1xf32> to vector<8x8xf32>
    %380 = arith.mulf %375, %379 : vector<8x8xf32>
    %381 = vector.extract_strided_slice %352 {offsets = [0, 0], sizes = [8, 8], strides = [1, 1]} : vector<8x64xf32> to vector<8x8xf32>
    %382 = vector.extract_strided_slice %352 {offsets = [0, 8], sizes = [8, 8], strides = [1, 1]} : vector<8x64xf32> to vector<8x8xf32>
    %383 = vector.extract_strided_slice %352 {offsets = [0, 16], sizes = [8, 8], strides = [1, 1]} : vector<8x64xf32> to vector<8x8xf32>
    %384 = vector.extract_strided_slice %352 {offsets = [0, 24], sizes = [8, 8], strides = [1, 1]} : vector<8x64xf32> to vector<8x8xf32>
    %385 = vector.extract_strided_slice %352 {offsets = [0, 32], sizes = [8, 8], strides = [1, 1]} : vector<8x64xf32> to vector<8x8xf32>
    %386 = vector.extract_strided_slice %352 {offsets = [0, 40], sizes = [8, 8], strides = [1, 1]} : vector<8x64xf32> to vector<8x8xf32>
    %387 = vector.extract_strided_slice %352 {offsets = [0, 48], sizes = [8, 8], strides = [1, 1]} : vector<8x64xf32> to vector<8x8xf32>
    %388 = vector.extract_strided_slice %352 {offsets = [0, 56], sizes = [8, 8], strides = [1, 1]} : vector<8x64xf32> to vector<8x8xf32>
    %389 = tpu.concatenate %381, %382, %383, %384, %385, %386, %387, %388 in 0 : vector<8x8xf32>, vector<8x8xf32>, vector<8x8xf32>, vector<8x8xf32>, vector<8x8xf32>, vector<8x8xf32>, vector<8x8xf32>, vector<8x8xf32> -> vector<64x8xf32>
    "tpu.trace_start"() <{level = 10 : i32, message = "ij,nj->in"}> : () -> ()
    %cst_55 = arith.constant dense<0.000000e+00> : vector<8x64xf32>
    %390 = tpu.matmul %380, %389, %cst_55 {dimension_numbers = #tpu.dot_dimension_numbers<[1], [1], [0], [0], [0, 0, 1, 0], [], []>} : vector<8x8xf32>, vector<64x8xf32>, vector<8x64xf32> -> vector<8x64xf32>
    "tpu.trace_stop"() : () -> ()
    %391 = vector.extract_strided_slice %81 {offsets = [0, 0], sizes = [64, 128], strides = [1, 1]} : vector<128x128xf32> to vector<64x128xf32>
    %cst_56 = arith.constant dense<0.000000e+00> : vector<8x128xf32>
    %392 = tpu.matmul %390, %391, %cst_56 {dimension_numbers = #tpu.dot_dimension_numbers<[1], [0], [0], [1], [0, 0, 1, 1], [], []>} : vector<8x64xf32>, vector<64x128xf32>, vector<8x128xf32> -> vector<8x128xf32>
    %393 = arith.addf %349, %392 : vector<8x128xf32>
    %394 = vector.extract_strided_slice %80 {offsets = [24, 64], sizes = [8, 64], strides = [1, 1]} : vector<96x128xf32> to vector<8x64xf32>
    %395 = vector.extract_strided_slice %80 {offsets = [56, 64], sizes = [8, 64], strides = [1, 1]} : vector<96x128xf32> to vector<8x64xf32>
    %396 = vector.extract_strided_slice %80 {offsets = [88, 64], sizes = [8, 64], strides = [1, 1]} : vector<96x128xf32> to vector<8x64xf32>
    "tpu.trace_start"() <{level = 10 : i32, message = "rn,rm->nm"}> : () -> ()
    %cst_57 = arith.constant dense<0.000000e+00> : vector<64x64xf32>
    %397 = tpu.matmul %394, %395, %cst_57 {dimension_numbers = #tpu.dot_dimension_numbers<[0], [0], [1], [1], [0, 1, 1, 1], [], []>} : vector<8x64xf32>, vector<8x64xf32>, vector<64x64xf32> -> vector<64x64xf32>
    %cst_58 = arith.constant 0.000000e+00 : f32
    "tpu.trace_stop"() : () -> ()
    %398 = vector.broadcast %cst_58 : f32 to vector<8x8xf32>
    %399 = vector.extract_strided_slice %397 {offsets = [0, 0], sizes = [8, 8], strides = [1, 1]} : vector<64x64xf32> to vector<8x8xf32>
    %400 = arith.addf %398, %399 : vector<8x8xf32>
    %401 = vector.extract_strided_slice %397 {offsets = [8, 8], sizes = [8, 8], strides = [1, 1]} : vector<64x64xf32> to vector<8x8xf32>
    %402 = arith.addf %400, %401 : vector<8x8xf32>
    %403 = vector.extract_strided_slice %397 {offsets = [16, 16], sizes = [8, 8], strides = [1, 1]} : vector<64x64xf32> to vector<8x8xf32>
    %404 = arith.addf %402, %403 : vector<8x8xf32>
    %405 = vector.extract_strided_slice %397 {offsets = [24, 24], sizes = [8, 8], strides = [1, 1]} : vector<64x64xf32> to vector<8x8xf32>
    %406 = arith.addf %404, %405 : vector<8x8xf32>
    %407 = vector.extract_strided_slice %397 {offsets = [32, 32], sizes = [8, 8], strides = [1, 1]} : vector<64x64xf32> to vector<8x8xf32>
    %408 = arith.addf %406, %407 : vector<8x8xf32>
    %409 = vector.extract_strided_slice %397 {offsets = [40, 40], sizes = [8, 8], strides = [1, 1]} : vector<64x64xf32> to vector<8x8xf32>
    %410 = arith.addf %408, %409 : vector<8x8xf32>
    %411 = vector.extract_strided_slice %397 {offsets = [48, 48], sizes = [8, 8], strides = [1, 1]} : vector<64x64xf32> to vector<8x8xf32>
    %412 = arith.addf %410, %411 : vector<8x8xf32>
    %413 = vector.extract_strided_slice %397 {offsets = [56, 56], sizes = [8, 8], strides = [1, 1]} : vector<64x64xf32> to vector<8x8xf32>
    %414 = arith.addf %412, %413 : vector<8x8xf32>
    %cst_59 = arith.constant dense<0xFF800000> : vector<8xf32>
    %415 = vector.multi_reduction <maximumf>, %414, %cst_59 [1] : vector<8x8xf32> to vector<8xf32>
    %416 = vector.shape_cast %415 : vector<8xf32> to vector<8x1xf32>
    %417 = vector.broadcast %416 : vector<8x1xf32> to vector<8x8xf32>
    %418 = arith.subf %414, %417 : vector<8x8xf32>
    %419 = math.exp %418 : vector<8x8xf32>
    %cst_60 = arith.constant dense<0.000000e+00> : vector<8xf32>
    %420 = vector.multi_reduction <add>, %419, %cst_60 [1] : vector<8x8xf32> to vector<8xf32>
    %421 = vector.shape_cast %420 : vector<8xf32> to vector<8x1xf32>
    %422 = tpu.reciprocal %421 : vector<8x1xf32> -> vector<8x1xf32>
    %423 = vector.broadcast %422 : vector<8x1xf32> to vector<8x8xf32>
    %424 = arith.mulf %419, %423 : vector<8x8xf32>
    %425 = vector.extract_strided_slice %396 {offsets = [0, 0], sizes = [8, 8], strides = [1, 1]} : vector<8x64xf32> to vector<8x8xf32>
    %426 = vector.extract_strided_slice %396 {offsets = [0, 8], sizes = [8, 8], strides = [1, 1]} : vector<8x64xf32> to vector<8x8xf32>
    %427 = vector.extract_strided_slice %396 {offsets = [0, 16], sizes = [8, 8], strides = [1, 1]} : vector<8x64xf32> to vector<8x8xf32>
    %428 = vector.extract_strided_slice %396 {offsets = [0, 24], sizes = [8, 8], strides = [1, 1]} : vector<8x64xf32> to vector<8x8xf32>
    %429 = vector.extract_strided_slice %396 {offsets = [0, 32], sizes = [8, 8], strides = [1, 1]} : vector<8x64xf32> to vector<8x8xf32>
    %430 = vector.extract_strided_slice %396 {offsets = [0, 40], sizes = [8, 8], strides = [1, 1]} : vector<8x64xf32> to vector<8x8xf32>
    %431 = vector.extract_strided_slice %396 {offsets = [0, 48], sizes = [8, 8], strides = [1, 1]} : vector<8x64xf32> to vector<8x8xf32>
    %432 = vector.extract_strided_slice %396 {offsets = [0, 56], sizes = [8, 8], strides = [1, 1]} : vector<8x64xf32> to vector<8x8xf32>
    %433 = tpu.concatenate %425, %426, %427, %428, %429, %430, %431, %432 in 0 : vector<8x8xf32>, vector<8x8xf32>, vector<8x8xf32>, vector<8x8xf32>, vector<8x8xf32>, vector<8x8xf32>, vector<8x8xf32>, vector<8x8xf32> -> vector<64x8xf32>
    "tpu.trace_start"() <{level = 10 : i32, message = "ij,nj->in"}> : () -> ()
    %cst_61 = arith.constant dense<0.000000e+00> : vector<8x64xf32>
    %434 = tpu.matmul %424, %433, %cst_61 {dimension_numbers = #tpu.dot_dimension_numbers<[1], [1], [0], [0], [0, 0, 1, 0], [], []>} : vector<8x8xf32>, vector<64x8xf32>, vector<8x64xf32> -> vector<8x64xf32>
    "tpu.trace_stop"() : () -> ()
    %435 = vector.extract_strided_slice %81 {offsets = [64, 0], sizes = [64, 128], strides = [1, 1]} : vector<128x128xf32> to vector<64x128xf32>
    %cst_62 = arith.constant dense<0.000000e+00> : vector<8x128xf32>
    %436 = tpu.matmul %434, %435, %cst_62 {dimension_numbers = #tpu.dot_dimension_numbers<[1], [0], [0], [1], [0, 0, 1, 1], [], []>} : vector<8x64xf32>, vector<64x128xf32>, vector<8x128xf32> -> vector<8x128xf32>
    %437 = arith.addf %393, %436 : vector<8x128xf32>
    %438 = tpu.concatenate %170, %259, %348, %437 in 0 : vector<8x128xf32>, vector<8x128xf32>, vector<8x128xf32>, vector<8x128xf32> -> vector<32x128xf32>
    %439 = vector.extract_strided_slice %438 {offsets = [0, 0], sizes = [32, 32], strides = [1, 1]} : vector<32x128xf32> to vector<32x32xf32>
    %440 = vector.extract_strided_slice %438 {offsets = [0, 32], sizes = [32, 32], strides = [1, 1]} : vector<32x128xf32> to vector<32x32xf32>
    %441 = vector.extract_strided_slice %438 {offsets = [0, 64], sizes = [32, 32], strides = [1, 1]} : vector<32x128xf32> to vector<32x32xf32>
    %442 = vector.extract_strided_slice %438 {offsets = [0, 96], sizes = [32, 32], strides = [1, 1]} : vector<32x128xf32> to vector<32x32xf32>
    %443 = tpu.concatenate %439, %440, %441, %442 in 0 : vector<32x32xf32>, vector<32x32xf32>, vector<32x32xf32>, vector<32x32xf32> -> vector<128x32xf32>
    %c0_63 = arith.constant 0 : index
    %c0_64 = arith.constant 0 : index
    %444 = vector.load %arg6[%c0_63, %c0_64] : memref<1x32xf32, #tpu.memory_space<vmem>>, vector<1x32xf32>
    %c0_65 = arith.constant 0 : index
    %c0_66 = arith.constant 0 : index
    %445 = vector.load %arg7[%c0_65, %c0_66] : memref<1x32xf32, #tpu.memory_space<vmem>>, vector<1x32xf32>
    %cst_67 = arith.constant dense<0.000000e+00> : vector<128xf32>
    %446 = vector.multi_reduction <add>, %443, %cst_67 [1] : vector<128x32xf32> to vector<128xf32>
    %447 = vector.shape_cast %446 : vector<128xf32> to vector<128x1xf32>
    %cst_68 = arith.constant 3.200000e+01 : f32
    %448 = vector.broadcast %cst_68 : f32 to vector<128x1xf32>
    %449 = arith.divf %447, %448 : vector<128x1xf32>
    %450 = vector.broadcast %449 : vector<128x1xf32> to vector<128x32xf32>
    %451 = arith.subf %443, %450 : vector<128x32xf32>
    %452 = arith.mulf %451, %451 : vector<128x32xf32>
    %cst_69 = arith.constant dense<0.000000e+00> : vector<128xf32>
    %453 = vector.multi_reduction <add>, %452, %cst_69 [1] : vector<128x32xf32> to vector<128xf32>
    %454 = vector.shape_cast %453 : vector<128xf32> to vector<128x1xf32>
    %cst_70 = arith.constant 3.200000e+01 : f32
    %455 = vector.broadcast %cst_70 : f32 to vector<128x1xf32>
    %456 = arith.divf %454, %455 : vector<128x1xf32>
    %cst_71 = arith.constant 9.99999974E-6 : f32
    %457 = vector.broadcast %cst_71 : f32 to vector<128x1xf32>
    %458 = arith.addf %456, %457 : vector<128x1xf32>
    %459 = math.rsqrt %458 : vector<128x1xf32>
    %460 = vector.broadcast %459 : vector<128x1xf32> to vector<128x32xf32>
    %461 = arith.mulf %451, %460 : vector<128x32xf32>
    %462 = vector.broadcast %444 : vector<1x32xf32> to vector<128x32xf32>
    %463 = arith.mulf %461, %462 : vector<128x32xf32>
    %464 = vector.broadcast %445 : vector<1x32xf32> to vector<128x32xf32>
    %465 = arith.addf %463, %464 : vector<128x32xf32>
    %466 = vector.extract_strided_slice %1 {offsets = [0, 0], sizes = [32, 32], strides = [1, 1]} : vector<32x128xf32> to vector<32x32xf32>
    %467 = vector.extract_strided_slice %465 {offsets = [0, 0], sizes = [32, 32], strides = [1, 1]} : vector<128x32xf32> to vector<32x32xf32>
    %468 = arith.addf %466, %467 : vector<32x32xf32>
    %469 = vector.extract_strided_slice %1 {offsets = [0, 32], sizes = [32, 32], strides = [1, 1]} : vector<32x128xf32> to vector<32x32xf32>
    %470 = vector.extract_strided_slice %465 {offsets = [32, 0], sizes = [32, 32], strides = [1, 1]} : vector<128x32xf32> to vector<32x32xf32>
    %471 = arith.addf %469, %470 : vector<32x32xf32>
    %472 = vector.extract_strided_slice %1 {offsets = [0, 64], sizes = [32, 32], strides = [1, 1]} : vector<32x128xf32> to vector<32x32xf32>
    %473 = vector.extract_strided_slice %465 {offsets = [64, 0], sizes = [32, 32], strides = [1, 1]} : vector<128x32xf32> to vector<32x32xf32>
    %474 = arith.addf %472, %473 : vector<32x32xf32>
    %475 = vector.extract_strided_slice %1 {offsets = [0, 96], sizes = [32, 32], strides = [1, 1]} : vector<32x128xf32> to vector<32x32xf32>
    %476 = vector.extract_strided_slice %465 {offsets = [96, 0], sizes = [32, 32], strides = [1, 1]} : vector<128x32xf32> to vector<32x32xf32>
    %477 = arith.addf %475, %476 : vector<32x32xf32>
    %478 = tpu.concatenate %468, %471, %474, %477 in 0 : vector<32x32xf32>, vector<32x32xf32>, vector<32x32xf32>, vector<32x32xf32> -> vector<128x32xf32>
    %c0_72 = arith.constant 0 : index
    %c0_73 = arith.constant 0 : index
    %479 = vector.load %arg8[%c0_72, %c0_73] : memref<32x64xf32, #tpu.memory_space<vmem>>, vector<32x64xf32>
    %cst_74 = arith.constant dense<0.000000e+00> : vector<128x64xf32>
    %480 = tpu.matmul %478, %479, %cst_74 {dimension_numbers = #tpu.dot_dimension_numbers<[1], [0], [0], [1], [0, 0, 1, 1], [], []>} : vector<128x32xf32>, vector<32x64xf32>, vector<128x64xf32> -> vector<128x64xf32>
    %c0_75 = arith.constant 0 : index
    %c0_76 = arith.constant 0 : index
    %481 = vector.load %arg9[%c0_75, %c0_76] : memref<1x64xf32, #tpu.memory_space<vmem>>, vector<1x64xf32>
    %482 = vector.broadcast %481 : vector<1x64xf32> to vector<128x64xf32>
    %483 = arith.addf %480, %482 : vector<128x64xf32>
    %cst_77 = arith.constant 5.000000e-01 : f32
    %484 = vector.broadcast %cst_77 : f32 to vector<128x64xf32>
    %485 = arith.mulf %484, %483 : vector<128x64xf32>
    %cst_78 = arith.constant 0.707106769 : f32
    %486 = vector.broadcast %cst_78 : f32 to vector<128x64xf32>
    %487 = arith.mulf %483, %486 : vector<128x64xf32>
    %cst_79 = arith.constant 0.000000e+00 : f32
    %488 = vector.broadcast %cst_79 : f32 to vector<128x64xf32>
    %489 = arith.cmpf oge, %487, %488 : vector<128x64xf32>
    %cst_80 = arith.constant 1.000000e+00 : f32
    %cst_81 = arith.constant -1.000000e+00 : f32
    %490 = vector.broadcast %cst_80 : f32 to vector<128x64xf32>
    %491 = vector.broadcast %cst_81 : f32 to vector<128x64xf32>
    %492 = arith.select %489, %490, %491 : vector<128x64xi1>, vector<128x64xf32>
    %493 = math.absf %487 : vector<128x64xf32>
    %cst_82 = arith.constant 0.327591091 : f32
    %494 = vector.broadcast %cst_82 : f32 to vector<128x64xf32>
    %495 = arith.mulf %494, %493 : vector<128x64xf32>
    %cst_83 = arith.constant 1.000000e+00 : f32
    %496 = vector.broadcast %cst_83 : f32 to vector<128x64xf32>
    %497 = arith.addf %496, %495 : vector<128x64xf32>
    %cst_84 = arith.constant 1.000000e+00 : f32
    %498 = vector.broadcast %cst_84 : f32 to vector<128x64xf32>
    %499 = arith.divf %498, %497 : vector<128x64xf32>
    %cst_85 = arith.constant 1.06140542 : f32
    %500 = vector.broadcast %cst_85 : f32 to vector<128x64xf32>
    %501 = arith.mulf %500, %499 : vector<128x64xf32>
    %cst_86 = arith.constant -1.45315206 : f32
    %502 = vector.broadcast %cst_86 : f32 to vector<128x64xf32>
    %503 = arith.addf %501, %502 : vector<128x64xf32>
    %504 = arith.mulf %503, %499 : vector<128x64xf32>
    %cst_87 = arith.constant 1.42141378 : f32
    %505 = vector.broadcast %cst_87 : f32 to vector<128x64xf32>
    %506 = arith.addf %504, %505 : vector<128x64xf32>
    %507 = arith.mulf %506, %499 : vector<128x64xf32>
    %cst_88 = arith.constant -0.284496725 : f32
    %508 = vector.broadcast %cst_88 : f32 to vector<128x64xf32>
    %509 = arith.addf %507, %508 : vector<128x64xf32>
    %510 = arith.mulf %509, %499 : vector<128x64xf32>
    %cst_89 = arith.constant 0.254829586 : f32
    %511 = vector.broadcast %cst_89 : f32 to vector<128x64xf32>
    %512 = arith.addf %510, %511 : vector<128x64xf32>
    %513 = arith.mulf %512, %499 : vector<128x64xf32>
    %cst_90 = arith.constant 0.000000e+00 : f32
    %514 = vector.broadcast %cst_90 : f32 to vector<128x64xf32>
    %515 = arith.subf %514, %493 : vector<128x64xf32>
    %516 = arith.mulf %515, %493 : vector<128x64xf32>
    %517 = math.exp %516 : vector<128x64xf32>
    %518 = arith.mulf %513, %517 : vector<128x64xf32>
    %cst_91 = arith.constant 1.000000e+00 : f32
    %519 = vector.broadcast %cst_91 : f32 to vector<128x64xf32>
    %520 = arith.subf %519, %518 : vector<128x64xf32>
    %521 = arith.mulf %492, %520 : vector<128x64xf32>
    %cst_92 = arith.constant 1.000000e+00 : f32
    %522 = vector.broadcast %cst_92 : f32 to vector<128x64xf32>
    %523 = arith.addf %522, %521 : vector<128x64xf32>
    %524 = arith.mulf %485, %523 : vector<128x64xf32>
    %c0_93 = arith.constant 0 : index
    %c0_94 = arith.constant 0 : index
    %525 = vector.load %arg10[%c0_93, %c0_94] : memref<64x32xf32, #tpu.memory_space<vmem>>, vector<64x32xf32>
    %cst_95 = arith.constant dense<0.000000e+00> : vector<128x32xf32>
    %526 = tpu.matmul %524, %525, %cst_95 {dimension_numbers = #tpu.dot_dimension_numbers<[1], [0], [0], [1], [0, 0, 1, 1], [], []>} : vector<128x64xf32>, vector<64x32xf32>, vector<128x32xf32> -> vector<128x32xf32>
    %c0_96 = arith.constant 0 : index
    %c0_97 = arith.constant 0 : index
    %527 = vector.load %arg11[%c0_96, %c0_97] : memref<1x32xf32, #tpu.memory_space<vmem>>, vector<1x32xf32>
    %528 = vector.broadcast %527 : vector<1x32xf32> to vector<128x32xf32>
    %529 = arith.addf %526, %528 : vector<128x32xf32>
    %cst_98 = arith.constant 5.000000e-01 : f32
    %530 = vector.broadcast %cst_98 : f32 to vector<128x32xf32>
    %531 = arith.mulf %530, %529 : vector<128x32xf32>
    %cst_99 = arith.constant 0.707106769 : f32
    %532 = vector.broadcast %cst_99 : f32 to vector<128x32xf32>
    %533 = arith.mulf %529, %532 : vector<128x32xf32>
    %cst_100 = arith.constant 0.000000e+00 : f32
    %534 = vector.broadcast %cst_100 : f32 to vector<128x32xf32>
    %535 = arith.cmpf oge, %533, %534 : vector<128x32xf32>
    %cst_101 = arith.constant 1.000000e+00 : f32
    %cst_102 = arith.constant -1.000000e+00 : f32
    %536 = vector.broadcast %cst_101 : f32 to vector<128x32xf32>
    %537 = vector.broadcast %cst_102 : f32 to vector<128x32xf32>
    %538 = arith.select %535, %536, %537 : vector<128x32xi1>, vector<128x32xf32>
    %539 = math.absf %533 : vector<128x32xf32>
    %cst_103 = arith.constant 0.327591091 : f32
    %540 = vector.broadcast %cst_103 : f32 to vector<128x32xf32>
    %541 = arith.mulf %540, %539 : vector<128x32xf32>
    %cst_104 = arith.constant 1.000000e+00 : f32
    %542 = vector.broadcast %cst_104 : f32 to vector<128x32xf32>
    %543 = arith.addf %542, %541 : vector<128x32xf32>
    %cst_105 = arith.constant 1.000000e+00 : f32
    %544 = vector.broadcast %cst_105 : f32 to vector<128x32xf32>
    %545 = arith.divf %544, %543 : vector<128x32xf32>
    %cst_106 = arith.constant 1.06140542 : f32
    %546 = vector.broadcast %cst_106 : f32 to vector<128x32xf32>
    %547 = arith.mulf %546, %545 : vector<128x32xf32>
    %cst_107 = arith.constant -1.45315206 : f32
    %548 = vector.broadcast %cst_107 : f32 to vector<128x32xf32>
    %549 = arith.addf %547, %548 : vector<128x32xf32>
    %550 = arith.mulf %549, %545 : vector<128x32xf32>
    %cst_108 = arith.constant 1.42141378 : f32
    %551 = vector.broadcast %cst_108 : f32 to vector<128x32xf32>
    %552 = arith.addf %550, %551 : vector<128x32xf32>
    %553 = arith.mulf %552, %545 : vector<128x32xf32>
    %cst_109 = arith.constant -0.284496725 : f32
    %554 = vector.broadcast %cst_109 : f32 to vector<128x32xf32>
    %555 = arith.addf %553, %554 : vector<128x32xf32>
    %556 = arith.mulf %555, %545 : vector<128x32xf32>
    %cst_110 = arith.constant 0.254829586 : f32
    %557 = vector.broadcast %cst_110 : f32 to vector<128x32xf32>
    %558 = arith.addf %556, %557 : vector<128x32xf32>
    %559 = arith.mulf %558, %545 : vector<128x32xf32>
    %cst_111 = arith.constant 0.000000e+00 : f32
    %560 = vector.broadcast %cst_111 : f32 to vector<128x32xf32>
    %561 = arith.subf %560, %539 : vector<128x32xf32>
    %562 = arith.mulf %561, %539 : vector<128x32xf32>
    %563 = math.exp %562 : vector<128x32xf32>
    %564 = arith.mulf %559, %563 : vector<128x32xf32>
    %cst_112 = arith.constant 1.000000e+00 : f32
    %565 = vector.broadcast %cst_112 : f32 to vector<128x32xf32>
    %566 = arith.subf %565, %564 : vector<128x32xf32>
    %567 = arith.mulf %538, %566 : vector<128x32xf32>
    %cst_113 = arith.constant 1.000000e+00 : f32
    %568 = vector.broadcast %cst_113 : f32 to vector<128x32xf32>
    %569 = arith.addf %568, %567 : vector<128x32xf32>
    %570 = arith.mulf %531, %569 : vector<128x32xf32>
    %c0_114 = arith.constant 0 : index
    %c0_115 = arith.constant 0 : index
    %571 = vector.load %arg12[%c0_114, %c0_115] : memref<1x32xf32, #tpu.memory_space<vmem>>, vector<1x32xf32>
    %c0_116 = arith.constant 0 : index
    %c0_117 = arith.constant 0 : index
    %572 = vector.load %arg13[%c0_116, %c0_117] : memref<1x32xf32, #tpu.memory_space<vmem>>, vector<1x32xf32>
    %cst_118 = arith.constant dense<0.000000e+00> : vector<128xf32>
    %573 = vector.multi_reduction <add>, %570, %cst_118 [1] : vector<128x32xf32> to vector<128xf32>
    %574 = vector.shape_cast %573 : vector<128xf32> to vector<128x1xf32>
    %cst_119 = arith.constant 3.200000e+01 : f32
    %575 = vector.broadcast %cst_119 : f32 to vector<128x1xf32>
    %576 = arith.divf %574, %575 : vector<128x1xf32>
    %577 = vector.broadcast %576 : vector<128x1xf32> to vector<128x32xf32>
    %578 = arith.subf %570, %577 : vector<128x32xf32>
    %579 = arith.mulf %578, %578 : vector<128x32xf32>
    %cst_120 = arith.constant dense<0.000000e+00> : vector<128xf32>
    %580 = vector.multi_reduction <add>, %579, %cst_120 [1] : vector<128x32xf32> to vector<128xf32>
    %581 = vector.shape_cast %580 : vector<128xf32> to vector<128x1xf32>
    %cst_121 = arith.constant 3.200000e+01 : f32
    %582 = vector.broadcast %cst_121 : f32 to vector<128x1xf32>
    %583 = arith.divf %581, %582 : vector<128x1xf32>
    %cst_122 = arith.constant 9.99999974E-6 : f32
    %584 = vector.broadcast %cst_122 : f32 to vector<128x1xf32>
    %585 = arith.addf %583, %584 : vector<128x1xf32>
    %586 = math.rsqrt %585 : vector<128x1xf32>
    %587 = vector.broadcast %586 : vector<128x1xf32> to vector<128x32xf32>
    %588 = arith.mulf %578, %587 : vector<128x32xf32>
    %589 = vector.broadcast %571 : vector<1x32xf32> to vector<128x32xf32>
    %590 = arith.mulf %588, %589 : vector<128x32xf32>
    %591 = vector.broadcast %572 : vector<1x32xf32> to vector<128x32xf32>
    %592 = arith.addf %590, %591 : vector<128x32xf32>
    %593 = tpu.iota {dimensions = array<i32: 0>} : vector<128x128xi32>
    %594 = tpu.iota {dimensions = array<i32: 1>} : vector<128x128xi32>
    %595 = arith.cmpi eq, %593, %594 : vector<128x128xi32>
    %596 = arith.extui %595 : vector<128x128xi1> to vector<128x128xi32>
    %597 = arith.sitofp %596 : vector<128x128xi32> to vector<128x128xf32>
    %cst_123 = arith.constant 0.000000e+00 : f32
    %598 = vector.broadcast %cst_123 : f32 to vector<32x128xf32>
    %599 = vector.extract_strided_slice %592 {offsets = [0, 0], sizes = [32, 32], strides = [1, 1]} : vector<128x32xf32> to vector<32x32xf32>
    %600 = arith.addf %468, %599 : vector<32x32xf32>
    %601 = vector.extract_strided_slice %597 {offsets = [0, 0], sizes = [32, 128], strides = [1, 1]} : vector<128x128xf32> to vector<32x128xf32>
    %cst_124 = arith.constant dense<0.000000e+00> : vector<32x128xf32>
    %602 = tpu.matmul %600, %601, %cst_124 {dimension_numbers = #tpu.dot_dimension_numbers<[1], [0], [0], [1], [0, 0, 1, 1], [], []>} : vector<32x32xf32>, vector<32x128xf32>, vector<32x128xf32> -> vector<32x128xf32>
    %603 = arith.addf %598, %602 : vector<32x128xf32>
    %604 = vector.extract_strided_slice %592 {offsets = [32, 0], sizes = [32, 32], strides = [1, 1]} : vector<128x32xf32> to vector<32x32xf32>
    %605 = arith.addf %471, %604 : vector<32x32xf32>
    %606 = vector.extract_strided_slice %597 {offsets = [32, 0], sizes = [32, 128], strides = [1, 1]} : vector<128x128xf32> to vector<32x128xf32>
    %cst_125 = arith.constant dense<0.000000e+00> : vector<32x128xf32>
    %607 = tpu.matmul %605, %606, %cst_125 {dimension_numbers = #tpu.dot_dimension_numbers<[1], [0], [0], [1], [0, 0, 1, 1], [], []>} : vector<32x32xf32>, vector<32x128xf32>, vector<32x128xf32> -> vector<32x128xf32>
    %608 = arith.addf %603, %607 : vector<32x128xf32>
    %609 = vector.extract_strided_slice %592 {offsets = [64, 0], sizes = [32, 32], strides = [1, 1]} : vector<128x32xf32> to vector<32x32xf32>
    %610 = arith.addf %474, %609 : vector<32x32xf32>
    %611 = vector.extract_strided_slice %597 {offsets = [64, 0], sizes = [32, 128], strides = [1, 1]} : vector<128x128xf32> to vector<32x128xf32>
    %cst_126 = arith.constant dense<0.000000e+00> : vector<32x128xf32>
    %612 = tpu.matmul %610, %611, %cst_126 {dimension_numbers = #tpu.dot_dimension_numbers<[1], [0], [0], [1], [0, 0, 1, 1], [], []>} : vector<32x32xf32>, vector<32x128xf32>, vector<32x128xf32> -> vector<32x128xf32>
    %613 = arith.addf %608, %612 : vector<32x128xf32>
    %614 = vector.extract_strided_slice %592 {offsets = [96, 0], sizes = [32, 32], strides = [1, 1]} : vector<128x32xf32> to vector<32x32xf32>
    %615 = arith.addf %477, %614 : vector<32x32xf32>
    %616 = vector.extract_strided_slice %597 {offsets = [96, 0], sizes = [32, 128], strides = [1, 1]} : vector<128x128xf32> to vector<32x128xf32>
    %cst_127 = arith.constant dense<0.000000e+00> : vector<32x128xf32>
    %617 = tpu.matmul %615, %616, %cst_127 {dimension_numbers = #tpu.dot_dimension_numbers<[1], [0], [0], [1], [0, 0, 1, 1], [], []>} : vector<32x32xf32>, vector<32x128xf32>, vector<32x128xf32> -> vector<32x128xf32>
    %618 = arith.addf %613, %617 : vector<32x128xf32>
    %c0_128 = arith.constant 0 : index
    %c0_129 = arith.constant 0 : index
    %619 = vector.load %arg14[%c0_128, %c0_129] : memref<32x128xf32, #tpu.memory_space<vmem>>, vector<32x128xf32>
    tpu.vector_store %arg14[%c0_128, %c0_129], %618 {strides = array<i32>} : memref<32x128xf32, #tpu.memory_space<vmem>>, vector<32x128xf32>,
    return
  }
  func.func @transform_0(%arg0: i32) -> (i32, i32) {
    %c0_i32 = arith.constant 0 : i32
    %c0_i32_0 = arith.constant 0 : i32
    %c0_i32_1 = arith.constant 0 : i32
    return %c0_i32, %c0_i32_0 : i32, i32
  }
  func.func @transform_1(%arg0: i32) -> (i32, i32) {
    %c0_i32 = arith.constant 0 : i32
    %c0_i32_0 = arith.constant 0 : i32
    %c0_i32_1 = arith.constant 0 : i32
    return %c0_i32, %c0_i32_0 : i32, i32
  }
  func.func @transform_2(%arg0: i32) -> (i32, i32) {
    %c0_i32 = arith.constant 0 : i32
    %c0_i32_0 = arith.constant 0 : i32
    %c0_i32_1 = arith.constant 0 : i32
    return %c0_i32, %c0_i32_0 : i32, i32
  }
  func.func @transform_3(%arg0: i32) -> (i32, i32) {
    %c0_i32 = arith.constant 0 : i32
    %c0_i32_0 = arith.constant 0 : i32
    %c0_i32_1 = arith.constant 0 : i32
    return %c0_i32, %c0_i32_0 : i32, i32
  }
  func.func @transform_4(%arg0: i32) -> (i32, i32) {
    %c0_i32 = arith.constant 0 : i32
    %c0_i32_0 = arith.constant 0 : i32
    %c0_i32_1 = arith.constant 0 : i32
    return %c0_i32, %c0_i32_0 : i32, i32
  }
  func.func @transform_5(%arg0: i32) -> (i32, i32) {
    %c0_i32 = arith.constant 0 : i32
    %c0_i32_0 = arith.constant 0 : i32
    %c0_i32_1 = arith.constant 0 : i32
    return %c0_i32, %c0_i32_0 : i32, i32
  }
  func.func @transform_6(%arg0: i32) -> (i32, i32) {
    %c0_i32 = arith.constant 0 : i32
    %c0_i32_0 = arith.constant 0 : i32
    %c0_i32_1 = arith.constant 0 : i32
    return %c0_i32, %c0_i32_0 : i32, i32
  }
  func.func @transform_7(%arg0: i32) -> (i32, i32) {
    %c0_i32 = arith.constant 0 : i32
    %c0_i32_0 = arith.constant 0 : i32
    %c0_i32_1 = arith.constant 0 : i32
    return %c0_i32, %c0_i32_0 : i32, i32
  }
  func.func @transform_8(%arg0: i32) -> (i32, i32) {
    %c0_i32 = arith.constant 0 : i32
    %c0_i32_0 = arith.constant 0 : i32
    %c0_i32_1 = arith.constant 0 : i32
    return %c0_i32, %c0_i32_0 : i32, i32
  }
  func.func @transform_9(%arg0: i32) -> (i32, i32) {
    %c0_i32 = arith.constant 0 : i32
    %c0_i32_0 = arith.constant 0 : i32
    %c0_i32_1 = arith.constant 0 : i32
    return %c0_i32, %c0_i32_0 : i32, i32
  }
  func.func @transform_10(%arg0: i32) -> (i32, i32) {
    %c0_i32 = arith.constant 0 : i32
    %c0_i32_0 = arith.constant 0 : i32
    %c0_i32_1 = arith.constant 0 : i32
    return %c0_i32, %c0_i32_0 : i32, i32
  }
  func.func @transform_11(%arg0: i32) -> (i32, i32) {
    %c0_i32 = arith.constant 0 : i32
    %c0_i32_0 = arith.constant 0 : i32
    %c0_i32_1 = arith.constant 0 : i32
    return %c0_i32, %c0_i32_0 : i32, i32
  }
  func.func @transform_12(%arg0: i32) -> (i32, i32) {
    %c0_i32 = arith.constant 0 : i32
    %c0_i32_0 = arith.constant 0 : i32
    %c0_i32_1 = arith.constant 0 : i32
    return %c0_i32, %c0_i32_0 : i32, i32
  }
  func.func @transform_13(%arg0: i32) -> (i32, i32) {
    %c0_i32 = arith.constant 0 : i32
    %c0_i32_0 = arith.constant 0 : i32
    %c0_i32_1 = arith.constant 0 : i32
    return %c0_i32, %c0_i32_0 : i32, i32
  }
}

</mosaic_0001>

<bundles_post_ra>
// kernel: conv_transformer_block_forward.1
= control target key start
LH: loop header
LB: loop body
LE: loop exit
PB: predicated region body
PF: predicated region fallthrough
CT: control target
= control target key end

     0   :  { %v6046_v2 = vmov 1   ;;  %v6047_v3 = vmov 0   ;;  %s6048_s29 = smov 120   ;;  %s6049_s30 = smov 121   ;;  %v6051_v6 = vmov 2   ;;  %v6054_v15 = vmov 3   ;;  %s8985_s0 = inlined_call_operand.vmem [shape: f32[32,160], index: 0, kind: input, shape index: {}]   ;;  %s8986_s1 = inlined_call_operand.vmem [shape: f32[9,128], index: 1, kind: input, shape index: {}]   ;;  %s8987_s2 = inlined_call_operand.vmem [shape: f32[32,9], index: 2, kind: input, shape index: {}]   ;;  %s8988_s3 = inlined_call_operand.vmem [shape: f32[96,33], index: 3, kind: input, shape index: {}]   ;;  %s8989_s4 = inlined_call_operand.vmem [shape: f32[128,128], index: 4, kind: input, shape index: {}]   ;;  %s8990_s5 = inlined_call_operand.vmem [shape: f32[1,32], index: 5, kind: input, shape index: {}]   ;;  %s8991_s6 = inlined_call_operand.vmem [shape: f32[1,32], index: 6, kind: input, shape index: {}]   ;;  %s8992_s7 = inlined_call_operand.vmem [shape: f32[32,64], index: 7, kind: input, shape index: {}]   ;;  %s8993_s8 = inlined_call_operand.vmem [shape: f32[1,64], index: 8, kind: input, shape index: {}]   ;;  %s8994_s9 = inlined_call_operand.vmem [shape: f32[64,32], index: 9, kind: input, shape index: {}]   ;;  %s8995_s10 = inlined_call_operand.vmem [shape: f32[1,32], index: 10, kind: input, shape index: {}]   ;;  %s8996_s11 = inlined_call_operand.vmem [shape: f32[1,32], index: 11, kind: input, shape index: {}]   ;;  %s8997_s12 = inlined_call_operand.vmem [shape: f32[1,32], index: 12, kind: input, shape index: {}]   ;;  %s8998_s13 = inlined_call_operand.vmem [shape: f32[32,128], index: 13, kind: output, shape index: {}]  }
   0x1   :  { %v6148_v0 = vld [vmem:[%s8985_s0 + $0x30] sm:$0xff]  ;;  %v6153_v1 = vld [vmem:[%s8985_s0 + $0x20] sm:$0xff]  ;;  %5758 = vset.pattern.permute.xlu2 %v6046_v2  ;;  %5757 = vset.pattern.permute.xlu1 %v6047_v3  ;;  %v6165_v4 = vld [vmem:[%s8985_s0 + $0x38] sm:$0xff]  ;;  %s6050_s18 = smov 119   ;;  %s6052_s27 = smov 113   ;;  %vm83_vm0 = vcmask 990208  }
   0x2   :  { %137 = vrot.lane.b32.xlu1 %v6148_v0, %s6048_s29  ;;  %79 = vrot.lane.b32.xlu0 %v6148_v0, %s6049_s30  ;;  %v6170_v5 = vld [vmem:[%s8985_s0 + $0x28] sm:$0xff]  ;;  %v6188_v7 = vld [vmem:[%s8987_s2 + $0x18] sm:$0xff]  ;;  %s6053_s17 = smov 112   ;;  %s6055_s20 = smov 111   ;;  %v6056_v24 = vmov 4   ;;  %vm141_vm1 = vcmask 982016  }
   0x3   :  { %75 = vrot.lane.b32.xlu2 %v6153_v1, %s6049_s30  ;;  %5763 = vset.pattern.permute.xlu0 %v6051_v6  ;;  %v6197_v8 = vld [vmem:[%s8985_s0 + $0x18] sm:$0xff]  ;;  %v6202_v9 = vld [vmem:[%s8985_s0 + $0x10] sm:$0xff]  ;;  %v6231_v11 = vld [vmem:[%s8985_s0 + $0x8] sm:$0xff]  ;;  %s6058_s24 = smov 104   ;;  %vm195_vm2 = vcmask 973824   ;;  %v6059_v57 = vmov 5  }
   0x4   :  { %v6221_v10 = vld [vmem:[%s8987_s2 + $0x10] sm:$0xff]  ;;  %v6236_v12 = vld [vmem:[%s8985_s0] sm:$0xff]  ;;  %v6264_v13 = vld [vmem:[%s8987_s2 + $0x8] sm:$0xff]  ;;  %s6060_s25 = smov 103   ;;  %vm249_vm3 = vcmask 924672   ;;  %vm303_vm4 = vcmask 916480  }
   0x5   :  { %v6291_v18 = vld [vmem:[%s8987_s2] sm:$0xff]  ;;  %s6057_s2 = smov 105   ;;  %vm357_vm5 = vcmask 908288   ;;  %vm605_vm6 = vcmask 1040384   ;;  %vm411_vm7 = vcmask 859136   ;;  %vm465_vm8 = vcmask 850944  }
   0x6   :  { %v6348_v39 = vld [vmem:[%s8986_s1] sm:$0xff]  ;;  %vm519_vm9 = vcmask 842752   ;;  %vm568_vm10 = vcmask 269312   ;;  %s6065_s19 = smov 64   ;;  %vm710_vm11 = vcmask 64512   ;;  %s6066_s15 = smov 96  }
   0x7   :  { %v6351_v40 = vperm.slane %v6348_v39, 0  ;;  %v6354_v41 = vperm.slane %v6348_v39, 1  ;;  %v6370_v48 = vperm.slane %v6348_v39, 2  ;;  %s6067_s16 = smov 88  }
   0xa   :  { %139 = vrot.lane.b32.xlu1 %v6165_v4, %s6048_s29  ;;  %81 = vrot.lane.b32.xlu0 %v6165_v4, %s6049_s30 }
   0xb   :  { %77 = vrot.lane.b32.xlu2 %v6170_v5, %s6049_s30 }
  0x12   :  { %135 = vrot.lane.b32.xlu1 %v6170_v5, %s6048_s29  ;;  %133 = vrot.lane.b32.xlu0 %v6153_v1, %s6048_s29 }
  0x13   :  { %191 = vrot.lane.b32.xlu2 %v6148_v0, %s6050_s18 }
  0x1a   :  { %113 = vperm.xlu1 %5757, %v6188_v7   ;;  %193 = vrot.lane.b32.xlu0 %v6165_v4, %s6050_s18 }
  0x1b   :  { %167 = vperm.xlu2 %5758, %v6188_v7  }
  0x22   :  { %73 = vrot.lane.b32.xlu1 %v6197_v8, %s6049_s30  ;;  %71 = vrot.lane.b32.xlu0 %v6202_v9, %s6049_s30 }
  0x23   :  { %129 = vrot.lane.b32.xlu2 %v6202_v9, %s6048_s29  ;;  %5760 = vset.pattern.permute.xlu1 %v6051_v6 }
  0x24   :  { %5759 = vset.pattern.permute.xlu2 %v6047_v3 }
  0x2a   :  { %187 = vrot.lane.b32.xlu1 %v6153_v1, %s6050_s18  ;;  %131 = vrot.lane.b32.xlu0 %v6197_v8, %s6048_s29 }
  0x2b   :  { %189 = vrot.lane.b32.xlu2 %v6170_v5, %s6050_s18 }
  0x32   :  { %247 = vrot.lane.b32.xlu1 %v6165_v4, %s6052_s27  ;;  %245 = vrot.lane.b32.xlu0 %v6148_v0, %s6052_s27 }
  0x33   :  { %108 = vperm.xlu2 %5759, %v6221_v10  }
  0x3a   :  { %221 = vperm.xlu1 %5760, %v6188_v7   ;;  %127 = vrot.lane.b32.xlu0 %v6231_v11, %s6048_s29 }
  0x3b   :  { %67 = vrot.lane.b32.xlu2 %v6236_v12, %s6049_s30 }
  0x3c   :  { %5762 = vset.pattern.permute.xlu2 %v6046_v2 }
  0x42   :  { %241 = vrot.lane.b32.xlu0 %v6153_v1, %s6052_s27  ;;  %69 = vrot.lane.b32.xlu1 %v6231_v11, %s6049_s30  ;;  %s6068_s30 = smov 80  }
  0x43   :  { %125 = vrot.lane.b32.xlu2 %v6236_v12, %s6048_s29  ;;  %5761 = vset.pattern.permute.xlu1 %v6047_v3 }
  0x4a   :  { %301 = vrot.lane.b32.xlu0 %v6165_v4, %s6053_s17  ;;  %183 = vrot.lane.b32.xlu1 %v6202_v9, %s6050_s18 }
  0x4b   :  { %185 = vrot.lane.b32.xlu2 %v6197_v8, %s6050_s18 }
  0x52   :  { %217 = vperm.xlu0 %5763, %v6221_v10   ;;  %243 = vrot.lane.b32.xlu1 %v6170_v5, %s6052_s27 }
  0x53   :  { %299 = vrot.lane.b32.xlu2 %v6148_v0, %s6053_s17 }
  0x5a   :  { %5764 = vset.pattern.permute.xlu0 %v6046_v2  ;;  %103 = vperm.xlu1 %5761, %v6264_v13  }
  0x5b   :  { %159 = vperm.xlu2 %5762, %v6264_v13   ;;  %163 = vperm.xlu0 %5764, %v6221_v10  }
  0x5d   :  { %v6269_v14 = vpop.permute.xlu2 %75 }
  0x62   :  { %5765 = vset.pattern.permute.xlu1 %v6054_v15 }
  0x63   :  { %179 = vrot.lane.b32.xlu2 %v6236_v12, %s6050_s18  ;;  %239 = vrot.lane.b32.xlu0 %v6197_v8, %s6052_s27 }
  0x64   :  { %275 = vperm.xlu1 %5765, %v6188_v7   ;;  %5766 = vset.pattern.permute.xlu2 %v6047_v3 }
  0x65   :  { %v6277_v16 = vpop.permute.xlu2 %77 }
  0x6b   :  { %237 = vrot.lane.b32.xlu2 %v6202_v9, %s6052_s27  ;;  %353 = vrot.lane.b32.xlu0 %v6148_v0, %s6055_s20 }
  0x6c   :  { %181 = vrot.lane.b32.xlu1 %v6231_v11, %s6050_s18 }
  0x6d   :  { %v6285_v17 = vpop.permute.xlu2 %191  ;;  %5767 = vset.pattern.permute.xlu1 %v6051_v6 }
  0x73   :  { %297 = vrot.lane.b32.xlu2 %v6170_v5, %s6053_s17  ;;  %155 = vperm.xlu0 %5764, %v6291_v18  }
  0x74   :  { %295 = vrot.lane.b32.xlu1 %v6153_v1, %s6053_s17  ;;  %v138_v19 = vpop.permute.xlu1 %137  ;;  %v80_v20 = vpop.permute.xlu0 %79 }
  0x75   :  { %v168_v21 = vpop.permute.xlu2 %167 }
  0x7b   :  { %98 = vperm.xlu2 %5766, %v6291_v18   ;;  %235 = vrot.lane.b32.xlu0 %v6231_v11, %s6052_s27 }
  0x7c   :  { %355 = vrot.lane.b32.xlu1 %v6165_v4, %s6055_s20  ;;  %v140_v22 = vpop.permute.xlu1 %139  ;;  %v82_v23 = vpop.permute.xlu0 %81  ;;  %5771 = vset.pattern.permute.xlu0 %v6056_v24 }
  0x7d   :  { %v87_v25 = vsel %vm83_vm0, %v80_v20, %v82_v23  ;;  %v130_v26 = vpop.permute.xlu2 %129  ;;  %v145_v42 = vsel %vm141_vm1, %v138_v19, %v140_v22  ;;  %v86_v23 = vsel %vm83_vm0, %v6269_v14, %v6277_v16 }
  0x7e   :  { %v95_v45 = vmul.f32 %v87_v25, %v6351_v40  ;;  %v153_v47 = vmul.f32 %v145_v42, %v6354_v41 }
  0x80   :  { %v173_v51 = vmul.f32 %v168_v21, %v153_v47 }
  0x83   :  { %5768 = vset.pattern.permute.xlu2 %v6054_v15  ;;  %349 = vrot.lane.b32.xlu0 %v6153_v1, %s6055_s20 }
  0x84   :  { %213 = vperm.xlu1 %5767, %v6264_v13   ;;  %271 = vperm.xlu2 %5768, %v6221_v10   ;;  %v6309_v27 = vpop.permute.xlu1 %135  ;;  %v6311_v28 = vpop.permute.xlu0 %133 }
  0x85   :  { %v6313_v29 = vpop.permute.xlu2 %189 }
  0x8b   :  { %409 = vrot.lane.b32.xlu0 %v6165_v4, %s6057_s2 }
  0x8c   :  { %5769 = vset.pattern.permute.xlu1 %v6056_v24  ;;  %233 = vrot.lane.b32.xlu2 %v6236_v12, %s6052_s27  ;;  %v114_v30 = vpop.permute.xlu1 %113  ;;  %v194_v31 = vpop.permute.xlu0 %193 }
  0x8d   :  { %v6320_v32 = vpop.permute.xlu2 %108  ;;  %329 = vperm.xlu1 %5769, %v6188_v7   ;;  %v199_v49 = vsel %vm195_vm2, %v6285_v17, %v194_v31  ;;  %v119_v50 = vmul.f32 %v114_v30, %v95_v45  ;;  %v94_v30 = vmul.f32 %v86_v23, %v6351_v40  ;;  %v6061_v31 = vmov 6  }
  0x8e   :  { %v207_v52 = vmul.f32 %v199_v49, %v6370_v48  ;;  %v6062_v49 = vmov 7  }
  0x8f   :  { %v177_v55 = vadd.f32 %v173_v51, %v119_v50 }
  0x93   :  { %325 = vperm.xlu0 %5771, %v6221_v10  }
  0x94   :  { %293 = vrot.lane.b32.xlu2 %v6197_v8, %s6053_s17  ;;  %v6326_v33 = vpop.permute.xlu1 %73  ;;  %v6328_v34 = vpop.permute.xlu0 %71 }
  0x95   :  { %291 = vrot.lane.b32.xlu1 %v6202_v9, %s6053_s17  ;;  %v6332_v35 = vpop.permute.xlu2 %67  ;;  %v85_v22 = vsel %vm83_vm0, %v6328_v34, %v6326_v33  ;;  %v118_v34 = vmul.f32 %v6320_v32, %v94_v30 }
  0x96   :  { %5770 = vset.pattern.permute.xlu1 %v6051_v6  ;;  %v93_v25 = vmul.f32 %v85_v22, %v6351_v40 }
  0x9b   :  { %347 = vrot.lane.b32.xlu0 %v6197_v8, %s6055_s20 }
  0x9c   :  { %407 = vrot.lane.b32.xlu2 %v6148_v0, %s6057_s2  ;;  %v6339_v36 = vpop.permute.xlu1 %187  ;;  %v132_v37 = vpop.permute.xlu0 %131 }
  0x9d   :  { %351 = vrot.lane.b32.xlu1 %v6170_v5, %s6055_s20  ;;  %v6343_v38 = vpop.permute.xlu2 %125  ;;  %v143_v60 = vsel %vm141_vm1, %v130_v26, %v132_v37  ;;  %v198_v26 = vsel %vm195_vm2, %v6339_v36, %v6313_v29 }
  0x9e   :  { %v151_v63 = vmul.f32 %v143_v60, %v6354_v41  ;;  %v206_v29 = vmul.f32 %v198_v26, %v6370_v48 }
  0xa3   :  { %461 = vrot.lane.b32.xlu0 %v6148_v0, %s6058_s24 }
  0xa4   :  { %267 = vperm.xlu2 %5768, %v6264_v13   ;;  %v6360_v43 = vpop.permute.xlu1 %247  ;;  %v6362_v44 = vpop.permute.xlu0 %245 }
  0xa5   :  { %209 = vperm.xlu1 %5770, %v6291_v18   ;;  %v6366_v46 = vpop.permute.xlu2 %185 }
  0xab   :  { %321 = vperm.xlu0 %5771, %v6264_v13  }
  0xac   :  { %287 = vrot.lane.b32.xlu2 %v6236_v12, %s6053_s17  ;;  %v222_v53 = vpop.permute.xlu1 %221  ;;  %v6378_v54 = vpop.permute.xlu0 %127 }
  0xad   :  { %v227_v56 = vmul.f32 %v222_v53, %v207_v52  ;;  %5772 = vset.pattern.permute.xlu1 %v6059_v57  ;;  %v6381_v58 = vpop.permute.xlu2 %299 }
  0xae   :  { %383 = vperm.xlu1 %5772, %v6188_v7  }
  0xaf   :  { %v6384_v59 = vadd.f32 %v227_v56, %v177_v55  ;;  %v6453_v55 = vperm.slane %v6348_v39, 3 }
  0xb3   :  { %341 = vrot.lane.b32.xlu0 %v6236_v12, %s6055_s20 }
  0xb4   :  { %345 = vrot.lane.b32.xlu2 %v6202_v9, %s6055_s20  ;;  %v242_v61 = vpop.permute.xlu0 %241  ;;  %v6391_v62 = vpop.permute.xlu1 %69  ;;  %5775 = vset.pattern.permute.xlu0 %v6059_v57 }
  0xb5   :  { %v160_v2 = vpop.permute.xlu2 %159 }
  0xb6   :  { %v171_v3 = vmul.f32 %v160_v2, %v151_v63  ;;  %289 = vrot.lane.b32.xlu1 %v6231_v11, %s6053_s17  ;;  %v142_v2 = vsel %vm141_vm1, %v6343_v38, %v6378_v54 }
  0xbb   :  { %401 = vrot.lane.b32.xlu0 %v6197_v8, %s6057_s2 }
  0xbc   :  { %405 = vrot.lane.b32.xlu2 %v6170_v5, %s6057_s2  ;;  %v6401_v6 = vpop.permute.xlu0 %301  ;;  %v6403_v15 = vpop.permute.xlu1 %183 }
  0xbd   :  { %v6405_v17 = vpop.permute.xlu2 %179  ;;  %v197_v26 = vsel %vm195_vm2, %v6403_v15, %v6366_v46 }
  0xbe   :  { %403 = vrot.lane.b32.xlu1 %v6153_v1, %s6057_s2 }
  0xc3   :  { %515 = vrot.lane.b32.xlu0 %v6148_v0, %s6060_s25  ;;  %v144_v0 = vsel %vm141_vm1, %v6311_v28, %v6309_v27 }
  0xc4   :  { %263 = vperm.xlu2 %5768, %v6291_v18   ;;  %v218_v19 = vpop.permute.xlu0 %217  ;;  %v244_v20 = vpop.permute.xlu1 %243  ;;  %v152_v14 = vmul.f32 %v144_v0, %v6354_v41 }
  0xc5   :  { %v238_v21 = vpop.permute.xlu2 %237  ;;  %v226_v42 = vmul.f32 %v218_v19, %v206_v29  ;;  %v252_v53 = vsel %vm249_vm3, %v242_v61, %v244_v20  ;;  %v150_v20 = vmul.f32 %v142_v2, %v6354_v41  ;;  %v307_v2 = vsel %vm303_vm4, %v6381_v58, %v6401_v6 }
  0xc6   :  { %463 = vrot.lane.b32.xlu1 %v6165_v4, %s6058_s24  ;;  %v260_v60 = vmul.f32 %v252_v53, %v6453_v55 }
  0xcb   :  { %375 = vperm.xlu0 %5775, %v6264_v13  }
  0xcc   :  { %5773 = vset.pattern.permute.xlu2 %v6061_v31  ;;  %v104_v33 = vpop.permute.xlu1 %103 }
  0xcd   :  { %v117_v16 = vmul.f32 %v104_v33, %v93_v25  ;;  %437 = vperm.xlu2 %5773, %v6188_v7   ;;  %v6432_v27 = vpop.permute.xlu2 %297  ;;  %v164_v28 = vpop.permute.xlu0 %163 }
  0xce   :  { %v172_v36 = vmul.f32 %v164_v28, %v152_v14  ;;  %379 = vperm.xlu1 %5772, %v6221_v10  }
  0xcf   :  { %v6437_v37 = vadd.f32 %v171_v3, %v117_v16  ;;  %v84_v3 = vsel %vm83_vm0, %v6332_v35, %v6391_v62  ;;  %v6063_v35 = vmov 8  }
  0xd0   :  { %v176_v45 = vadd.f32 %v172_v36, %v118_v34  ;;  %v92_v19 = vmul.f32 %v84_v3, %v6351_v40 }
  0xd2   :  { %v230_v47 = vadd.f32 %v226_v42, %v176_v45  ;;  %v6518_v42 = vperm.slane %v6348_v39, 4 }
  0xd3   :  { %453 = vrot.lane.b32.xlu0 %v6202_v9, %s6058_s24 }
  0xd4   :  { %5780 = vset.pattern.permute.xlu0 %v6062_v49 }
  0xd5   :  { %399 = vrot.lane.b32.xlu2 %v6202_v9, %s6057_s2  ;;  %v99_v32 = vpop.permute.xlu2 %98  ;;  %v240_v50 = vpop.permute.xlu0 %239 }
  0xd6   :  { %v251_v51 = vsel %vm249_vm3, %v238_v21, %v240_v50  ;;  %343 = vrot.lane.b32.xlu1 %v6231_v11, %s6055_s20  ;;  %v6447_v52 = vpop.permute.xlu1 %275  ;;  %5774 = vset.pattern.permute.xlu2 %v6056_v24  ;;  %v116_v22 = vmul.f32 %v99_v32, %v92_v19  ;;  %s6069_s20 = smov 72  }
  0xd7   :  { %5776 = vset.pattern.permute.xlu1 %v6061_v31  ;;  %v259_v46 = vmul.f32 %v251_v51, %v6453_v55 }
  0xdb   :  { %513 = vrot.lane.b32.xlu0 %v6170_v5, %s6060_s25 }
  0xdd   :  { %459 = vrot.lane.b32.xlu2 %v6170_v5, %s6058_s24  ;;  %v6459_v56 = vpop.permute.xlu0 %353 }
  0xde   :  { %457 = vrot.lane.b32.xlu1 %v6153_v1, %s6058_s24  ;;  %v6464_v24 = vpop.permute.xlu1 %181  ;;  %v272_v63 = vpop.permute.xlu2 %271 }
  0xdf   :  { %v280_v61 = vmul.f32 %v272_v63, %v260_v60  ;;  %v196_v53 = vsel %vm195_vm2, %v6405_v17, %v6464_v24  ;;  %v253_v60 = vsel %vm249_vm3, %v6362_v44, %v6360_v43  ;;  %v6557_v24 = vperm.slane %v6348_v39, 5 }
  0xe0   :  { %v204_v63 = vmul.f32 %v196_v53, %v6370_v48  ;;  %v261_v43 = vmul.f32 %v253_v60, %v6453_v55 }
  0xe1   :  { %v284_v5 = vadd.f32 %v280_v61, %v230_v47 }
  0xe3   :  { %487 = vperm.xlu0 %5780, %v6221_v10  }
  0xe5   :  { %317 = vperm.xlu2 %5774, %v6291_v18   ;;  %v156_v21 = vpop.permute.xlu0 %155 }
  0xe6   :  { %v170_v23 = vmul.f32 %v156_v21, %v150_v20  ;;  %517 = vrot.lane.b32.xlu1 %v6165_v4, %s6060_s25  ;;  %v296_v38 = vpop.permute.xlu1 %295  ;;  %v234_v54 = vpop.permute.xlu2 %233 }
  0xe7   :  { %v306_v29 = vsel %vm303_vm4, %v296_v38, %v6432_v27 }
  0xe8   :  { %v174_v0 = vadd.f32 %v170_v23, %v116_v22  ;;  %v314_v45 = vmul.f32 %v306_v29, %v6518_v42 }
  0xeb   :  { %509 = vrot.lane.b32.xlu0 %v6197_v8, %s6060_s25 }
  0xec   :  { %5784 = vset.pattern.permute.xlu0 %v6063_v35 }
  0xed   :  { %5777 = vset.pattern.permute.xlu2 %v6062_v49  ;;  %v236_v40 = vpop.permute.xlu0 %235 }
  0xee   :  { %v6483_v41 = vsel %vm249_vm3, %v234_v54, %v236_v40  ;;  %433 = vperm.xlu1 %5776, %v6221_v10   ;;  %v356_v62 = vpop.permute.xlu1 %355  ;;  %491 = vperm.xlu2 %5777, %v6188_v7   ;;  %v6487_v4 = vpop.permute.xlu2 %293 }
  0xef   :  { %v258_v58 = vmul.f32 %v6483_v41, %v6453_v55 }
  0xf3   :  { %541 = vperm.xlu0 %5784, %v6221_v10   ;;  %v205_v10 = vmul.f32 %v197_v26, %v6370_v48  ;;  %v315_v48 = vmul.f32 %v307_v2, %v6518_v42 }
  0xf5   :  { %v6490_v25 = vpop.permute.xlu0 %349 }
  0xf6   :  { %v214_v30 = vpop.permute.xlu1 %213  ;;  %395 = vrot.lane.b32.xlu1 %v6236_v12, %s6057_s2  ;;  %397 = vrot.lane.b32.xlu2 %v6231_v11, %s6057_s2  ;;  %v6499_v33 = vpop.permute.xlu2 %407  ;;  %s6072_s2 = smov 16  }
  0xf7   :  { %5778 = vset.pattern.permute.xlu1 %v6059_v57  ;;  %5779 = vset.pattern.permute.xlu2 %v6061_v31  ;;  %v225_v14 = vmul.f32 %v214_v30, %v205_v10 }
  0xf9   :  { %v229_v57 = vadd.f32 %v225_v14, %v6437_v37 }
  0xfb   :  { %533 = vperm.xlu0 %5784, %v6291_v18  }
  0xfd   :  { %v6506_v15 = vpop.permute.xlu0 %409 }
  0xfe   :  { %455 = vrot.lane.b32.xlu1 %v6197_v8, %s6058_s24  ;;  %511 = vrot.lane.b32.xlu2 %v6153_v1, %s6060_s25  ;;  %v268_v16 = vpop.permute.xlu2 %267 }
  0xff   :  { %v279_v28 = vmul.f32 %v268_v16, %v259_v46  ;;  %v330_v34 = vpop.permute.xlu1 %329 }
 0x100   :  { %v335_v6 = vmul.f32 %v330_v34, %v315_v48 }
 0x101   :  { %v6515_v36 = vadd.f32 %v279_v28, %v229_v57 }
 0x105   :  { %v326_v8 = vpop.permute.xlu0 %325 }
 0x106   :  { %v334_v47 = vmul.f32 %v326_v8, %v314_v45  ;;  %371 = vperm.xlu1 %5778, %v6291_v18   ;;  %429 = vperm.xlu2 %5779, %v6264_v13   ;;  %v6523_v1 = vpop.permute.xlu2 %287 }
 0x107   :  { %v6525_v37 = vpop.permute.xlu1 %291 }
 0x108   :  { %v338_v32 = vadd.f32 %v334_v47, %v284_v5  ;;  %v361_v5 = vsel %vm357_vm5, %v6459_v56, %v356_v62 }
 0x109   :  { %v369_v20 = vmul.f32 %v361_v5, %v6557_v24  ;;  %v415_v5 = vsel %vm411_vm7, %v6499_v33, %v6506_v15  ;;  %v305_v33 = vsel %vm303_vm4, %v6525_v37, %v6487_v4 }
 0x10a   :  { %v313_v4 = vmul.f32 %v305_v33, %v6518_v42 }
 0x10d   :  { %v6534_v51 = vpop.permute.xlu0 %347 }
 0x10e   :  { %5781 = vset.pattern.permute.xlu1 %v6063_v35  ;;  %449 = vrot.lane.b32.xlu2 %v6236_v12, %s6058_s24  ;;  %v6530_v27 = vpop.permute.xlu2 %345 }
 0x10f   :  { %v352_v50 = vpop.permute.xlu1 %351  ;;  %545 = vperm.xlu1 %5781, %v6188_v7   ;;  %5783 = vset.pattern.permute.xlu2 %v6062_v49 }
 0x115   :  { %v6559_v3 = vpop.permute.xlu0 %461 }
 0x116   :  { %507 = vrot.lane.b32.xlu2 %v6202_v9, %s6060_s25  ;;  %v6545_v61 = vpop.permute.xlu2 %405  ;;  %v281_v9 = vmul.f32 %v6447_v52, %v261_v43 }
 0x117   :  { %v210_v7 = vpop.permute.xlu1 %209  ;;  %451 = vrot.lane.b32.xlu1 %v6231_v11, %s6058_s24 }
 0x118   :  { %v224_v17 = vmul.f32 %v210_v7, %v204_v63  ;;  %5782 = vset.pattern.permute.xlu1 %v6061_v31  ;;  %v285_v19 = vadd.f32 %v281_v9, %v6384_v59 }
 0x11a   :  { %v228_v44 = vadd.f32 %v224_v17, %v174_v0  ;;  %v339_v22 = vadd.f32 %v335_v6, %v285_v19 }
 0x11d   :  { %v6571_v56 = vpop.permute.xlu0 %321 }
 0x11e   :  { %483 = vperm.xlu2 %5783, %v6264_v13   ;;  %v264_v31 = vpop.permute.xlu2 %263 }
 0x11f   :  { %v278_v52 = vmul.f32 %v264_v31, %v258_v58  ;;  %425 = vperm.xlu1 %5782, %v6291_v18   ;;  %v6606_v58 = vperm.slane %v6348_v39, 7 }
 0x120   :  { %v384_v21 = vpop.permute.xlu1 %383 }
 0x121   :  { %v282_v23 = vadd.f32 %v278_v52, %v228_v44  ;;  %v389_v38 = vmul.f32 %v384_v21, %v369_v20  ;;  %v6598_v44 = vperm.slane %v6348_v39, 6 }
 0x123   :  { %v6569_v54 = vadd.f32 %v389_v38, %v339_v22  ;;  %v423_v52 = vmul.f32 %v415_v5, %v6598_v44 }
 0x125   :  { %v342_v0 = vpop.permute.xlu0 %341 }
 0x126   :  { %505 = vrot.lane.b32.xlu2 %v6231_v11, %s6060_s25 }
 0x127   :  { %503 = vrot.lane.b32.xlu1 %v6236_v12, %s6060_s25  ;;  %v438_v59 = vpop.permute.xlu2 %437  ;;  %5786 = vset.pattern.permute.xlu2 %v6063_v35  ;;  %v360_v12 = vsel %vm357_vm5, %v6490_v25, %v352_v50  ;;  %v8999_v25 = vmov 1.0  }
 0x128   :  { %v290_v55 = vpop.permute.xlu1 %289  ;;  %5785 = vset.pattern.permute.xlu1 %v6062_v49  ;;  %v368_v30 = vmul.f32 %v360_v12, %v6557_v24  ;;  %5482 = vmatpush.msk.msra.mxu0 %vm605_vm6, %v8999_v25  ;;  %v443_v39 = vmul.f32 %v438_v59, %v423_v52 }
 0x129   :  { %v304_v63 = vsel %vm303_vm4, %v6523_v1, %v290_v55  ;;  %vm1110_vm4 = vcmask 523264  }
 0x12a   :  { %v312_v17 = vmul.f32 %v304_v63, %v6518_v42 }
 0x12d   :  { %v402_v11 = vpop.permute.xlu0 %401 }
 0x12e   :  { %537 = vperm.xlu2 %5786, %v6264_v13  }
 0x12f   :  { %479 = vperm.xlu1 %5785, %v6291_v18   ;;  %v6581_v40 = vpop.permute.xlu2 %399 }
 0x130   :  { %v404_v41 = vpop.permute.xlu1 %403 }
 0x131   :  { %v414_v1 = vsel %vm411_vm7, %v404_v41, %v6545_v61 }
 0x132   :  { %v422_v15 = vmul.f32 %v414_v1, %v6598_v44 }
 0x135   :  { %v516_v49 = vpop.permute.xlu0 %515 }
 0x137   :  { %v460_v62 = vpop.permute.xlu2 %459 }
 0x138   :  { %v464_v26 = vpop.permute.xlu1 %463 }
 0x139   :  { %v469_v31 = vsel %vm465_vm8, %v6559_v3, %v464_v26  ;;  %v359_v3 = vsel %vm357_vm5, %v6530_v27, %v6534_v51  ;;  %v413_v26 = vsel %vm411_vm7, %v6581_v40, %v402_v11  ;;  %v447_v27 = vadd.f32 %v443_v39, %v6569_v54 }
 0x13a   :  { %v477_v61 = vmul.f32 %v469_v31, %v6606_v58  ;;  %v367_v51 = vmul.f32 %v359_v3, %v6557_v24 }
 0x13d   :  { %v376_v57 = vpop.permute.xlu0 %375 }
 0x13f   :  { %v318_v35 = vpop.permute.xlu2 %317 }
 0x140   :  { %v380_v10 = vpop.permute.xlu1 %379  ;;  %v332_v48 = vmul.f32 %v318_v35, %v312_v17 }
 0x141   :  { %v388_v14 = vmul.f32 %v380_v10, %v368_v30  ;;  %v333_v30 = vmul.f32 %v6571_v56, %v313_v4 }
 0x142   :  { %v336_v21 = vadd.f32 %v332_v48, %v282_v23  ;;  %v5787_v23 = vld [vmem:[%s8986_s1 + $0x8] ss:$0 sm:$0xff] }
 0x143   :  { %v392_v46 = vadd.f32 %v388_v14, %v338_v32 }
 0x145   :  { %v454_v34 = vpop.permute.xlu0 %453 }
 0x148   :  { %v344_v13 = vpop.permute.xlu1 %343  ;;  %v492_v16 = vpop.permute.xlu2 %491 }
 0x149   :  { %v358_v43 = vsel %vm357_vm5, %v342_v0, %v344_v13  ;;  %v497_v37 = vmul.f32 %v492_v16, %v477_v61  ;;  %v387_v16 = vmul.f32 %v376_v57, %v367_v51 }
 0x14a   :  { %v366_v6 = vmul.f32 %v358_v43, %v6557_v24  ;;  %v337_v24 = vadd.f32 %v333_v30, %v6515_v36 }
 0x14b   :  { %v501_v40 = vadd.f32 %v497_v37, %v447_v27 }
 0x14d   :  { %v514_v53 = vpop.permute.xlu0 %513 }
 0x150   :  { %v458_v18 = vpop.permute.xlu1 %457  ;;  %v6586_v28 = vpop.permute.xlu2 %397 }
 0x151   :  { %v468_v41 = vsel %vm465_vm8, %v458_v18, %v460_v62 }
 0x152   :  { %v476_v10 = vmul.f32 %v468_v41, %v6606_v58 }
 0x155   :  { %v488_v32 = vpop.permute.xlu0 %487 }
 0x156   :  { %v496_v11 = vmul.f32 %v488_v32, %v476_v10  ;;  %v561_v10 = vld [vmem:[%s8988_s3 + $0x28] sm:$0xff] }
 0x158   :  { %v518_v29 = vpop.permute.xlu1 %517  ;;  %v512_v45 = vpop.permute.xlu2 %511 }
 0x159   :  { %v522_v38 = vsel %vm519_vm9, %v512_v45, %v514_v53  ;;  %v523_v59 = vsel %vm519_vm9, %v516_v49, %v518_v29  ;;  %v421_v49 = vmul.f32 %v413_v26, %v6598_v44 }
 0x15a   :  { %v530_v12 = vmul.f32 %v5787_v23, %v522_v38  ;;  %v531_v62 = vmul.f32 %v5787_v23, %v523_v59 }
 0x15d   :  { %v510_v9 = vpop.permute.xlu0 %509 }
 0x160   :  { %v434_v8 = vpop.permute.xlu1 %433  ;;  %v430_v47 = vpop.permute.xlu2 %429 }
 0x161   :  { %v442_v0 = vmul.f32 %v434_v8, %v422_v15  ;;  %v441_v45 = vmul.f32 %v430_v47, %v421_v49 }
 0x163   :  { %v446_v14 = vadd.f32 %v442_v0, %v392_v46 }
 0x165   :  { %v542_v35 = vpop.permute.xlu0 %541  ;;  %v500_v53 = vadd.f32 %v496_v11, %v446_v14  ;;  %v562_v14 = vld [vmem:[%s8988_s3 + $0x30] sm:$0xff] }
 0x166   :  { %v550_v29 = vmul.f32 %v542_v35, %v530_v12 }
 0x168   :  { %v6589_v50 = vpop.permute.xlu1 %395  ;;  %v6591_v60 = vpop.permute.xlu2 %449  ;;  %v554_v17 = vadd.f32 %v550_v29, %v500_v53 }
 0x169   :  { %v412_v36 = vsel %vm411_vm7, %v6589_v50, %v6586_v28  ;;  %v556_v28 = vld [vmem:[%s8988_s3] sm:$0xff]  ;;  %v557_v50 = vld [vmem:[%s8988_s3 + $0x8] sm:$0xff] }
 0x16a   :  { %v420_v1 = vmul.f32 %v412_v36, %v6598_v44 }
 0x170   :  { %v456_v7 = vpop.permute.xlu1 %455  ;;  %v508_v2 = vpop.permute.xlu2 %507 }
 0x171   :  { %v467_v42 = vsel %vm465_vm8, %v454_v34, %v456_v7  ;;  %v521_v56 = vsel %vm519_vm9, %v508_v2, %v510_v9  ;;  %v391_v34 = vadd.f32 %v387_v16, %v337_v24 }
 0x172   :  { %v475_v8 = vmul.f32 %v467_v42, %v6606_v58  ;;  %v529_v63 = vmul.f32 %v5787_v23, %v521_v56 }
 0x173   :  { %v445_v57 = vadd.f32 %v441_v45, %v391_v34 }
 0x178   :  { %v372_v19 = vpop.permute.xlu1 %371  ;;  %v484_v20 = vpop.permute.xlu2 %483 }
 0x179   :  { %v386_v22 = vmul.f32 %v372_v19, %v366_v6  ;;  %v495_v7 = vmul.f32 %v484_v20, %v475_v8 }
 0x17b   :  { %v390_v55 = vadd.f32 %v386_v22, %v336_v21  ;;  %v499_v5 = vadd.f32 %v495_v7, %v445_v57  ;;  %v534_v21 = vpop.permute.xlu0 %533 }
 0x180   :  { %v506_v13 = vpop.permute.xlu2 %505 }
 0x181   :  { %v546_v18 = vpop.permute.xlu1 %545 }
 0x182   :  { %v551_v54 = vmul.f32 %v546_v18, %v531_v62  ;;  %v563_v62 = vld [vmem:[%s8988_s3 + $0x38] sm:$0xff]  ;;  %v564_v18 = vld [vmem:[%s8988_s3 + $0x40] sm:$0xff] }
 0x184   :  { %v555_v46 = vadd.f32 %v551_v54, %v501_v40 }
 0x186   :  { %621 = vmatpush.msra.mxu0 %v555_v46 }
 0x188   :  { %622 = vmatpush.msra.mxu0 %v554_v17  ;;  %v538_v43 = vpop.permute.xlu2 %537 }
 0x189   :  { %v549_v32 = vmul.f32 %v538_v43, %v529_v63  ;;  %v452_v48 = vpop.permute.xlu1 %451 }
 0x18a   :  { %v466_v6 = vsel %vm465_vm8, %v6591_v60, %v452_v48  ;;  %v558_v60 = vld [vmem:[%s8988_s3 + $0x10] sm:$0xff] }
 0x18b   :  { %v553_v2 = vadd.f32 %v549_v32, %v499_v5  ;;  %v474_v20 = vmul.f32 %v466_v6, %v6606_v58  ;;  %v559_v58 = vld [vmem:[%s8988_s3 + $0x18] sm:$0xff] }
 0x18d   :  { %623 = vmatpush.msra.mxu0 %v553_v2 }
 0x191   :  { %v426_v9 = vpop.permute.xlu1 %425 }
 0x192   :  { %v440_v19 = vmul.f32 %v426_v9, %v420_v1 }
 0x194   :  { %v444_v33 = vadd.f32 %v440_v19, %v390_v55  ;;  %v560_v55 = vld [vmem:[%s8988_s3 + $0x20] sm:$0xff] }
 0x199   :  { %v504_v47 = vpop.permute.xlu1 %503 }
 0x19a   :  { %v520_v31 = vsel %vm519_vm9, %v504_v47, %v506_v13 }
 0x19b   :  { %v528_v52 = vmul.f32 %v5787_v23, %v520_v31 }
 0x19d   :  { %v548_v39 = vmul.f32 %v534_v21, %v528_v52 }
 0x1a1   :  { %v480_v22 = vpop.permute.xlu1 %479 }
 0x1a2   :  { %v494_v15 = vmul.f32 %v480_v22, %v474_v20 }
 0x1a4   :  { %v498_v61 = vadd.f32 %v494_v15, %v444_v33 }
 0x1a6   :  { %v552_v38 = vadd.f32 %v548_v39, %v498_v61 }
 0x1a8   :  { %624 = vmatpush.msra.mxu0 %v552_v38 }
 0x1a9   :  { %5483 = vmatmul.msk.f32.vlgmr.msra.gmra.mxu0 %vm568_vm10, %v556_v28 }
 0x1b1   :  { %5484 = vmatmul.msk.f32.gmra.mxu0 %vm568_vm10, %v557_v50 }
 0x1b9   :  { %5485 = vmatmul.msk.f32.gmra.mxu0 %vm568_vm10, %v558_v60 }
 0x1c1   :  { %5486 = vmatmul.msk.f32.gmra.mxu0 %vm568_vm10, %v559_v58 }
 0x1c9   :  { %5487 = vmatmul.msk.f32.gmra.mxu0 %vm568_vm10, %v560_v55 }
 0x1d1   :  { %5488 = vmatmul.msk.f32.gmra.mxu0 %vm568_vm10, %v561_v10 }
 0x1d9   :  { %5489 = vmatmul.msk.f32.gmra.mxu0 %vm568_vm10, %v562_v14 }
 0x1e1   :  { %5490 = vmatmul.msk.f32.gmra.mxu0 %vm568_vm10, %v563_v62 }
 0x1e9   :  { %5491 = vmatmul.msk.f32.gmra.mxu0 %vm568_vm10, %v564_v18 }
 0x226   :  { %v626_v44 = vpop.f32.mrf.mxu0 }
 0x227   :  { %891 = vrot.lane.b32.xlu1 %v626_v44, %s6065_s19 }
 0x22e   :  { %v6667_v23 = vpop.f32.mrf.mxu0 }
 0x236   :  { %v6669_v0 = vpop.f32.mrf.mxu0 }
 0x23e   :  { %v6671_v4 = vpop.f32.mrf.mxu0 }
 0x246   :  { %v638_v37 = vpop.f32.mrf.mxu0 }
 0x247   :  { %927 = vrot.lane.b32.xlu2 %v638_v37, %s6065_s19  ;;  %750 = vmatpush.msra.mxu1 %v638_v37 }
 0x24e   :  { %v6711_v17 = vpop.f32.mrf.mxu0 }
 0x256   :  { %v6714_v43 = vpop.f32.mrf.mxu0 }
 0x25c   :  { %678 = vxpose.xlu1.b32.start.end [1/1] (short) (narrow) %v626_v44, 64 }
 0x25e   :  { %v6718_v5 = vpop.f32.mrf.mxu0 }
 0x266   :  { %v6721_v9 = vpop.f32.mrf.mxu0 }
 0x299   :  { %v892_v3 = vpop.permute.xlu1 %891 }
 0x29a   :  { %894 = vxpose.xlu0.b32.start.end [1/1] (short) (narrow) %v892_v3, 64 }
 0x2a1   :  { %v928_v41 = vpop.permute.xlu2 %927 }
 0x2a2   :  { %969 = vmatpush.msra.mxu3 %v928_v41 }
 0x300   :  { %v694_v59 = vpop.trf.xlu1 }
 0x301   :  { %5495 = vmatmul.msk.f32.vlgmr.msra.gmra.mxu1 %vm710_vm11, %v694_v59 }
 0x308   :  { %v695_v26 = vpop.trf.xlu1 }
 0x309   :  { %5496 = vmatmul.msk.f32.gmra.mxu1 %vm710_vm11, %v695_v26 }
 0x310   :  { %v696_v12 = vpop.trf.xlu1 }
 0x311   :  { %5497 = vmatmul.msk.f32.gmra.mxu1 %vm710_vm11, %v696_v12 }
 0x318   :  { %v697_v35 = vpop.trf.xlu1 }
 0x319   :  { %5498 = vmatmul.msk.f32.gmra.mxu1 %vm710_vm11, %v697_v35 }
 0x320   :  { %v698_v13 = vpop.trf.xlu1 }
 0x321   :  { %5499 = vmatmul.msk.f32.gmra.mxu1 %vm710_vm11, %v698_v13 }
 0x328   :  { %v699_v16 = vpop.trf.xlu1 }
 0x329   :  { %5500 = vmatmul.msk.f32.gmra.mxu1 %vm710_vm11, %v699_v16 }
 0x330   :  { %v700_v11 = vpop.trf.xlu1 }
 0x331   :  { %5501 = vmatmul.msk.f32.gmra.mxu1 %vm710_vm11, %v700_v11 }
 0x338   :  { %v701_v56 = vpop.trf.xlu1 }
 0x339   :  { %5502 = vmatmul.msk.f32.gmra.mxu1 %vm710_vm11, %v701_v56 }
 0x33e   :  { %v910_v30 = vpop.trf.xlu0 }
 0x33f   :  { %5512 = vmatmul.msk.f32.vlgmr.msra.gmra.mxu3 %vm710_vm11, %v910_v30 }
 0x346   :  { %v911_v27 = vpop.trf.xlu0 }
 0x347   :  { %5513 = vmatmul.msk.f32.gmra.mxu3 %vm710_vm11, %v911_v27 }
 0x34e   :  { %v912_v51 = vpop.trf.xlu0 }
 0x34f   :  { %5514 = vmatmul.msk.f32.gmra.mxu3 %vm710_vm11, %v912_v51 }
 0x356   :  { %v913_v42 = vpop.trf.xlu0 }
 0x357   :  { %5515 = vmatmul.msk.f32.gmra.mxu3 %vm710_vm11, %v913_v42 }
 0x35e   :  { %v914_v49 = vpop.trf.xlu0 }
 0x35f   :  { %5516 = vmatmul.msk.f32.gmra.mxu3 %vm710_vm11, %v914_v49 }
 0x366   :  { %v915_v40 = vpop.trf.xlu0 }
 0x367   :  { %5517 = vmatmul.msk.f32.gmra.mxu3 %vm710_vm11, %v915_v40 }
 0x36e   :  { %v916_v29 = vpop.trf.xlu0 }
 0x36f   :  { %5518 = vmatmul.msk.f32.gmra.mxu3 %vm710_vm11, %v916_v29 }
 0x376   :  { %v917_v54 = vpop.trf.xlu0 }
 0x377   :  { %5519 = vmatmul.msk.f32.gmra.mxu3 %vm710_vm11, %v917_v54 }
 0x37e   :  { %v752_v24 = vpop.f32.mrf.mxu1 }
 0x386   :  { %v755_v45 = vpop.f32.mrf.mxu1 }
 0x38e   :  { %v758_v8 = vpop.f32.mrf.mxu1 }
 0x38f   :  { %783 = vrot.lane.b32.xlu1 %v758_v8, %s6053_s17 }
 0x396   :  { %v761_v32 = vpop.f32.mrf.mxu1 }
 0x397   :  { %843 = vrot.lane.b32.xlu1 %v6721_v9, %s6066_s15 }
 0x39e   :  { %v764_v2 = vpop.f32.mrf.mxu1 }
 0x39f   :  { %839 = vrot.lane.b32.xlu1 %v6721_v9, %s6053_s17 }
 0x3a6   :  { %v767_v36 = vpop.f32.mrf.mxu1 }
 0x3ae   :  { %v770_v47 = vpop.f32.mrf.mxu1 }
 0x3b6   :  { %v773_v1 = vpop.f32.mrf.mxu1 }
 0x3c2   :  { %v971_v46 = vpop.f32.mrf.mxu3 }
 0x3ca   :  { %v974_v53 = vpop.f32.mrf.mxu3 }
 0x3cb   :  { %997 = vrot.lane.b32.xlu2 %v974_v53, %s6048_s29 }
 0x3d2   :  { %v977_v34 = vpop.f32.mrf.mxu3 }
 0x3d3   :  { %1002 = vrot.lane.b32.xlu2 %v977_v34, %s6053_s17 }
 0x3da   :  { %v980_v63 = vpop.f32.mrf.mxu3 }
 0x3db   :  { %1007 = vrot.lane.b32.xlu2 %v980_v63, %s6058_s24 }
 0x3e2   :  { %v983_v7 = vpop.f32.mrf.mxu3 }
 0x3e3   :  { %1012 = vrot.lane.b32.xlu2 %v983_v7, %s6066_s15 }
 0x3ea   :  { %v986_v57 = vpop.f32.mrf.mxu3 }
 0x3eb   :  { %1017 = vrot.lane.b32.xlu2 %v986_v57, %s6067_s16 }
 0x3f2   :  { %v989_v48 = vpop.f32.mrf.mxu3 }
 0x3f3   :  { %1022 = vrot.lane.b32.xlu0 %v989_v48, %s6068_s30  ;;  %778 = vrot.lane.b32.xlu2 %v755_v45, %s6048_s29 }
 0x3fa   :  { %v992_v6 = vpop.f32.mrf.mxu3 }
 0x3fb   :  { %788 = vrot.lane.b32.xlu2 %v761_v32, %s6058_s24  ;;  %841 = vrot.lane.b32.xlu0 %v6721_v9, %s6058_s24 }
 0x401   :  { %v784_v58 = vpop.permute.xlu1 %783 }
 0x403   :  { %793 = vrot.lane.b32.xlu2 %v764_v2, %s6066_s15  ;;  %837 = vrot.lane.b32.xlu0 %v6721_v9, %s6048_s29 }
 0x409   :  { %v844_v49 = vpop.permute.xlu1 %843 }
 0x40b   :  { %798 = vrot.lane.b32.xlu2 %v767_v36, %s6067_s16 }
 0x411   :  { %v840_v40 = vpop.permute.xlu1 %839 }
 0x413   :  { %803 = vrot.lane.b32.xlu2 %v770_v47, %s6068_s30 }
 0x41b   :  { %808 = vrot.lane.b32.xlu2 %v773_v1, %s6069_s20  ;;  %v565_v1 = vld [vmem:[%s8988_s3 + $0x48] sm:$0xff] }
 0x41c   :  { %5492 = vmatmul.msk.f32.gmra.mxu0 %vm568_vm10, %v565_v1 }
 0x423   :  { %1027 = vrot.lane.b32.xlu2 %v992_v6, %s6069_s20  ;;  %v566_v6 = vld [vmem:[%s8988_s3 + $0x50] sm:$0xff] }
 0x424   :  { %5493 = vmatmul.msk.f32.gmra.mxu0 %vm568_vm10, %v566_v6 }
 0x425   :  { %v998_v31 = vpop.permute.xlu2 %997 }
 0x426   :  { %v1000_v38 = vadd.f32 %v998_v31, %v971_v46  ;;  %v567_v31 = vld [vmem:[%s8988_s3 + $0x58] sm:$0xff] }
 0x42b   :  { %849 = vrot.lane.b32.xlu2 %v6721_v9, %s6069_s20 }
 0x42c   :  { %5494 = vmatmul.msk.f32.gmra.mxu0 %vm568_vm10, %v567_v31 }
 0x42d   :  { %v1003_v19 = vpop.permute.xlu2 %1002 }
 0x42e   :  { %v1005_v28 = vadd.f32 %v1003_v19, %v1000_v38 }
 0x433   :  { %847 = vrot.lane.b32.xlu2 %v6721_v9, %s6068_s30 }
 0x435   :  { %v1008_v20 = vpop.permute.xlu2 %1007 }
 0x436   :  { %v1010_v60 = vadd.f32 %v1008_v20, %v1005_v28 }
 0x43b   :  { %845 = vrot.lane.b32.xlu2 %v6721_v9, %s6067_s16 }
 0x43d   :  { %v1013_v52 = vpop.permute.xlu2 %1012 }
 0x43e   :  { %v1015_v55 = vadd.f32 %v1013_v52, %v1010_v60 }
 0x445   :  { %v1018_v21 = vpop.permute.xlu2 %1017 }
 0x446   :  { %v1020_v37 = vadd.f32 %v1018_v21, %v1015_v55 }
 0x44d   :  { %v779_v22 = vpop.permute.xlu2 %778 }
 0x44e   :  { %v781_v44 = vadd.f32 %v779_v22, %v752_v24 }
 0x450   :  { %v786_v41 = vadd.f32 %v784_v58, %v781_v44 }
 0x455   :  { %v789_v33 = vpop.permute.xlu2 %788 }
 0x456   :  { %v791_v59 = vadd.f32 %v789_v33, %v786_v41 }
 0x45d   :  { %v794_v15 = vpop.permute.xlu2 %793 }
 0x45e   :  { %v796_v30 = vadd.f32 %v794_v15, %v791_v59 }
 0x465   :  { %v799_v39 = vpop.permute.xlu2 %798  ;;  %v1023_v3 = vpop.permute.xlu0 %1022 }
 0x466   :  { %v1025_v26 = vadd.f32 %v1023_v3, %v1020_v37  ;;  %v801_v51 = vadd.f32 %v799_v39, %v796_v30 }
 0x46d   :  { %v804_v61 = vpop.permute.xlu2 %803  ;;  %v842_v18 = vpop.permute.xlu0 %841 }
 0x46e   :  { %v806_v10 = vadd.f32 %v804_v61, %v801_v51 }
 0x475   :  { %v809_v50 = vpop.permute.xlu2 %808  ;;  %v838_v11 = vpop.permute.xlu0 %837 }
 0x476   :  { %v811_v14 = vadd.f32 %v809_v50, %v806_v10  ;;  %v6801_v10 = vld [vmem:[%s8989_s4 + $0x70] sm:$0xff] }
 0x478   :  { %v812_v13 = vsel %vm710_vm11, %v811_v14, -inf }
 0x47d   :  { %v1028_v12 = vpop.permute.xlu2 %1027 }
 0x47e   :  { %v1030_v27 = vadd.f32 %v1028_v12, %v1025_v26 }
 0x480   :  { %v1031_v35 = vsel %vm710_vm11, %v1030_v27, -inf }
 0x481   :  { %1032 = vmax.xlane.f32.xlu2 %v1031_v35  ;;  %v6796_v35 = vld [vmem:[%s8989_s4 + $0x78] sm:$0xff] }
 0x482   :  { %1122 = vmatpush.msrb.mxu3 %v6796_v35 }
 0x484   :  { %1123 = vmatpush.msrb.mxu3 %v6801_v10 }
 0x485   :  { %v850_v42 = vpop.permute.xlu2 %849 }
 0x486   :  { %1069 = vrot.lane.b32.xlu1 %v850_v42, %s6065_s19  ;;  %5503 = vmatpush.xpose.msk.msrb.mxu0 %vm710_vm11, %v850_v42  ;;  %v6813_v42 = vld [vmem:[%s8989_s4 + $0x60] sm:$0xff] }
 0x489   :  { %813 = vmax.xlane.f32.xlu2 %v812_v13  ;;  %v6819_v13 = vld [vmem:[%s8989_s4 + $0x58] sm:$0xff] }
 0x48d   :  { %v848_v62 = vpop.permute.xlu2 %847 }
 0x48e   :  { %1067 = vrot.lane.b32.xlu0 %v848_v62, %s6065_s19  ;;  %5504 = vmatpush.xpose.msk.msrb.mxu0 %vm710_vm11, %v848_v62  ;;  %v6826_v62 = vld [vmem:[%s8989_s4 + $0x50] sm:$0xff] }
 0x495   :  { %v846_v16 = vpop.permute.xlu2 %845 }
 0x496   :  { %1063 = vrot.lane.b32.xlu0 %v844_v49, %s6065_s19  ;;  %5505 = vmatpush.xpose.msk.msrb.mxu0 %vm710_vm11, %v846_v16 }
 0x49a   :  { %5506 = vmatpush.xpose.msk.msrb.mxu0 %vm710_vm11, %v844_v49 }
 0x49e   :  { %1061 = vrot.lane.b32.xlu0 %v842_v18, %s6065_s19  ;;  %5507 = vmatpush.xpose.msk.msrb.mxu0 %vm710_vm11, %v842_v18 }
 0x4a1   :  { %1065 = vrot.lane.b32.xlu2 %v846_v16, %s6065_s19 }
 0x4a2   :  { %5508 = vmatpush.xpose.msk.msrb.mxu0 %vm710_vm11, %v840_v40 }
 0x4a6   :  { %1059 = vrot.lane.b32.xlu0 %v840_v40, %s6065_s19  ;;  %5509 = vmatpush.xpose.msk.msrb.mxu0 %vm710_vm11, %v838_v11  ;;  %v6836_v40 = vld [vmem:[%s8989_s4 + $0x48] sm:$0xff] }
 0x4a9   :  { %1057 = vrot.lane.b32.xlu2 %v838_v11, %s6065_s19  ;;  %v6841_v11 = vld [vmem:[%s8989_s4 + $0x40] sm:$0xff] }
 0x4aa   :  { %5510 = vmatpush.xpose.msk.msrb.mxu0 %vm710_vm11, %v6721_v9 }
 0x4b1   :  { %1055 = vrot.lane.b32.xlu2 %v6721_v9, %s6065_s19 }
 0x4b9   :  { %1369 = vrot.lane.b32.xlu2 %v6667_v23, %s6065_s19 }
 0x4df   :  { %1157 = vxpose.xlu2.b32.start.end [1/1] (short) (narrow) %v6667_v23, 64 }
 0x4f4   :  { %v1033_v29 = vpop.xlane.xlu2 %1032 }
 0x4f5   :  { %v1034_v56 = vsub.f32 %v1030_v27, %v1033_v29  ;;  %v6848_v29 = vld [vmem:[%s8989_s4 + $0x38] sm:$0xff] }
 0x4f7   :  { %v1035_v54 = vmul.f32 1.442695, %v1034_v56  ;;  %v6853_v56 = vld [vmem:[%s8989_s4 + $0x30] sm:$0xff] }
 0x4f8   :  { %v1070_v24 = vpop.permute.xlu1 %1069 }
 0x4f9   :  { %5794 = vpow2.f32 %v1035_v54  ;;  %5520 = vmatpush.xpose.msk.msra.mxu2 %vm710_vm11, %v1070_v24  ;;  %v6859_v54 = vld [vmem:[%s8989_s4 + $0x28] sm:$0xff]  ;;  %v6865_v24 = vld [vmem:[%s8989_s4 + $0x20] sm:$0xff] }
 0x4fc   :  { %v814_v45 = vpop.xlane.xlu2 %813 }
 0x4fd   :  { %v815_v8 = vsub.f32 %v811_v14, %v814_v45  ;;  %v6807_v14 = vld [vmem:[%s8989_s4 + $0x68] sm:$0xff]  ;;  %v6872_v45 = vld [vmem:[%s8989_s4 + $0x18] sm:$0xff] }
 0x4fe   :  { %1124 = vmatpush.msrb.mxu3 %v6807_v14 }
 0x4ff   :  { %v5795_v46 = vpop.eup %5794  ;;  %v816_v53 = vmul.f32 1.442695, %v815_v8  ;;  %v6877_v8 = vld [vmem:[%s8989_s4 + $0x10] sm:$0xff] }
 0x500   :  { %v1068_v34 = vpop.permute.xlu0 %1067  ;;  %v1037_v63 = vsel %vm710_vm11, %v5795_v46, 0.0  ;;  %1125 = vmatpush.msrb.mxu3 %v6813_v42 }
 0x501   :  { %5796 = vpow2.f32 %v816_v53  ;;  %5521 = vmatpush.xpose.msk.msra.mxu2 %vm710_vm11, %v1068_v34  ;;  %1038 = vadd.xlane.f32.xlu1 %v1037_v63  ;;  %v6890_v53 = vld [vmem:[%s8989_s4] sm:$0xff]  ;;  %v6893_v34 = vpop.f32.mrf.mxu0 }
 0x502   :  { %1126 = vmatpush.msrb.mxu3 %v6819_v13 }
 0x504   :  { %v1066_v7 = vpop.permute.xlu2 %1065  ;;  %1127 = vmatpush.msrb.mxu3 %v6826_v62 }
 0x505   :  { %5522 = vmatpush.xpose.msk.msra.mxu2 %vm710_vm11, %v1066_v7 }
 0x506   :  { %1128 = vmatpush.msrb.mxu3 %v6836_v40 }
 0x507   :  { %v5797_v23 = vpop.eup %5796 }
 0x508   :  { %v1064_v57 = vpop.permute.xlu0 %1063  ;;  %v818_v32 = vsel %vm710_vm11, %v5797_v23, 0.0  ;;  %1129 = vmatpush.msrb.mxu3 %v6841_v11 }
 0x509   :  { %819 = vadd.xlane.f32.xlu0 %v818_v32  ;;  %5523 = vmatpush.xpose.msk.msra.mxu2 %vm710_vm11, %v1064_v57  ;;  %v6895_v63 = vpop.f32.mrf.mxu0 }
 0x50a   :  { %1145 = vmatpush.msra.mxu3 %v6848_v29 }
 0x50c   :  { %v1058_v2 = vpop.permute.xlu2 %1057  ;;  %1146 = vmatpush.msra.mxu3 %v6853_v56 }
 0x50e   :  { %1147 = vmatpush.msra.mxu3 %v6859_v54 }
 0x510   :  { %v1062_v48 = vpop.permute.xlu0 %1061  ;;  %1148 = vmatpush.msra.mxu3 %v6865_v24 }
 0x511   :  { %5524 = vmatpush.xpose.msk.msra.mxu2 %vm710_vm11, %v1062_v48  ;;  %v6897_v7 = vpop.f32.mrf.mxu0 }
 0x512   :  { %1149 = vmatpush.msra.mxu3 %v6872_v45 }
 0x514   :  { %v1056_v36 = vpop.permute.xlu2 %1055  ;;  %1150 = vmatpush.msra.mxu3 %v6877_v8 }
 0x518   :  { %v1060_v9 = vpop.permute.xlu0 %1059 }
 0x519   :  { %5525 = vmatpush.xpose.msk.msra.mxu2 %vm710_vm11, %v1060_v9 }
 0x51a   :  { %1405 = vrot.lane.b32.xlu1 %v6711_v17, %s6065_s19 }
 0x51c   :  { %v1370_v47 = vpop.permute.xlu2 %1369 }
 0x51d   :  { %5526 = vmatpush.xpose.msk.msra.mxu2 %vm710_vm11, %v1058_v2 }
 0x521   :  { %5527 = vmatpush.xpose.msk.msra.mxu2 %vm710_vm11, %v1056_v36 }
 0x525   :  { %1228 = vmatpush.msrb.mxu2 %v6711_v17 }
 0x532   :  { %1372 = vxpose.xlu0.b32.start.end [1/1] (short) (narrow) %v1370_v47, 64 }
 0x574   :  { %v1039_v17 = vpop.xlane.xlu1 %1038 }
 0x575   :  { %5798 = vrcp.f32 %v1039_v17  ;;  %v1051_v22 = vand.u32 2147483648, %v1039_v17  ;;  %v1049_v15 = vand.u32 2147483647, %v1039_v17  ;;  %vm1045_vm13 = vweird.f32 %v1039_v17 }
 0x577   :  { %v1052_v38 = vor.u32 1.1754944e-38, %v1051_v22  ;;  %vm1050_vm15 = vcmp.eq.f32.partialorder %v1049_v15, 8.507059e+37 }
 0x578   :  { %v1173_v44 = vpop.trf.xlu2 }
 0x57b   :  { %v5799_v19 = vpop.eup %5798 }
 0x57c   :  { %v1041_v20 = vmul.f32 %v5799_v19, %v1039_v17  ;;  %v820_v52 = vpop.xlane.xlu0 %819  ;;  %vm1046_vm12 = vweird.f32 %v5799_v19 }
 0x57d   :  { %5800 = vrcp.f32 %v820_v52  ;;  %vm1047_vm14 = vmor %vm1045_vm13, %vm1046_vm12  ;;  %v832_v3 = vand.u32 2147483648, %v820_v52  ;;  %v830_v41 = vand.u32 2147483647, %v820_v52  ;;  %vm826_vm1 = vweird.f32 %v820_v52 }
 0x57e   :  { %v1042_v21 = vsub.f32 1.0, %v1041_v20 }
 0x57f   :  { %v833_v26 = vor.u32 1.1754944e-38, %v832_v3  ;;  %vm831_vm3 = vcmp.eq.f32.partialorder %v830_v41, 8.507059e+37 }
 0x580   :  { %v1043_v33 = vmul.f32 %v5799_v19, %v1042_v21  ;;  %v1174_v51 = vpop.trf.xlu2 }
 0x582   :  { %v1044_v39 = vadd.f32 %v5799_v19, %v1043_v33 }
 0x583   :  { %v5801_v61 = vpop.eup %5800 }
 0x584   :  { %v822_v28 = vmul.f32 %v5801_v61, %v820_v52  ;;  %v1048_v50 = vsel %vm1047_vm14, %v5799_v19, %v1044_v39  ;;  %vm827_vm0 = vweird.f32 %v5801_v61 }
 0x585   :  { %v1053_v60 = vsel %vm1050_vm15, %v1052_v38, %v1048_v50  ;;  %vm828_vm2 = vmor %vm826_vm1, %vm827_vm0 }
 0x586   :  { %v823_v58 = vsub.f32 1.0, %v822_v28  ;;  %v1054_v55 = vmul.f32 %v5795_v46, %v1053_v60  ;;  %v6883_v46 = vld [vmem:[%s8989_s4 + $0x8] sm:$0xff] }
 0x587   :  { %1151 = vmatpush.msra.mxu3 %v6883_v46 }
 0x588   :  { %v824_v37 = vmul.f32 %v5801_v61, %v823_v58  ;;  %5528 = vmatmul.msk.f32.vlgmr.msra.gmra.mxu2 %vm710_vm11, %v1054_v55  ;;  %v1175_v49 = vpop.trf.xlu2 }
 0x589   :  { %1152 = vmatpush.msra.mxu3 %v6890_v53 }
 0x58a   :  { %v825_v59 = vadd.f32 %v5801_v61, %v824_v37 }
 0x58c   :  { %v829_v12 = vsel %vm828_vm2, %v5801_v61, %v825_v59  ;;  %v1406_v57 = vpop.permute.xlu1 %1405 }
 0x58d   :  { %v834_v30 = vsel %vm831_vm3, %v833_v26, %v829_v12 }
 0x58e   :  { %v835_v27 = vmul.f32 %v5797_v23, %v834_v30 }
 0x590   :  { %5511 = vmatmul.msk.f32.vlgmr.msrb.gmra.mxu0 %vm710_vm11, %v835_v27  ;;  %5531 = vmatmul.msk.f32.vlgmr.msrb.gmra.mxu2 %vm710_vm11, %v1173_v44  ;;  %v1176_v16 = vpop.trf.xlu2 }
 0x598   :  { %5532 = vmatmul.msk.f32.gmra.mxu2 %vm710_vm11, %v1174_v51  ;;  %v1177_v18 = vpop.trf.xlu2 }
 0x5a0   :  { %5533 = vmatmul.msk.f32.gmra.mxu2 %vm710_vm11, %v1175_v49  ;;  %v1178_v9 = vpop.trf.xlu2 }
 0x5a8   :  { %5534 = vmatmul.msk.f32.gmra.mxu2 %vm710_vm11, %v1176_v16  ;;  %v1179_v1 = vpop.trf.xlu2 }
 0x5b0   :  { %5535 = vmatmul.msk.f32.gmra.mxu2 %vm710_vm11, %v1177_v18  ;;  %v1180_v31 = vpop.trf.xlu2 }
 0x5b8   :  { %5536 = vmatmul.msk.f32.gmra.mxu2 %vm710_vm11, %v1178_v9 }
 0x5c0   :  { %5537 = vmatmul.msk.f32.gmra.mxu2 %vm710_vm11, %v1179_v1 }
 0x5c8   :  { %5538 = vmatmul.msk.f32.gmra.mxu2 %vm710_vm11, %v1180_v31 }
 0x5d6   :  { %v1388_v32 = vpop.trf.xlu0 }
 0x5de   :  { %v1389_v47 = vpop.trf.xlu0 }
 0x5e6   :  { %v1390_v17 = vpop.trf.xlu0 }
 0x5ee   :  { %v1391_v20 = vpop.trf.xlu0 }
 0x5f6   :  { %v1392_v21 = vpop.trf.xlu0 }
 0x5fe   :  { %v1393_v28 = vpop.trf.xlu0 }
 0x606   :  { %v1394_v44 = vpop.trf.xlu0 }
 0x60b   :  { %v1107_v23 = vpop.f32.mrf.mxu2 }
 0x60c   :  { %5529 = vmatmul.msk.f32.vlgmr.msrb.gmra.mxu3 %vm1110_vm4, %v1107_v23 }
 0x60d   :  { %1447 = vmatpush.msrb.mxu3 %v1406_v57  ;;  %v887_v48 = vpop.f32.mrf.mxu0 }
 0x60e   :  { %v1395_v55 = vpop.trf.xlu0 }
 0x613   :  { %v1230_v2 = vpop.f32.mrf.mxu2 }
 0x614   :  { %5530 = vmatmul.msk.f32.vlgmr.msra.gmra.mxu3 %vm1110_vm4, %v887_v48 }
 0x61b   :  { %v1233_v36 = vpop.f32.mrf.mxu2 }
 0x61c   :  { %1256 = vrot.lane.b32.xlu1 %v1233_v36, %s6048_s29  ;;  %5548 = vmatmul.msk.f32.vlgmr.msrb.gmra.mxu3 %vm710_vm11, %v1388_v32 }
 0x623   :  { %v1236_v6 = vpop.f32.mrf.mxu2 }
 0x624   :  { %1261 = vrot.lane.b32.xlu2 %v1236_v6, %s6053_s17  ;;  %5549 = vmatmul.msk.f32.gmra.mxu3 %vm710_vm11, %v1389_v47 }
 0x62b   :  { %v1239_v19 = vpop.f32.mrf.mxu2 }
 0x62c   :  { %1266 = vrot.lane.b32.xlu1 %v1239_v19, %s6058_s24  ;;  %1323 = vrot.lane.b32.xlu2 %v6893_v34, %s6067_s16 }
 0x62d   :  { %5550 = vmatmul.msk.f32.gmra.mxu3 %vm710_vm11, %v1390_v17 }
 0x633   :  { %v1242_v52 = vpop.f32.mrf.mxu2 }
 0x634   :  { %1271 = vrot.lane.b32.xlu1 %v1242_v52, %s6066_s15  ;;  %1319 = vrot.lane.b32.xlu2 %v6893_v34, %s6058_s24 }
 0x635   :  { %5551 = vmatmul.msk.f32.gmra.mxu3 %vm710_vm11, %v1391_v20 }
 0x63b   :  { %v1245_v50 = vpop.f32.mrf.mxu2 }
 0x63c   :  { %1315 = vrot.lane.b32.xlu2 %v6893_v34, %s6048_s29 }
 0x63d   :  { %5552 = vmatmul.msk.f32.gmra.mxu3 %vm710_vm11, %v1392_v21 }
 0x643   :  { %v1248_v58 = vpop.f32.mrf.mxu2 }
 0x645   :  { %5553 = vmatmul.msk.f32.gmra.mxu3 %vm710_vm11, %v1393_v28 }
 0x64b   :  { %v1251_v3 = vpop.f32.mrf.mxu2 }
 0x64d   :  { %5554 = vmatmul.msk.f32.gmra.mxu3 %vm710_vm11, %v1394_v44 }
 0x655   :  { %5555 = vmatmul.msk.f32.gmra.mxu3 %vm710_vm11, %v1395_v55 }
 0x67e   :  { %v1262_v49 = vpop.permute.xlu2 %1261 }
 0x686   :  { %v1324_v6 = vpop.permute.xlu2 %1323 }
 0x68e   :  { %v1257_v37 = vpop.permute.xlu1 %1256  ;;  %v1320_v19 = vpop.permute.xlu2 %1319 }
 0x68f   :  { %v6919_v22 = vpop.f32.mrf.mxu3  ;;  %v1259_v51 = vadd.f32 %v1257_v37, %v1230_v2 }
 0x691   :  { %v1264_v16 = vadd.f32 %v1262_v49, %v1259_v51 }
 0x696   :  { %v1316_v21 = vpop.permute.xlu2 %1315 }
 0x697   :  { %v6921_v33 = vpop.f32.mrf.mxu3 }
 0x69e   :  { %v1267_v41 = vpop.permute.xlu1 %1266 }
 0x69f   :  { %v6923_v15 = vpop.f32.mrf.mxu3  ;;  %v1269_v23 = vadd.f32 %v1267_v41, %v1264_v16 }
 0x6a6   :  { %v1272_v59 = vpop.permute.xlu1 %1271 }
 0x6a7   :  { %v1452_v39 = vpop.f32.mrf.mxu3  ;;  %v1274_v57 = vadd.f32 %v1272_v59, %v1269_v23 }
 0x6a8   :  { %1475 = vrot.lane.b32.xlu1 %v1452_v39, %s6048_s29 }
 0x6b0   :  { %v1455_v61 = vpop.f32.mrf.mxu3 }
 0x6b1   :  { %1480 = vrot.lane.b32.xlu1 %v1455_v61, %s6053_s17 }
 0x6b8   :  { %v1458_v38 = vpop.f32.mrf.mxu3 }
 0x6b9   :  { %1485 = vrot.lane.b32.xlu1 %v1458_v38, %s6058_s24 }
 0x6c0   :  { %v1461_v60 = vpop.f32.mrf.mxu3 }
 0x6c1   :  { %1276 = vrot.lane.b32.xlu1 %v1245_v50, %s6067_s16  ;;  %1490 = vrot.lane.b32.xlu0 %v1461_v60, %s6066_s15 }
 0x6c8   :  { %v1464_v2 = vpop.f32.mrf.mxu3 }
 0x6c9   :  { %1281 = vrot.lane.b32.xlu1 %v1248_v58, %s6068_s30 }
 0x6d0   :  { %v1467_v52 = vpop.f32.mrf.mxu3 }
 0x6d1   :  { %1286 = vrot.lane.b32.xlu1 %v1251_v3, %s6069_s20 }
 0x6d8   :  { %v1470_v39 = vpop.f32.mrf.mxu3 }
 0x6d9   :  { %1327 = vrot.lane.b32.xlu1 %v6893_v34, %s6069_s20 }
 0x6e1   :  { %1325 = vrot.lane.b32.xlu1 %v6893_v34, %s6068_s30 }
 0x6e9   :  { %1321 = vrot.lane.b32.xlu1 %v6893_v34, %s6066_s15 }
 0x6f1   :  { %1317 = vrot.lane.b32.xlu1 %v6893_v34, %s6053_s17 }
 0x71a   :  { %v1476_v26 = vpop.permute.xlu1 %1475 }
 0x71b   :  { %v1478_v58 = vadd.f32 %v1476_v26, %v6923_v15 }
 0x723   :  { %v1481_v12 = vpop.permute.xlu1 %1480 }
 0x724   :  { %v1483_v55 = vadd.f32 %v1481_v12, %v1478_v58 }
 0x72b   :  { %v1486_v30 = vpop.permute.xlu1 %1485 }
 0x72c   :  { %v1488_v41 = vadd.f32 %v1486_v30, %v1483_v55 }
 0x733   :  { %v1277_v27 = vpop.permute.xlu1 %1276  ;;  %v1491_v3 = vpop.permute.xlu0 %1490 }
 0x734   :  { %v1279_v32 = vadd.f32 %v1277_v27, %v1274_v57  ;;  %v1493_v59 = vadd.f32 %v1491_v3, %v1488_v41 }
 0x73b   :  { %v1282_v18 = vpop.permute.xlu1 %1281 }
 0x73c   :  { %v1284_v48 = vadd.f32 %v1282_v18, %v1279_v32 }
 0x743   :  { %v1287_v9 = vpop.permute.xlu1 %1286 }
 0x744   :  { %v1289_v36 = vadd.f32 %v1287_v9, %v1284_v48 }
 0x746   :  { %v1290_v47 = vsel %vm710_vm11, %v1289_v36, -inf }
 0x747   :  { %1291 = vmax.xlane.f32.xlu1 %v1290_v47 }
 0x74b   :  { %v1328_v1 = vpop.permute.xlu1 %1327 }
 0x74c   :  { %5539 = vmatpush.xpose.msk.msrb.mxu1 %vm710_vm11, %v1328_v1 }
 0x753   :  { %v1326_v31 = vpop.permute.xlu1 %1325 }
 0x754   :  { %5540 = vmatpush.xpose.msk.msrb.mxu1 %vm710_vm11, %v1326_v31  ;;  %1545 = vrot.lane.b32.xlu2 %v1326_v31, %s6065_s19 }
 0x758   :  { %5541 = vmatpush.xpose.msk.msrb.mxu1 %vm710_vm11, %v1324_v6 }
 0x75b   :  { %v1322_v17 = vpop.permute.xlu1 %1321 }
 0x75c   :  { %5542 = vmatpush.xpose.msk.msrb.mxu1 %vm710_vm11, %v1322_v17 }
 0x760   :  { %5543 = vmatpush.xpose.msk.msrb.mxu1 %vm710_vm11, %v1320_v19  ;;  %1495 = vrot.lane.b32.xlu1 %v1464_v2, %s6067_s16 }
 0x763   :  { %v1318_v20 = vpop.permute.xlu1 %1317 }
 0x764   :  { %5544 = vmatpush.xpose.msk.msrb.mxu1 %vm710_vm11, %v1318_v20 }
 0x768   :  { %5545 = vmatpush.xpose.msk.msrb.mxu1 %vm710_vm11, %v1316_v21  ;;  %1500 = vrot.lane.b32.xlu1 %v1467_v52, %s6068_s30 }
 0x76c   :  { %5546 = vmatpush.xpose.msk.msrb.mxu1 %vm710_vm11, %v6893_v34 }
 0x770   :  { %1599 = vmatpush.msra.mxu1 %v6796_v35  ;;  %1505 = vrot.lane.b32.xlu1 %v1470_v39, %s6069_s20 }
 0x772   :  { %1600 = vmatpush.msra.mxu1 %v6801_v10 }
 0x774   :  { %1601 = vmatpush.msra.mxu1 %v6807_v14 }
 0x776   :  { %1602 = vmatpush.msra.mxu1 %v6813_v42 }
 0x778   :  { %1603 = vmatpush.msra.mxu1 %v6819_v13  ;;  %1547 = vrot.lane.b32.xlu1 %v1328_v1, %s6065_s19 }
 0x77a   :  { %1604 = vmatpush.msra.mxu1 %v6826_v62 }
 0x77c   :  { %1605 = vmatpush.msra.mxu1 %v6836_v40 }
 0x77e   :  { %1606 = vmatpush.msra.mxu1 %v6841_v11 }
 0x780   :  { %1543 = vrot.lane.b32.xlu1 %v1324_v6, %s6065_s19 }
 0x7ae   :  { %v1546_v57 = vpop.permute.xlu2 %1545 }
 0x7ba   :  { %v1292_v61 = vpop.xlane.xlu1 %1291 }
 0x7bb   :  { %v1293_v38 = vsub.f32 %v1289_v36, %v1292_v61 }
 0x7bd   :  { %v1294_v28 = vmul.f32 1.442695, %v1293_v38 }
 0x7bf   :  { %5802 = vpow2.f32 %v1294_v28 }
 0x7c5   :  { %v5803_v50 = vpop.eup %5802 }
 0x7c6   :  { %v1296_v60 = vsel %vm710_vm11, %v5803_v50, 0.0 }
 0x7c7   :  { %1297 = vadd.xlane.f32.xlu0 %v1296_v60 }
 0x7d2   :  { %v1496_v44 = vpop.permute.xlu1 %1495 }
 0x7d3   :  { %v1498_v27 = vadd.f32 %v1496_v44, %v1493_v59 }
 0x7da   :  { %v1501_v37 = vpop.permute.xlu1 %1500 }
 0x7db   :  { %1882 = vrot.lane.b32.xlu0 %v6714_v43, %s6065_s19  ;;  %v1503_v51 = vadd.f32 %v1501_v37, %v1498_v27 }
 0x7e2   :  { %v1506_v49 = vpop.permute.xlu1 %1505 }
 0x7e3   :  { %v1508_v16 = vadd.f32 %v1506_v49, %v1503_v51 }
 0x7e5   :  { %v1509_v18 = vsel %vm710_vm11, %v1508_v16, -inf }
 0x7e6   :  { %1510 = vmax.xlane.f32.xlu1 %v1509_v18 }
 0x7ea   :  { %v1548_v23 = vpop.permute.xlu1 %1547 }
 0x7eb   :  { %5556 = vmatpush.xpose.msk.msra.mxu0 %vm710_vm11, %v1548_v23 }
 0x7ef   :  { %5557 = vmatpush.xpose.msk.msra.mxu0 %vm710_vm11, %v1546_v57 }
 0x7f2   :  { %v1544_v15 = vpop.permute.xlu1 %1543 }
 0x7f3   :  { %5558 = vmatpush.xpose.msk.msra.mxu0 %vm710_vm11, %v1544_v15 }
 0x7ff   :  { %1541 = vrot.lane.b32.xlu1 %v1322_v17, %s6065_s19 }
 0x807   :  { %1539 = vrot.lane.b32.xlu1 %v1320_v19, %s6065_s19 }
 0x80f   :  { %1537 = vrot.lane.b32.xlu1 %v1318_v20, %s6065_s19 }
 0x817   :  { %1535 = vrot.lane.b32.xlu1 %v1316_v21, %s6065_s19 }
 0x81f   :  { %1533 = vrot.lane.b32.xlu1 %v6893_v34, %s6065_s19 }
 0x83a   :  { %v1298_v26 = vpop.xlane.xlu0 %1297 }
 0x83b   :  { %5804 = vrcp.f32 %v1298_v26  ;;  %v1310_v48 = vand.u32 2147483648, %v1298_v26  ;;  %v1308_v36 = vand.u32 2147483647, %v1298_v26  ;;  %vm1304_vm6 = vweird.f32 %v1298_v26 }
 0x83d   :  { %v1311_v1 = vor.u32 1.1754944e-38, %v1310_v48  ;;  %vm1309_vm8 = vcmp.eq.f32.partialorder %v1308_v36, 8.507059e+37 }
 0x841   :  { %v5805_v12 = vpop.eup %5804 }
 0x842   :  { %v1300_v30 = vmul.f32 %v5805_v12, %v1298_v26  ;;  %vm1305_vm5 = vweird.f32 %v5805_v12 }
 0x843   :  { %vm1306_vm7 = vmor %vm1304_vm6, %vm1305_vm5 }
 0x844   :  { %v1301_v32 = vsub.f32 1.0, %v1300_v30 }
 0x846   :  { %v1302_v9 = vmul.f32 %v5805_v12, %v1301_v32 }
 0x848   :  { %v1303_v47 = vadd.f32 %v5805_v12, %v1302_v9 }
 0x84a   :  { %v1307_v6 = vsel %vm1306_vm7, %v5805_v12, %v1303_v47  ;;  %vm2630_vm7 = vcmask 261120  }
 0x84b   :  { %v1312_v31 = vsel %vm1309_vm8, %v1311_v1, %v1307_v6 }
 0x84c   :  { %v1313_v2 = vmul.f32 %v5803_v50, %v1312_v31 }
 0x84d   :  { %v1883_v49 = vpop.permute.xlu0 %1882 }
 0x84e   :  { %5547 = vmatmul.msk.f32.vlgmr.msrb.gmra.mxu1 %vm710_vm11, %v1313_v2 }
 0x84f   :  { %1705 = vmatpush.msrb.mxu1 %v6714_v43 }
 0x854   :  { %1634 = vxpose.xlu1.b32.start.end [1/1] (short) (narrow) %v6669_v0, 64 }
 0x859   :  { %v1511_v34 = vpop.xlane.xlu1 %1510 }
 0x85a   :  { %v1512_v17 = vsub.f32 %v1508_v16, %v1511_v34 }
 0x85c   :  { %v1513_v19 = vmul.f32 1.442695, %v1512_v17 }
 0x85e   :  { %5806 = vpow2.f32 %v1513_v19 }
 0x864   :  { %v5807_v20 = vpop.eup %5806 }
 0x865   :  { %v1515_v52 = vsel %vm710_vm11, %v5807_v20, 0.0 }
 0x866   :  { %1516 = vadd.xlane.f32.xlu2 %v1515_v52 }
 0x871   :  { %v1542_v21 = vpop.permute.xlu1 %1541 }
 0x872   :  { %5559 = vmatpush.xpose.msk.msra.mxu0 %vm710_vm11, %v1542_v21 }
 0x879   :  { %v1540_v39 = vpop.permute.xlu1 %1539 }
 0x87a   :  { %5560 = vmatpush.xpose.msk.msra.mxu0 %vm710_vm11, %v1540_v39 }
 0x87e   :  { %1846 = vrot.lane.b32.xlu2 %v6669_v0, %s6065_s19 }
 0x881   :  { %v1538_v43 = vpop.permute.xlu1 %1537 }
 0x882   :  { %5561 = vmatpush.xpose.msk.msra.mxu0 %vm710_vm11, %v1538_v43 }
 0x889   :  { %v1536_v61 = vpop.permute.xlu1 %1535 }
 0x88a   :  { %5562 = vmatpush.xpose.msk.msra.mxu0 %vm710_vm11, %v1536_v61 }
 0x891   :  { %v1534_v38 = vpop.permute.xlu1 %1533 }
 0x892   :  { %5563 = vmatpush.xpose.msk.msra.mxu0 %vm710_vm11, %v1534_v38 }
 0x896   :  { %1622 = vmatpush.msrb.mxu0 %v6848_v29 }
 0x898   :  { %1623 = vmatpush.msrb.mxu0 %v6853_v56 }
 0x89a   :  { %1624 = vmatpush.msrb.mxu0 %v6859_v54 }
 0x89c   :  { %1625 = vmatpush.msrb.mxu0 %v6865_v24 }
 0x89e   :  { %1626 = vmatpush.msrb.mxu0 %v6872_v45 }
 0x8a0   :  { %1627 = vmatpush.msrb.mxu0 %v6877_v8 }
 0x8a2   :  { %1628 = vmatpush.msrb.mxu0 %v6883_v46 }
 0x8a4   :  { %1629 = vmatpush.msrb.mxu0 %v6890_v53 }
 0x8cb   :  { %v1365_v16 = vpop.f32.mrf.mxu1 }
 0x8d9   :  { %v1517_v0 = vpop.xlane.xlu2 %1516 }
 0x8da   :  { %5808 = vrcp.f32 %v1517_v0  ;;  %v1529_v58 = vand.u32 2147483648, %v1517_v0  ;;  %v1527_v3 = vand.u32 2147483647, %v1517_v0  ;;  %vm1523_vm10 = vweird.f32 %v1517_v0 }
 0x8dc   :  { %v1530_v41 = vor.u32 1.1754944e-38, %v1529_v58  ;;  %vm1528_vm13 = vcmp.eq.f32.partialorder %v1527_v3, 8.507059e+37 }
 0x8e0   :  { %v5809_v28 = vpop.eup %5808 }
 0x8e1   :  { %v1519_v50 = vmul.f32 %v5809_v28, %v1517_v0  ;;  %v1847_v60 = vpop.permute.xlu2 %1846  ;;  %vm1524_vm9 = vweird.f32 %v5809_v28 }
 0x8e2   :  { %1849 = vxpose.xlu0.b32.start.end [1/1] (short) (narrow) %v1847_v60, 64  ;;  %vm1525_vm12 = vmor %vm1523_vm10, %vm1524_vm9 }
 0x8e3   :  { %v1520_v44 = vsub.f32 1.0, %v1519_v50 }
 0x8e5   :  { %v1521_v55 = vmul.f32 %v5809_v28, %v1520_v44 }
 0x8e7   :  { %v1522_v37 = vadd.f32 %v5809_v28, %v1521_v55 }
 0x8e9   :  { %v1526_v59 = vsel %vm1525_vm12, %v5809_v28, %v1522_v37 }
 0x8ea   :  { %v1531_v27 = vsel %vm1528_vm13, %v1530_v41, %v1526_v59 }
 0x8eb   :  { %v1532_v51 = vmul.f32 %v5807_v20, %v1531_v27 }
 0x8ed   :  { %5564 = vmatmul.msk.f32.vlgmr.msra.gmra.mxu0 %vm710_vm11, %v1532_v51 }
 0x8ee   :  { %1924 = vmatpush.msra.mxu0 %v1883_v49 }
 0x8f5   :  { %5566 = vmatmul.msk.f32.vlgmr.msrb.gmra.mxu0 %vm1110_vm4, %v1365_v16 }
 0x8f8   :  { %v1650_v23 = vpop.trf.xlu1 }
 0x900   :  { %v1651_v57 = vpop.trf.xlu1 }
 0x908   :  { %v1652_v15 = vpop.trf.xlu1 }
 0x910   :  { %v1653_v12 = vpop.trf.xlu1 }
 0x918   :  { %v1654_v6 = vpop.trf.xlu1 }
 0x920   :  { %v1655_v31 = vpop.trf.xlu1 }
 0x928   :  { %v1656_v2 = vpop.trf.xlu1 }
 0x930   :  { %v1657_v17 = vpop.trf.xlu1 }
 0x96a   :  { %v1585_v18 = vpop.f32.mrf.mxu0 }
 0x96b   :  { %5565 = vmatmul.msk.f32.vlgmr.msra.gmra.mxu1 %vm1110_vm4, %v1585_v18 }
 0x972   :  { %v7023_v52 = vpop.f32.mrf.mxu0 }
 0x973   :  { %5567 = vmatmul.msk.f32.vlgmr.msrb.gmra.mxu1 %vm710_vm11, %v1650_v23 }
 0x97b   :  { %5568 = vmatmul.msk.f32.gmra.mxu1 %vm710_vm11, %v1651_v57 }
 0x983   :  { %5569 = vmatmul.msk.f32.gmra.mxu1 %vm710_vm11, %v1652_v15 }
 0x986   :  { %v1865_v26 = vpop.trf.xlu0 }
 0x987   :  { %5584 = vmatmul.msk.f32.vlgmr.msra.gmra.mxu0 %vm710_vm11, %v1865_v26 }
 0x98b   :  { %5570 = vmatmul.msk.f32.gmra.mxu1 %vm710_vm11, %v1653_v12 }
 0x98e   :  { %v1866_v30 = vpop.trf.xlu0 }
 0x98f   :  { %5585 = vmatmul.msk.f32.gmra.mxu0 %vm710_vm11, %v1866_v30 }
 0x993   :  { %5571 = vmatmul.msk.f32.gmra.mxu1 %vm710_vm11, %v1654_v6 }
 0x996   :  { %v1867_v32 = vpop.trf.xlu0 }
 0x997   :  { %5586 = vmatmul.msk.f32.gmra.mxu0 %vm710_vm11, %v1867_v32 }
 0x99b   :  { %5572 = vmatmul.msk.f32.gmra.mxu1 %vm710_vm11, %v1655_v31 }
 0x99e   :  { %v1868_v48 = vpop.trf.xlu0 }
 0x99f   :  { %5587 = vmatmul.msk.f32.gmra.mxu0 %vm710_vm11, %v1868_v48 }
 0x9a3   :  { %5573 = vmatmul.msk.f32.gmra.mxu1 %vm710_vm11, %v1656_v2 }
 0x9a6   :  { %v1869_v9 = vpop.trf.xlu0 }
 0x9a7   :  { %5588 = vmatmul.msk.f32.gmra.mxu0 %vm710_vm11, %v1869_v9 }
 0x9ab   :  { %5574 = vmatmul.msk.f32.gmra.mxu1 %vm710_vm11, %v1657_v17 }
 0x9ae   :  { %v1870_v36 = vpop.trf.xlu0 }
 0x9af   :  { %5589 = vmatmul.msk.f32.gmra.mxu0 %vm710_vm11, %v1870_v36 }
 0x9b6   :  { %v1871_v47 = vpop.trf.xlu0 }
 0x9b7   :  { %5590 = vmatmul.msk.f32.gmra.mxu0 %vm710_vm11, %v1871_v47 }
 0x9be   :  { %v1872_v1 = vpop.trf.xlu0 }
 0x9bf   :  { %5591 = vmatmul.msk.f32.gmra.mxu0 %vm710_vm11, %v1872_v1 }
 0x9e8   :  { %v7018_v34 = vpop.f32.mrf.mxu1 }
 0x9f0   :  { %v7021_v19 = vpop.f32.mrf.mxu1 }
 0x9f8   :  { %v1710_v20 = vpop.f32.mrf.mxu1 }
 0xa00   :  { %v1713_v21 = vpop.f32.mrf.mxu1 }
 0xa04   :  { %v1926_v39 = vpop.f32.mrf.mxu0 }
 0xa08   :  { %v1716_v43 = vpop.f32.mrf.mxu1 }
 0xa09   :  { %1743 = vrot.lane.b32.xlu0 %v1716_v43, %s6058_s24 }
 0xa0c   :  { %v1929_v61 = vpop.f32.mrf.mxu0 }
 0xa0d   :  { %1952 = vrot.lane.b32.xlu2 %v1929_v61, %s6048_s29 }
 0xa10   :  { %v1719_v55 = vpop.f32.mrf.mxu1 }
 0xa14   :  { %v1932_v38 = vpop.f32.mrf.mxu0 }
 0xa15   :  { %1957 = vrot.lane.b32.xlu2 %v1932_v38, %s6053_s17 }
 0xa18   :  { %v1722_v37 = vpop.f32.mrf.mxu1 }
 0xa1c   :  { %v1935_v0 = vpop.f32.mrf.mxu0 }
 0xa1d   :  { %1962 = vrot.lane.b32.xlu1 %v1935_v0, %s6058_s24  ;;  %1733 = vrot.lane.b32.xlu2 %v1710_v20, %s6048_s29 }
 0xa20   :  { %v1725_v27 = vpop.f32.mrf.mxu1 }
 0xa24   :  { %v1938_v28 = vpop.f32.mrf.mxu0 }
 0xa25   :  { %1798 = vrot.lane.b32.xlu1 %v6895_v63, %s6066_s15  ;;  %1738 = vrot.lane.b32.xlu2 %v1713_v21, %s6053_s17 }
 0xa28   :  { %v1728_v49 = vpop.f32.mrf.mxu1 }
 0xa2c   :  { %v1941_v50 = vpop.f32.mrf.mxu0 }
 0xa2d   :  { %1794 = vrot.lane.b32.xlu1 %v6895_v63, %s6053_s17  ;;  %1967 = vrot.lane.b32.xlu2 %v1938_v28, %s6066_s15 }
 0xa34   :  { %v1944_v60 = vpop.f32.mrf.mxu0 }
 0xa35   :  { %1972 = vrot.lane.b32.xlu2 %v1941_v50, %s6067_s16 }
 0xa3c   :  { %v1947_v44 = vpop.f32.mrf.mxu0 }
 0xa3d   :  { %1977 = vrot.lane.b32.xlu2 %v1944_v60, %s6068_s30 }
 0xa45   :  { %1982 = vrot.lane.b32.xlu2 %v1947_v44, %s6069_s20 }
 0xa4d   :  { %1804 = vrot.lane.b32.xlu2 %v6895_v63, %s6069_s20 }
 0xa55   :  { %1802 = vrot.lane.b32.xlu2 %v6895_v63, %s6068_s30 }
 0xa5d   :  { %1800 = vrot.lane.b32.xlu2 %v6895_v63, %s6067_s16 }
 0xa65   :  { %1796 = vrot.lane.b32.xlu2 %v6895_v63, %s6058_s24 }
 0xa67   :  { %v1953_v58 = vpop.permute.xlu2 %1952 }
 0xa68   :  { %v1955_v36 = vadd.f32 %v1953_v58, %v1926_v39 }
 0xa6d   :  { %1792 = vrot.lane.b32.xlu2 %v6895_v63, %s6048_s29 }
 0xa6f   :  { %v1958_v3 = vpop.permute.xlu2 %1957 }
 0xa70   :  { %v1960_v47 = vadd.f32 %v1958_v3, %v1955_v36 }
 0xa75   :  { %1748 = vrot.lane.b32.xlu2 %v1719_v55, %s6066_s15 }
 0xa77   :  { %v1734_v41 = vpop.permute.xlu2 %1733 }
 0xa7b   :  { %v1744_v39 = vpop.permute.xlu0 %1743 }
 0xa7d   :  { %1753 = vrot.lane.b32.xlu2 %v1722_v37, %s6067_s16 }
 0xa7f   :  { %v1739_v59 = vpop.permute.xlu2 %1738 }
 0xa85   :  { %1758 = vrot.lane.b32.xlu2 %v1725_v27, %s6068_s30 }
 0xa87   :  { %v1968_v51 = vpop.permute.xlu2 %1967 }
 0xa8d   :  { %1763 = vrot.lane.b32.xlu2 %v1728_v49, %s6069_s20 }
 0xa8f   :  { %v1973_v16 = vpop.permute.xlu2 %1972  ;;  %v1963_v15 = vpop.permute.xlu1 %1962 }
 0xa90   :  { %v1965_v6 = vadd.f32 %v1963_v15, %v1960_v47 }
 0xa92   :  { %v1970_v31 = vadd.f32 %v1968_v51, %v1965_v6 }
 0xa94   :  { %v1975_v17 = vadd.f32 %v1973_v16, %v1970_v31 }
 0xa97   :  { %v1978_v18 = vpop.permute.xlu2 %1977  ;;  %v1799_v30 = vpop.permute.xlu1 %1798 }
 0xa98   :  { %v1980_v20 = vadd.f32 %v1978_v18, %v1975_v17 }
 0xa9f   :  { %v1983_v23 = vpop.permute.xlu2 %1982  ;;  %v1795_v48 = vpop.permute.xlu1 %1794 }
 0xaa0   :  { %v1985_v21 = vadd.f32 %v1983_v23, %v1980_v20 }
 0xaa7   :  { %v1805_v57 = vpop.permute.xlu2 %1804 }
 0xaa8   :  { %5575 = vmatpush.xpose.msk.msra.mxu2 %vm710_vm11, %v1805_v57  ;;  %2024 = vrot.lane.b32.xlu1 %v1805_v57, %s6065_s19 }
 0xaaf   :  { %v1803_v26 = vpop.permute.xlu2 %1802 }
 0xab0   :  { %5576 = vmatpush.xpose.msk.msra.mxu2 %vm710_vm11, %v1803_v26  ;;  %2022 = vrot.lane.b32.xlu0 %v1803_v26, %s6065_s19 }
 0xab7   :  { %v1801_v12 = vpop.permute.xlu2 %1800 }
 0xab8   :  { %5577 = vmatpush.xpose.msk.msra.mxu2 %vm710_vm11, %v1801_v12  ;;  %2020 = vrot.lane.b32.xlu2 %v1801_v12, %s6065_s19 }
 0xabc   :  { %5578 = vmatpush.xpose.msk.msra.mxu2 %vm710_vm11, %v1799_v30 }
 0xabf   :  { %v1797_v32 = vpop.permute.xlu2 %1796 }
 0xac0   :  { %5579 = vmatpush.xpose.msk.msra.mxu2 %vm710_vm11, %v1797_v32 }
 0xac4   :  { %5580 = vmatpush.xpose.msk.msra.mxu2 %vm710_vm11, %v1795_v48 }
 0xac7   :  { %v1793_v9 = vpop.permute.xlu2 %1792 }
 0xac8   :  { %5581 = vmatpush.xpose.msk.msra.mxu2 %vm710_vm11, %v1793_v9 }
 0xacc   :  { %5582 = vmatpush.xpose.msk.msra.mxu2 %vm710_vm11, %v6895_v63 }
 0xacf   :  { %v1749_v1 = vpop.permute.xlu2 %1748 }
 0xad0   :  { %2076 = vmatpush.msrb.mxu2 %v6796_v35  ;;  %v1736_v35 = vadd.f32 %v1734_v41, %v7021_v19 }
 0xad2   :  { %2077 = vmatpush.msrb.mxu2 %v6801_v10  ;;  %v1741_v10 = vadd.f32 %v1739_v59, %v1736_v35 }
 0xad4   :  { %2078 = vmatpush.msrb.mxu2 %v6807_v14  ;;  %v1746_v43 = vadd.f32 %v1744_v39, %v1741_v10 }
 0xad6   :  { %2079 = vmatpush.msrb.mxu2 %v6813_v42  ;;  %v1986_v42 = vsel %vm710_vm11, %v1985_v21, -inf }
 0xad7   :  { %v1754_v2 = vpop.permute.xlu2 %1753 }
 0xad8   :  { %2080 = vmatpush.msrb.mxu2 %v6819_v13  ;;  %v1751_v13 = vadd.f32 %v1749_v1, %v1746_v43 }
 0xada   :  { %2081 = vmatpush.msrb.mxu2 %v6826_v62  ;;  %v1756_v61 = vadd.f32 %v1754_v2, %v1751_v13 }
 0xadc   :  { %2082 = vmatpush.msrb.mxu2 %v6836_v40 }
 0xade   :  { %2083 = vmatpush.msrb.mxu2 %v6841_v11 }
 0xadf   :  { %v1759_v14 = vpop.permute.xlu2 %1758 }
 0xae0   :  { %v1761_v38 = vadd.f32 %v1759_v14, %v1756_v61 }
 0xae1   :  { %1987 = vmax.xlane.f32.xlu2 %v1986_v42 }
 0xae7   :  { %v1764_v62 = vpop.permute.xlu2 %1763 }
 0xae8   :  { %v1766_v0 = vadd.f32 %v1764_v62, %v1761_v38 }
 0xaea   :  { %v1767_v40 = vsel %vm710_vm11, %v1766_v0, -inf }
 0xaeb   :  { %1768 = vmax.xlane.f32.xlu2 %v1767_v40 }
 0xb03   :  { %2018 = vrot.lane.b32.xlu2 %v1799_v30, %s6065_s19 }
 0xb0b   :  { %2016 = vrot.lane.b32.xlu2 %v1797_v32, %s6065_s19 }
 0xb12   :  { %v2021_v28 = vpop.permute.xlu2 %2020 }
 0xb13   :  { %2014 = vrot.lane.b32.xlu2 %v1795_v48, %s6065_s19 }
 0xb1a   :  { %v2025_v11 = vpop.permute.xlu1 %2024 }
 0xb1b   :  { %2012 = vrot.lane.b32.xlu2 %v1793_v9, %s6065_s19  ;;  %5592 = vmatpush.xpose.msk.msra.mxu3 %vm710_vm11, %v2025_v11 }
 0xb22   :  { %v2023_v19 = vpop.permute.xlu0 %2022 }
 0xb23   :  { %2010 = vrot.lane.b32.xlu2 %v6895_v63, %s6065_s19  ;;  %5593 = vmatpush.xpose.msk.msra.mxu3 %vm710_vm11, %v2023_v19 }
 0xb27   :  { %5594 = vmatpush.xpose.msk.msra.mxu3 %vm710_vm11, %v2021_v28 }
 0xb49   :  { %2111 = vxpose.xlu2.b32.start.end [1/1] (short) (narrow) %v6671_v4, 64 }
 0xb54   :  { %v1988_v50 = vpop.xlane.xlu2 %1987 }
 0xb55   :  { %v1989_v60 = vsub.f32 %v1985_v21, %v1988_v50 }
 0xb57   :  { %v1990_v44 = vmul.f32 1.442695, %v1989_v60 }
 0xb59   :  { %5810 = vpow2.f32 %v1990_v44 }
 0xb5e   :  { %v1769_v58 = vpop.xlane.xlu2 %1768 }
 0xb5f   :  { %v5811_v55 = vpop.eup %5810  ;;  %v1770_v3 = vsub.f32 %v1766_v0, %v1769_v58 }
 0xb60   :  { %v1992_v37 = vsel %vm710_vm11, %v5811_v55, 0.0 }
 0xb61   :  { %v1771_v41 = vmul.f32 1.442695, %v1770_v3  ;;  %1993 = vadd.xlane.f32.xlu0 %v1992_v37 }
 0xb63   :  { %5812 = vpow2.f32 %v1771_v41 }
 0xb66   :  { %v2019_v63 = vpop.permute.xlu2 %2018 }
 0xb67   :  { %5595 = vmatpush.xpose.msk.msra.mxu3 %vm710_vm11, %v2019_v63 }
 0xb69   :  { %v5813_v59 = vpop.eup %5812 }
 0xb6a   :  { %v1773_v27 = vsel %vm710_vm11, %v5813_v59, 0.0 }
 0xb6b   :  { %1774 = vadd.xlane.f32.xlu1 %v1773_v27 }
 0xb6e   :  { %v2017_v51 = vpop.permute.xlu2 %2016 }
 0xb6f   :  { %5596 = vmatpush.xpose.msk.msra.mxu3 %vm710_vm11, %v2017_v51 }
 0xb75   :  { %2359 = vrot.lane.b32.xlu0 %v6718_v5, %s6065_s19 }
 0xb76   :  { %v2015_v49 = vpop.permute.xlu2 %2014 }
 0xb77   :  { %5597 = vmatpush.xpose.msk.msra.mxu3 %vm710_vm11, %v2015_v49 }
 0xb7e   :  { %v2013_v16 = vpop.permute.xlu2 %2012 }
 0xb7f   :  { %5598 = vmatpush.xpose.msk.msra.mxu3 %vm710_vm11, %v2013_v16 }
 0xb84   :  { %2323 = vrot.lane.b32.xlu1 %v6671_v4, %s6065_s19 }
 0xb86   :  { %v2011_v18 = vpop.permute.xlu2 %2010 }
 0xb87   :  { %5599 = vmatpush.xpose.msk.msra.mxu3 %vm710_vm11, %v2011_v18 }
 0xb8b   :  { %2099 = vmatpush.msrb.mxu3 %v6848_v29 }
 0xb8d   :  { %2100 = vmatpush.msrb.mxu3 %v6853_v56 }
 0xb8f   :  { %2101 = vmatpush.msrb.mxu3 %v6859_v54 }
 0xb91   :  { %2102 = vmatpush.msrb.mxu3 %v6865_v24 }
 0xb93   :  { %2103 = vmatpush.msrb.mxu3 %v6872_v45 }
 0xb95   :  { %2104 = vmatpush.msrb.mxu3 %v6877_v8 }
 0xb97   :  { %2105 = vmatpush.msrb.mxu3 %v6883_v46 }
 0xb99   :  { %2106 = vmatpush.msrb.mxu3 %v6890_v53 }
 0xbd4   :  { %v1994_v4 = vpop.xlane.xlu0 %1993 }
 0xbd5   :  { %5814 = vrcp.f32 %v1994_v4  ;;  %v2006_v26 = vand.u32 2147483648, %v1994_v4  ;;  %v2004_v54 = vand.u32 2147483647, %v1994_v4  ;;  %vm2000_vm15 = vweird.f32 %v1994_v4 }
 0xbd7   :  { %v2007_v45 = vor.u32 1.1754944e-38, %v2006_v26  ;;  %vm2005_vm1 = vcmp.eq.f32.partialorder %v2004_v54, 8.507059e+37 }
 0xbdb   :  { %v5815_v23 = vpop.eup %5814 }
 0xbdc   :  { %v1996_v57 = vmul.f32 %v5815_v23, %v1994_v4  ;;  %vm2001_vm14 = vweird.f32 %v5815_v23 }
 0xbdd   :  { %vm2002_vm0 = vmor %vm2000_vm15, %vm2001_vm14 }
 0xbde   :  { %v1997_v15 = vsub.f32 1.0, %v1996_v57  ;;  %v1775_v29 = vpop.xlane.xlu1 %1774 }
 0xbdf   :  { %5816 = vrcp.f32 %v1775_v29  ;;  %v1787_v9 = vand.u32 2147483648, %v1775_v29  ;;  %v1785_v47 = vand.u32 2147483647, %v1775_v29  ;;  %vm1781_vm3 = vweird.f32 %v1775_v29 }
 0xbe0   :  { %v1998_v56 = vmul.f32 %v5815_v23, %v1997_v15 }
 0xbe1   :  { %v1788_v6 = vor.u32 1.1754944e-38, %v1787_v9  ;;  %vm1786_vm6 = vcmp.eq.f32.partialorder %v1785_v47, 8.507059e+37 }
 0xbe2   :  { %v1999_v24 = vadd.f32 %v5815_v23, %v1998_v56  ;;  %v2127_v20 = vpop.trf.xlu2 }
 0xbe4   :  { %v2003_v8 = vsel %vm2002_vm0, %v5815_v23, %v1999_v24 }
 0xbe5   :  { %v5817_v46 = vpop.eup %5816  ;;  %v2008_v12 = vsel %vm2005_vm1, %v2007_v45, %v2003_v8 }
 0xbe6   :  { %v1777_v53 = vmul.f32 %v5817_v46, %v1775_v29  ;;  %v2009_v30 = vmul.f32 %v5811_v55, %v2008_v12  ;;  %vm1782_vm2 = vweird.f32 %v5817_v46 }
 0xbe7   :  { %v2360_v32 = vpop.permute.xlu0 %2359  ;;  %vm1783_vm5 = vmor %vm1781_vm3, %vm1782_vm2 }
 0xbe8   :  { %v1778_v48 = vsub.f32 1.0, %v1777_v53  ;;  %5600 = vmatmul.msk.f32.vlgmr.msra.gmra.mxu3 %vm710_vm11, %v2009_v30 }
 0xbe9   :  { %2401 = vmatpush.msra.mxu3 %v2360_v32 }
 0xbea   :  { %v1779_v36 = vmul.f32 %v5817_v46, %v1778_v48  ;;  %v2128_v21 = vpop.trf.xlu2 }
 0xbec   :  { %v1780_v1 = vadd.f32 %v5817_v46, %v1779_v36 }
 0xbee   :  { %v1784_v31 = vsel %vm1783_vm5, %v5817_v46, %v1780_v1 }
 0xbef   :  { %v1789_v2 = vsel %vm1786_vm6, %v1788_v6, %v1784_v31  ;;  %v6020_v6 = vld [vmem:[%s8989_s4 + $0x78] sm:$0xff] }
 0xbf0   :  { %v1790_v17 = vmul.f32 %v5813_v59, %v1789_v2  ;;  %v6021_v2 = vld [vmem:[%s8989_s4 + $0x70] sm:$0xff] }
 0xbf2   :  { %5583 = vmatmul.msk.f32.vlgmr.msra.gmra.mxu2 %vm710_vm11, %v1790_v17  ;;  %v2129_v14 = vpop.trf.xlu2 }
 0xbf3   :  { %2182 = vmatpush.msra.mxu2 %v6718_v5 }
 0xbf6   :  { %v2324_v35 = vpop.permute.xlu1 %2323 }
 0xbf7   :  { %2326 = vxpose.xlu0.b32.start.end [1/1] (short) (narrow) %v2324_v35, 64  ;;  %v6022_v35 = vld [vmem:[%s8989_s4 + $0x68] sm:$0xff] }
 0xbfa   :  { %v2130_v43 = vpop.trf.xlu2 }
 0xc02   :  { %v2131_v5 = vpop.trf.xlu2 }
 0xc0a   :  { %v2132_v42 = vpop.trf.xlu2 }
 0xc12   :  { %v2133_v61 = vpop.trf.xlu2 }
 0xc1a   :  { %v2134_v62 = vpop.trf.xlu2 }
 0xc6b   :  { %v2062_v10 = vpop.f32.mrf.mxu3 }
 0xc6c   :  { %5601 = vmatmul.msk.f32.vlgmr.msrb.gmra.mxu2 %vm1110_vm4, %v2062_v10  ;;  %v6023_v10 = vld [vmem:[%s8989_s4 + $0x60] sm:$0xff] }
 0xc74   :  { %5603 = vmatmul.msk.f32.vlgmr.msra.gmra.mxu2 %vm710_vm11, %v2127_v20 }
 0xc75   :  { %v1842_v39 = vpop.f32.mrf.mxu2 }
 0xc76   :  { %5602 = vmatmul.msk.f32.vlgmr.msrb.gmra.mxu3 %vm1110_vm4, %v1842_v39  ;;  %v6024_v39 = vld [vmem:[%s8989_s4 + $0x58] sm:$0xff] }
 0xc7c   :  { %5604 = vmatmul.msk.f32.gmra.mxu2 %vm710_vm11, %v2128_v21 }
 0xc84   :  { %5605 = vmatmul.msk.f32.gmra.mxu2 %vm710_vm11, %v2129_v14 }
 0xc8c   :  { %5606 = vmatmul.msk.f32.gmra.mxu2 %vm710_vm11, %v2130_v43 }
 0xc94   :  { %5607 = vmatmul.msk.f32.gmra.mxu2 %vm710_vm11, %v2131_v5  ;;  %v6025_v5 = vld [vmem:[%s8989_s4 + $0x50] sm:$0xff] }
 0xc9b   :  { %v2342_v13 = vpop.trf.xlu0 }
 0xc9c   :  { %5620 = vmatmul.msk.f32.vlgmr.msra.gmra.mxu3 %vm710_vm11, %v2342_v13  ;;  %5608 = vmatmul.msk.f32.gmra.mxu2 %vm710_vm11, %v2132_v42  ;;  %v6026_v13 = vld [vmem:[%s8989_s4 + $0x48] sm:$0xff] }
 0xca3   :  { %v2343_v38 = vpop.trf.xlu0 }
 0xca4   :  { %5621 = vmatmul.msk.f32.gmra.mxu3 %vm710_vm11, %v2343_v38  ;;  %5609 = vmatmul.msk.f32.gmra.mxu2 %vm710_vm11, %v2133_v61 }
 0xcab   :  { %v2344_v0 = vpop.trf.xlu0 }
 0xcac   :  { %5622 = vmatmul.msk.f32.gmra.mxu3 %vm710_vm11, %v2344_v0  ;;  %5610 = vmatmul.msk.f32.gmra.mxu2 %vm710_vm11, %v2134_v62  ;;  %v6027_v62 = vld [vmem:[%s8989_s4 + $0x40] sm:$0xff] }
 0xcb3   :  { %v2345_v40 = vpop.trf.xlu0 }
 0xcb4   :  { %5623 = vmatmul.msk.f32.gmra.mxu3 %vm710_vm11, %v2345_v40 }
 0xcbb   :  { %v2346_v11 = vpop.trf.xlu0 }
 0xcbc   :  { %5624 = vmatmul.msk.f32.gmra.mxu3 %vm710_vm11, %v2346_v11 }
 0xcc3   :  { %v2347_v19 = vpop.trf.xlu0 }
 0xcc4   :  { %5625 = vmatmul.msk.f32.gmra.mxu3 %vm710_vm11, %v2347_v19 }
 0xccb   :  { %v2348_v28 = vpop.trf.xlu0 }
 0xccc   :  { %5626 = vmatmul.msk.f32.gmra.mxu3 %vm710_vm11, %v2348_v28 }
 0xcd3   :  { %v2349_v60 = vpop.trf.xlu0 }
 0xcd4   :  { %5627 = vmatmul.msk.f32.gmra.mxu3 %vm710_vm11, %v2349_v60 }
 0xcef   :  { %v2085_v50 = vpop.f32.mrf.mxu2 }
 0xcf7   :  { %v7126_v44 = vpop.f32.mrf.mxu2 }
 0xcf9   :  { %v2108_v58 = vpop.f32.mrf.mxu3 }
 0xcfa   :  { %v7128_v55 = vadd.f32 %v2108_v58, %v2085_v50 }
 0xcff   :  { %v2187_v3 = vpop.f32.mrf.mxu2 }
 0xd00   :  { %2210 = vrot.lane.b32.xlu1 %v2187_v3, %s6048_s29 }
 0xd07   :  { %v2190_v37 = vpop.f32.mrf.mxu2 }
 0xd08   :  { %2215 = vrot.lane.b32.xlu1 %v2190_v37, %s6053_s17 }
 0xd0f   :  { %v2193_v63 = vpop.f32.mrf.mxu2 }
 0xd17   :  { %v2196_v51 = vpop.f32.mrf.mxu2 }
 0xd1f   :  { %v7132_v41 = vpop.f32.mrf.mxu3  ;;  %v2199_v16 = vpop.f32.mrf.mxu2 }
 0xd27   :  { %v2406_v59 = vpop.f32.mrf.mxu3  ;;  %v2202_v18 = vpop.f32.mrf.mxu2 }
 0xd28   :  { %2429 = vrot.lane.b32.xlu1 %v2406_v59, %s6048_s29 }
 0xd2f   :  { %v2409_v27 = vpop.f32.mrf.mxu3  ;;  %v2205_v4 = vpop.f32.mrf.mxu2 }
 0xd30   :  { %2220 = vrot.lane.b32.xlu1 %v2193_v63, %s6058_s24  ;;  %2434 = vrot.lane.b32.xlu2 %v2409_v27, %s6053_s17 }
 0xd37   :  { %v2412_v49 = vpop.f32.mrf.mxu3 }
 0xd38   :  { %2225 = vrot.lane.b32.xlu1 %v2196_v51, %s6066_s15  ;;  %2275 = vrot.lane.b32.xlu2 %v6897_v7, %s6066_s15  ;;  %v7213_v51 = vadd.f32 %v6921_v33, %v6919_v22 }
 0xd39   :  { %2439 = vrot.lane.b32.xlu0 %v2412_v49, %s6058_s24 }
 0xd3f   :  { %v2415_v23 = vpop.f32.mrf.mxu3 }
 0xd40   :  { %2230 = vrot.lane.b32.xlu1 %v2199_v16, %s6067_s16  ;;  %2271 = vrot.lane.b32.xlu2 %v6897_v7, %s6053_s17 }
 0xd47   :  { %v2418_v57 = vpop.f32.mrf.mxu3 }
 0xd48   :  { %2235 = vrot.lane.b32.xlu1 %v2202_v18, %s6068_s30 }
 0xd4f   :  { %v2421_v29 = vpop.f32.mrf.mxu3 }
 0xd50   :  { %2240 = vrot.lane.b32.xlu1 %v2205_v4, %s6069_s20 }
 0xd57   :  { %v2424_v56 = vpop.f32.mrf.mxu3 }
 0xd58   :  { %2281 = vrot.lane.b32.xlu1 %v6897_v7, %s6069_s20 }
 0xd60   :  { %2279 = vrot.lane.b32.xlu1 %v6897_v7, %s6068_s30 }
 0xd68   :  { %2277 = vrot.lane.b32.xlu1 %v6897_v7, %s6067_s16 }
 0xd70   :  { %2273 = vrot.lane.b32.xlu1 %v6897_v7, %s6058_s24 }
 0xd72   :  { %v2211_v15 = vpop.permute.xlu1 %2210 }
 0xd73   :  { %v2213_v17 = vadd.f32 %v2211_v15, %v7126_v44 }
 0xd78   :  { %2269 = vrot.lane.b32.xlu1 %v6897_v7, %s6048_s29 }
 0xd7a   :  { %v2216_v26 = vpop.permute.xlu1 %2215 }
 0xd7b   :  { %v2218_v20 = vadd.f32 %v2216_v26, %v2213_v17 }
 0xd80   :  { %2444 = vrot.lane.b32.xlu1 %v2415_v23, %s6066_s15 }
 0xd88   :  { %2449 = vrot.lane.b32.xlu1 %v2418_v57, %s6067_s16 }
 0xd8a   :  { %v2435_v30 = vpop.permute.xlu2 %2434 }
 0xd90   :  { %2454 = vrot.lane.b32.xlu1 %v2421_v29, %s6068_s30 }
 0xd92   :  { %v2276_v9 = vpop.permute.xlu2 %2275 }
 0xd98   :  { %2459 = vrot.lane.b32.xlu1 %v2424_v56, %s6069_s20  ;;  %v7232_v56 = vadd.f32 %v7023_v52, %v7018_v34  ;;  %v6028_v52 = vld [vmem:[%s8989_s4 + $0x38] sm:$0xff] }
 0xd9a   :  { %v2430_v54 = vpop.permute.xlu1 %2429  ;;  %v2272_v47 = vpop.permute.xlu2 %2271 }
 0xd9b   :  { %v2432_v61 = vadd.f32 %v2430_v54, %v7132_v41 }
 0xd9d   :  { %v2437_v11 = vadd.f32 %v2435_v30, %v2432_v61  ;;  %v6033_v30 = vld [vmem:[%s8989_s4 + $0x10] sm:$0xff] }
 0xda2   :  { %v2221_v24 = vpop.permute.xlu1 %2220 }
 0xda3   :  { %v2223_v21 = vadd.f32 %v2221_v24, %v2218_v20 }
 0xdaa   :  { %v2226_v45 = vpop.permute.xlu1 %2225 }
 0xdab   :  { %v2228_v14 = vadd.f32 %v2226_v45, %v2223_v21  ;;  %v2440_v0 = vpop.permute.xlu0 %2439 }
 0xdac   :  { %v2442_v28 = vadd.f32 %v2440_v0, %v2437_v11 }
 0xdb2   :  { %v2231_v8 = vpop.permute.xlu1 %2230 }
 0xdb3   :  { %v2233_v42 = vadd.f32 %v2231_v8, %v2228_v14  ;;  %v6029_v8 = vld [vmem:[%s8989_s4 + $0x30] sm:$0xff] }
 0xdba   :  { %v2236_v46 = vpop.permute.xlu1 %2235 }
 0xdbb   :  { %v2238_v38 = vadd.f32 %v2236_v46, %v2233_v42  ;;  %v6030_v46 = vld [vmem:[%s8989_s4 + $0x28] sm:$0xff] }
 0xdc2   :  { %v2241_v12 = vpop.permute.xlu1 %2240 }
 0xdc3   :  { %v2243_v40 = vadd.f32 %v2241_v12, %v2238_v38  ;;  %v6031_v12 = vld [vmem:[%s8989_s4 + $0x20] sm:$0xff] }
 0xdc5   :  { %v2244_v50 = vsel %vm710_vm11, %v2243_v40, -inf }
 0xdca   :  { %v2282_v53 = vpop.permute.xlu1 %2281 }
 0xdcb   :  { %5611 = vmatpush.xpose.msk.msra.mxu1 %vm710_vm11, %v2282_v53  ;;  %2501 = vrot.lane.b32.xlu2 %v2282_v53, %s6065_s19  ;;  %v6032_v53 = vld [vmem:[%s8989_s4 + $0x18] sm:$0xff] }
 0xdd2   :  { %v2280_v32 = vpop.permute.xlu1 %2279 }
 0xdd3   :  { %5612 = vmatpush.xpose.msk.msra.mxu1 %vm710_vm11, %v2280_v32  ;;  %2499 = vrot.lane.b32.xlu0 %v2280_v32, %s6065_s19  ;;  %v6034_v32 = vld [vmem:[%s8989_s4 + $0x8] sm:$0xff] }
 0xdda   :  { %v2278_v48 = vpop.permute.xlu1 %2277 }
 0xddb   :  { %5613 = vmatpush.xpose.msk.msra.mxu1 %vm710_vm11, %v2278_v48  ;;  %2497 = vrot.lane.b32.xlu1 %v2278_v48, %s6065_s19  ;;  %v6035_v48 = vld [vmem:[%s8989_s4] sm:$0xff]  ;;  %s6070_s4 = smov 32  }
 0xddf   :  { %5614 = vmatpush.xpose.msk.msra.mxu1 %vm710_vm11, %v2276_v9 }
 0xde2   :  { %v2274_v36 = vpop.permute.xlu1 %2273 }
 0xde3   :  { %5615 = vmatpush.xpose.msk.msra.mxu1 %vm710_vm11, %v2274_v36 }
 0xde7   :  { %5616 = vmatpush.xpose.msk.msra.mxu1 %vm710_vm11, %v2272_v47 }
 0xdea   :  { %v2270_v1 = vpop.permute.xlu1 %2269 }
 0xdeb   :  { %5617 = vmatpush.xpose.msk.msra.mxu1 %vm710_vm11, %v2270_v1 }
 0xdef   :  { %5618 = vmatpush.xpose.msk.msra.mxu1 %vm710_vm11, %v6897_v7 }
 0xdf2   :  { %v2445_v31 = vpop.permute.xlu1 %2444 }
 0xdf3   :  { %2553 = vmatpush.msrb.mxu1 %v6020_v6  ;;  %v2447_v60 = vadd.f32 %v2445_v31, %v2442_v28 }
 0xdf5   :  { %2554 = vmatpush.msrb.mxu1 %v6021_v2 }
 0xdf7   :  { %2555 = vmatpush.msrb.mxu1 %v6022_v35 }
 0xdf9   :  { %2556 = vmatpush.msrb.mxu1 %v6023_v10 }
 0xdfa   :  { %v2450_v43 = vpop.permute.xlu1 %2449 }
 0xdfb   :  { %2557 = vmatpush.msrb.mxu1 %v6024_v39  ;;  %v2452_v44 = vadd.f32 %v2450_v43, %v2447_v60 }
 0xdfd   :  { %2558 = vmatpush.msrb.mxu1 %v6025_v5  ;;  %v2634_v5 = vsel %vm2630_vm7, %v7232_v56, 0.0 }
 0xdff   :  { %2559 = vmatpush.msrb.mxu1 %v6026_v13 }
 0xe01   :  { %2560 = vmatpush.msrb.mxu1 %v6027_v62 }
 0xe02   :  { %v2455_v19 = vpop.permute.xlu1 %2454 }
 0xe03   :  { %v2457_v58 = vadd.f32 %v2455_v19, %v2452_v44 }
 0xe05   :  { %2245 = vmax.xlane.f32.xlu1 %v2244_v50 }
 0xe0a   :  { %v2460_v3 = vpop.permute.xlu1 %2459 }
 0xe0b   :  { %v2462_v37 = vadd.f32 %v2460_v3, %v2457_v58 }
 0xe0d   :  { %v2463_v41 = vsel %vm710_vm11, %v2462_v37, -inf }
 0xe0e   :  { %2464 = vmax.xlane.f32.xlu1 %v2463_v41 }
 0xe25   :  { %v2502_v63 = vpop.permute.xlu2 %2501 }
 0xe26   :  { %5628 = vmatpush.xpose.msk.msrb.mxu0 %vm710_vm11, %v2502_v63 }
 0xe27   :  { %2495 = vrot.lane.b32.xlu1 %v2276_v9, %s6065_s19 }
 0xe2f   :  { %2493 = vrot.lane.b32.xlu1 %v2274_v36, %s6065_s19 }
 0xe37   :  { %2491 = vrot.lane.b32.xlu1 %v2272_v47, %s6065_s19 }
 0xe3f   :  { %2489 = vrot.lane.b32.xlu1 %v2270_v1, %s6065_s19 }
 0xe45   :  { %v2500_v59 = vpop.permute.xlu0 %2499 }
 0xe46   :  { %5629 = vmatpush.xpose.msk.msrb.mxu0 %vm710_vm11, %v2500_v59  ;;  %v6071_v59 = vmov 32.0  }
 0xe47   :  { %2487 = vrot.lane.b32.xlu1 %v6897_v7, %s6065_s19  ;;  %v2631_v7 = vsel %vm2630_vm7, %v7213_v51, 0.0 }
 0xe4d   :  { %v2498_v27 = vpop.permute.xlu1 %2497 }
 0xe4e   :  { %5630 = vmatpush.xpose.msk.msrb.mxu0 %vm710_vm11, %v2498_v27 }
 0xe4f   :  { %2596 = vrot.lane.b32.xlu1 %v7128_v55, %s6066_s15 }
 0xe57   :  { %2604 = vrot.lane.b32.xlu1 %v7213_v51, %s6065_s19 }
 0xe78   :  { %v2246_v49 = vpop.xlane.xlu1 %2245 }
 0xe79   :  { %v2247_v16 = vsub.f32 %v2243_v40, %v2246_v49 }
 0xe7b   :  { %v2248_v18 = vmul.f32 1.442695, %v2247_v16 }
 0xe7d   :  { %5818 = vpow2.f32 %v2248_v18 }
 0xe81   :  { %v2465_v4 = vpop.xlane.xlu1 %2464  ;;  %2632 = vadd.xlane.f32.xlu1 %v2631_v7 }
 0xe82   :  { %v2466_v23 = vsub.f32 %v2462_v37, %v2465_v4  ;;  %v2637_v37 = vsel %vm2630_vm7, %v7128_v55, 0.0 }
 0xe83   :  { %v7219_v57 = vpop.eup %5818 }
 0xe84   :  { %v2467_v15 = vmul.f32 1.442695, %v2466_v23  ;;  %v2250_v22 = vsel %vm710_vm11, %v7219_v57, 0.0 }
 0xe85   :  { %2251 = vadd.xlane.f32.xlu2 %v2250_v22 }
 0xe86   :  { %5820 = vpow2.f32 %v2467_v15 }
 0xe8c   :  { %v7223_v33 = vpop.eup %5820 }
 0xe8d   :  { %v2469_v29 = vsel %vm710_vm11, %v7223_v33, 0.0 }
 0xe8e   :  { %2470 = vadd.xlane.f32.xlu0 %v2469_v29 }
 0xe99   :  { %v2496_v26 = vpop.permute.xlu1 %2495 }
 0xe9a   :  { %5631 = vmatpush.xpose.msk.msrb.mxu0 %vm710_vm11, %v2496_v26 }
 0xe9d   :  { %2592 = vrot.lane.b32.xlu2 %v7213_v51, %s6066_s15 }
 0xea1   :  { %v2494_v54 = vpop.permute.xlu1 %2493 }
 0xea2   :  { %2594 = vrot.lane.b32.xlu0 %v7232_v56, %s6066_s15  ;;  %5632 = vmatpush.xpose.msk.msrb.mxu0 %vm710_vm11, %v2494_v54 }
 0xea9   :  { %v2492_v24 = vpop.permute.xlu1 %2491 }
 0xeaa   :  { %2606 = vrot.lane.b32.xlu0 %v7232_v56, %s6065_s19  ;;  %5633 = vmatpush.xpose.msk.msrb.mxu0 %vm710_vm11, %v2492_v24 }
 0xeb1   :  { %v2490_v45 = vpop.permute.xlu1 %2489 }
 0xeb2   :  { %2608 = vrot.lane.b32.xlu0 %v7128_v55, %s6065_s19  ;;  %5634 = vmatpush.xpose.msk.msrb.mxu0 %vm710_vm11, %v2490_v45 }
 0xeb9   :  { %v2488_v34 = vpop.permute.xlu1 %2487 }
 0xeba   :  { %5635 = vmatpush.xpose.msk.msrb.mxu0 %vm710_vm11, %v2488_v34 }
 0xebe   :  { %2576 = vmatpush.msra.mxu0 %v6028_v52 }
 0xec0   :  { %2577 = vmatpush.msra.mxu0 %v6029_v8 }
 0xec1   :  { %v7276_v40 = vpop.permute.xlu1 %2596 }
 0xec2   :  { %2578 = vmatpush.msra.mxu0 %v6030_v46  ;;  %v2649_v50 = vsel %vm2630_vm7, %v7276_v40, 0.0 }
 0xec4   :  { %2579 = vmatpush.msra.mxu0 %v6031_v12 }
 0xec6   :  { %2580 = vmatpush.msra.mxu0 %v6032_v53 }
 0xec8   :  { %2581 = vmatpush.msra.mxu0 %v6033_v30 }
 0xec9   :  { %v7294_v41 = vpop.permute.xlu1 %2604 }
 0xeca   :  { %2582 = vmatpush.msra.mxu0 %v6034_v32  ;;  %v2655_v63 = vsel %vm2630_vm7, %v7294_v41, 0.0 }
 0xecc   :  { %2583 = vmatpush.msra.mxu0 %v6035_v48 }
 0xef4   :  { %v2633_v54 = vpop.xlane.xlu1 %2632 }
 0xef8   :  { %v2252_v9 = vpop.xlane.xlu2 %2251 }
 0xef9   :  { %5822 = vrcp.f32 %v2252_v9  ;;  %v2264_v17 = vand.u32 2147483648, %v2252_v9  ;;  %v2262_v20 = vand.u32 2147483647, %v2252_v9  ;;  %vm2258_vm9 = vweird.f32 %v2252_v9 }
 0xefb   :  { %v2265_v21 = vor.u32 1.1754944e-38, %v2264_v17  ;;  %vm2263_vm12 = vcmp.eq.f32.partialorder %v2262_v20, 8.507059e+37 }
 0xeff   :  { %v5823_v36 = vpop.eup %5822 }
 0xf00   :  { %v2254_v47 = vmul.f32 %v5823_v36, %v2252_v9  ;;  %v7268_v1 = vpop.permute.xlu2 %2592  ;;  %vm2259_vm8 = vweird.f32 %v5823_v36 }
 0xf01   :  { %v2471_v6 = vpop.xlane.xlu0 %2470  ;;  %v2643_v31 = vsel %vm2630_vm7, %v7268_v1, 0.0  ;;  %vm2260_vm10 = vmor %vm2258_vm9, %vm2259_vm8 }
 0xf02   :  { %v2255_v2 = vsub.f32 1.0, %v2254_v47  ;;  %5824 = vrcp.f32 %v2471_v6  ;;  %2644 = vadd.xlane.f32.xlu2 %v2643_v31  ;;  %v2483_v38 = vand.u32 2147483648, %v2471_v6  ;;  %v2481_v0 = vand.u32 2147483647, %v2471_v6 }
 0xf03   :  { %vm2477_vm14 = vweird.f32 %v2471_v6  ;;  %5826 = vrcp.f32 %v6071_v59 }
 0xf04   :  { %v2256_v35 = vmul.f32 %v5823_v36, %v2255_v2  ;;  %v2484_v19 = vor.u32 1.1754944e-38, %v2483_v38  ;;  %vm2482_vm0 = vcmp.eq.f32.partialorder %v2481_v0, 8.507059e+37 }
 0xf06   :  { %v2257_v10 = vadd.f32 %v5823_v36, %v2256_v35 }
 0xf08   :  { %v5825_v39 = vpop.eup %5824  ;;  %v2261_v14 = vsel %vm2260_vm10, %v5823_v36, %v2257_v10 }
 0xf09   :  { %v2473_v43 = vmul.f32 %v5825_v39, %v2471_v6  ;;  %v2266_v42 = vsel %vm2263_vm12, %v2265_v21, %v2261_v14  ;;  %vm2478_vm13 = vweird.f32 %v5825_v39  ;;  %v5827_v49 = vpop.eup %5826 }
 0xf0a   :  { %2635 = vadd.xlane.f32.xlu2 %v2634_v5  ;;  %v2267_v13 = vmul.f32 %v7219_v57, %v2266_v42  ;;  %vm2479_vm15 = vmor %vm2477_vm14, %vm2478_vm13  ;;  %v2680_v18 = vmul.f32 32.0, %v5827_v49 }
 0xf0b   :  { %v2474_v61 = vsub.f32 1.0, %v2473_v43 }
 0xf0c   :  { %5619 = vmatmul.msk.f32.vlgmr.msra.gmra.mxu1 %vm710_vm11, %v2267_v13  ;;  %v2681_v7 = vsub.f32 1.0, %v2680_v18 }
 0xf0d   :  { %v2475_v62 = vmul.f32 %v5825_v39, %v2474_v61 }
 0xf0e   :  { %v2682_v4 = vmul.f32 %v5827_v49, %v2681_v7 }
 0xf0f   :  { %v2476_v11 = vadd.f32 %v5825_v39, %v2475_v62 }
 0xf10   :  { %v2683_v23 = vadd.f32 %v5827_v49, %v2682_v4 }
 0xf11   :  { %v2480_v28 = vsel %vm2479_vm15, %v5825_v39, %v2476_v11 }
 0xf12   :  { %2650 = vadd.xlane.f32.xlu2 %v2649_v50  ;;  %v2485_v60 = vsel %vm2482_vm0, %v2484_v19, %v2480_v28 }
 0xf13   :  { %v2486_v44 = vmul.f32 %v7223_v33, %v2485_v60 }
 0xf14   :  { %v7281_v58 = vpop.permute.xlu0 %2594 }
 0xf15   :  { %5636 = vmatmul.msk.f32.vlgmr.msrb.gmra.mxu0 %vm710_vm11, %v2486_v44  ;;  %v2646_v3 = vsel %vm2630_vm7, %v7281_v58, 0.0  ;;  %vm2684_vm11 = vweird.f32 %v5827_v49 }
 0xf16   :  { %2647 = vadd.xlane.f32.xlu0 %v2646_v3  ;;  %v7302_v57 = vsel %vm2684_vm11, %v5827_v49, %v2683_v23 }
 0xf17   :  { %v2686_v45 = vmul.f32 %v7302_v57, %v2633_v54 }
 0xf19   :  { %v7313_v52 = vsub.f32 %v7213_v51, %v2686_v45 }
 0xf1b   :  { %v2718_v53 = vmul.f32 %v7313_v52, %v7313_v52 }
 0xf1c   :  { %v7298_v27 = vpop.permute.xlu0 %2606 }
 0xf1d   :  { %v2658_v16 = vsel %vm2630_vm7, %v7298_v27, 0.0  ;;  %v2734_v9 = vsel %vm2630_vm7, %v2718_v53, 0.0 }
 0xf1e   :  { %2638 = vadd.xlane.f32.xlu0 %v2637_v37 }
 0xf24   :  { %v2609_v34 = vpop.permute.xlu0 %2608 }
 0xf25   :  { %v2661_v8 = vsel %vm2630_vm7, %v2609_v34, 0.0 }
 0xf2a   :  { %2616 = vrot.lane.b32.xlu2 %v7213_v51, %s6070_s4 }
 0xf32   :  { %2618 = vrot.lane.b32.xlu0 %v7232_v56, %s6070_s4 }
 0xf3a   :  { %2620 = vrot.lane.b32.xlu0 %v7128_v55, %s6070_s4 }
 0xf53   :  { %2656 = vadd.xlane.f32.xlu2 %v2655_v63 }
 0xf64   :  { %2659 = vadd.xlane.f32.xlu0 %v2658_v16 }
 0xf75   :  { %v2645_v15 = vpop.xlane.xlu2 %2644 }
 0xf76   :  { %v2690_v22 = vmul.f32 %v7302_v57, %v2645_v15 }
 0xf78   :  { %v7306_v33 = vsub.f32 %v7268_v1, %v2690_v22 }
 0xf7a   :  { %v2722_v29 = vmul.f32 %v7306_v33, %v7306_v33 }
 0xf7c   :  { %v2746_v26 = vsel %vm2630_vm7, %v2722_v29, 0.0 }
 0xf7d   :  { %2747 = vadd.xlane.f32.xlu2 %v2746_v26  ;;  %v2636_v24 = vpop.xlane.xlu2 %2635 }
 0xf7e   :  { %v2687_v12 = vmul.f32 %v7302_v57, %v2636_v24 }
 0xf80   :  { %v7321_v48 = vsub.f32 %v7232_v56, %v2687_v12 }
 0xf82   :  { %v2719_v1 = vmul.f32 %v7321_v48, %v7321_v48 }
 0xf84   :  { %v2737_v35 = vsel %vm2630_vm7, %v2719_v1, 0.0 }
 0xf85   :  { %2662 = vadd.xlane.f32.xlu2 %v2661_v8  ;;  %v2651_v46 = vpop.xlane.xlu2 %2650 }
 0xf86   :  { %v2692_v47 = vmul.f32 %v7302_v57, %v2651_v46 }
 0xf88   :  { %v7331_v56 = vsub.f32 %v7276_v40, %v2692_v47 }
 0xf89   :  { %v2319_v30 = vpop.f32.mrf.mxu1  ;;  %v2648_v32 = vpop.xlane.xlu0 %2647 }
 0xf8a   :  { %5638 = vmatmul.msk.f32.vlgmr.msra.gmra.mxu0 %vm1110_vm4, %v2319_v30  ;;  %v2724_v21 = vmul.f32 %v7331_v56, %v7331_v56  ;;  %v2691_v23 = vmul.f32 %v7302_v57, %v2648_v32 }
 0xf8c   :  { %v2752_v39 = vsel %vm2630_vm7, %v2724_v21, 0.0  ;;  %v7385_v15 = vsub.f32 %v7281_v58, %v2691_v23 }
 0xf8d   :  { %v2617_v51 = vpop.permute.xlu2 %2616  ;;  %2735 = vadd.xlane.f32.xlu2 %v2734_v9 }
 0xf8e   :  { %v2667_v36 = vsel %vm2630_vm7, %v2617_v51, 0.0  ;;  %v2723_v22 = vmul.f32 %v7385_v15, %v7385_v15 }
 0xf8f   :  { %2668 = vadd.xlane.f32.xlu0 %v2667_v36 }
 0xf90   :  { %v2749_v29 = vsel %vm2630_vm7, %v2723_v22, 0.0 }
 0xf91   :  { %v2639_v6 = vpop.xlane.xlu0 %2638 }
 0xf92   :  { %v2688_v31 = vmul.f32 %v7302_v57, %v2639_v6  ;;  %v2539_v2 = vpop.f32.mrf.mxu0 }
 0xf93   :  { %5637 = vmatmul.msk.f32.vlgmr.msrb.gmra.mxu1 %vm1110_vm4, %v2539_v2 }
 0xf94   :  { %v7334_v17 = vsub.f32 %v7128_v55, %v2688_v31 }
 0xf95   :  { %2738 = vadd.xlane.f32.xlu2 %v2737_v35 }
 0xf96   :  { %v2720_v20 = vmul.f32 %v7334_v17, %v7334_v17 }
 0xf98   :  { %v2740_v10 = vsel %vm2630_vm7, %v2720_v20, 0.0 }
 0xf99   :  { %2741 = vadd.xlane.f32.xlu0 %v2740_v10 }
 0xf9d   :  { %2753 = vadd.xlane.f32.xlu2 %v2752_v39 }
 0xfa4   :  { %v7343_v14 = vpop.permute.xlu0 %2618 }
 0xfa5   :  { %v2670_v55 = vsel %vm2630_vm7, %v7343_v14, 0.0 }
 0xfa6   :  { %2671 = vadd.xlane.f32.xlu2 %v2670_v55  ;;  %v7421_v55 = vld [vmem:[%s8990_s5] ss:$0 sm:$0xff]  ;;  %s6073_s5 = smov 48  }
 0xfac   :  { %v7347_v43 = vpop.permute.xlu0 %2620 }
 0xfad   :  { %v2673_v5 = vsel %vm2630_vm7, %v7347_v43, 0.0 }
 0xfae   :  { %2674 = vadd.xlane.f32.xlu0 %v2673_v5 }
 0xfc6   :  { %v2657_v42 = vpop.xlane.xlu2 %2656 }
 0xfc7   :  { %v2694_v13 = vmul.f32 %v7302_v57, %v2657_v42 }
 0xfc9   :  { %v7353_v61 = vsub.f32 %v7294_v41, %v2694_v13  ;;  %v7428_v13 = vld [vmem:[%s8991_s6] ss:$0 sm:$0xff] }
 0xfcb   :  { %v2726_v38 = vmul.f32 %v7353_v61, %v7353_v61 }
 0xfcd   :  { %v2758_v62 = vsel %vm2630_vm7, %v2726_v38, 0.0 }
 0xfce   :  { %2759 = vadd.xlane.f32.xlu2 %v2758_v62 }
 0xfd7   :  { %v2660_v0 = vpop.xlane.xlu0 %2659 }
 0xfd8   :  { %v2695_v40 = vmul.f32 %v7302_v57, %v2660_v0 }
 0xfda   :  { %v7360_v11 = vsub.f32 %v7298_v27, %v2695_v40 }
 0xfdc   :  { %v2727_v19 = vmul.f32 %v7360_v11, %v7360_v11 }
 0xfde   :  { %v2761_v28 = vsel %vm2630_vm7, %v2727_v19, 0.0 }
 0xfdf   :  { %2762 = vadd.xlane.f32.xlu0 %v2761_v28 }
 0xff0   :  { %v7365_v50 = vpop.xlane.xlu2 %2747 }
 0xff1   :  { %v2786_v62 = vmul.f32 %v7365_v50, %v7302_v57 }
 0xff3   :  { %v2802_v19 = vadd.f32 1e-05, %v2786_v62 }
 0xff5   :  { %vm2860_vm8 = vweird.f32 %v2802_v19 }
 0xff8   :  { %v2663_v60 = vpop.xlane.xlu2 %2662 }
 0xff9   :  { %v2696_v44 = vmul.f32 %v7302_v57, %v2663_v60 }
 0xffb   :  { %v7368_v3 = vsub.f32 %v2609_v34, %v2696_v44 }
 0xffd   :  { %v2728_v37 = vmul.f32 %v7368_v3, %v7368_v3 }
 0xfff   :  { %v2764_v41 = vsel %vm2630_vm7, %v2728_v37, 0.0 }
0x1000   :  { %2765 = vadd.xlane.f32.xlu2 %v2764_v41  ;;  %v2736_v24 = vpop.xlane.xlu2 %2735 }
0x1001   :  { %v2782_v45 = vmul.f32 %v2736_v24, %v7302_v57 }
0x1002   :  { %v2669_v63 = vpop.xlane.xlu0 %2668 }
0x1003   :  { %v2698_v59 = vmul.f32 %v7302_v57, %v2669_v63  ;;  %v2798_v34 = vadd.f32 1e-05, %v2782_v45 }
0x1005   :  { %v7374_v27 = vsub.f32 %v2617_v51, %v2698_v59  ;;  %5828 = vrsqrt.f32 %v2798_v34  ;;  %vm2820_vm2 = vweird.f32 %v2798_v34 }
0x1006   :  { %5830 = vrsqrt.f32 %v2802_v19 }
0x1007   :  { %v2730_v49 = vmul.f32 %v7374_v27, %v7374_v27  ;;  %v2585_v18 = vpop.f32.mrf.mxu0 }
0x1008   :  { %v2739_v8 = vpop.xlane.xlu2 %2738 }
0x1009   :  { %v2770_v16 = vsel %vm2630_vm7, %v2730_v49, 0.0  ;;  %v2783_v0 = vmul.f32 %v2739_v8, %v7302_v57 }
0x100a   :  { %2771 = vadd.xlane.f32.xlu0 %v2770_v16 }
0x100b   :  { %v5829_v46 = vpop.eup %5828  ;;  %v2799_v28 = vadd.f32 1e-05, %v2783_v0 }
0x100c   :  { %v2815_v12 = vmul.f32 %v5829_v46, %v2798_v34  ;;  %vm2821_vm1 = vweird.f32 %v5829_v46  ;;  %v5831_v41 = vpop.eup %5830 }
0x100d   :  { %vm2822_vm3 = vmor %vm2820_vm2, %vm2821_vm1  ;;  %5832 = vrsqrt.f32 %v2799_v28  ;;  %v2855_v59 = vmul.f32 %v5831_v41, %v2802_v19  ;;  %vm2861_vm5 = vweird.f32 %v5831_v41  ;;  %vm2830_vm10 = vweird.f32 %v2799_v28 }
0x100e   :  { %v2816_v32 = vmul.f32 %v5829_v46, %v2815_v12  ;;  %vm2862_vm9 = vmor %vm2860_vm8, %vm2861_vm5 }
0x100f   :  { %v2856_v22 = vmul.f32 %v5831_v41, %v2855_v59 }
0x1010   :  { %v2562_v7 = vpop.f32.mrf.mxu1  ;;  %v2754_v53 = vpop.xlane.xlu2 %2753  ;;  %v2817_v9 = vmul.f32 0.5, %v2816_v32 }
0x1011   :  { %v7379_v4 = vadd.f32 %v2585_v18, %v2562_v7  ;;  %v2788_v60 = vmul.f32 %v2754_v53, %v7302_v57  ;;  %v2857_v8 = vmul.f32 0.5, %v2856_v22 }
0x1012   :  { %v2818_v36 = vsub.f32 1.5, %v2817_v9 }
0x1013   :  { %2598 = vrot.lane.b32.xlu1 %v7379_v4, %s6066_s15  ;;  %v2640_v58 = vsel %vm2630_vm7, %v7379_v4, 0.0  ;;  %v2804_v37 = vadd.f32 1e-05, %v2788_v60  ;;  %v5833_v63 = vpop.eup %5832 }
0x1014   :  { %v2819_v6 = vmul.f32 %v5829_v46, %v2818_v36  ;;  %v2825_v16 = vmul.f32 %v5833_v63, %v2799_v28  ;;  %vm2831_vm6 = vweird.f32 %v5833_v63 }
0x1015   :  { %5834 = vrsqrt.f32 %v2804_v37  ;;  %vm2832_vm12 = vmor %vm2830_vm10, %vm2831_vm6  ;;  %vm2880_vm14 = vweird.f32 %v2804_v37 }
0x1016   :  { %v2823_v35 = vsel %vm2822_vm3, %v5829_v46, %v2819_v6 }
0x1017   :  { %v2974_v21 = vmul.f32 %v2823_v35, %v7313_v52 }
0x1019   :  { %v2672_v1 = vpop.xlane.xlu2 %2671  ;;  %v2993_v5 = vmul.f32 %v7421_v55, %v2974_v21 }
0x101a   :  { %v2699_v31 = vmul.f32 %v7302_v57, %v2672_v1 }
0x101b   :  { %v3012_v52 = vadd.f32 %v7428_v13, %v2993_v5  ;;  %v5835_v45 = vpop.eup %5834 }
0x101c   :  { %v7411_v20 = vsub.f32 %v7343_v14, %v2699_v31  ;;  %v2742_v14 = vpop.xlane.xlu0 %2741  ;;  %v2875_v53 = vmul.f32 %v5835_v45, %v2804_v37  ;;  %vm2881_vm13 = vweird.f32 %v5835_v45 }
0x101d   :  { %v2784_v49 = vmul.f32 %v2742_v14, %v7302_v57  ;;  %vm2882_vm15 = vmor %vm2880_vm14, %vm2881_vm13 }
0x101e   :  { %v2731_v39 = vmul.f32 %v7411_v20, %v7411_v20  ;;  %v2876_v36 = vmul.f32 %v5835_v45, %v2875_v53 }
0x1020   :  { %v2773_v42 = vsel %vm2630_vm7, %v2731_v39, 0.0  ;;  %v2877_v35 = vmul.f32 0.5, %v2876_v36 }
0x1022   :  { %v2878_v5 = vsub.f32 1.5, %v2877_v35 }
0x1024   :  { %v7432_v38 = vpop.xlane.xlu0 %2674  ;;  %v2879_v62 = vmul.f32 %v5835_v45, %v2878_v5 }
0x1026   :  { %v2883_v28 = vsel %vm2882_vm15, %v5835_v45, %v2879_v62 }
0x103d   :  { %2750 = vadd.xlane.f32.xlu1 %v2749_v29  ;;  %v2800_v29 = vadd.f32 1e-05, %v2784_v49 }
0x103f   :  { %5836 = vrsqrt.f32 %v2800_v29  ;;  %vm2840_vm11 = vweird.f32 %v2800_v29 }
0x1052   :  { %v7437_v40 = vpop.xlane.xlu0 %2762 }
0x1056   :  { %2610 = vrot.lane.b32.xlu1 %v7379_v4, %s6065_s19 }
0x105e   :  { %2622 = vrot.lane.b32.xlu1 %v7379_v4, %s6070_s4 }
0x107d   :  { %v7440_v44 = vpop.xlane.xlu0 %2771 }
0x1085   :  { %v7394_v26 = vpop.permute.xlu1 %2598 }
0x1086   :  { %v2652_v54 = vsel %vm2630_vm7, %v7394_v26, 0.0 }
0x1087   :  { %2653 = vadd.xlane.f32.xlu0 %v2652_v54 }
0x1088   :  { %2641 = vadd.xlane.f32.xlu1 %v2640_v58  ;;  %v2826_v58 = vmul.f32 %v5833_v63, %v2825_v16  ;;  %v2760_v16 = vpop.xlane.xlu2 %2759 }
0x108a   :  { %v2827_v12 = vmul.f32 0.5, %v2826_v58 }
0x108c   :  { %v2828_v9 = vsub.f32 1.5, %v2827_v12 }
0x108e   :  { %v2829_v6 = vmul.f32 %v5833_v63, %v2828_v9 }
0x1090   :  { %v2833_v21 = vsel %vm2832_vm12, %v5833_v63, %v2829_v6  ;;  %v2980_v63 = vmul.f32 %v2883_v28, %v7331_v56  ;;  %v2766_v62 = vpop.xlane.xlu2 %2765 }
0x1091   :  { %v2975_v14 = vmul.f32 %v2833_v21, %v7321_v48 }
0x1092   :  { %v2999_v48 = vmul.f32 %v7421_v55, %v2980_v63  ;;  %v2794_v63 = vmul.f32 %v7440_v44, %v7302_v57 }
0x1093   :  { %v2994_v19 = vmul.f32 %v7421_v55, %v2975_v14 }
0x1095   :  { %v3013_v59 = vadd.f32 %v7428_v13, %v2994_v19 }
0x10b0   :  { %v7401_v30 = vpop.xlane.xlu1 %2750 }
0x10c8   :  { %v7403_v51 = vpop.permute.xlu1 %2610 }
0x10c9   :  { %v2664_v47 = vsel %vm2630_vm7, %v7403_v51, 0.0 }
0x10ca   :  { %2665 = vadd.xlane.f32.xlu0 %v2664_v47  ;;  %v5837_v47 = vpop.eup %5836 }
0x10cb   :  { %v2835_v31 = vmul.f32 %v5837_v47, %v2800_v29  ;;  %vm2841_vm0 = vweird.f32 %v5837_v47 }
0x10cc   :  { %vm2842_vm1 = vmor %vm2840_vm11, %vm2841_vm0 }
0x10cd   :  { %v2836_v39 = vmul.f32 %v5837_v47, %v2835_v31 }
0x10d0   :  { %v7408_v2 = vpop.permute.xlu1 %2622 }
0x10d1   :  { %v2676_v10 = vsel %vm2630_vm7, %v7408_v2, 0.0 }
0x10d2   :  { %2677 = vadd.xlane.f32.xlu1 %v2676_v10 }
0x10da   :  { %2774 = vadd.xlane.f32.xlu1 %v2773_v42 }
0x10de   :  { %3032 = vrot.lane.b32.xlu0 %v3012_v52, %s6072_s2  ;;  %v2837_v52 = vmul.f32 0.5, %v2836_v39 }
0x10e0   :  { %v2838_v60 = vsub.f32 1.5, %v2837_v52 }
0x10fa   :  { %v2654_v50 = vpop.xlane.xlu0 %2653 }
0x10fb   :  { %v2693_v18 = vmul.f32 %v7302_v57, %v2654_v50  ;;  %v2642_v7 = vpop.xlane.xlu1 %2641  ;;  %v3018_v50 = vadd.f32 %v7428_v13, %v2999_v48  ;;  %v7513_v48 = vadd.f32 1e-05, %v2794_v63 }
0x10fc   :  { %v2689_v23 = vmul.f32 %v7302_v57, %v2642_v7 }
0x10fd   :  { %v7449_v24 = vsub.f32 %v7394_v26, %v2693_v18  ;;  %v2790_v18 = vmul.f32 %v2760_v16, %v7302_v57 }
0x10fe   :  { %v7446_v54 = vsub.f32 %v7379_v4, %v2689_v23  ;;  %v2858_v4 = vsub.f32 1.5, %v2857_v8  ;;  %v2787_v23 = vmul.f32 %v7401_v30, %v7302_v57 }
0x10ff   :  { %v2725_v32 = vmul.f32 %v7449_v24, %v7449_v24  ;;  %v2806_v22 = vadd.f32 1e-05, %v2790_v18 }
0x1100   :  { %v2721_v34 = vmul.f32 %v7446_v54, %v7446_v54  ;;  %v2859_v1 = vmul.f32 %v5831_v41, %v2858_v4  ;;  %v2803_v29 = vadd.f32 1e-05, %v2787_v23 }
0x1101   :  { %v2755_v26 = vsel %vm2630_vm7, %v2725_v32, 0.0  ;;  %5838 = vrsqrt.f32 %v2806_v22  ;;  %vm2900_vm3 = vweird.f32 %v2806_v22 }
0x1102   :  { %v2743_v46 = vsel %vm2630_vm7, %v2721_v34, 0.0  ;;  %v2863_v10 = vsel %vm2862_vm9, %v5831_v41, %v2859_v1  ;;  %5840 = vrsqrt.f32 %v2803_v29  ;;  %vm2870_vm8 = vweird.f32 %v2803_v29 }
0x1103   :  { %2744 = vadd.xlane.f32.xlu2 %v2743_v46  ;;  %v2978_v42 = vmul.f32 %v2863_v10, %v7306_v33  ;;  %v2839_v33 = vmul.f32 %v5837_v47, %v2838_v60 }
0x1105   :  { %v2997_v0 = vmul.f32 %v7421_v55, %v2978_v42  ;;  %v2843_v37 = vsel %vm2842_vm1, %v5837_v47, %v2839_v33 }
0x1106   :  { %v2976_v49 = vmul.f32 %v2843_v37, %v7334_v17  ;;  %v2700_v17 = vmul.f32 %v7302_v57, %v7432_v38 }
0x1107   :  { %v3016_v41 = vadd.f32 %v7428_v13, %v2997_v0  ;;  %v5839_v58 = vpop.eup %5838  ;;  %v2792_v0 = vmul.f32 %v2766_v62, %v7302_v57 }
0x1108   :  { %2756 = vadd.xlane.f32.xlu0 %v2755_v26  ;;  %v2995_v56 = vmul.f32 %v7421_v55, %v2976_v49  ;;  %v5841_v45 = vpop.eup %5840  ;;  %v7479_v34 = vsub.f32 %v7347_v43, %v2700_v17  ;;  %v2895_v8 = vmul.f32 %v5839_v58, %v2806_v22  ;;  %vm2901_vm2 = vweird.f32 %v5839_v58 }
0x1109   :  { %v2865_v46 = vmul.f32 %v5841_v45, %v2803_v29  ;;  %vm2871_vm5 = vweird.f32 %v5841_v45  ;;  %vm2902_vm6 = vmor %vm2900_vm3, %vm2901_vm2 }
0x110a   :  { %v3014_v7 = vadd.f32 %v7428_v13, %v2995_v56  ;;  %v2896_v30 = vmul.f32 %v5839_v58, %v2895_v8  ;;  %v2732_v32 = vmul.f32 %v7479_v34, %v7479_v34  ;;  %vm2872_vm9 = vmor %vm2870_vm8, %vm2871_vm5 }
0x110b   :  { %v2866_v9 = vmul.f32 %v5841_v45, %v2865_v46 }
0x110c   :  { %v2897_v36 = vmul.f32 0.5, %v2896_v30  ;;  %v2776_v43 = vsel %vm2630_vm7, %v2732_v32, 0.0 }
0x110d   :  { %v2867_v47 = vmul.f32 0.5, %v2866_v9 }
0x110e   :  { %v2898_v1 = vsub.f32 1.5, %v2897_v36 }
0x110f   :  { %v2868_v6 = vsub.f32 1.5, %v2867_v47 }
0x1110   :  { %v2899_v31 = vmul.f32 %v5839_v58, %v2898_v1 }
0x1111   :  { %v2869_v35 = vmul.f32 %v5841_v45, %v2868_v6 }
0x1113   :  { %v2873_v10 = vsel %vm2872_vm9, %v5841_v45, %v2869_v35  ;;  %vm2940_vm9 = vweird.f32 %v7513_v48 }
0x1114   :  { %v2979_v39 = vmul.f32 %v2873_v10, %v7385_v15  ;;  %v7502_v15 = vadd.f32 1e-05, %v2792_v0 }
0x1116   :  { %v2998_v42 = vmul.f32 %v7421_v55, %v2979_v39  ;;  %5842 = vrsqrt.f32 %v7502_v15  ;;  %vm2920_vm2 = vweird.f32 %v7502_v15 }
0x1118   :  { %v3017_v52 = vadd.f32 %v7428_v13, %v2998_v42 }
0x111b   :  { %3052 = vrot.lane.b32.xlu2 %v3016_v41, %s6073_s5 }
0x111c   :  { %3034 = vrot.lane.b32.xlu0 %v3013_v59, %s6072_s2  ;;  %v7517_v56 = vpop.eup %5842 }
0x111d   :  { %v2915_v23 = vmul.f32 %v7517_v56, %v7502_v15  ;;  %vm2921_vm0 = vweird.f32 %v7517_v56 }
0x111e   :  { %vm2922_vm3 = vmor %vm2920_vm2, %vm2921_vm0 }
0x111f   :  { %v2916_v8 = vmul.f32 %v7517_v56, %v2915_v23 }
0x1124   :  { %3056 = vrot.lane.b32.xlu0 %v3018_v50, %s6073_s5 }
0x112c   :  { %3036 = vrot.lane.b32.xlu0 %v3014_v7, %s6072_s2 }
0x113d   :  { %v2666_v12 = vpop.xlane.xlu0 %2665 }
0x113e   :  { %v2697_v53 = vmul.f32 %v7302_v57, %v2666_v12 }
0x1140   :  { %v7485_v4 = vsub.f32 %v7403_v51, %v2697_v53  ;;  %v2903_v51 = vsel %vm2902_vm6, %v5839_v58, %v2899_v31 }
0x1141   :  { %v2982_v21 = vmul.f32 %v2903_v51, %v7353_v61  ;;  %v2791_v61 = vmul.f32 %v7437_v40, %v7302_v57 }
0x1142   :  { %v2729_v38 = vmul.f32 %v7485_v4, %v7485_v4 }
0x1143   :  { %v3001_v5 = vmul.f32 %v7421_v55, %v2982_v21  ;;  %v7506_v28 = vadd.f32 1e-05, %v2791_v61 }
0x1144   :  { %2777 = vadd.xlane.f32.xlu2 %v2776_v43  ;;  %v2767_v26 = vsel %vm2630_vm7, %v2729_v38, 0.0  ;;  %v2917_v38 = vmul.f32 0.5, %v2916_v8  ;;  %v7580_v8 = vld [vmem:[%s8985_s0] sm:$0xff] }
0x1145   :  { %2768 = vadd.xlane.f32.xlu1 %v2767_v26  ;;  %v3020_v14 = vadd.f32 %v7428_v13, %v3001_v5  ;;  %v2678_v19 = vpop.xlane.xlu1 %2677  ;;  %5844 = vrsqrt.f32 %v7506_v28  ;;  %vm2910_vm5 = vweird.f32 %v7506_v28 }
0x1146   :  { %v2701_v40 = vmul.f32 %v7302_v57, %v2678_v19  ;;  %v2918_v31 = vsub.f32 1.5, %v2917_v38 }
0x1148   :  { %v7523_v44 = vsub.f32 %v7408_v2, %v2701_v40 }
0x114a   :  { %v2733_v45 = vmul.f32 %v7523_v44, %v7523_v44 }
0x114b   :  { %v7519_v18 = vpop.eup %5844 }
0x114c   :  { %v2905_v29 = vmul.f32 %v7519_v18, %v7506_v28  ;;  %v2779_v9 = vsel %vm2630_vm7, %v2733_v45, 0.0  ;;  %vm2911_vm1 = vweird.f32 %v7519_v18 }
0x114d   :  { %v2775_v49 = vpop.xlane.xlu1 %2774  ;;  %vm2912_vm6 = vmor %vm2910_vm5, %vm2911_vm1 }
0x114e   :  { %v2795_v7 = vmul.f32 %v2775_v49, %v7302_v57  ;;  %v2906_v53 = vmul.f32 %v7519_v18, %v2905_v29 }
0x1150   :  { %v7504_v60 = vpop.permute.xlu0 %3032  ;;  %v7530_v58 = vadd.f32 1e-05, %v2795_v7  ;;  %v2907_v47 = vmul.f32 0.5, %v2906_v53 }
0x1152   :  { %v2908_v5 = vsub.f32 1.5, %v2907_v47 }
0x115c   :  { %3072 = vrot.lane.b32.xlu2 %v3020_v14, %s6068_s30 }
0x115e   :  { %3054 = vrot.lane.b32.xlu1 %v3017_v52, %s6073_s5  ;;  %v2919_v52 = vmul.f32 %v7517_v56, %v2918_v31 }
0x1160   :  { %v2923_v63 = vsel %vm2922_vm3, %v7517_v56, %v2919_v52 }
0x1161   :  { %v2984_v49 = vmul.f32 %v2923_v63, %v7368_v3 }
0x1163   :  { %v3003_v56 = vmul.f32 %v7421_v55, %v2984_v49 }
0x1165   :  { %v3022_v23 = vadd.f32 %v7428_v13, %v3003_v56  ;;  %v3165_v56 = vld [vmem:[%s8992_s7 + $0x8] sm:$0xff] }
0x1176   :  { %v2745_v41 = vpop.xlane.xlu2 %2744 }
0x1177   :  { %v2785_v59 = vmul.f32 %v2745_v41, %v7302_v57 }
0x1179   :  { %v2801_v33 = vadd.f32 1e-05, %v2785_v59 }
0x117b   :  { %5846 = vrsqrt.f32 %v2801_v33  ;;  %v2757_v37 = vpop.xlane.xlu0 %2756  ;;  %vm2850_vm12 = vweird.f32 %v2801_v33 }
0x117c   :  { %v2789_v50 = vmul.f32 %v2757_v37, %v7302_v57  ;;  %5848 = vrsqrt.f32 %v7513_v48 }
0x117e   :  { %v2805_v16 = vadd.f32 1e-05, %v2789_v50 }
0x1180   :  { %5850 = vrsqrt.f32 %v2805_v16  ;;  %vm2890_vm15 = vweird.f32 %v2805_v16 }
0x1181   :  { %v5847_v22 = vpop.eup %5846  ;;  %5852 = vrsqrt.f32 %v7530_v58 }
0x1182   :  { %v2845_v17 = vmul.f32 %v5847_v22, %v2801_v33  ;;  %v7535_v46 = vpop.eup %5848  ;;  %vm2851_vm10 = vweird.f32 %v5847_v22 }
0x1183   :  { %v2935_v36 = vmul.f32 %v7535_v46, %v7513_v48  ;;  %vm2852_vm13 = vmor %vm2850_vm12, %vm2851_vm10  ;;  %vm2941_vm8 = vweird.f32 %v7535_v46 }
0x1184   :  { %v2846_v2 = vmul.f32 %v5847_v22, %v2845_v17  ;;  %vm2942_vm10 = vmor %vm2940_vm9, %vm2941_vm8  ;;  %v3053_v17 = vpop.permute.xlu2 %3052 }
0x1185   :  { %v2936_v35 = vmul.f32 %v7535_v46, %v2935_v36 }
0x1186   :  { %v5851_v12 = vpop.eup %5850  ;;  %v2847_v30 = vmul.f32 0.5, %v2846_v2  ;;  %v7583_v2 = vadd.f32 %v7580_v8, %v3053_v17 }
0x1187   :  { %v2885_v32 = vmul.f32 %v5851_v12, %v2805_v16  ;;  %v5853_v10 = vpop.eup %5852  ;;  %vm2891_vm14 = vweird.f32 %v5851_v12  ;;  %v2937_v62 = vmul.f32 0.5, %v2936_v35 }
0x1188   :  { %v2848_v43 = vsub.f32 1.5, %v2847_v30  ;;  %2780 = vadd.xlane.f32.xlu1 %v2779_v9  ;;  %v2945_v0 = vmul.f32 %v5853_v10, %v7530_v58  ;;  %vm2892_vm11 = vmor %vm2890_vm15, %vm2891_vm14  ;;  %vm2951_vm12 = vweird.f32 %v5853_v10 }
0x1189   :  { %v2886_v26 = vmul.f32 %v5851_v12, %v2885_v32  ;;  %v2938_v59 = vsub.f32 1.5, %v2937_v62 }
0x118a   :  { %v2849_v1 = vmul.f32 %v5847_v22, %v2848_v43  ;;  %v2946_v33 = vmul.f32 %v5853_v10, %v2945_v0 }
0x118b   :  { %v2887_v6 = vmul.f32 0.5, %v2886_v26  ;;  %v2939_v15 = vmul.f32 %v7535_v46, %v2938_v59  ;;  %v7623_v59 = vld [vmem:[%s8985_s0 + $0x20] sm:$0xff] }
0x118c   :  { %v2853_v51 = vsel %vm2852_vm13, %v5847_v22, %v2849_v1  ;;  %vm2950_vm13 = vweird.f32 %v7530_v58 }
0x118d   :  { %v2977_v21 = vmul.f32 %v2853_v51, %v7446_v54  ;;  %v2888_v39 = vsub.f32 1.5, %v2887_v6  ;;  %v2909_v54 = vmul.f32 %v7519_v18, %v2908_v5  ;;  %v2943_v16 = vsel %vm2942_vm10, %v7535_v46, %v2939_v15  ;;  %vm2952_vm14 = vmor %vm2950_vm13, %vm2951_vm12 }
0x118e   :  { %v2986_v7 = vmul.f32 %v2943_v16, %v7374_v27  ;;  %v3035_v51 = vpop.permute.xlu0 %3034  ;;  %v3164_v16 = vld [vmem:[%s8992_s7] sm:$0xff] }
0x118f   :  { %v2889_v42 = vmul.f32 %v5851_v12, %v2888_v39  ;;  %v2996_v14 = vmul.f32 %v7421_v55, %v2977_v21  ;;  %v2913_v37 = vsel %vm2912_vm6, %v7519_v18, %v2909_v54 }
0x1190   :  { %v2983_v50 = vmul.f32 %v2913_v37, %v7360_v11  ;;  %v3005_v48 = vmul.f32 %v7421_v55, %v2986_v7  ;;  %v7653_v7 = vld [vmem:[%s8985_s0 + $0x30] sm:$0xff] }
0x1191   :  { %v2893_v61 = vsel %vm2892_vm11, %v5851_v12, %v2889_v42  ;;  %v3015_v19 = vadd.f32 %v7428_v13, %v2996_v14 }
0x1192   :  { %v2981_v41 = vmul.f32 %v2893_v61, %v7449_v24  ;;  %v2947_v24 = vmul.f32 0.5, %v2946_v33  ;;  %v3002_v3 = vmul.f32 %v7421_v55, %v2983_v50  ;;  %v3024_v27 = vadd.f32 %v7428_v13, %v3005_v48  ;;  %v7605_v61 = vld [vmem:[%s8985_s0 + $0x10] sm:$0xff]  ;;  %v3167_v50 = vld [vmem:[%s8992_s7 + $0x18] sm:$0xff] }
0x1193   :  { %3038 = vrot.lane.b32.xlu0 %v3015_v19, %s6072_s2  ;;  %v7618_v63 = vadd.f32 %v7605_v61, %v3035_v51  ;;  %3252 = vmatpush.msra.mxu1 %v3167_v50 }
0x1194   :  { %v3000_v40 = vmul.f32 %v7421_v55, %v2981_v41  ;;  %v2948_v18 = vsub.f32 1.5, %v2947_v24  ;;  %v3021_v11 = vadd.f32 %v7428_v13, %v3002_v3 }
0x1196   :  { %v3019_v28 = vadd.f32 %v7428_v13, %v3000_v40  ;;  %v2949_v22 = vmul.f32 %v5853_v10, %v2948_v18 }
0x1198   :  { %v2953_v29 = vsel %vm2952_vm14, %v5853_v10, %v2949_v22 }
0x1199   :  { %v2987_v45 = vmul.f32 %v2953_v29, %v7411_v20  ;;  %v7592_v20 = vadd.f32 %v7580_v8, %v7504_v60 }
0x119b   :  { %3058 = vrot.lane.b32.xlu0 %v3019_v28, %s6073_s5  ;;  %v3006_v58 = vmul.f32 %v7421_v55, %v2987_v45  ;;  %v3166_v28 = vld [vmem:[%s8992_s7 + $0x10] sm:$0xff] }
0x119c   :  { %3253 = vmatpush.msra.mxu1 %v3166_v28 }
0x119d   :  { %v3025_v46 = vadd.f32 %v7428_v13, %v3006_v58 }
0x119e   :  { %3254 = vmatpush.msra.mxu1 %v3165_v56  ;;  %v7756_v56 = vld [vmem:[%s8993_s8] ss:$0 sm:$0xff] }
0x11a0   :  { %3255 = vmatpush.msra.mxu1 %v3164_v16 }
0x11a1   :  { %3076 = vrot.lane.b32.xlu1 %v3022_v23, %s6068_s30 }
0x11a3   :  { %3074 = vrot.lane.b32.xlu0 %v3021_v11, %s6068_s30 }
0x11a9   :  { %3092 = vrot.lane.b32.xlu1 %v3024_v27, %s6053_s17 }
0x11ab   :  { %3116 = vrot.lane.b32.xlu0 %v7583_v2, %s6066_s15 }
0x11b1   :  { %3094 = vrot.lane.b32.xlu1 %v3025_v46, %s6053_s17 }
0x11b3   :  { %3176 = vrot.lane.b32.xlu0 %v7592_v20, %s6053_s17 }
0x11b7   :  { %v2778_v12 = vpop.xlane.xlu2 %2777 }
0x11b8   :  { %v2796_v53 = vmul.f32 %v2778_v12, %v7302_v57  ;;  %v2769_v30 = vpop.xlane.xlu1 %2768 }
0x11b9   :  { %v2793_v32 = vmul.f32 %v2769_v30, %v7302_v57 }
0x11ba   :  { %v2812_v9 = vadd.f32 1e-05, %v2796_v53 }
0x11bb   :  { %v2809_v38 = vadd.f32 1e-05, %v2793_v32 }
0x11bc   :  { %5854 = vrsqrt.f32 %v2812_v9  ;;  %vm2960_vm11 = vweird.f32 %v2812_v9 }
0x11bd   :  { %5856 = vrsqrt.f32 %v2809_v38  ;;  %vm2930_vm2 = vweird.f32 %v2809_v38 }
0x11bf   :  { %v3073_v12 = vpop.permute.xlu2 %3072 }
0x11c0   :  { %v7668_v32 = vadd.f32 %v7580_v8, %v3073_v12 }
0x11c2   :  { %v5855_v36 = vpop.eup %5854 }
0x11c3   :  { %v5857_v43 = vpop.eup %5856  ;;  %v2955_v26 = vmul.f32 %v5855_v36, %v2812_v9  ;;  %vm2961_vm15 = vweird.f32 %v5855_v36 }
0x11c4   :  { %v2925_v60 = vmul.f32 %v5857_v43, %v2809_v38  ;;  %vm2931_vm0 = vweird.f32 %v5857_v43  ;;  %vm2962_vm1 = vmor %vm2960_vm11, %vm2961_vm15 }
0x11c5   :  { %v2956_v47 = vmul.f32 %v5855_v36, %v2955_v26  ;;  %vm2932_vm3 = vmor %vm2930_vm2, %vm2931_vm0 }
0x11c6   :  { %v2926_v1 = vmul.f32 %v5857_v43, %v2925_v60 }
0x11c7   :  { %v2957_v6 = vmul.f32 0.5, %v2956_v47 }
0x11c8   :  { %v2927_v31 = vmul.f32 0.5, %v2926_v1 }
0x11c9   :  { %v2958_v35 = vsub.f32 1.5, %v2957_v6 }
0x11ca   :  { %v2928_v10 = vsub.f32 1.5, %v2927_v31 }
0x11cb   :  { %v2959_v21 = vmul.f32 %v5855_v36, %v2958_v35 }
0x11cc   :  { %v2929_v39 = vmul.f32 %v5857_v43, %v2928_v10 }
0x11cd   :  { %v2963_v5 = vsel %vm2962_vm1, %v5855_v36, %v2959_v21 }
0x11ce   :  { %v2988_v42 = vmul.f32 %v2963_v5, %v7479_v34  ;;  %v2933_v14 = vsel %vm2932_vm3, %v5857_v43, %v2929_v39  ;;  %v6040_v39 = vld [vmem:[%s8985_s0 + $0x8] sm:$0xff] }
0x11cf   :  { %v2985_v52 = vmul.f32 %v2933_v14, %v7485_v4  ;;  %v3057_v4 = vpop.permute.xlu0 %3056 }
0x11d0   :  { %v3055_v62 = vpop.permute.xlu1 %3054  ;;  %v3007_v0 = vmul.f32 %v7421_v55, %v2988_v42  ;;  %v7626_v33 = vadd.f32 %v7623_v59, %v3057_v4  ;;  %v6041_v42 = vld [vmem:[%s8985_s0 + $0x18] sm:$0xff] }
0x11d1   :  { %v7608_v19 = vadd.f32 %v7605_v61, %v3055_v62  ;;  %v3004_v54 = vmul.f32 %v7421_v55, %v2985_v52  ;;  %v6042_v62 = vld [vmem:[%s8985_s0 + $0x28] sm:$0xff] }
0x11d2   :  { %v3026_v41 = vadd.f32 %v7428_v13, %v3007_v0 }
0x11d3   :  { %3118 = vrot.lane.b32.xlu2 %v7608_v19, %s6066_s15  ;;  %v3023_v34 = vadd.f32 %v7428_v13, %v3004_v54 }
0x11d4   :  { %3096 = vrot.lane.b32.xlu1 %v3026_v41, %s6053_s17 }
0x11d5   :  { %3078 = vrot.lane.b32.xlu0 %v3023_v34, %s6068_s30 }
0x11d7   :  { %v3037_v40 = vpop.permute.xlu0 %3036 }
0x11d8   :  { %v7633_v37 = vadd.f32 %v7623_v59, %v3037_v40  ;;  %v6043_v40 = vld [vmem:[%s8985_s0 + $0x38] sm:$0xff] }
0x11db   :  { %3178 = vrot.lane.b32.xlu2 %v7618_v63, %s6053_s17 }
0x11dd   :  { %3120 = vrot.lane.b32.xlu0 %v7626_v33, %s6066_s15 }
0x11e3   :  { %3180 = vrot.lane.b32.xlu2 %v7633_v37, %s6053_s17 }
0x11fb   :  { %v2781_v49 = vpop.xlane.xlu1 %2780 }
0x11fc   :  { %v2797_v15 = vmul.f32 %v2781_v49, %v7302_v57 }
0x11fe   :  { %v2813_v24 = vadd.f32 1e-05, %v2797_v15 }
0x1200   :  { %5858 = vrsqrt.f32 %v2813_v24  ;;  %vm2970_vm6 = vweird.f32 %v2813_v24 }
0x1205   :  { %v3039_v18 = vpop.permute.xlu0 %3038 }
0x1206   :  { %v5859_v3 = vpop.eup %5858  ;;  %v7656_v23 = vadd.f32 %v7653_v7, %v3039_v18 }
0x1207   :  { %v2965_v22 = vmul.f32 %v5859_v3, %v2813_v24  ;;  %vm2971_vm5 = vweird.f32 %v5859_v3 }
0x1208   :  { %3182 = vrot.lane.b32.xlu2 %v7656_v23, %s6053_s17  ;;  %vm2972_vm8 = vmor %vm2970_vm6, %vm2971_vm5 }
0x1209   :  { %v2966_v11 = vmul.f32 %v5859_v3, %v2965_v22 }
0x120b   :  { %v2967_v48 = vmul.f32 0.5, %v2966_v11 }
0x120d   :  { %v2968_v29 = vsub.f32 1.5, %v2967_v48  ;;  %v3059_v17 = vpop.permute.xlu0 %3058 }
0x120e   :  { %v7661_v45 = vadd.f32 %v7653_v7, %v3059_v17  ;;  %v3952_v17 = vld [vmem:[%s8994_s9 + $0x38] sm:$0xff] }
0x120f   :  { %v2969_v27 = vmul.f32 %v5859_v3, %v2968_v29  ;;  %5719 = vmatpush.msrb.mxu2 %v3952_v17  ;;  %4013 = vmatpush.msrb.mxu1 %v3952_v17 }
0x1210   :  { %3122 = vrot.lane.b32.xlu0 %v7661_v45, %s6066_s15 }
0x1211   :  { %v2973_v58 = vsel %vm2972_vm8, %v5859_v3, %v2969_v27 }
0x1212   :  { %v2989_v46 = vmul.f32 %v2973_v58, %v7523_v44  ;;  %v3951_v58 = vld [vmem:[%s8994_s9 + $0x30] sm:$0xff] }
0x1213   :  { %v3077_v44 = vpop.permute.xlu1 %3076  ;;  %5720 = vmatpush.msrb.mxu2 %v3951_v58  ;;  %4014 = vmatpush.msrb.mxu1 %v3951_v58 }
0x1214   :  { %v3008_v53 = vmul.f32 %v7421_v55, %v2989_v46  ;;  %v7681_v43 = vadd.f32 %v7623_v59, %v3077_v44  ;;  %v3950_v46 = vld [vmem:[%s8994_s9 + $0x28] sm:$0xff] }
0x1215   :  { %v3075_v30 = vpop.permute.xlu0 %3074  ;;  %5721 = vmatpush.msrb.mxu2 %v3950_v46  ;;  %4015 = vmatpush.msrb.mxu1 %v3950_v46 }
0x1216   :  { %v3027_v9 = vadd.f32 %v7428_v13, %v3008_v53  ;;  %v7675_v36 = vadd.f32 %v7605_v61, %v3075_v30  ;;  %9011 = vst [vmem:[#allocation3_spill] sm:$0xff] %v7681_v43  ;;  %v3949_v30 = vld [vmem:[%s8994_s9 + $0x20] sm:$0xff] }
0x1217   :  { %5722 = vmatpush.msrb.mxu2 %v3949_v30  ;;  %4016 = vmatpush.msrb.mxu1 %v3949_v30 }
0x1218   :  { %3128 = vrot.lane.b32.xlu0 %v7668_v32, %s6065_s19  ;;  %3098 = vrot.lane.b32.xlu1 %v3027_v9, %s6053_s17  ;;  %9010 = vst [vmem:[#allocation2_spill] sm:$0xff] %v7675_v36 }
0x121b   :  { %v3093_v13 = vpop.permute.xlu1 %3092 }
0x121c   :  { %v7687_v60 = vadd.f32 %v7580_v8, %v3093_v13  ;;  %v7713_v5 = vadd.f32 %v6040_v39, %v3093_v13 }
0x121d   :  { %v3117_v38 = vpop.permute.xlu0 %3116 }
0x121e   :  { %3184 = vrot.lane.b32.xlu2 %v3117_v38, %s6053_s17 }
0x1220   :  { %3130 = vrot.lane.b32.xlu0 %v7675_v36, %s6065_s19 }
0x1223   :  { %v3095_v47 = vpop.permute.xlu1 %3094 }
0x1224   :  { %v7693_v6 = vadd.f32 %v7605_v61, %v3095_v47  ;;  %v7720_v14 = vadd.f32 %v6041_v42, %v3095_v47  ;;  %v3947_v47 = vld [vmem:[%s8994_s9 + $0x10] sm:$0xff] }
0x1225   :  { %v3177_v55 = vpop.permute.xlu0 %3176 }
0x1226   :  { %5639 = vmatmul.msk.f32.vlgmr.msra.gmra.mxu1 %vm2630_vm7, %v3177_v55  ;;  %v3948_v55 = vld [vmem:[%s8994_s9 + $0x18] sm:$0xff] }
0x1227   :  { %5723 = vmatpush.msrb.mxu2 %v3948_v55  ;;  %4017 = vmatpush.msrb.mxu1 %v3948_v55 }
0x1228   :  { %3132 = vrot.lane.b32.xlu0 %v7681_v43, %s6065_s19 }
0x1229   :  { %5724 = vmatpush.msrb.mxu2 %v3947_v47  ;;  %4018 = vmatpush.msrb.mxu1 %v3947_v47 }
0x122d   :  { %v3119_v26 = vpop.permute.xlu2 %3118 }
0x122e   :  { %3186 = vrot.lane.b32.xlu2 %v3119_v26, %s6053_s17 }
0x1230   :  { %3144 = vrot.lane.b32.xlu0 %v7687_v60, %s6070_s4 }
0x1235   :  { %v3179_v1 = vpop.permute.xlu2 %3178 }
0x1236   :  { %5640 = vmatmul.msk.f32.gmra.mxu1 %vm2630_vm7, %v3179_v1 }
0x1238   :  { %3148 = vrot.lane.b32.xlu0 %v7693_v6, %s6070_s4 }
0x123d   :  { %v3181_v31 = vpop.permute.xlu2 %3180 }
0x123e   :  { %5641 = vmatmul.msk.f32.gmra.mxu1 %vm2630_vm7, %v3181_v31 }
0x1246   :  { %v3097_v8 = vpop.permute.xlu1 %3096 }
0x1247   :  { %v7700_v35 = vadd.f32 %v7623_v59, %v3097_v8  ;;  %v3079_v51 = vpop.permute.xlu0 %3078  ;;  %v7728_v0 = vadd.f32 %v6042_v62, %v3097_v8  ;;  %v3945_v62 = vld [vmem:[%s8994_s9] sm:$0xff] }
0x1248   :  { %v7703_v10 = vadd.f32 %v7653_v7, %v3079_v51 }
0x1249   :  { %9012 = vst [vmem:[#allocation4_spill] sm:$0xff] %v7700_v35  ;;  %3152 = vrot.lane.b32.xlu0 %v7700_v35, %s6070_s4 }
0x124a   :  { %9013 = vst [vmem:[#allocation5_spill] sm:$0xff] %v7703_v10  ;;  %3134 = vrot.lane.b32.xlu2 %v7703_v10, %s6065_s19 }
0x124b   :  { %9014 = vst [vmem:[#allocation6_spill] sm:$0xff] %v7728_v0 }
0x124f   :  { %v3121_v21 = vpop.permute.xlu0 %3120 }
0x1250   :  { %3188 = vrot.lane.b32.xlu1 %v3121_v21, %s6053_s17  ;;  %v3946_v21 = vld [vmem:[%s8994_s9 + $0x8] sm:$0xff] }
0x1251   :  { %5725 = vmatpush.msrb.mxu2 %v3946_v21  ;;  %4019 = vmatpush.msrb.mxu1 %v3946_v21 }
0x1253   :  { %5726 = vmatpush.msrb.mxu2 %v3945_v62  ;;  %4020 = vmatpush.msrb.mxu1 %v3945_v62 }
0x1258   :  { %3146 = vrot.lane.b32.xlu1 %v7713_v5, %s6070_s4 }
0x1260   :  { %3150 = vrot.lane.b32.xlu1 %v7720_v14, %s6070_s4 }
0x1262   :  { %v3183_v52 = vpop.permute.xlu2 %3182 }
0x1263   :  { %5642 = vmatmul.msk.f32.gmra.mxu1 %vm2630_vm7, %v3183_v52 }
0x1268   :  { %3154 = vrot.lane.b32.xlu1 %v7728_v0, %s6070_s4 }
0x1278   :  { %v3185_v61 = vpop.permute.xlu2 %3184 }
0x1279   :  { %5643 = vmatmul.msk.f32.gmra.mxu1 %vm2630_vm7, %v3185_v61 }
0x1282   :  { %v3123_v54 = vpop.permute.xlu0 %3122 }
0x1283   :  { %3190 = vrot.lane.b32.xlu2 %v3123_v54, %s6053_s17 }
0x1288   :  { %v3187_v41 = vpop.permute.xlu2 %3186 }
0x1289   :  { %5644 = vmatmul.msk.f32.gmra.mxu1 %vm2630_vm7, %v3187_v41 }
0x128a   :  { %v3129_v34 = vpop.permute.xlu0 %3128  ;;  %v3099_v4 = vpop.permute.xlu1 %3098 }
0x128b   :  { %v7736_v59 = vadd.f32 %v7653_v7, %v3099_v4  ;;  %v7741_v49 = vadd.f32 %v6043_v40, %v3099_v4  ;;  %3192 = vrot.lane.b32.xlu2 %v3129_v34, %s6053_s17 }
0x128d   :  { %9015 = vst [vmem:[#allocation7_spill] sm:$0xff] %v7736_v59  ;;  %3158 = vrot.lane.b32.xlu1 %v7741_v49, %s6070_s4  ;;  %3156 = vrot.lane.b32.xlu0 %v7736_v59, %s6070_s4 }
0x128e   :  { %9016 = vst [vmem:[#allocation8_spill] sm:$0xff] %v7741_v49 }
0x1292   :  { %v3131_v15 = vpop.permute.xlu0 %3130 }
0x1293   :  { %3194 = vrot.lane.b32.xlu2 %v3131_v15, %s6053_s17 }
0x129a   :  { %v3133_v24 = vpop.permute.xlu0 %3132 }
0x129b   :  { %3196 = vrot.lane.b32.xlu2 %v3133_v24, %s6053_s17 }
0x12a2   :  { %v3145_v1 = vpop.permute.xlu0 %3144 }
0x12a3   :  { %v7751_v28 = vpop.f32.mrf.mxu1 }
0x12a4   :  { %v3135_v50 = vpop.permute.xlu2 %3134 }
0x12a5   :  { %3198 = vrot.lane.b32.xlu0 %v3135_v50, %s6053_s17 }
0x12b3   :  { %v3260_v16 = vpop.f32.mrf.mxu1 }
0x12b4   :  { %v7759_v18 = vadd.f32 %v7756_v56, %v3260_v16  ;;  %v3149_v16 = vpop.permute.xlu0 %3148 }
0x12b6   :  { %v7762_v3 = vmul.f32 0.70710677, %v7759_v18 }
0x12b8   :  { %v7765_v7 = vand.u32 2147483647, %v7762_v3  ;;  %vm3338_vm1 = vcmp.ge.f32.partialorder %v7762_v3, 0.0 }
0x12ba   :  { %v3386_v22 = vmul.f32 0.3275911, %v7765_v7  ;;  %v3802_v4 = vsub.f32 0.0, %v7765_v7 }
0x12bb   :  { %v3263_v11 = vpop.f32.mrf.mxu1 }
0x12bc   :  { %v3402_v48 = vadd.f32 1.0, %v3386_v22  ;;  %v7769_v29 = vadd.f32 %v7756_v56, %v3263_v11  ;;  %v3818_v22 = vmul.f32 %v3802_v4, %v7765_v7 }
0x12be   :  { %5860 = vrcp.f32 %v3402_v48  ;;  %v7775_v27 = vmul.f32 0.70710677, %v7769_v29  ;;  %v3443_v31 = vand.u32 2147483648, %v3402_v48  ;;  %v3441_v51 = vand.u32 2147483647, %v3402_v48 }
0x12bf   :  { %vm3437_vm10 = vweird.f32 %v3402_v48 }
0x12c0   :  { %v7784_v12 = vand.u32 2147483647, %v7775_v27  ;;  %v3444_v61 = vor.u32 1.1754944e-38, %v3443_v31  ;;  %vm3442_vm13 = vcmp.eq.f32.partialorder %v3441_v51, 8.507059e+37  ;;  %vm3339_vm2 = vcmp.ge.f32.partialorder %v7775_v27, 0.0 }
0x12c2   :  { %v3189_v53 = vpop.permute.xlu1 %3188  ;;  %v3387_v38 = vmul.f32 0.3275911, %v7784_v12 }
0x12c3   :  { %5645 = vmatmul.msk.f32.gmra.mxu1 %vm2630_vm7, %v3189_v53 }
0x12c4   :  { %v5861_v9 = vpop.eup %5860  ;;  %v3403_v13 = vadd.f32 1.0, %v3387_v38  ;;  %v3835_v38 = vmul.f32 1.442695, %v3818_v22 }
0x12c5   :  { %v3433_v44 = vmul.f32 %v5861_v9, %v3402_v48  ;;  %vm3438_vm9 = vweird.f32 %v5861_v9 }
0x12c6   :  { %5862 = vrcp.f32 %v3403_v13  ;;  %vm3439_vm12 = vmor %vm3437_vm10, %vm3438_vm9  ;;  %v3458_v11 = vand.u32 2147483648, %v3403_v13  ;;  %v3456_v17 = vand.u32 2147483647, %v3403_v13  ;;  %vm3452_vm15 = vweird.f32 %v3403_v13 }
0x12c7   :  { %v3434_v26 = vsub.f32 1.0, %v3433_v44  ;;  %5864 = vpow2.f32 %v3835_v38 }
0x12c8   :  { %v3459_v44 = vor.u32 1.1754944e-38, %v3458_v11  ;;  %vm3457_vm11 = vcmp.eq.f32.partialorder %v3456_v17, 8.507059e+37 }
0x12c9   :  { %v3435_v8 = vmul.f32 %v5861_v9, %v3434_v26 }
0x12ca   :  { %v3147_v39 = vpop.permute.xlu1 %3146 }
0x12cb   :  { %v3436_v42 = vadd.f32 %v5861_v9, %v3435_v8  ;;  %v3160_v52 = vsel %vm2630_vm7, %v3145_v1, %v3147_v39  ;;  %v3803_v1 = vsub.f32 0.0, %v7784_v12  ;;  %v3153_v8 = vpop.permute.xlu0 %3152 }
0x12cc   :  { %3200 = vrot.lane.b32.xlu1 %v3160_v52, %s6053_s17  ;;  %v5863_v41 = vpop.eup %5862 }
0x12cd   :  { %v3440_v54 = vsel %vm3439_vm12, %v5861_v9, %v3436_v42  ;;  %v3448_v15 = vmul.f32 %v5863_v41, %v3403_v13  ;;  %vm3453_vm14 = vweird.f32 %v5863_v41  ;;  %v3819_v52 = vmul.f32 %v3803_v1, %v7784_v12  ;;  %v5865_v4 = vpop.eup %5864 }
0x12ce   :  { %v3445_v34 = vsel %vm3442_vm13, %v3444_v61, %v3440_v54  ;;  %vm3454_vm0 = vmor %vm3452_vm15, %vm3453_vm14 }
0x12cf   :  { %v3658_v40 = vmul.f32 1.0614054, %v3445_v34  ;;  %v3449_v50 = vsub.f32 1.0, %v3448_v15 }
0x12d1   :  { %v3674_v24 = vadd.f32 -1.4531521, %v3658_v40  ;;  %v3450_v46 = vmul.f32 %v5863_v41, %v3449_v50 }
0x12d2   :  { %v3151_v48 = vpop.permute.xlu1 %3150 }
0x12d3   :  { %v3690_v58 = vmul.f32 %v3674_v24, %v3445_v34  ;;  %v3161_v53 = vsel %vm2630_vm7, %v3149_v16, %v3151_v48  ;;  %v3451_v9 = vadd.f32 %v5863_v41, %v3450_v46  ;;  %v3837_v24 = vmul.f32 1.442695, %v3819_v52 }
0x12d4   :  { %3202 = vrot.lane.b32.xlu2 %v3161_v53, %s6053_s17  ;;  %v9002_v48 = vmov -1.0   ;;  %v3306_v53 = vmul.f32 0.5, %v7759_v18 }
0x12d5   :  { %v3706_v30 = vadd.f32 1.4214138, %v3690_v58  ;;  %v3455_v26 = vsel %vm3454_vm0, %v5863_v41, %v3451_v9  ;;  %v3354_v17 = vsel %vm3338_vm1, 1.0, %v9002_v48  ;;  %5866 = vpow2.f32 %v3837_v24 }
0x12d6   :  { %v3460_v7 = vsel %vm3457_vm11, %v3459_v44, %v3455_v26 }
0x12d7   :  { %v3722_v55 = vmul.f32 %v3706_v30, %v3445_v34  ;;  %v3659_v31 = vmul.f32 1.0614054, %v3460_v7 }
0x12d9   :  { %v3738_v47 = vadd.f32 -0.28449672, %v3722_v55  ;;  %v3675_v42 = vadd.f32 -1.4531521, %v3659_v31 }
0x12da   :  { %v3155_v51 = vpop.permute.xlu1 %3154 }
0x12db   :  { %v3754_v21 = vmul.f32 %v3738_v47, %v3445_v34  ;;  %v3162_v39 = vsel %vm2630_vm7, %v3153_v8, %v3155_v51  ;;  %v3691_v61 = vmul.f32 %v3675_v42, %v3460_v7  ;;  %v5867_v47 = vpop.eup %5866  ;;  %v3355_v51 = vsel %vm3339_vm2, 1.0, %v9002_v48 }
0x12dc   :  { %3204 = vrot.lane.b32.xlu0 %v3162_v39, %s6053_s17  ;;  %v3307_v39 = vmul.f32 0.5, %v7769_v29 }
0x12dd   :  { %v3770_v13 = vadd.f32 0.2548296, %v3754_v21  ;;  %v3191_v62 = vpop.permute.xlu2 %3190  ;;  %v3707_v41 = vadd.f32 1.4214138, %v3691_v61 }
0x12de   :  { %5646 = vmatmul.msk.f32.gmra.mxu1 %vm2630_vm7, %v3191_v62 }
0x12df   :  { %v3786_v54 = vmul.f32 %v3770_v13, %v3445_v34  ;;  %v3723_v16 = vmul.f32 %v3707_v41, %v3460_v7 }
0x12e0   :  { %v3266_v40 = vpop.f32.mrf.mxu1 }
0x12e1   :  { %v3866_v15 = vmul.f32 %v5865_v4, %v3786_v54  ;;  %v7816_v50 = vadd.f32 %v7756_v56, %v3266_v40  ;;  %v3739_v12 = vadd.f32 -0.28449672, %v3723_v16 }
0x12e3   :  { %v3882_v22 = vsub.f32 1.0, %v3866_v15  ;;  %v7819_v11 = vmul.f32 0.70710677, %v7816_v50  ;;  %v3755_v46 = vmul.f32 %v3739_v12, %v3460_v7 }
0x12e5   :  { %v3898_v34 = vmul.f32 %v3882_v22, %v3354_v17  ;;  %v3372_v58 = vand.u32 2147483647, %v7819_v11  ;;  %v3193_v3 = vpop.permute.xlu2 %3192  ;;  %v3771_v38 = vadd.f32 0.2548296, %v3755_v46  ;;  %vm3340_vm10 = vcmp.ge.f32.partialorder %v7819_v11, 0.0 }
0x12e6   :  { %5647 = vmatmul.msk.f32.gmra.mxu1 %vm2630_vm7, %v3193_v3 }
0x12e7   :  { %v3914_v30 = vadd.f32 1.0, %v3898_v34  ;;  %v3388_v9 = vmul.f32 0.3275911, %v3372_v58  ;;  %v3787_v26 = vmul.f32 %v3771_v38, %v3460_v7  ;;  %v3804_v16 = vsub.f32 0.0, %v3372_v58 }
0x12e9   :  { %v3930_v44 = vmul.f32 %v3914_v30, %v3306_v53  ;;  %v3404_v55 = vadd.f32 1.0, %v3388_v9  ;;  %v3867_v1 = vmul.f32 %v5867_v47, %v3787_v26  ;;  %v3820_v46 = vmul.f32 %v3804_v16, %v3372_v58 }
0x12eb   :  { %5868 = vrcp.f32 %v3404_v55  ;;  %5656 = vmatmul.msk.f32.vlgmr.msrb.gmra.mxu2 %vm1110_vm4, %v3930_v44  ;;  %v3883_v8 = vsub.f32 1.0, %v3867_v1  ;;  %v3473_v62 = vand.u32 2147483648, %v3404_v55  ;;  %v3471_v41 = vand.u32 2147483647, %v3404_v55 }
0x12ec   :  { %vm3467_vm5 = vweird.f32 %v3404_v55  ;;  %v3839_v26 = vmul.f32 1.442695, %v3820_v46 }
0x12ed   :  { %v3195_v31 = vpop.permute.xlu2 %3194  ;;  %v3899_v18 = vmul.f32 %v3883_v8, %v3355_v51  ;;  %v3474_v15 = vor.u32 1.1754944e-38, %v3473_v62  ;;  %vm3472_vm8 = vcmp.eq.f32.partialorder %v3471_v41, 8.507059e+37 }
0x12ee   :  { %5648 = vmatmul.msk.f32.gmra.mxu1 %vm2630_vm7, %v3195_v31 }
0x12ef   :  { %v3915_v13 = vadd.f32 1.0, %v3899_v18 }
0x12f1   :  { %v5869_v21 = vpop.eup %5868  ;;  %v3931_v52 = vmul.f32 %v3915_v13, %v3307_v39 }
0x12f2   :  { %v3463_v42 = vmul.f32 %v5869_v21, %v3404_v55  ;;  %vm3468_vm3 = vweird.f32 %v5869_v21 }
0x12f3   :  { %5657 = vmatmul.msk.f32.gmra.mxu2 %vm1110_vm4, %v3931_v52  ;;  %vm3469_vm6 = vmor %vm3467_vm5, %vm3468_vm3 }
0x12f4   :  { %v3464_v7 = vsub.f32 1.0, %v3463_v42 }
0x12f5   :  { %v3197_v61 = vpop.permute.xlu2 %3196 }
0x12f6   :  { %v3465_v54 = vmul.f32 %v5869_v21, %v3464_v7  ;;  %v3269_v27 = vpop.f32.mrf.mxu1  ;;  %5649 = vmatmul.msk.f32.gmra.mxu1 %vm2630_vm7, %v3197_v61 }
0x12f7   :  { %v7833_v4 = vadd.f32 %v7756_v56, %v3269_v27 }
0x12f8   :  { %v3466_v40 = vadd.f32 %v5869_v21, %v3465_v54 }
0x12f9   :  { %v7836_v29 = vmul.f32 0.70710677, %v7833_v4 }
0x12fa   :  { %v3470_v24 = vsel %vm3469_vm6, %v5869_v21, %v3466_v40 }
0x12fb   :  { %v3373_v22 = vand.u32 2147483647, %v7836_v29  ;;  %v3475_v12 = vsel %vm3472_vm8, %v3474_v15, %v3470_v24  ;;  %vm3341_vm2 = vcmp.ge.f32.partialorder %v7836_v29, 0.0 }
0x12fc   :  { %v3660_v17 = vmul.f32 1.0614054, %v3475_v12 }
0x12fd   :  { %v3389_v34 = vmul.f32 0.3275911, %v3373_v22 }
0x12fe   :  { %v3676_v3 = vadd.f32 -1.4531521, %v3660_v17 }
0x12ff   :  { %v3405_v53 = vadd.f32 1.0, %v3389_v34  ;;  %v3157_v30 = vpop.permute.xlu0 %3156  ;;  %v3159_v9 = vpop.permute.xlu1 %3158  ;;  %v3356_v34 = vsel %vm3340_vm10, 1.0, %v9002_v48 }
0x1300   :  { %v3163_v38 = vsel %vm2630_vm7, %v3157_v30, %v3159_v9  ;;  %v3692_v44 = vmul.f32 %v3676_v3, %v3475_v12  ;;  %v7855_v30 = vadd.f32 %v7756_v56, %v7751_v28 }
0x1301   :  { %5870 = vrcp.f32 %v3405_v53  ;;  %3206 = vrot.lane.b32.xlu1 %v3163_v38, %s6053_s17  ;;  %v3488_v52 = vand.u32 2147483648, %v3405_v53  ;;  %v3486_v27 = vand.u32 2147483647, %v3405_v53  ;;  %vm3482_vm12 = vweird.f32 %v3405_v53 }
0x1302   :  { %v3708_v55 = vadd.f32 1.4214138, %v3692_v44  ;;  %5872 = vpow2.f32 %v3839_v26 }
0x1303   :  { %v3489_v17 = vor.u32 1.1754944e-38, %v3488_v52  ;;  %vm3487_vm14 = vcmp.eq.f32.partialorder %v3486_v27, 8.507059e+37 }
0x1304   :  { %v3724_v47 = vmul.f32 %v3708_v55, %v3475_v12 }
0x1306   :  { %v3272_v1 = vpop.f32.mrf.mxu1  ;;  %v3740_v31 = vadd.f32 -0.28449672, %v3724_v47  ;;  %v7859_v47 = vmul.f32 0.70710677, %v7855_v30 }
0x1307   :  { %v5871_v8 = vpop.eup %5870  ;;  %v7842_v51 = vadd.f32 %v7756_v56, %v3272_v1 }
0x1308   :  { %v3478_v58 = vmul.f32 %v5871_v8, %v3405_v53  ;;  %v3756_v18 = vmul.f32 %v3740_v31, %v3475_v12  ;;  %vm3483_vm9 = vweird.f32 %v5871_v8  ;;  %v5873_v61 = vpop.eup %5872  ;;  %v3308_v53 = vmul.f32 0.5, %v7816_v50 }
0x1309   :  { %v7845_v21 = vmul.f32 0.70710677, %v7842_v51  ;;  %vm3484_vm13 = vmor %vm3482_vm12, %vm3483_vm9  ;;  %v7864_v50 = vand.u32 2147483647, %v7859_v47 }
0x130a   :  { %v3479_v39 = vsub.f32 1.0, %v3478_v58  ;;  %v3772_v42 = vadd.f32 0.2548296, %v3756_v18 }
0x130b   :  { %v7848_v13 = vand.u32 2147483647, %v7845_v21  ;;  %vm3342_vm3 = vcmp.ge.f32.partialorder %v7845_v21, 0.0 }
0x130c   :  { %v3480_v7 = vmul.f32 %v5871_v8, %v3479_v39  ;;  %v3788_v62 = vmul.f32 %v3772_v42, %v3475_v12  ;;  %v3805_v12 = vsub.f32 0.0, %v3373_v22 }
0x130d   :  { %v3390_v54 = vmul.f32 0.3275911, %v7848_v13 }
0x130e   :  { %v3868_v41 = vmul.f32 %v5873_v61, %v3788_v62  ;;  %v3481_v40 = vadd.f32 %v5871_v8, %v3480_v7  ;;  %v3821_v44 = vmul.f32 %v3805_v12, %v3373_v22  ;;  %v3385_v61 = vmul.f32 0.3275911, %v7864_v50 }
0x130f   :  { %v3406_v15 = vadd.f32 1.0, %v3390_v54 }
0x1310   :  { %v3884_v24 = vsub.f32 1.0, %v3868_v41  ;;  %v3485_v16 = vsel %vm3484_vm13, %v5871_v8, %v3481_v40  ;;  %v3841_v58 = vmul.f32 1.442695, %v3821_v44  ;;  %v3806_v40 = vsub.f32 0.0, %v7848_v13 }
0x1311   :  { %5874 = vrcp.f32 %v3406_v15  ;;  %v3490_v46 = vsel %vm3487_vm14, %v3489_v17, %v3485_v16  ;;  %v3503_v39 = vand.u32 2147483648, %v3406_v15  ;;  %v3501_v7 = vand.u32 2147483647, %v3406_v15 }
0x1312   :  { %v3900_v3 = vmul.f32 %v3884_v24, %v3356_v34  ;;  %v3661_v11 = vmul.f32 1.0614054, %v3490_v46  ;;  %5876 = vpow2.f32 %v3841_v58  ;;  %vm3497_vm0 = vweird.f32 %v3406_v15 }
0x1313   :  { %v3504_v27 = vor.u32 1.1754944e-38, %v3503_v39  ;;  %vm3502_vm1 = vcmp.eq.f32.partialorder %v3501_v7, 8.507059e+37  ;;  %v3401_v34 = vadd.f32 1.0, %v3385_v61  ;;  %v3357_v44 = vsel %vm3341_vm2, 1.0, %v9002_v48 }
0x1314   :  { %v3916_v9 = vadd.f32 1.0, %v3900_v3  ;;  %v3677_v38 = vadd.f32 -1.4531521, %v3661_v11  ;;  %v3358_v61 = vsel %vm3342_vm3, 1.0, %v9002_v48 }
0x1315   :  { %5878 = vrcp.f32 %v3401_v34  ;;  %vm3422_vm6 = vweird.f32 %v3401_v34 }
0x1316   :  { %v3932_v55 = vmul.f32 %v3916_v9, %v3308_v53  ;;  %v3693_v31 = vmul.f32 %v3677_v38, %v3490_v46 }
0x1317   :  { %v5875_v26 = vpop.eup %5874  ;;  %v3199_v1 = vpop.permute.xlu0 %3198 }
0x1318   :  { %v3493_v8 = vmul.f32 %v5875_v26, %v3406_v15  ;;  %5650 = vmatmul.msk.f32.gmra.mxu1 %vm2630_vm7, %v3199_v1  ;;  %5658 = vmatmul.msk.f32.gmra.mxu2 %vm1110_vm4, %v3932_v55  ;;  %v3709_v28 = vadd.f32 1.4214138, %v3693_v31  ;;  %vm3498_vm15 = vweird.f32 %v5875_v26  ;;  %v5877_v3 = vpop.eup %5876  ;;  %v3822_v15 = vmul.f32 %v3806_v40, %v7848_v13 }
0x1319   :  { %vm3499_vm11 = vmor %vm3497_vm0, %vm3498_vm15  ;;  %vm3337_vm15 = vcmp.ge.f32.partialorder %v7859_v47, 0.0 }
0x131a   :  { %v3494_v18 = vsub.f32 1.0, %v3493_v8  ;;  %v3725_v22 = vmul.f32 %v3709_v28, %v3490_v46  ;;  %v3309_v8 = vmul.f32 0.5, %v7833_v4  ;;  %v3353_v47 = vsel %vm3337_vm15, 1.0, %v9002_v48 }
0x131b   :  { %v5879_v58 = vpop.eup %5878 }
0x131c   :  { %v3495_v42 = vmul.f32 %v5875_v26, %v3494_v18  ;;  %v3741_v52 = vadd.f32 -0.28449672, %v3725_v22  ;;  %v3418_v13 = vmul.f32 %v5879_v58, %v3401_v34  ;;  %vm3423_vm5 = vweird.f32 %v5879_v58 }
0x131d   :  { %vm3424_vm8 = vmor %vm3422_vm6, %vm3423_vm5 }
0x131e   :  { %v3496_v62 = vadd.f32 %v5875_v26, %v3495_v42  ;;  %v3757_v54 = vmul.f32 %v3741_v52, %v3490_v46  ;;  %v3419_v7 = vsub.f32 1.0, %v3418_v13 }
0x1320   :  { %v3500_v41 = vsel %vm3499_vm11, %v5875_v26, %v3496_v62  ;;  %v3773_v24 = vadd.f32 0.2548296, %v3757_v54  ;;  %v3843_v26 = vmul.f32 1.442695, %v3822_v15  ;;  %v3420_v4 = vmul.f32 %v5879_v58, %v3419_v7 }
0x1321   :  { %v3505_v16 = vsel %vm3502_vm1, %v3504_v27, %v3500_v41  ;;  %v3310_v27 = vmul.f32 0.5, %v7842_v51 }
0x1322   :  { %v3662_v17 = vmul.f32 1.0614054, %v3505_v16  ;;  %v3789_v12 = vmul.f32 %v3773_v24, %v3490_v46  ;;  %5880 = vpow2.f32 %v3843_v26  ;;  %v3421_v40 = vadd.f32 %v5879_v58, %v3420_v4 }
0x1324   :  { %v3678_v11 = vadd.f32 -1.4531521, %v3662_v17  ;;  %v3869_v53 = vmul.f32 %v5877_v3, %v3789_v12  ;;  %v3428_v17 = vand.u32 2147483648, %v3401_v34  ;;  %v3426_v12 = vand.u32 2147483647, %v3401_v34 }
0x1325   :  { %v3425_v21 = vsel %vm3424_vm8, %v5879_v58, %v3421_v40 }
0x1326   :  { %v3694_v9 = vmul.f32 %v3678_v11, %v3505_v16  ;;  %v3885_v38 = vsub.f32 1.0, %v3869_v53  ;;  %v3429_v11 = vor.u32 1.1754944e-38, %v3428_v17  ;;  %vm3427_vm9 = vcmp.eq.f32.partialorder %v3426_v12, 8.507059e+37 }
0x1328   :  { %v3710_v55 = vadd.f32 1.4214138, %v3694_v9  ;;  %v3901_v1 = vmul.f32 %v3885_v38, %v3357_v44  ;;  %v5881_v42 = vpop.eup %5880  ;;  %v3430_v51 = vsel %vm3427_vm9, %v3429_v11, %v3425_v21 }
0x1329   :  { %v3657_v34 = vmul.f32 1.0614054, %v3430_v51 }
0x132a   :  { %v3726_v31 = vmul.f32 %v3710_v55, %v3505_v16  ;;  %v3917_v28 = vadd.f32 1.0, %v3901_v1 }
0x132b   :  { %v3673_v26 = vadd.f32 -1.4531521, %v3657_v34 }
0x132c   :  { %v3742_v46 = vadd.f32 -0.28449672, %v3726_v31  ;;  %v3933_v18 = vmul.f32 %v3917_v28, %v3309_v8 }
0x132d   :  { %v3689_v1 = vmul.f32 %v3673_v26, %v3430_v51 }
0x132e   :  { %v3758_v29 = vmul.f32 %v3742_v46, %v3505_v16  ;;  %5659 = vmatmul.msk.f32.gmra.mxu2 %vm1110_vm4, %v3933_v18  ;;  %v3203_v38 = vpop.permute.xlu2 %3202 }
0x132f   :  { %v3705_v28 = vadd.f32 1.4214138, %v3689_v1 }
0x1330   :  { %v3774_v39 = vadd.f32 0.2548296, %v3758_v29 }
0x1331   :  { %v3721_v29 = vmul.f32 %v3705_v28, %v3430_v51 }
0x1332   :  { %v3790_v22 = vmul.f32 %v3774_v39, %v3505_v16 }
0x1334   :  { %v3870_v52 = vmul.f32 %v5881_v42, %v3790_v22  ;;  %v3801_v22 = vsub.f32 0.0, %v7864_v50 }
0x1336   :  { %v3886_v62 = vsub.f32 1.0, %v3870_v52  ;;  %v3737_v52 = vadd.f32 -0.28449672, %v3721_v29 }
0x1338   :  { %v3902_v54 = vmul.f32 %v3886_v62, %v3358_v61  ;;  %v3817_v61 = vmul.f32 %v3801_v22, %v7864_v50 }
0x133a   :  { %v3918_v41 = vadd.f32 1.0, %v3902_v54 }
0x133c   :  { %v3934_v24 = vmul.f32 %v3918_v41, %v3310_v27 }
0x133e   :  { %5660 = vmatmul.msk.f32.gmra.mxu2 %vm1110_vm4, %v3934_v24  ;;  %v3201_v16 = vpop.permute.xlu1 %3200  ;;  %v3753_v24 = vmul.f32 %v3737_v52, %v3430_v51 }
0x133f   :  { %5651 = vmatmul.msk.f32.gmra.mxu1 %vm2630_vm7, %v3201_v16  ;;  %v3833_v16 = vmul.f32 1.442695, %v3817_v61 }
0x1340   :  { %v3275_v3 = vpop.f32.mrf.mxu1  ;;  %v3769_v34 = vadd.f32 0.2548296, %v3753_v24 }
0x1341   :  { %v7879_v15 = vadd.f32 %v7756_v56, %v3275_v3 }
0x1343   :  { %v7882_v53 = vmul.f32 0.70710677, %v7879_v15 }
0x1345   :  { %v3375_v9 = vand.u32 2147483647, %v7882_v53  ;;  %vm3343_vm0 = vcmp.ge.f32.partialorder %v7882_v53, 0.0 }
0x1346   :  { %v3359_v53 = vsel %vm3343_vm0, 1.0, %v9002_v48 }
0x1347   :  { %v3391_v44 = vmul.f32 0.3275911, %v3375_v9  ;;  %5652 = vmatmul.msk.f32.gmra.mxu1 %vm2630_vm7, %v3203_v38  ;;  %v3807_v54 = vsub.f32 0.0, %v3375_v9 }
0x1349   :  { %v3407_v55 = vadd.f32 1.0, %v3391_v44  ;;  %v3823_v21 = vmul.f32 %v3807_v54, %v3375_v9 }
0x134b   :  { %5882 = vrcp.f32 %v3407_v55  ;;  %v3518_v18 = vand.u32 2147483648, %v3407_v55  ;;  %v3516_v39 = vand.u32 2147483647, %v3407_v55  ;;  %vm3512_vm12 = vweird.f32 %v3407_v55 }
0x134c   :  { %5884 = vpow2.f32 %v3833_v16  ;;  %v3845_v44 = vmul.f32 1.442695, %v3823_v21 }
0x134d   :  { %v3519_v7 = vor.u32 1.1754944e-38, %v3518_v18  ;;  %vm3517_vm14 = vcmp.eq.f32.partialorder %v3516_v39, 8.507059e+37 }
0x134e   :  { %v3205_v31 = vpop.permute.xlu0 %3204 }
0x134f   :  { %5653 = vmatmul.msk.f32.gmra.mxu1 %vm2630_vm7, %v3205_v31 }
0x1351   :  { %v5883_v8 = vpop.eup %5882 }
0x1352   :  { %v3508_v46 = vmul.f32 %v5883_v8, %v3407_v55  ;;  %vm3513_vm10 = vweird.f32 %v5883_v8 }
0x1353   :  { %vm3514_vm13 = vmor %vm3512_vm12, %vm3513_vm10 }
0x1354   :  { %v3509_v58 = vsub.f32 1.0, %v3508_v46 }
0x1356   :  { %v3510_v13 = vmul.f32 %v5883_v8, %v3509_v58  ;;  %v5885_v58 = vpop.eup %5884 }
0x1358   :  { %v3511_v42 = vadd.f32 %v5883_v8, %v3510_v13 }
0x135a   :  { %v3515_v62 = vsel %vm3514_vm13, %v5883_v8, %v3511_v42  ;;  %v3785_v8 = vmul.f32 %v3769_v34, %v3430_v51 }
0x135b   :  { %v3520_v4 = vsel %vm3517_vm14, %v3519_v7, %v3515_v62  ;;  %v3278_v27 = vpop.f32.mrf.mxu1 }
0x135c   :  { %v3663_v41 = vmul.f32 1.0614054, %v3520_v4  ;;  %v7890_v40 = vadd.f32 %v7756_v56, %v3278_v27  ;;  %v3865_v29 = vmul.f32 %v5885_v58, %v3785_v8  ;;  %v3311_v58 = vmul.f32 0.5, %v7879_v15 }
0x135e   :  { %v3679_v17 = vadd.f32 -1.4531521, %v3663_v41  ;;  %v7893_v12 = vmul.f32 0.70710677, %v7890_v40  ;;  %v3881_v54 = vsub.f32 1.0, %v3865_v29 }
0x1360   :  { %v3695_v3 = vmul.f32 %v3679_v17, %v3520_v4  ;;  %v7896_v11 = vand.u32 2147483647, %v7893_v12  ;;  %vm3344_vm12 = vcmp.ge.f32.partialorder %v7893_v12, 0.0 }
0x1362   :  { %v3711_v50 = vadd.f32 1.4214138, %v3695_v3  ;;  %v3392_v38 = vmul.f32 0.3275911, %v7896_v11  ;;  %v3808_v8 = vsub.f32 0.0, %v7896_v11 }
0x1363   :  { %v3281_v55 = vpop.f32.mrf.mxu1 }
0x1364   :  { %v3727_v26 = vmul.f32 %v3711_v50, %v3520_v4  ;;  %v3408_v1 = vadd.f32 1.0, %v3392_v38  ;;  %v7900_v31 = vadd.f32 %v7756_v56, %v3281_v55  ;;  %v3897_v38 = vmul.f32 %v3881_v54, %v3353_v47 }
0x1366   :  { %v3743_v28 = vadd.f32 -0.28449672, %v3727_v26  ;;  %5886 = vrcp.f32 %v3408_v1  ;;  %v7903_v9 = vmul.f32 0.70710677, %v7900_v31  ;;  %v3533_v21 = vand.u32 2147483648, %v3408_v1 }
0x1367   :  { %5888 = vpow2.f32 %v3845_v44  ;;  %v3531_v34 = vand.u32 2147483647, %v3408_v1  ;;  %vm3527_vm1 = vweird.f32 %v3408_v1 }
0x1368   :  { %v3759_v46 = vmul.f32 %v3743_v28, %v3520_v4  ;;  %v7906_v18 = vand.u32 2147483647, %v7903_v9  ;;  %vm3345_vm0 = vcmp.ge.f32.partialorder %v7903_v9, 0.0 }
0x1369   :  { %vm3532_vm3 = vcmp.eq.f32.partialorder %v3531_v34, 8.507059e+37 }
0x136a   :  { %v3775_v13 = vadd.f32 0.2548296, %v3759_v46  ;;  %v3393_v39 = vmul.f32 0.3275911, %v7906_v18 }
0x136b   :  { %v3284_v22 = vpop.f32.mrf.mxu1 }
0x136c   :  { %v5887_v42 = vpop.eup %5886  ;;  %v3791_v7 = vmul.f32 %v3775_v13, %v3520_v4  ;;  %v7910_v51 = vadd.f32 %v7756_v56, %v3284_v22  ;;  %v7914_v61 = vadd.f32 1.0, %v3393_v39  ;;  %v7922_v4 = vld [vmem:[%s8995_s10] ss:$0 sm:$0xff]  ;;  %v3534_v13 = vor.u32 1.1754944e-38, %v3533_v21 }
0x136d   :  { %v5889_v52 = vpop.eup %5888  ;;  %v3523_v62 = vmul.f32 %v5887_v42, %v3408_v1  ;;  %vm3528_vm11 = vweird.f32 %v5887_v42  ;;  %v3913_v1 = vadd.f32 1.0, %v3897_v38 }
0x136e   :  { %v3871_v27 = vmul.f32 %v5889_v52, %v3791_v7  ;;  %v7917_v41 = vmul.f32 0.70710677, %v7910_v51  ;;  %5890 = vrcp.f32 %v7914_v61  ;;  %v4025_v17 = vpop.f32.mrf.mxu2  ;;  %vm3529_vm2 = vmor %vm3527_vm1, %vm3528_vm11  ;;  %vm3542_vm6 = vweird.f32 %v7914_v61 }
0x136f   :  { %v3524_v24 = vsub.f32 1.0, %v3523_v62  ;;  %v7931_v55 = vadd.f32 %v7922_v4, %v4025_v17  ;;  %v3824_v17 = vmul.f32 %v3808_v8, %v7896_v11  ;;  %v3546_v11 = vand.u32 2147483647, %v7914_v61 }
0x1370   :  { %v3887_v16 = vsub.f32 1.0, %v3871_v27  ;;  %v7928_v50 = vand.u32 2147483647, %v7917_v41 }
0x1371   :  { %v3525_v3 = vmul.f32 %v5887_v42, %v3524_v24  ;;  %v7940_v52 = vmul.f32 0.70710677, %v7931_v55  ;;  %vm3547_vm9 = vcmp.eq.f32.partialorder %v3546_v11, 8.507059e+37 }
0x1372   :  { %v3903_v44 = vmul.f32 %v3887_v16, %v3359_v53  ;;  %v3394_v28 = vmul.f32 0.3275911, %v7928_v50  ;;  %v3548_v53 = vand.u32 2147483648, %v7914_v61 }
0x1373   :  { %v3526_v26 = vadd.f32 %v5887_v42, %v3525_v3  ;;  %v3207_v46 = vpop.permute.xlu1 %3206  ;;  %v3287_v15 = vpop.f32.mrf.mxu1  ;;  %v7952_v21 = vand.u32 2147483647, %v7940_v52 }
0x1374   :  { %v3919_v29 = vadd.f32 1.0, %v3903_v44  ;;  %5654 = vmatmul.msk.f32.gmra.mxu1 %vm2630_vm7, %v3207_v46  ;;  %v5891_v39 = vpop.eup %5890  ;;  %v7937_v7 = vadd.f32 1.0, %v3394_v28  ;;  %v7955_v3 = vadd.f32 %v7756_v56, %v3287_v15  ;;  %v3549_v46 = vor.u32 1.1754944e-38, %v3548_v53 }
0x1375   :  { %v3530_v22 = vsel %vm3529_vm2, %v5887_v42, %v3526_v26  ;;  %v3538_v27 = vmul.f32 %v5891_v39, %v7914_v61  ;;  %v3305_v42 = vmul.f32 0.5, %v7855_v30  ;;  %vm3543_vm5 = vweird.f32 %v5891_v39 }
0x1376   :  { %v3935_v62 = vmul.f32 %v3919_v29, %v3311_v58  ;;  %v7942_v54 = vsel %vm3532_vm3, %v3534_v13, %v3530_v22  ;;  %5892 = vrcp.f32 %v7937_v7  ;;  %v4028_v44 = vpop.f32.mrf.mxu2  ;;  %v3847_v26 = vmul.f32 1.442695, %v3824_v17  ;;  %vm3544_vm8 = vmor %vm3542_vm6, %vm3543_vm5 }
0x1377   :  { %v3664_v24 = vmul.f32 1.0614054, %v7942_v54  ;;  %v3539_v47 = vsub.f32 1.0, %v3538_v27  ;;  %v3929_v34 = vmul.f32 %v3913_v1, %v3305_v42  ;;  %v4151_v8 = vmul.f32 0.3275911, %v7952_v21 }
0x1378   :  { %5661 = vmatmul.msk.f32.gmra.mxu2 %vm1110_vm4, %v3935_v62  ;;  %v3809_v58 = vsub.f32 0.0, %v7906_v18  ;;  %v7966_v22 = vmul.f32 0.70710677, %v7955_v3  ;;  %v7969_v1 = vadd.f32 %v7922_v4, %v4028_v44  ;;  %v3563_v42 = vand.u32 2147483648, %v7937_v7 }
0x1379   :  { %v3680_v16 = vadd.f32 -1.4531521, %v3664_v24  ;;  %v3540_v38 = vmul.f32 %v5891_v39, %v3539_v47  ;;  %v7963_v13 = vadd.f32 1.0, %v4151_v8  ;;  %v3561_v11 = vand.u32 2147483647, %v7937_v7 }
0x137a   :  { %v3825_v53 = vmul.f32 %v3809_v58, %v7906_v18  ;;  %vm3557_vm13 = vweird.f32 %v7937_v7 }
0x137b   :  { %v3696_v30 = vmul.f32 %v3680_v16, %v7942_v54  ;;  %v3541_v28 = vadd.f32 %v5891_v39, %v3540_v38  ;;  %5894 = vrcp.f32 %v7963_v13  ;;  %v7983_v16 = vmul.f32 0.70710677, %v7969_v1 }
0x137c   :  { %5655 = vmatmul.msk.f32.vlgmr.msrb.gmra.mxu1 %vm1110_vm4, %v3929_v34  ;;  %v5893_v56 = vpop.eup %5892  ;;  %5896 = vpow2.f32 %v3847_v26  ;;  %vm3562_vm15 = vcmp.eq.f32.partialorder %v3561_v11, 8.507059e+37  ;;  %v3360_v11 = vsel %vm3344_vm12, 1.0, %v9002_v48  ;;  %vm4202_vm11 = vweird.f32 %v7963_v13 }
0x137d   :  { %v3712_v29 = vadd.f32 1.4214138, %v3696_v30  ;;  %v3545_v62 = vsel %vm3544_vm8, %v5891_v39, %v3541_v28  ;;  %v3553_v61 = vmul.f32 %v5893_v56, %v7937_v7  ;;  %v7980_v39 = vand.u32 2147483647, %v7966_v22 }
0x137e   :  { %v7973_v15 = vsel %vm3547_vm9, %v3549_v46, %v3545_v62  ;;  %vm3558_vm10 = vweird.f32 %v5893_v56  ;;  %v3810_v30 = vsub.f32 0.0, %v7928_v50  ;;  %v7993_v28 = vand.u32 2147483647, %v7983_v16 }
0x137f   :  { %v3728_v27 = vmul.f32 %v3712_v29, %v7942_v54  ;;  %v3665_v24 = vmul.f32 1.0614054, %v7973_v15  ;;  %v3554_v17 = vsub.f32 1.0, %v3553_v61  ;;  %v3395_v26 = vmul.f32 0.3275911, %v7980_v39  ;;  %vm3559_vm14 = vmor %vm3557_vm13, %vm3558_vm10 }
0x1380   :  { %v3849_v29 = vmul.f32 1.442695, %v3825_v53  ;;  %v3564_v62 = vor.u32 1.1754944e-38, %v3563_v42  ;;  %v3826_v7 = vmul.f32 %v3810_v30, %v7928_v50  ;;  %vm3346_vm10 = vcmp.ge.f32.partialorder %v7917_v41, 0.0 }
0x1381   :  { %v3744_v47 = vadd.f32 -0.28449672, %v3728_v27  ;;  %v3681_v34 = vadd.f32 -1.4531521, %v3665_v24  ;;  %v3555_v38 = vmul.f32 %v5893_v56, %v3554_v17  ;;  %v5895_v46 = vpop.eup %5894  ;;  %v7995_v61 = vadd.f32 1.0, %v3395_v26 }
0x1382   :  { %v5897_v27 = vpop.eup %5896  ;;  %v4152_v26 = vmul.f32 0.3275911, %v7993_v28  ;;  %vm4203_vm1 = vweird.f32 %v5895_v46  ;;  %vm4103_vm12 = vcmp.ge.f32.partialorder %v7940_v52, 0.0 }
0x1383   :  { %v3760_v44 = vmul.f32 %v3744_v47, %v7942_v54  ;;  %v3697_v18 = vmul.f32 %v3681_v34, %v7973_v15  ;;  %v3556_v8 = vadd.f32 %v5893_v56, %v3555_v38  ;;  %v4198_v47 = vmul.f32 %v5895_v46, %v7963_v13  ;;  %vm4204_vm2 = vmor %vm4202_vm11, %vm4203_vm1 }
0x1384   :  { %5898 = vrcp.f32 %v7995_v61  ;;  %v8016_v12 = vadd.f32 1.0, %v4152_v26  ;;  %vm3572_vm6 = vweird.f32 %v7995_v61 }
0x1385   :  { %v3776_v58 = vadd.f32 0.2548296, %v3760_v44  ;;  %v3713_v24 = vadd.f32 1.4214138, %v3697_v18  ;;  %v3560_v17 = vsel %vm3559_vm14, %v5893_v56, %v3556_v8  ;;  %v4199_v44 = vsub.f32 1.0, %v4198_v47 }
0x1386   :  { %v7999_v38 = vsel %vm3562_vm15, %v3564_v62, %v3560_v17  ;;  %v3312_v56 = vmul.f32 0.5, %v7890_v40  ;;  %v4206_v8 = vand.u32 2147483647, %v7963_v13  ;;  %5900 = vpow2.f32 %v3849_v29 }
0x1387   :  { %v3792_v34 = vmul.f32 %v3776_v58, %v7942_v54  ;;  %v3729_v53 = vmul.f32 %v3713_v24, %v7973_v15  ;;  %v3666_v42 = vmul.f32 1.0614054, %v7999_v38  ;;  %v4200_v30 = vmul.f32 %v5895_v46, %v4199_v44 }
0x1388   :  { %v3851_v62 = vmul.f32 1.442695, %v3826_v7  ;;  %v4567_v24 = vsub.f32 0.0, %v7952_v21  ;;  %vm4207_vm3 = vcmp.eq.f32.partialorder %v4206_v8, 8.507059e+37  ;;  %5902 = vrcp.f32 %v8016_v12 }
0x1389   :  { %v3872_v54 = vmul.f32 %v5897_v27, %v3792_v34  ;;  %v3745_v18 = vadd.f32 -0.28449672, %v3729_v53  ;;  %v3682_v50 = vadd.f32 -1.4531521, %v3666_v42  ;;  %v4201_v34 = vadd.f32 %v5895_v46, %v4200_v30 }
0x138a   :  { %v5899_v27 = vpop.eup %5898  ;;  %v4208_v53 = vand.u32 2147483648, %v7963_v13  ;;  %v3578_v30 = vand.u32 2147483648, %v7995_v61  ;;  %5904 = vpow2.f32 %v3851_v62  ;;  %vm4217_vm14 = vweird.f32 %v8016_v12 }
0x138b   :  { %v3888_v58 = vsub.f32 1.0, %v3872_v54  ;;  %v3761_v17 = vmul.f32 %v3745_v18, %v7973_v15  ;;  %v3698_v40 = vmul.f32 %v3682_v50, %v7999_v38  ;;  %v3568_v29 = vmul.f32 %v5899_v27, %v7995_v61 }
0x138c   :  { %v3576_v54 = vand.u32 2147483647, %v7995_v61  ;;  %v4205_v18 = vsel %vm4204_vm2, %v5895_v46, %v4201_v34  ;;  %v4209_v50 = vor.u32 1.1754944e-38, %v4208_v53  ;;  %vm3573_vm5 = vweird.f32 %v5899_v27 }
0x138d   :  { %v3904_v47 = vmul.f32 %v3888_v58, %v3360_v11  ;;  %v3777_v42 = vadd.f32 0.2548296, %v3761_v17  ;;  %v3714_v44 = vadd.f32 1.4214138, %v3698_v40  ;;  %v3569_v11 = vsub.f32 1.0, %v3568_v29  ;;  %v5901_v58 = vpop.eup %5900  ;;  %vm3574_vm8 = vmor %vm3572_vm6, %vm3573_vm5 }
0x138e   :  { %v8025_v17 = vsel %vm4207_vm3, %v4209_v50, %v4205_v18  ;;  %vm3577_vm9 = vcmp.eq.f32.partialorder %v3576_v54, 8.507059e+37  ;;  %v8039_v18 = vld [vmem:[%s8993_s8] ss:$0 sm:$0xff]  ;;  %v8044_v9 = vpop.eup %5902  ;;  %v3313_v54 = vmul.f32 0.5, %v7900_v31  ;;  %v4221_v52 = vand.u32 2147483647, %v8016_v12 }
0x138f   :  { %v3920_v7 = vadd.f32 1.0, %v3904_v47  ;;  %v3793_v26 = vmul.f32 %v3777_v42, %v7973_v15  ;;  %v3730_v25 = vmul.f32 %v3714_v44, %v7999_v38  ;;  %v3570_v47 = vmul.f32 %v5899_v27, %v3569_v11 }
0x1390   :  { %v4423_v46 = vmul.f32 1.0614054, %v8025_v17  ;;  %v3361_v42 = vsel %vm3345_vm0, 1.0, %v9002_v48  ;;  %v4583_v44 = vmul.f32 %v4567_v24, %v7952_v21  ;;  %v3811_v21 = vsub.f32 0.0, %v7980_v39 }
0x1391   :  { %v3936_v13 = vmul.f32 %v3920_v7, %v3312_v56  ;;  %v3873_v8 = vmul.f32 %v5901_v58, %v3793_v26  ;;  %v3746_v40 = vadd.f32 -0.28449672, %v3730_v25  ;;  %v3571_v53 = vadd.f32 %v5899_v27, %v3570_v47  ;;  %v5905_v58 = vpop.eup %5904 }
0x1392   :  { %v4439_v56 = vadd.f32 -1.4531521, %v4423_v46  ;;  %v3579_v25 = vor.u32 1.1754944e-38, %v3578_v30  ;;  %v4600_v46 = vmul.f32 1.442695, %v4583_v44  ;;  %v4213_v31 = vmul.f32 %v8044_v9, %v8016_v12 }
0x1393   :  { %5662 = vmatmul.msk.f32.gmra.mxu2 %vm1110_vm4, %v3936_v13  ;;  %v3889_v15 = vsub.f32 1.0, %v3873_v8  ;;  %v3762_v34 = vmul.f32 %v3746_v40, %v7999_v38  ;;  %v3575_v7 = vsel %vm3574_vm8, %v5899_v27, %v3571_v53  ;;  %vm4218_vm13 = vweird.f32 %v8044_v9 }
0x1394   :  { %v3580_v26 = vsel %vm3577_vm9, %v3579_v25, %v3575_v7  ;;  %v4455_v24 = vmul.f32 %v4439_v56, %v8025_v17  ;;  %5906 = vpow2.f32 %v4600_v46  ;;  %vm3347_vm15 = vcmp.ge.f32.partialorder %v7966_v22, 0.0  ;;  %vm8093_vm0 = vmor %vm4217_vm14, %vm4218_vm13 }
0x1395   :  { %v3290_v62 = vpop.f32.mrf.mxu1  ;;  %v3905_v29 = vmul.f32 %v3889_v15, %v3361_v42  ;;  %v3778_v61 = vadd.f32 0.2548296, %v3762_v34  ;;  %v3667_v30 = vmul.f32 1.0614054, %v3580_v26  ;;  %v3827_v34 = vmul.f32 %v3811_v21, %v7980_v39 }
0x1396   :  { %v8042_v50 = vadd.f32 %v8039_v18, %v3290_v62  ;;  %v4471_v8 = vadd.f32 1.4214138, %v4455_v24  ;;  %v3362_v39 = vsel %vm3346_vm10, 1.0, %v9002_v48  ;;  %vm4222_vm2 = vcmp.eq.f32.partialorder %v4221_v52, 8.507059e+37 }
0x1397   :  { %v3921_v11 = vadd.f32 1.0, %v3905_v29  ;;  %v3794_v27 = vmul.f32 %v3778_v61, %v7999_v38  ;;  %v3683_v15 = vadd.f32 -1.4531521, %v3667_v30  ;;  %v3314_v61 = vmul.f32 0.5, %v7910_v51 }
0x1398   :  { %v8052_v13 = vmul.f32 0.70710677, %v8042_v50  ;;  %v4487_v56 = vmul.f32 %v4471_v8, %v8025_v17 }
0x1399   :  { %v3937_v40 = vmul.f32 %v3921_v11, %v3313_v54  ;;  %v3874_v47 = vmul.f32 %v5905_v58, %v3794_v27  ;;  %v3699_v25 = vmul.f32 %v3683_v15, %v3580_v26  ;;  %v3853_v54 = vmul.f32 1.442695, %v3827_v34 }
0x139a   :  { %v8058_v53 = vand.u32 2147483647, %v8052_v13  ;;  %v4503_v29 = vadd.f32 -0.28449672, %v4487_v56  ;;  %v4214_v11 = vsub.f32 1.0, %v4213_v31  ;;  %v5907_v34 = vpop.eup %5906 }
0x139b   :  { %v4031_v38 = vpop.f32.mrf.mxu2  ;;  %v3890_v42 = vsub.f32 1.0, %v3874_v47  ;;  %5663 = vmatmul.msk.f32.gmra.mxu2 %vm1110_vm4, %v3937_v40  ;;  %v3715_v21 = vadd.f32 1.4214138, %v3699_v25 }
0x139c   :  { %v8062_v62 = vadd.f32 %v7922_v4, %v4031_v38  ;;  %v3396_v44 = vmul.f32 0.3275911, %v8058_v53  ;;  %v4519_v41 = vmul.f32 %v4503_v29, %v8025_v17  ;;  %v4215_v51 = vmul.f32 %v8044_v9, %v4214_v11 }
0x139d   :  { %v3906_v7 = vmul.f32 %v3890_v42, %v3362_v39  ;;  %v3731_v58 = vmul.f32 %v3715_v21, %v3580_v26 }
0x139e   :  { %v8071_v24 = vmul.f32 0.70710677, %v8062_v62  ;;  %v3412_v27 = vadd.f32 1.0, %v3396_v44  ;;  %v4535_v46 = vadd.f32 0.2548296, %v4519_v41  ;;  %v4216_v39 = vadd.f32 %v8044_v9, %v4215_v51 }
0x139f   :  { %v3922_v30 = vadd.f32 1.0, %v3906_v7  ;;  %v3747_v47 = vadd.f32 -0.28449672, %v3731_v58  ;;  %v4071_v44 = vmul.f32 0.5, %v7931_v55  ;;  %v3315_v55 = vmul.f32 0.5, %v7955_v3 }
0x13a0   :  { %v8074_v8 = vand.u32 2147483647, %v8071_v24  ;;  %5908 = vrcp.f32 %v3412_v27  ;;  %v4551_v42 = vmul.f32 %v4535_v46, %v8025_v17  ;;  %v4223_v17 = vand.u32 2147483648, %v8016_v12 }
0x13a1   :  { %v3938_v40 = vmul.f32 %v3922_v30, %v3314_v61  ;;  %5910 = vpow2.f32 %v3853_v54  ;;  %v3763_v38 = vmul.f32 %v3747_v47, %v3580_v26  ;;  %v4119_v54 = vsel %vm4103_vm12, 1.0, %v9002_v48 }
0x13a2   :  { %v4153_v15 = vmul.f32 0.3275911, %v8074_v8  ;;  %v4631_v7 = vmul.f32 %v5907_v34, %v4551_v42  ;;  %v4220_v47 = vsel %vm8093_vm0, %v8044_v9, %v4216_v39  ;;  %vm3587_vm1 = vweird.f32 %v3412_v27 }
0x13a3   :  { %5664 = vmatmul.msk.f32.gmra.mxu2 %vm1110_vm4, %v3938_v40  ;;  %v3779_v56 = vadd.f32 0.2548296, %v3763_v38  ;;  %v3593_v40 = vand.u32 2147483648, %v3412_v27  ;;  %v3363_v38 = vsel %vm3347_vm15, 1.0, %v9002_v48  ;;  %v4224_v46 = vor.u32 1.1754944e-38, %v4223_v17 }
0x13a4   :  { %v8080_v31 = vadd.f32 1.0, %v4153_v15  ;;  %v4647_v58 = vsub.f32 1.0, %v4631_v7  ;;  %v3812_v9 = vsub.f32 0.0, %v8058_v53  ;;  %vm3348_vm12 = vcmp.ge.f32.partialorder %v8052_v13, 0.0 }
0x13a5   :  { %v3795_v29 = vmul.f32 %v3779_v56, %v3580_v26  ;;  %v3591_v26 = vand.u32 2147483647, %v3412_v27  ;;  %v8104_v39 = vsel %vm4222_vm2, %v4224_v46, %v4220_v47 }
0x13a6   :  { %v5909_v25 = vpop.eup %5908  ;;  %5912 = vrcp.f32 %v8080_v31  ;;  %v4663_v12 = vmul.f32 %v4647_v58, %v4119_v54  ;;  %v4236_v52 = vand.u32 2147483647, %v8080_v31  ;;  %v4238_v17 = vand.u32 2147483648, %v8080_v31 }
0x13a7   :  { %v3583_v61 = vmul.f32 %v5909_v25, %v3412_v27  ;;  %v5911_v21 = vpop.eup %5910  ;;  %vm3588_vm11 = vweird.f32 %v5909_v25  ;;  %vm3592_vm5 = vcmp.eq.f32.partialorder %v3591_v26, 8.507059e+37  ;;  %vm4232_vm8 = vweird.f32 %v8080_v31 }
0x13a8   :  { %v3875_v11 = vmul.f32 %v5911_v21, %v3795_v29  ;;  %v4679_v42 = vadd.f32 1.0, %v4663_v12  ;;  %vm3589_vm3 = vmor %vm3587_vm1, %vm3588_vm11  ;;  %v3594_v29 = vor.u32 1.1754944e-38, %v3593_v40  ;;  %vm4237_vm10 = vcmp.eq.f32.partialorder %v4236_v52, 8.507059e+37 }
0x13a9   :  { %v3584_v30 = vsub.f32 1.0, %v3583_v61  ;;  %vm4105_vm1 = vcmp.ge.f32.partialorder %v8071_v24, 0.0 }
0x13aa   :  { %v3891_v51 = vsub.f32 1.0, %v3875_v11  ;;  %v8106_v54 = vmul.f32 %v4679_v42, %v4071_v44  ;;  %v3828_v44 = vmul.f32 %v3812_v9, %v8058_v53 }
0x13ab   :  { %v3585_v15 = vmul.f32 %v5909_v25, %v3584_v30 }
0x13ac   :  { %v5913_v22 = vpop.eup %5912  ;;  %v3907_v34 = vmul.f32 %v3891_v51, %v3363_v38  ;;  %v4715_v41 = vsel %vm2630_vm7, %v8106_v54, 0.0  ;;  %v4239_v51 = vor.u32 1.1754944e-38, %v4238_v17 }
0x13ad   :  { %v3586_v56 = vadd.f32 %v5909_v25, %v3585_v15  ;;  %v4228_v3 = vmul.f32 %v5913_v22, %v8080_v31  ;;  %vm4233_vm6 = vweird.f32 %v5913_v22  ;;  %4716 = vadd.xlane.f32.xlu1 %v4715_v41  ;;  %v4424_v15 = vmul.f32 1.0614054, %v8104_v39 }
0x13ae   :  { %v3923_v61 = vadd.f32 1.0, %v3907_v34  ;;  %vm4234_vm9 = vmor %vm4232_vm8, %vm4233_vm6  ;;  %v3855_v34 = vmul.f32 1.442695, %v3828_v44 }
0x13af   :  { %v3590_v7 = vsel %vm3589_vm3, %v5909_v25, %v3586_v56  ;;  %v4229_v21 = vsub.f32 1.0, %v4228_v3  ;;  %v4440_v42 = vadd.f32 -1.4531521, %v4424_v15 }
0x13b0   :  { %v3595_v27 = vsel %vm3592_vm5, %v3594_v29, %v3590_v7  ;;  %v3939_v11 = vmul.f32 %v3923_v61, %v3315_v55  ;;  %5914 = vpow2.f32 %v3855_v34 }
0x13b1   :  { %v3668_v30 = vmul.f32 1.0614054, %v3595_v27  ;;  %v4230_v58 = vmul.f32 %v5913_v22, %v4229_v21  ;;  %v4034_v26 = vpop.f32.mrf.mxu2  ;;  %v4456_v17 = vmul.f32 %v4440_v42, %v8104_v39 }
0x13b2   :  { %v8113_v40 = vadd.f32 %v7922_v4, %v4034_v26  ;;  %5665 = vmatmul.msk.f32.gmra.mxu2 %vm1110_vm4, %v3939_v11 }
0x13b3   :  { %v3684_v25 = vadd.f32 -1.4531521, %v3668_v30  ;;  %v4231_v47 = vadd.f32 %v5913_v22, %v4230_v58  ;;  %v4569_v58 = vsub.f32 0.0, %v8074_v8 }
0x13b4   :  { %v8119_v55 = vmul.f32 0.70710677, %v8113_v40 }
0x13b5   :  { %v3700_v12 = vmul.f32 %v3684_v25, %v3595_v27  ;;  %v4235_v38 = vsel %vm4234_vm9, %v5913_v22, %v4231_v47  ;;  %v4472_v47 = vadd.f32 1.4214138, %v4456_v17 }
0x13b6   :  { %v8124_v46 = vand.u32 2147483647, %v8119_v55  ;;  %v8126_v53 = vsel %vm4237_vm10, %v4239_v51, %v4235_v38  ;;  %v5915_v51 = vpop.eup %5914  ;;  %v4585_v38 = vmul.f32 %v4569_v58, %v8074_v8  ;;  %v3364_v8 = vsel %vm3348_vm12, 1.0, %v9002_v48 }
0x13b7   :  { %v3716_v31 = vadd.f32 1.4214138, %v3700_v12  ;;  %v4425_v56 = vmul.f32 1.0614054, %v8126_v53 }
0x13b8   :  { %v4154_v3 = vmul.f32 0.3275911, %v8124_v46  ;;  %v4604_v17 = vmul.f32 1.442695, %v4585_v38 }
0x13b9   :  { %v3732_v29 = vmul.f32 %v3716_v31, %v3595_v27  ;;  %v4441_v9 = vadd.f32 -1.4531521, %v4425_v56 }
0x13ba   :  { %v4170_v61 = vadd.f32 1.0, %v4154_v3 }
0x13bb   :  { %v3748_v7 = vadd.f32 -0.28449672, %v3732_v29  ;;  %v4457_v22 = vmul.f32 %v4441_v9, %v8126_v53  ;;  %v4568_v29 = vsub.f32 0.0, %v7993_v28 }
0x13bc   :  { %v3293_v21 = vpop.f32.mrf.mxu1  ;;  %5916 = vrcp.f32 %v4170_v61  ;;  %vm4247_vm14 = vweird.f32 %v4170_v61 }
0x13bd   :  { %v8132_v52 = vadd.f32 %v8039_v18, %v3293_v21  ;;  %v3764_v11 = vmul.f32 %v3748_v7, %v3595_v27  ;;  %v4473_v30 = vadd.f32 1.4214138, %v4457_v22  ;;  %v4488_v7 = vmul.f32 %v4472_v47, %v8104_v39 }
0x13be   :  { %v4584_v58 = vmul.f32 %v4568_v29, %v7993_v28 }
0x13bf   :  { %v8137_v41 = vmul.f32 0.70710677, %v8132_v52  ;;  %v3780_v26 = vadd.f32 0.2548296, %v3764_v11  ;;  %v4489_v25 = vmul.f32 %v4473_v30, %v8126_v53 }
0x13c0   :  { %v4602_v29 = vmul.f32 1.442695, %v4584_v58 }
0x13c1   :  { %v8141_v44 = vand.u32 2147483647, %v8137_v41  ;;  %v3796_v15 = vmul.f32 %v3780_v26, %v3595_v27  ;;  %v4505_v34 = vadd.f32 -0.28449672, %v4489_v25  ;;  %v3316_v26 = vmul.f32 0.5, %v8042_v50 }
0x13c2   :  { %v5917_v12 = vpop.eup %5916  ;;  %v4504_v25 = vadd.f32 -0.28449672, %v4488_v7 }
0x13c3   :  { %v3397_v31 = vmul.f32 0.3275911, %v8141_v44  ;;  %v3876_v56 = vmul.f32 %v5915_v51, %v3796_v15  ;;  %v4243_v3 = vmul.f32 %v5917_v12, %v4170_v61  ;;  %v4521_v13 = vmul.f32 %v4505_v34, %v8126_v53 }
0x13c4   :  { %v3296_v42 = vpop.f32.mrf.mxu1  ;;  %v4251_v15 = vand.u32 2147483647, %v4170_v61  ;;  %vm4248_vm13 = vweird.f32 %v5917_v12  ;;  %v4520_v50 = vmul.f32 %v4504_v25, %v8104_v39 }
0x13c5   :  { %v8147_v9 = vadd.f32 1.0, %v3397_v31  ;;  %v3892_v21 = vsub.f32 1.0, %v3876_v56  ;;  %v4244_v22 = vsub.f32 1.0, %v4243_v3  ;;  %v8151_v27 = vadd.f32 %v8039_v18, %v3296_v42  ;;  %v4037_v42 = vpop.f32.mrf.mxu2  ;;  %vm4249_vm15 = vmor %vm4247_vm14, %vm4248_vm13 }
0x13c6   :  { %v4253_v31 = vand.u32 2147483648, %v4170_v61  ;;  %v4537_v56 = vadd.f32 0.2548296, %v4521_v13  ;;  %vm4252_vm0 = vcmp.eq.f32.partialorder %v4251_v15, 8.507059e+37  ;;  %vm4104_vm13 = vcmp.ge.f32.partialorder %v7983_v16, 0.0 }
0x13c7   :  { %5918 = vrcp.f32 %v8147_v9  ;;  %v3908_v11 = vmul.f32 %v3892_v21, %v3364_v8  ;;  %v4245_v30 = vmul.f32 %v5917_v12, %v4244_v22  ;;  %v8159_v51 = vmul.f32 0.70710677, %v8151_v27 }
0x13c8   :  { %5920 = vpow2.f32 %v4604_v17  ;;  %v4254_v8 = vor.u32 1.1754944e-38, %v4253_v31  ;;  %v8169_v17 = vadd.f32 %v7922_v4, %v4037_v42  ;;  %v3606_v15 = vand.u32 2147483647, %v8147_v9 }
0x13c9   :  { %v3924_v47 = vadd.f32 1.0, %v3908_v11  ;;  %v4246_v38 = vadd.f32 %v5917_v12, %v4245_v30  ;;  %v8162_v34 = vand.u32 2147483647, %v8159_v51  ;;  %v4553_v11 = vmul.f32 %v4537_v56, %v8126_v53 }
0x13ca   :  { %v4570_v30 = vsub.f32 0.0, %v8124_v46  ;;  %v3608_v4 = vand.u32 2147483648, %v8147_v9  ;;  %v8188_v56 = vmul.f32 0.70710677, %v8169_v17  ;;  %vm3602_vm2 = vweird.f32 %v8147_v9 }
0x13cb   :  { %v3940_v3 = vmul.f32 %v3924_v47, %v3316_v26  ;;  %v3398_v22 = vmul.f32 0.3275911, %v8162_v34  ;;  %v4250_v61 = vsel %vm4249_vm15, %v5917_v12, %v4246_v38  ;;  %vm3607_vm5 = vcmp.eq.f32.partialorder %v3606_v15, 8.507059e+37 }
0x13cc   :  { %v3299_v21 = vpop.f32.mrf.mxu1  ;;  %v8178_v25 = vsel %vm4252_vm0, %v4254_v8, %v4250_v61  ;;  %v4536_v8 = vadd.f32 0.2548296, %v4520_v50  ;;  %v4073_v15 = vmul.f32 0.5, %v8062_v62  ;;  %vm4106_vm14 = vcmp.ge.f32.partialorder %v8119_v55, 0.0 }
0x13cd   :  { %v5919_v28 = vpop.eup %5918  ;;  %5666 = vmatmul.msk.f32.gmra.mxu2 %vm1110_vm4, %v3940_v3  ;;  %v8172_v13 = vadd.f32 %v8039_v18, %v3299_v21  ;;  %v8176_v26 = vadd.f32 1.0, %v3398_v22  ;;  %v4426_v12 = vmul.f32 1.0614054, %v8178_v25  ;;  %v3813_v21 = vsub.f32 0.0, %v8141_v44 }
0x13ce   :  { %v3598_v7 = vmul.f32 %v5919_v28, %v8147_v9  ;;  %v5921_v47 = vpop.eup %5920  ;;  %vm3603_vm11 = vweird.f32 %v5919_v28  ;;  %v3609_v22 = vor.u32 1.1754944e-38, %v3608_v4  ;;  %v8203_v9 = vand.u32 2147483647, %v8188_v56 }
0x13cf   :  { %v8183_v31 = vmul.f32 0.70710677, %v8172_v13  ;;  %5922 = vrcp.f32 %v8176_v26  ;;  %v4633_v53 = vmul.f32 %v5921_v47, %v4553_v11  ;;  %vm3604_vm3 = vmor %vm3602_vm2, %vm3603_vm11  ;;  %v4121_v47 = vsel %vm4105_vm1, 1.0, %v9002_v48 }
0x13d0   :  { %v3599_v58 = vsub.f32 1.0, %v3598_v7  ;;  %5924 = vpow2.f32 %v4602_v29  ;;  %v4586_v7 = vmul.f32 %v4570_v30, %v8124_v46  ;;  %v3829_v4 = vmul.f32 %v3813_v21, %v8141_v44 }
0x13d1   :  { %v8191_v38 = vand.u32 2147483647, %v8183_v31  ;;  %v4649_v61 = vsub.f32 1.0, %v4633_v53  ;;  %vm3617_vm8 = vweird.f32 %v8176_v26  ;;  %vm3349_vm1 = vcmp.ge.f32.partialorder %v8137_v41, 0.0 }
0x13d2   :  { %v3600_v3 = vmul.f32 %v5919_v28, %v3599_v58  ;;  %v4442_v58 = vadd.f32 -1.4531521, %v4426_v12  ;;  %v4606_v12 = vmul.f32 1.442695, %v4586_v7  ;;  %v3857_v21 = vmul.f32 1.442695, %v3829_v4 }
0x13d3   :  { %v3399_v29 = vmul.f32 0.3275911, %v8191_v38  ;;  %v4665_v10 = vmul.f32 %v4649_v61, %v4121_v47  ;;  %v3623_v61 = vand.u32 2147483648, %v8176_v26  ;;  %v3621_v47 = vand.u32 2147483647, %v8176_v26 }
0x13d4   :  { %v3601_v42 = vadd.f32 %v5919_v28, %v3600_v3  ;;  %vm3350_vm2 = vcmp.ge.f32.partialorder %v8159_v51, 0.0 }
0x13d5   :  { %v8205_v3 = vadd.f32 1.0, %v3399_v29  ;;  %v5923_v46 = vpop.eup %5922  ;;  %v4552_v29 = vmul.f32 %v4536_v8, %v8104_v39  ;;  %vm3622_vm10 = vcmp.eq.f32.partialorder %v3621_v47, 8.507059e+37 }
0x13d6   :  { %v3605_v11 = vsel %vm3604_vm3, %v5919_v28, %v3601_v42  ;;  %v4458_v28 = vmul.f32 %v4442_v58, %v8178_v25  ;;  %v5925_v50 = vpop.eup %5924  ;;  %v3613_v53 = vmul.f32 %v5923_v46, %v8176_v26  ;;  %vm3618_vm6 = vweird.f32 %v5923_v46 }
0x13d7   :  { %v8200_v24 = vsel %vm3607_vm5, %v3609_v22, %v3605_v11  ;;  %5926 = vrcp.f32 %v8205_v3  ;;  %v4681_v22 = vadd.f32 1.0, %v4665_v10  ;;  %v4155_v11 = vmul.f32 0.3275911, %v8203_v9  ;;  %vm3619_vm9 = vmor %vm3617_vm8, %vm3618_vm6 }
0x13d8   :  { %v3669_v30 = vmul.f32 1.0614054, %v8200_v24  ;;  %v3614_v48 = vsub.f32 1.0, %v3613_v53  ;;  %v4474_v49 = vadd.f32 1.4214138, %v4458_v28  ;;  %v8223_v8 = vmul.f32 %v5925_v50, %v4552_v29 }
0x13d9   :  { %v8217_v58 = vmul.f32 %v4681_v22, %v4073_v15  ;;  %v8225_v28 = vadd.f32 1.0, %v4155_v11  ;;  %5928 = vpow2.f32 %v4606_v12  ;;  %v3624_v53 = vor.u32 1.1754944e-38, %v3623_v61 }
0x13da   :  { %v3685_v42 = vadd.f32 -1.4531521, %v3669_v30  ;;  %v3615_v62 = vmul.f32 %v5923_v46, %v3614_v48  ;;  %v4490_v7 = vmul.f32 %v4474_v49, %v8178_v25  ;;  %5930 = vpow2.f32 %v3857_v21 }
0x13db   :  { %v4721_v39 = vsel %vm2630_vm7, %v8217_v58, 0.0  ;;  %v3814_v11 = vsub.f32 0.0, %v8162_v34  ;;  %5932 = vrcp.f32 %v8225_v28  ;;  %vm3632_vm15 = vweird.f32 %v8205_v3 }
0x13dc   :  { %v3701_v44 = vmul.f32 %v3685_v42, %v8200_v24  ;;  %v3616_v4 = vadd.f32 %v5923_v46, %v3615_v62  ;;  %4722 = vadd.xlane.f32.xlu1 %v4721_v39  ;;  %v4506_v15 = vadd.f32 -0.28449672, %v4490_v7  ;;  %vm4262_vm5 = vweird.f32 %v8225_v28 }
0x13dd   :  { %v5927_v30 = vpop.eup %5926  ;;  %vm3351_vm8 = vcmp.ge.f32.partialorder %v8183_v31, 0.0 }
0x13de   :  { %v3717_v10 = vadd.f32 1.4214138, %v3701_v44  ;;  %v3628_v49 = vmul.f32 %v5927_v30, %v8205_v3  ;;  %v3620_v42 = vsel %vm3619_vm9, %v5923_v46, %v3616_v4  ;;  %v4522_v50 = vmul.f32 %v4506_v15, %v8178_v25 }
0x13df   :  { %v8231_v29 = vsel %vm3622_vm10, %v3624_v53, %v3620_v42  ;;  %v3638_v44 = vand.u32 2147483648, %v8205_v3  ;;  %vm3633_vm12 = vweird.f32 %v5927_v30  ;;  %v3636_v46 = vand.u32 2147483647, %v8205_v3 }
0x13e0   :  { %v3733_v48 = vmul.f32 %v3717_v10, %v8200_v24  ;;  %v3629_v26 = vsub.f32 1.0, %v3628_v49  ;;  %v3670_v12 = vmul.f32 1.0614054, %v8231_v29  ;;  %v4538_v61 = vadd.f32 0.2548296, %v4522_v50  ;;  %v5929_v10 = vpop.eup %5928  ;;  %vm3634_vm0 = vmor %vm3632_vm15, %vm3633_vm12 }
0x13e1   :  { %v3830_v4 = vmul.f32 %v3814_v11, %v8162_v34  ;;  %v3639_v49 = vor.u32 1.1754944e-38, %v3638_v44  ;;  %v4648_v50 = vsub.f32 1.0, %v8223_v8  ;;  %vm3637_vm11 = vcmp.eq.f32.partialorder %v3636_v46, 8.507059e+37 }
0x13e2   :  { %v3749_v22 = vadd.f32 -0.28449672, %v3733_v48  ;;  %v3630_v21 = vmul.f32 %v5927_v30, %v3629_v26  ;;  %v3686_v47 = vadd.f32 -1.4531521, %v3670_v12  ;;  %v4554_v7 = vmul.f32 %v4538_v61, %v8178_v25  ;;  %v5931_v48 = vpop.eup %5930 }
0x13e3   :  { %v8248_v12 = vpop.eup %5932  ;;  %v3815_v3 = vsub.f32 0.0, %v8191_v38  ;;  %v3859_v44 = vmul.f32 1.442695, %v3830_v4 }
0x13e4   :  { %v3765_v62 = vmul.f32 %v3749_v22, %v8200_v24  ;;  %v3631_v15 = vadd.f32 %v5927_v30, %v3630_v21  ;;  %v3702_v53 = vmul.f32 %v3686_v47, %v8231_v29  ;;  %v4634_v42 = vmul.f32 %v5929_v10, %v4554_v7 }
0x13e5   :  { %v9019_v22 = vmov -1.0   ;;  %v4258_v7 = vmul.f32 %v8248_v12, %v8225_v28  ;;  %v3831_v4 = vmul.f32 %v3815_v3, %v8191_v38  ;;  %5934 = vpow2.f32 %v3859_v44 }
0x13e6   :  { %v3781_v39 = vadd.f32 0.2548296, %v3765_v62  ;;  %v4122_v55 = vsel %vm4106_vm14, 1.0, %v9019_v22  ;;  %v3635_v25 = vsel %vm3634_vm0, %v5927_v30, %v3631_v15  ;;  %v3718_v34 = vadd.f32 1.4214138, %v3702_v53 }
0x13e7   :  { %v3640_v11 = vsel %vm3637_vm11, %v3639_v49, %v3635_v25  ;;  %v4650_v61 = vsub.f32 1.0, %v4634_v42  ;;  %v4120_v8 = vsel %vm4104_vm13, 1.0, %v9019_v22  ;;  %v3365_v41 = vsel %vm3349_vm1, 1.0, %v9019_v22 }
0x13e8   :  { %v3797_v26 = vmul.f32 %v3781_v39, %v8200_v24  ;;  %v3671_v21 = vmul.f32 1.0614054, %v3640_v11  ;;  %v4074_v24 = vmul.f32 0.5, %v8113_v40  ;;  %v3734_v30 = vmul.f32 %v3718_v34, %v8231_v29 }
0x13e9   :  { %v4666_v46 = vmul.f32 %v4650_v61, %v4122_v55  ;;  %v4664_v39 = vmul.f32 %v4648_v50, %v4120_v8  ;;  %v3317_v42 = vmul.f32 0.5, %v8132_v52  ;;  %v3861_v50 = vmul.f32 1.442695, %v3831_v4 }
0x13ea   :  { %v3877_v62 = vmul.f32 %v5931_v48, %v3797_v26  ;;  %v3687_v10 = vadd.f32 -1.4531521, %v3671_v21  ;;  %v3750_v15 = vadd.f32 -0.28449672, %v3734_v30  ;;  %v4259_v26 = vsub.f32 1.0, %v4258_v7 }
0x13eb   :  { %v4682_v48 = vadd.f32 1.0, %v4666_v46  ;;  %v4680_v38 = vadd.f32 1.0, %v4664_v39  ;;  %v4072_v8 = vmul.f32 0.5, %v7969_v1  ;;  %5936 = vpow2.f32 %v3861_v50 }
0x13ec   :  { %v3893_v47 = vsub.f32 1.0, %v3877_v62  ;;  %v3703_v16 = vmul.f32 %v3687_v10, %v3640_v11  ;;  %v3766_v40 = vmul.f32 %v3750_v15, %v8231_v29  ;;  %v4260_v30 = vmul.f32 %v8248_v12, %v4259_v26 }
0x13ed   :  { %v8262_v49 = vmul.f32 %v4682_v48, %v4074_v24  ;;  %v5935_v24 = vpop.eup %5934  ;;  %v8278_v10 = vmul.f32 %v4680_v38, %v4072_v8  ;;  %vm4263_vm3 = vweird.f32 %v8248_v12  ;;  %v3318_v50 = vmul.f32 0.5, %v8151_v27 }
0x13ee   :  { %v3909_v53 = vmul.f32 %v3893_v47, %v3365_v41  ;;  %v3719_v25 = vadd.f32 1.4214138, %v3703_v16  ;;  %v3782_v34 = vadd.f32 0.2548296, %v3766_v40  ;;  %v4261_v15 = vadd.f32 %v8248_v12, %v4260_v30  ;;  %vm4264_vm6 = vmor %vm4262_vm5, %vm4263_vm3 }
0x13ef   :  { %v4724_v61 = vsel %vm2630_vm7, %v8262_v49, 0.0  ;;  %v4718_v48 = vsel %vm2630_vm7, %v8278_v10, 0.0  ;;  %v4268_v16 = vand.u32 2147483648, %v8225_v28 }
0x13f0   :  { %v3925_v55 = vadd.f32 1.0, %v3909_v53  ;;  %v3735_v21 = vmul.f32 %v3719_v25, %v3640_v11  ;;  %4725 = vadd.xlane.f32.xlu0 %v4724_v61  ;;  %v3798_v52 = vmul.f32 %v3782_v34, %v8231_v29  ;;  %v3366_v29 = vsel %vm3350_vm2, 1.0, %v9019_v22 }
0x13f1   :  { %v3302_v62 = vpop.f32.mrf.mxu1  ;;  %v4266_v25 = vand.u32 2147483647, %v8225_v28  ;;  %v5937_v34 = vpop.eup %5936  ;;  %v4265_v38 = vsel %vm4264_vm6, %v8248_v12, %v4261_v15 }
0x13f2   :  { %v3941_v3 = vmul.f32 %v3925_v55, %v3317_v42  ;;  %v8268_v44 = vadd.f32 %v8039_v18, %v3302_v62  ;;  %v3751_v46 = vadd.f32 -0.28449672, %v3735_v21  ;;  %v3878_v7 = vmul.f32 %v5935_v24, %v3798_v52  ;;  %v8294_v55 = vld [vmem:[%s8995_s10] ss:$0 sm:$0xff] }
0x13f3   :  { %v4269_v21 = vor.u32 1.1754944e-38, %v4268_v16  ;;  %vm4267_vm9 = vcmp.eq.f32.partialorder %v4266_v25, 8.507059e+37  ;;  %v3367_v24 = vsel %vm3351_vm8, 1.0, %v9019_v22 }
0x13f4   :  { %v8275_v47 = vmul.f32 0.70710677, %v8268_v44  ;;  %5667 = vmatmul.msk.f32.gmra.mxu2 %vm1110_vm4, %v3941_v3  ;;  %v3767_v18 = vmul.f32 %v3751_v46, %v3640_v11  ;;  %v3894_v39 = vsub.f32 1.0, %v3878_v7  ;;  %v3319_v7 = vmul.f32 0.5, %v8172_v13 }
0x13f5   :  { %v8315_v28 = vsel %vm4267_vm9, %v4269_v21, %v4265_v38  ;;  %vm4107_vm9 = vcmp.ge.f32.partialorder %v8188_v56, 0.0 }
0x13f6   :  { %v8281_v1 = vand.u32 2147483647, %v8275_v47  ;;  %v3783_v41 = vadd.f32 0.2548296, %v3767_v18  ;;  %v3910_v4 = vmul.f32 %v3894_v39, %v3366_v29  ;;  %v4427_v39 = vmul.f32 1.0614054, %v8315_v28 }
0x13f7   :  { %vm3352_vm8 = vcmp.ge.f32.partialorder %v8275_v47, 0.0 }
0x13f8   :  { %v3400_v51 = vmul.f32 0.3275911, %v8281_v1  ;;  %v3799_v40 = vmul.f32 %v3783_v41, %v3640_v11  ;;  %4719 = vadd.xlane.f32.xlu0 %v4718_v48  ;;  %v3926_v61 = vadd.f32 1.0, %v3910_v4  ;;  %v3816_v38 = vsub.f32 0.0, %v8281_v1 }
0x13f9   :  { %v4022_v53 = vpop.f32.mrf.mxu1  ;;  %v3368_v47 = vsel %vm3352_vm8, 1.0, %v9019_v22 }
0x13fa   :  { %v3416_v42 = vadd.f32 1.0, %v3400_v51  ;;  %v8297_v26 = vadd.f32 %v8294_v55, %v4022_v53  ;;  %v3879_v11 = vmul.f32 %v5937_v34, %v3799_v40  ;;  %v3942_v3 = vmul.f32 %v3926_v61, %v3318_v50 }
0x13fb   :  { %v4040_v62 = vpop.f32.mrf.mxu2  ;;  %v4443_v40 = vadd.f32 -1.4531521, %v4427_v39 }
0x13fc   :  { %5938 = vrcp.f32 %v3416_v42  ;;  %v3895_v8 = vsub.f32 1.0, %v3879_v11  ;;  %v8308_v52 = vmul.f32 0.70710677, %v8297_v26  ;;  %v8311_v27 = vadd.f32 %v8294_v55, %v4040_v62  ;;  %5668 = vmatmul.msk.f32.gmra.mxu2 %vm1110_vm4, %v3942_v3 }
0x13fd   :  { %v3653_v16 = vand.u32 2147483648, %v3416_v42  ;;  %v3651_v13 = vand.u32 2147483647, %v3416_v42  ;;  %vm3647_vm12 = vweird.f32 %v3416_v42  ;;  %v4459_v62 = vmul.f32 %v4443_v40, %v8315_v28 }
0x13fe   :  { %v3911_v31 = vmul.f32 %v3895_v8, %v3367_v24  ;;  %v8318_v30 = vand.u32 2147483647, %v8308_v52  ;;  %v8321_v12 = vmul.f32 0.70710677, %v8311_v27 }
0x13ff   :  { %v3654_v61 = vor.u32 1.1754944e-38, %v3653_v16  ;;  %vm3652_vm14 = vcmp.eq.f32.partialorder %v3651_v13, 8.507059e+37 }
0x1400   :  { %v3927_v18 = vadd.f32 1.0, %v3911_v31  ;;  %v4150_v29 = vmul.f32 0.3275911, %v8318_v30  ;;  %v8327_v51 = vand.u32 2147483647, %v8321_v12 }
0x1401   :  { %v4475_v31 = vadd.f32 1.4214138, %v4459_v62 }
0x1402   :  { %v5939_v46 = vpop.eup %5938  ;;  %v3943_v15 = vmul.f32 %v3927_v18, %v3319_v7  ;;  %v4166_v4 = vadd.f32 1.0, %v4150_v29  ;;  %v4156_v53 = vmul.f32 0.3275911, %v8327_v51  ;;  %v3832_v29 = vmul.f32 %v3816_v38, %v8281_v1 }
0x1403   :  { %v3643_v41 = vmul.f32 %v5939_v46, %v3416_v42  ;;  %vm3648_vm10 = vweird.f32 %v5939_v46  ;;  %v4491_v40 = vmul.f32 %v4475_v31, %v8315_v28 }
0x1404   :  { %5940 = vrcp.f32 %v4166_v4  ;;  %v4172_v34 = vadd.f32 1.0, %v4156_v53  ;;  %5669 = vmatmul.msk.f32.gmra.mxu2 %vm1110_vm4, %v3943_v15  ;;  %vm3649_vm13 = vmor %vm3647_vm12, %vm3648_vm10  ;;  %v4191_v53 = vand.u32 2147483647, %v4166_v4  ;;  %v3863_v13 = vmul.f32 1.442695, %v3832_v29 }
0x1405   :  { %v3644_v48 = vsub.f32 1.0, %v3643_v41  ;;  %v4193_v41 = vand.u32 2147483648, %v4166_v4  ;;  %vm4187_vm0 = vweird.f32 %v4166_v4  ;;  %vm4102_vm10 = vcmp.ge.f32.partialorder %v8308_v52, 0.0 }
0x1406   :  { %5942 = vrcp.f32 %v4172_v34  ;;  %v4283_v1 = vand.u32 2147483648, %v4172_v34  ;;  %vm4192_vm2 = vcmp.eq.f32.partialorder %v4191_v53, 8.507059e+37  ;;  %vm4277_vm3 = vweird.f32 %v4172_v34 }
0x1407   :  { %v3645_v25 = vmul.f32 %v5939_v46, %v3644_v48  ;;  %v4194_v62 = vor.u32 1.1754944e-38, %v4193_v41  ;;  %v4507_v41 = vadd.f32 -0.28449672, %v4491_v40  ;;  %5944 = vpow2.f32 %v3863_v13 }
0x1409   :  { %v3646_v50 = vadd.f32 %v5939_v46, %v3645_v25 }
0x140a   :  { %v5941_v3 = vpop.eup %5940 }
0x140b   :  { %v3650_v11 = vsel %vm3649_vm13, %v5939_v46, %v3646_v50  ;;  %v4183_v24 = vmul.f32 %v5941_v3, %v4166_v4  ;;  %vm4188_vm15 = vweird.f32 %v5941_v3  ;;  %v4571_v46 = vsub.f32 0.0, %v8203_v9 }
0x140c   :  { %v3655_v21 = vsel %vm3652_vm14, %v3654_v61, %v3650_v11  ;;  %v5943_v7 = vpop.eup %5942  ;;  %vm4189_vm11 = vmor %vm4187_vm0, %vm4188_vm15  ;;  %vm4108_vm15 = vcmp.ge.f32.partialorder %v8321_v12, 0.0 }
0x140d   :  { %v3672_v8 = vmul.f32 1.0614054, %v3655_v21  ;;  %v4184_v39 = vsub.f32 1.0, %v4183_v24  ;;  %v4273_v42 = vmul.f32 %v5943_v7, %v4172_v34  ;;  %vm4278_vm1 = vweird.f32 %v5943_v7 }
0x140e   :  { %v4587_v24 = vmul.f32 %v4571_v46, %v8203_v9  ;;  %vm4279_vm5 = vmor %vm4277_vm3, %vm4278_vm1 }
0x140f   :  { %v3688_v18 = vadd.f32 -1.4531521, %v3672_v8  ;;  %v4185_v48 = vmul.f32 %v5941_v3, %v4184_v39  ;;  %v4274_v16 = vsub.f32 1.0, %v4273_v42  ;;  %v4281_v8 = vand.u32 2147483647, %v4172_v34 }
0x1410   :  { %v4608_v46 = vmul.f32 1.442695, %v4587_v24 }
0x1411   :  { %v3704_v15 = vmul.f32 %v3688_v18, %v3655_v21  ;;  %v4186_v50 = vadd.f32 %v5941_v3, %v4185_v48  ;;  %v4275_v61 = vmul.f32 %v5943_v7, %v4274_v16  ;;  %v4284_v48 = vor.u32 1.1754944e-38, %v4283_v1 }
0x1412   :  { %vm4282_vm6 = vcmp.eq.f32.partialorder %v4281_v8, 8.507059e+37  ;;  %5946 = vpow2.f32 %v4608_v46 }
0x1413   :  { %v3720_v25 = vadd.f32 1.4214138, %v3704_v15  ;;  %v4190_v38 = vsel %vm4189_vm11, %v5941_v3, %v4186_v50  ;;  %v4276_v31 = vadd.f32 %v5943_v7, %v4275_v61  ;;  %v4566_v3 = vsub.f32 0.0, %v8318_v30 }
0x1414   :  { %v8337_v39 = vsel %vm4192_vm2, %v4194_v62, %v4190_v38  ;;  %v5945_v38 = vpop.eup %5944 }
0x1415   :  { %v3736_v11 = vmul.f32 %v3720_v25, %v3655_v21  ;;  %v4422_v29 = vmul.f32 1.0614054, %v8337_v39  ;;  %v4280_v15 = vsel %vm4279_vm5, %v5943_v7, %v4276_v31  ;;  %v4582_v13 = vmul.f32 %v4566_v3, %v8318_v30 }
0x1416   :  { %v4043_v18 = vpop.f32.mrf.mxu2  ;;  %v8348_v16 = vsel %vm4282_vm6, %v4284_v48, %v4280_v15  ;;  %v4523_v7 = vmul.f32 %v4507_v41, %v8315_v28 }
0x1417   :  { %v3752_v42 = vadd.f32 -0.28449672, %v3736_v11  ;;  %v8340_v4 = vadd.f32 %v8294_v55, %v4043_v18  ;;  %v4438_v53 = vadd.f32 -1.4531521, %v4422_v29  ;;  %v4428_v61 = vmul.f32 1.0614054, %v8348_v16 }
0x1418   :  { %v4572_v18 = vsub.f32 0.0, %v8327_v51  ;;  %v4598_v29 = vmul.f32 1.442695, %v4582_v13 }
0x1419   :  { %v3768_v9 = vmul.f32 %v3752_v42, %v3655_v21  ;;  %v8346_v34 = vmul.f32 0.70710677, %v8340_v4  ;;  %v4454_v40 = vmul.f32 %v4438_v53, %v8337_v39  ;;  %v4444_v8 = vadd.f32 -1.4531521, %v4428_v61 }
0x141a   :  { %v4588_v46 = vmul.f32 %v4572_v18, %v8327_v51 }
0x141b   :  { %v3784_v25 = vadd.f32 0.2548296, %v3768_v9  ;;  %v8351_v50 = vand.u32 2147483647, %v8346_v34  ;;  %v4470_v11 = vadd.f32 1.4214138, %v4454_v40  ;;  %v4460_v3 = vmul.f32 %v4444_v8, %v8348_v16  ;;  %v5947_v40 = vpop.eup %5946 }
0x141c   :  { %v4610_v18 = vmul.f32 1.442695, %v4588_v46 }
0x141d   :  { %v3800_v62 = vmul.f32 %v3784_v25, %v3655_v21  ;;  %v4157_v1 = vmul.f32 0.3275911, %v8351_v50  ;;  %v4486_v30 = vmul.f32 %v4470_v11, %v8337_v39  ;;  %v4539_v21 = vadd.f32 0.2548296, %v4523_v7 }
0x141e   :  { %v4046_v42 = vpop.f32.mrf.mxu2  ;;  %v4476_v25 = vadd.f32 1.4214138, %v4460_v3 }
0x141f   :  { %v3880_v24 = vmul.f32 %v5945_v38, %v3800_v62  ;;  %v8360_v31 = vadd.f32 1.0, %v4157_v1  ;;  %v8364_v41 = vadd.f32 %v8294_v55, %v4046_v42  ;;  %v4502_v9 = vadd.f32 -0.28449672, %v4486_v30 }
0x1420   :  { %v4555_v61 = vmul.f32 %v4539_v21, %v8315_v28  ;;  %v3320_v62 = vmul.f32 0.5, %v8268_v44  ;;  %v4492_v11 = vmul.f32 %v4476_v25, %v8348_v16 }
0x1421   :  { %v3896_v15 = vsub.f32 1.0, %v3880_v24  ;;  %5948 = vrcp.f32 %v8360_v31  ;;  %v8370_v48 = vmul.f32 0.70710677, %v8364_v41  ;;  %v4518_v7 = vmul.f32 %v4502_v9, %v8337_v39 }
0x1422   :  { %5950 = vpow2.f32 %v4598_v29  ;;  %v4508_v30 = vadd.f32 -0.28449672, %v4492_v11  ;;  %v4635_v28 = vmul.f32 %v5947_v40, %v4555_v61  ;;  %v4296_v52 = vand.u32 2147483647, %v8360_v31 }
0x1423   :  { %v3912_v53 = vmul.f32 %v3896_v15, %v3368_v47  ;;  %v8374_v13 = vand.u32 2147483647, %v8370_v48  ;;  %v4534_v8 = vadd.f32 0.2548296, %v4518_v7  ;;  %vm4292_vm12 = vweird.f32 %v8360_v31 }
0x1424   :  { %v4524_v21 = vmul.f32 %v4508_v30, %v8348_v16  ;;  %v4651_v7 = vsub.f32 1.0, %v4635_v28  ;;  %vm4297_vm14 = vcmp.eq.f32.partialorder %v4296_v52, 8.507059e+37 }
0x1425   :  { %v3928_v1 = vadd.f32 1.0, %v3912_v53  ;;  %v4158_v38 = vmul.f32 0.3275911, %v8374_v13  ;;  %v4550_v44 = vmul.f32 %v4534_v8, %v8337_v39  ;;  %v4298_v39 = vand.u32 2147483648, %v8360_v31 }
0x1426   :  { %v4049_v42 = vpop.f32.mrf.mxu2  ;;  %v4540_v25 = vadd.f32 0.2548296, %v4524_v21  ;;  %v4123_v8 = vsel %vm4107_vm9, 1.0, %v9019_v22  ;;  %vm4109_vm9 = vcmp.ge.f32.partialorder %v8346_v34, 0.0 }
0x1427   :  { %v5949_v24 = vpop.eup %5948  ;;  %v3944_v51 = vmul.f32 %v3928_v1, %v3320_v62  ;;  %v8382_v3 = vadd.f32 1.0, %v4158_v38  ;;  %v8385_v15 = vadd.f32 %v8294_v55, %v4049_v42  ;;  %v4118_v1 = vsel %vm4102_vm10, 1.0, %v9019_v22 }
0x1428   :  { %v4288_v29 = vmul.f32 %v5949_v24, %v8360_v31  ;;  %v5951_v47 = vpop.eup %5950  ;;  %v4556_v11 = vmul.f32 %v4540_v25, %v8348_v16  ;;  %v4667_v30 = vmul.f32 %v4651_v7, %v4123_v8  ;;  %v4299_v28 = vor.u32 1.1754944e-38, %v4298_v39 }
0x1429   :  { %5670 = vmatmul.msk.f32.gmra.mxu2 %vm1110_vm4, %v3944_v51  ;;  %5952 = vrcp.f32 %v8382_v3  ;;  %v8394_v53 = vmul.f32 0.70710677, %v8385_v15  ;;  %v4630_v46 = vmul.f32 %v5951_v47, %v4550_v44  ;;  %vm4293_vm4 = vweird.f32 %v5949_v24 }
0x142a   :  { %v4289_v9 = vsub.f32 1.0, %v4288_v29  ;;  %5954 = vpow2.f32 %v4610_v18  ;;  %vm4294_vm13 = vmor %vm4292_vm12, %vm4293_vm4  ;;  %v4070_v16 = vmul.f32 0.5, %v8297_v26  ;;  %vm4307_vm11 = vweird.f32 %v8382_v3 }
0x142b   :  { %v8398_v61 = vand.u32 2147483647, %v8394_v53  ;;  %v4646_v62 = vsub.f32 1.0, %v4630_v46  ;;  %v4573_v46 = vsub.f32 0.0, %v8351_v50  ;;  %vm4110_vm10 = vcmp.ge.f32.partialorder %v8370_v48, 0.0 }
0x142c   :  { %v4290_v40 = vmul.f32 %v5949_v24, %v4289_v9 }
0x142d   :  { %v4159_v51 = vmul.f32 0.3275911, %v8398_v61  ;;  %v4662_v18 = vmul.f32 %v4646_v62, %v4118_v1  ;;  %v4313_v62 = vand.u32 2147483648, %v8382_v3  ;;  %v4589_v8 = vmul.f32 %v4573_v46, %v8351_v50 }
0x142e   :  { %v4291_v38 = vadd.f32 %v5949_v24, %v4290_v40  ;;  %v4574_v46 = vsub.f32 0.0, %v8374_v13 }
0x142f   :  { %v5953_v42 = vpop.eup %5952  ;;  %v8409_v47 = vadd.f32 1.0, %v4159_v51  ;;  %v4678_v31 = vadd.f32 1.0, %v4662_v18  ;;  %v4314_v50 = vor.u32 1.1754944e-38, %v4313_v62 }
0x1430   :  { %v4295_v29 = vsel %vm4294_vm13, %v5949_v24, %v4291_v38  ;;  %v5955_v44 = vpop.eup %5954  ;;  %v4303_v21 = vmul.f32 %v5953_v42, %v8382_v3  ;;  %v4683_v24 = vadd.f32 1.0, %v4667_v30  ;;  %vm4308_vm0 = vweird.f32 %v5953_v42 }
0x1431   :  { %v4636_v9 = vmul.f32 %v5955_v44, %v4556_v11  ;;  %v8412_v56 = vsel %vm4297_vm14, %v4299_v28, %v4295_v29  ;;  %5956 = vrcp.f32 %v8409_v47  ;;  %v8416_v40 = vmul.f32 %v4678_v31, %v4070_v16  ;;  %vm4309_vm1 = vmor %vm4307_vm11, %vm4308_vm0 }
0x1432   :  { %v4304_v25 = vsub.f32 1.0, %v4303_v21  ;;  %v4429_v7 = vmul.f32 1.0614054, %v8412_v56  ;;  %v4311_v11 = vand.u32 2147483647, %v8382_v3  ;;  %v4075_v38 = vmul.f32 0.5, %v8169_v17 }
0x1433   :  { %v4712_v26 = vsel %vm2630_vm7, %v8416_v40, 0.0  ;;  %v4652_v52 = vsub.f32 1.0, %v4636_v9  ;;  %v4124_v44 = vsel %vm4108_vm15, 1.0, %v9019_v22  ;;  %v4612_v9 = vmul.f32 1.442695, %v4589_v8 }
0x1434   :  { %v4305_v39 = vmul.f32 %v5953_v42, %v4304_v25  ;;  %v4445_v1 = vadd.f32 -1.4531521, %v4429_v7  ;;  %4713 = vadd.xlane.f32.xlu2 %v4712_v26  ;;  %v8434_v21 = vmul.f32 %v4683_v24, %v4075_v38  ;;  %vm4312_vm2 = vcmp.eq.f32.partialorder %v4311_v11, 8.507059e+37 }
0x1435   :  { %v4052_v51 = vpop.f32.mrf.mxu2  ;;  %v4668_v16 = vmul.f32 %v4652_v52, %v4124_v44  ;;  %v4328_v52 = vand.u32 2147483648, %v8409_v47  ;;  %5958 = vpow2.f32 %v4612_v9  ;;  %vm4322_vm5 = vweird.f32 %v8409_v47 }
0x1436   :  { %v4306_v18 = vadd.f32 %v5953_v42, %v4305_v39  ;;  %v8428_v30 = vadd.f32 %v8294_v55, %v4052_v51  ;;  %v4461_v29 = vmul.f32 %v4445_v1, %v8412_v56  ;;  %v4727_v62 = vsel %vm2630_vm7, %v8434_v21, 0.0 }
0x1437   :  { %v5957_v28 = vpop.eup %5956  ;;  %v4684_v38 = vadd.f32 1.0, %v4668_v16  ;;  %v4590_v51 = vmul.f32 %v4574_v46, %v8374_v13  ;;  %v4329_v13 = vor.u32 1.1754944e-38, %v4328_v52  ;;  %v4575_v9 = vsub.f32 0.0, %v8398_v61 }
0x1438   :  { %v4310_v17 = vsel %vm4309_vm1, %v5953_v42, %v4306_v18  ;;  %v4318_v3 = vmul.f32 %v5957_v28, %v8409_v47  ;;  %v8438_v31 = vmul.f32 0.70710677, %v8428_v30  ;;  %v4477_v25 = vadd.f32 1.4214138, %v4461_v29 }
0x1439   :  { %v4315_v7 = vsel %vm4312_vm2, %v4314_v50, %v4310_v17  ;;  %v4076_v42 = vmul.f32 0.5, %v8311_v27  ;;  %vm4323_vm3 = vweird.f32 %v5957_v28  ;;  %v4326_v29 = vand.u32 2147483647, %v8409_v47 }
0x143a   :  { %v4319_v39 = vsub.f32 1.0, %v4318_v3  ;;  %v8442_v12 = vand.u32 2147483647, %v8438_v31  ;;  %v4430_v24 = vmul.f32 1.0614054, %v4315_v7  ;;  %v4493_v26 = vmul.f32 %v4477_v25, %v8412_v56  ;;  %vm4324_vm6 = vmor %vm4322_vm5, %vm4323_vm3 }
0x143b   :  { %v8457_v3 = vmul.f32 %v4684_v38, %v4076_v42  ;;  %v4614_v46 = vmul.f32 1.442695, %v4590_v51  ;;  %vm4327_vm8 = vcmp.eq.f32.partialorder %v4326_v29, 8.507059e+37  ;;  %vm4111_vm15 = vcmp.ge.f32.partialorder %v8394_v53, 0.0 }
0x143c   :  { %v4320_v1 = vmul.f32 %v5957_v28, %v4319_v39  ;;  %v4160_v11 = vmul.f32 0.3275911, %v8442_v12  ;;  %v4446_v8 = vadd.f32 -1.4531521, %v4430_v24  ;;  %4728 = vadd.xlane.f32.xlu2 %v4727_v62  ;;  %v4509_v18 = vadd.f32 -0.28449672, %v4493_v26 }
0x143d   :  { %vm4112_vm0 = vcmp.ge.f32.partialorder %v8438_v31, 0.0 }
0x143e   :  { %v8452_v27 = vadd.f32 1.0, %v4160_v11  ;;  %v4462_v44 = vmul.f32 %v4446_v8, %v4315_v7  ;;  %v4321_v17 = vadd.f32 %v5957_v28, %v4320_v1  ;;  %v4525_v50 = vmul.f32 %v4509_v18, %v8412_v56  ;;  %v5959_v1 = vpop.eup %5958 }
0x143f   :  { %v4730_v11 = vsel %vm2630_vm7, %v8457_v3, 0.0  ;;  %v4591_v8 = vmul.f32 %v4575_v9, %v8398_v61 }
0x1440   :  { %5960 = vrcp.f32 %v8452_v27  ;;  %v4478_v16 = vadd.f32 1.4214138, %v4462_v44  ;;  %v4541_v25 = vadd.f32 0.2548296, %v4525_v50  ;;  %v4325_v39 = vsel %vm4324_vm6, %v5957_v28, %v4321_v17 }
0x1441   :  { %v4330_v62 = vsel %vm4327_vm8, %v4329_v13, %v4325_v39  ;;  %5962 = vpow2.f32 %v4614_v46  ;;  %v4077_v44 = vmul.f32 0.5, %v8340_v4  ;;  %v4125_v17 = vsel %vm4109_vm9, 1.0, %v9019_v22 }
0x1442   :  { %v4494_v24 = vmul.f32 %v4478_v16, %v4315_v7  ;;  %v4557_v26 = vmul.f32 %v4541_v25, %v8412_v56  ;;  %v4431_v47 = vmul.f32 1.0614054, %v4330_v62  ;;  %v4616_v46 = vmul.f32 1.442695, %v4591_v8 }
0x1443   :  { %v4341_v39 = vand.u32 2147483647, %v8452_v27  ;;  %v4343_v61 = vand.u32 2147483648, %v8452_v27  ;;  %vm4337_vm12 = vweird.f32 %v8452_v27 }
0x1444   :  { %v4510_v42 = vadd.f32 -0.28449672, %v4494_v24  ;;  %4731 = vadd.xlane.f32.xlu2 %v4730_v11  ;;  %v4637_v52 = vmul.f32 %v5959_v1, %v4557_v26  ;;  %v4447_v38 = vadd.f32 -1.4531521, %v4431_v47  ;;  %5964 = vpow2.f32 %v4616_v46 }
0x1445   :  { %vm4342_vm14 = vcmp.eq.f32.partialorder %v4341_v39, 8.507059e+37 }
0x1446   :  { %v5961_v28 = vpop.eup %5960  ;;  %v4526_v51 = vmul.f32 %v4510_v42, %v4315_v7  ;;  %v4653_v29 = vsub.f32 1.0, %v4637_v52  ;;  %v4463_v56 = vmul.f32 %v4447_v38, %v4330_v62  ;;  %v4344_v38 = vor.u32 1.1754944e-38, %v4343_v61 }
0x1447   :  { %v4333_v18 = vmul.f32 %v5961_v28, %v8452_v27  ;;  %v5963_v9 = vpop.eup %5962  ;;  %vm4338_vm4 = vweird.f32 %v5961_v28  ;;  %v4576_v27 = vsub.f32 0.0, %v8442_v12 }
0x1448   :  { %v4542_v50 = vadd.f32 0.2548296, %v4526_v51  ;;  %v4669_v16 = vmul.f32 %v4653_v29, %v4125_v17  ;;  %v4479_v13 = vadd.f32 1.4214138, %v4463_v56  ;;  %vm4339_vm13 = vmor %vm4337_vm12, %vm4338_vm4 }
0x1449   :  { %v4334_v34 = vsub.f32 1.0, %v4333_v18  ;;  %v4592_v39 = vmul.f32 %v4576_v27, %v8442_v12 }
0x144a   :  { %v4558_v25 = vmul.f32 %v4542_v50, %v4315_v7  ;;  %v4685_v26 = vadd.f32 1.0, %v4669_v16  ;;  %v4495_v47 = vmul.f32 %v4479_v13, %v4330_v62  ;;  %v4126_v7 = vsel %vm4110_vm10, 1.0, %v9019_v22 }
0x144b   :  { %v4335_v24 = vmul.f32 %v5961_v28, %v4334_v34  ;;  %v4078_v34 = vmul.f32 0.5, %v8364_v41  ;;  %v4618_v12 = vmul.f32 1.442695, %v4592_v39 }
0x144c   :  { %v4638_v4 = vmul.f32 %v5963_v9, %v4558_v25  ;;  %v8472_v1 = vmul.f32 %v4685_v26, %v4077_v44  ;;  %v4511_v11 = vadd.f32 -0.28449672, %v4495_v47 }
0x144d   :  { %v4336_v42 = vadd.f32 %v5961_v28, %v4335_v24  ;;  %5966 = vpow2.f32 %v4618_v12 }
0x144e   :  { %v4654_v52 = vsub.f32 1.0, %v4638_v4  ;;  %v4733_v8 = vsel %vm2630_vm7, %v8472_v1, 0.0  ;;  %v4527_v18 = vmul.f32 %v4511_v11, %v4330_v62  ;;  %v4127_v11 = vsel %vm4111_vm15, 1.0, %v9019_v22 }
0x144f   :  { %v4340_v29 = vsel %vm4339_vm13, %v5961_v28, %v4336_v42  ;;  %4734 = vadd.xlane.f32.xlu0 %v4733_v8  ;;  %v5965_v28 = vpop.eup %5964 }
0x1450   :  { %v4055_v51 = vpop.f32.mrf.mxu2  ;;  %v4670_v44 = vmul.f32 %v4654_v52, %v4126_v7  ;;  %v4345_v48 = vsel %vm4342_vm14, %v4344_v38, %v4340_v29  ;;  %v4543_v17 = vadd.f32 0.2548296, %v4527_v18  ;;  %v4079_v52 = vmul.f32 0.5, %v8385_v15 }
0x1451   :  { %v8481_v56 = vadd.f32 %v8294_v55, %v4055_v51  ;;  %v4432_v50 = vmul.f32 1.0614054, %v4345_v48 }
0x1452   :  { %v4686_v13 = vadd.f32 1.0, %v4670_v44  ;;  %v4559_v46 = vmul.f32 %v4543_v17, %v4330_v62 }
0x1453   :  { %v8485_v16 = vmul.f32 0.70710677, %v8481_v56  ;;  %v4448_v25 = vadd.f32 -1.4531521, %v4432_v50  ;;  %v5967_v17 = vpop.eup %5966 }
0x1454   :  { %v8491_v9 = vmul.f32 %v4686_v13, %v4078_v34  ;;  %v4639_v24 = vmul.f32 %v5965_v28, %v4559_v46  ;;  %v4128_v13 = vsel %vm4112_vm0, 1.0, %v9019_v22  ;;  %v4080_v28 = vmul.f32 0.5, %v8428_v30 }
0x1455   :  { %v8489_v61 = vand.u32 2147483647, %v8485_v16  ;;  %v4464_v26 = vmul.f32 %v4448_v25, %v4345_v48 }
0x1456   :  { %v4736_v41 = vsel %vm2630_vm7, %v8491_v9, 0.0  ;;  %v4655_v62 = vsub.f32 1.0, %v4639_v24 }
0x1457   :  { %v4161_v47 = vmul.f32 0.3275911, %v8489_v61  ;;  %4737 = vadd.xlane.f32.xlu1 %v4736_v41  ;;  %v4480_v4 = vadd.f32 1.4214138, %v4464_v26 }
0x1458   :  { %v4671_v42 = vmul.f32 %v4655_v62, %v4127_v11 }
0x1459   :  { %v4496_v7 = vmul.f32 %v4480_v4, %v4345_v48  ;;  %v4177_v38 = vadd.f32 1.0, %v4161_v47 }
0x145a   :  { %v4687_v8 = vadd.f32 1.0, %v4671_v42 }
0x145b   :  { %v4512_v53 = vadd.f32 -0.28449672, %v4496_v7  ;;  %5968 = vrcp.f32 %v4177_v38  ;;  %v4358_v62 = vand.u32 2147483648, %v4177_v38  ;;  %vm4352_vm1 = vweird.f32 %v4177_v38 }
0x145c   :  { %v8499_v51 = vmul.f32 %v4687_v8, %v4079_v52  ;;  %v4356_v11 = vand.u32 2147483647, %v4177_v38 }
0x145d   :  { %v4528_v18 = vmul.f32 %v4512_v53, %v4345_v48  ;;  %v4359_v42 = vor.u32 1.1754944e-38, %v4358_v62 }
0x145e   :  { %v4739_v29 = vsel %vm2630_vm7, %v8499_v51, 0.0  ;;  %vm4357_vm3 = vcmp.eq.f32.partialorder %v4356_v11, 8.507059e+37 }
0x145f   :  { %v4544_v27 = vadd.f32 0.2548296, %v4528_v18  ;;  %4740 = vadd.xlane.f32.xlu2 %v4739_v29 }
0x1461   :  { %v4560_v44 = vmul.f32 %v4544_v27, %v4345_v48  ;;  %v5969_v34 = vpop.eup %5968 }
0x1462   :  { %v4348_v25 = vmul.f32 %v5969_v34, %v4177_v38  ;;  %vm4353_vm11 = vweird.f32 %v5969_v34 }
0x1463   :  { %v4640_v50 = vmul.f32 %v5967_v17, %v4560_v44  ;;  %vm4354_vm2 = vmor %vm4352_vm1, %vm4353_vm11 }
0x1464   :  { %v4349_v26 = vsub.f32 1.0, %v4348_v25 }
0x1465   :  { %v4656_v15 = vsub.f32 1.0, %v4640_v50 }
0x1466   :  { %v4350_v48 = vmul.f32 %v5969_v34, %v4349_v26 }
0x1467   :  { %v4672_v46 = vmul.f32 %v4656_v15, %v4128_v13 }
0x1468   :  { %v4351_v47 = vadd.f32 %v5969_v34, %v4350_v48 }
0x1469   :  { %v4688_v39 = vadd.f32 1.0, %v4672_v46 }
0x146a   :  { %v4355_v12 = vsel %vm4354_vm2, %v5969_v34, %v4351_v47  ;;  %vm4113_vm2 = vcmp.ge.f32.partialorder %v8485_v16, 0.0 }
0x146b   :  { %v8506_v24 = vmul.f32 %v4688_v39, %v4080_v28  ;;  %v8517_v52 = vsel %vm4357_vm3, %v4359_v42, %v4355_v12 }
0x146c   :  { %v4433_v18 = vmul.f32 1.0614054, %v8517_v52 }
0x146d   :  { %v4742_v41 = vsel %vm2630_vm7, %v8506_v24, 0.0 }
0x146e   :  { %4743 = vadd.xlane.f32.xlu1 %v4742_v41  ;;  %v4449_v38 = vadd.f32 -1.4531521, %v4433_v18 }
0x1470   :  { %v4465_v34 = vmul.f32 %v4449_v38, %v8517_v52 }
0x1472   :  { %v4481_v41 = vadd.f32 1.4214138, %v4465_v34 }
0x1474   :  { %v4497_v42 = vmul.f32 %v4481_v41, %v8517_v52 }
0x1477   :  { %v4058_v31 = vpop.f32.mrf.mxu2 }
0x1478   :  { %v8511_v4 = vadd.f32 %v8294_v55, %v4058_v31 }
0x147a   :  { %v8514_v30 = vmul.f32 0.70710677, %v8511_v4 }
0x147c   :  { %v4146_v7 = vand.u32 2147483647, %v8514_v30  ;;  %vm4114_vm11 = vcmp.ge.f32.partialorder %v8514_v30, 0.0 }
0x147e   :  { %v4162_v8 = vmul.f32 0.3275911, %v4146_v7 }
0x147f   :  { %v4061_v29 = vpop.f32.mrf.mxu2 }
0x1480   :  { %v4178_v53 = vadd.f32 1.0, %v4162_v8  ;;  %v8521_v27 = vadd.f32 %v8294_v55, %v4061_v29  ;;  %v4577_v8 = vsub.f32 0.0, %v8489_v61  ;;  %v4578_v29 = vsub.f32 0.0, %v4146_v7 }
0x1482   :  { %5970 = vrcp.f32 %v4178_v53  ;;  %v8524_v44 = vmul.f32 0.70710677, %v8521_v27  ;;  %v4373_v26 = vand.u32 2147483648, %v4178_v53  ;;  %v4371_v47 = vand.u32 2147483647, %v4178_v53 }
0x1483   :  { %vm4367_vm6 = vweird.f32 %v4178_v53  ;;  %v4594_v0 = vmul.f32 %v4578_v29, %v4146_v7 }
0x1484   :  { %v8527_v17 = vand.u32 2147483647, %v8524_v44  ;;  %v4374_v12 = vor.u32 1.1754944e-38, %v4373_v26  ;;  %vm4372_vm9 = vcmp.eq.f32.partialorder %v4371_v47, 8.507059e+37  ;;  %vm4115_vm3 = vcmp.ge.f32.partialorder %v8524_v44, 0.0 }
0x1485   :  { %v4131_v44 = vsel %vm4115_vm3, 1.0, %v9019_v22 }
0x1486   :  { %v4163_v13 = vmul.f32 0.3275911, %v8527_v17 }
0x1487   :  { %v4064_v46 = vpop.f32.mrf.mxu2 }
0x1488   :  { %v5971_v50 = vpop.eup %5970  ;;  %v4179_v28 = vadd.f32 1.0, %v4163_v13  ;;  %v8532_v39 = vadd.f32 %v8294_v55, %v4064_v46 }
0x1489   :  { %v4363_v15 = vmul.f32 %v5971_v50, %v4178_v53  ;;  %vm4368_vm5 = vweird.f32 %v5971_v50 }
0x148a   :  { %5972 = vrcp.f32 %v4179_v28  ;;  %v8535_v31 = vmul.f32 0.70710677, %v8532_v39  ;;  %vm4369_vm8 = vmor %vm4367_vm6, %vm4368_vm5  ;;  %v4388_v35 = vand.u32 2147483648, %v4179_v28  ;;  %v4386_v47 = vand.u32 2147483647, %v4179_v28 }
0x148b   :  { %v4364_v25 = vsub.f32 1.0, %v4363_v15  ;;  %vm4382_vm4 = vweird.f32 %v4179_v28 }
0x148c   :  { %v8538_v11 = vand.u32 2147483647, %v8535_v31  ;;  %vm4387_vm13 = vcmp.eq.f32.partialorder %v4386_v47, 8.507059e+37  ;;  %vm4116_vm5 = vcmp.ge.f32.partialorder %v8535_v31, 0.0 }
0x148d   :  { %v4365_v48 = vmul.f32 %v5971_v50, %v4364_v25  ;;  %v4513_v25 = vadd.f32 -0.28449672, %v4497_v42  ;;  %v4389_v42 = vor.u32 1.1754944e-38, %v4388_v35  ;;  %v4132_v31 = vsel %vm4116_vm5, 1.0, %v9019_v22 }
0x148e   :  { %v4164_v38 = vmul.f32 0.3275911, %v8538_v11 }
0x148f   :  { %v4366_v62 = vadd.f32 %v5971_v50, %v4365_v48  ;;  %v4593_v48 = vmul.f32 %v4577_v8, %v8489_v61 }
0x1490   :  { %v5973_v15 = vpop.eup %5972  ;;  %v4180_v53 = vadd.f32 1.0, %v4164_v38 }
0x1491   :  { %v4370_v18 = vsel %vm4369_vm8, %v5971_v50, %v4366_v62  ;;  %v4378_v46 = vmul.f32 %v5973_v15, %v4179_v28  ;;  %v4529_v50 = vmul.f32 %v4513_v25, %v8517_v52  ;;  %vm4383_vm10 = vweird.f32 %v5973_v15 }
0x1492   :  { %v4375_v34 = vsel %vm4372_vm9, %v4374_v12, %v4370_v18  ;;  %5974 = vrcp.f32 %v4180_v53  ;;  %v4620_v62 = vmul.f32 1.442695, %v4593_v48  ;;  %v4622_v18 = vmul.f32 1.442695, %v4594_v0  ;;  %vm4384_vm12 = vmor %vm4382_vm4, %vm4383_vm10 }
0x1493   :  { %v4434_v13 = vmul.f32 1.0614054, %v4375_v34  ;;  %v4379_v26 = vsub.f32 1.0, %v4378_v46  ;;  %v4545_v8 = vadd.f32 0.2548296, %v4529_v50  ;;  %vm4397_vm15 = vweird.f32 %v4180_v53 }
0x1494   :  { %5976 = vpow2.f32 %v4620_v62 }
0x1495   :  { %v4450_v59 = vadd.f32 -1.4531521, %v4434_v13  ;;  %v4380_v43 = vmul.f32 %v5973_v15, %v4379_v26  ;;  %5978 = vpow2.f32 %v4622_v18  ;;  %v4561_v0 = vmul.f32 %v4545_v8, %v8517_v52 }
0x1497   :  { %v4466_v41 = vmul.f32 %v4450_v59, %v4375_v34  ;;  %v4381_v36 = vadd.f32 %v5973_v15, %v4380_v43  ;;  %v4403_v43 = vand.u32 2147483648, %v4180_v53 }
0x1498   :  { %v5975_v61 = vpop.eup %5974 }
0x1499   :  { %v4482_v12 = vadd.f32 1.4214138, %v4466_v41  ;;  %v4385_v7 = vsel %vm4384_vm12, %v5973_v15, %v4381_v36  ;;  %v4393_v59 = vmul.f32 %v5975_v61, %v4180_v53  ;;  %vm4398_vm14 = vweird.f32 %v5975_v61 }
0x149a   :  { %v8545_v13 = vsel %vm4387_vm13, %v4389_v42, %v4385_v7  ;;  %v4401_v41 = vand.u32 2147483647, %v4180_v53  ;;  %v4579_v36 = vsub.f32 0.0, %v8527_v17  ;;  %v5977_v50 = vpop.eup %5976  ;;  %vm4399_vm0 = vmor %vm4397_vm15, %vm4398_vm14 }
0x149b   :  { %v4498_v38 = vmul.f32 %v4482_v12, %v4375_v34  ;;  %v4435_v46 = vmul.f32 1.0614054, %v8545_v13  ;;  %v4394_v25 = vsub.f32 1.0, %v4393_v59  ;;  %v5979_v12 = vpop.eup %5978  ;;  %v4641_v18 = vmul.f32 %v5977_v50, %v4561_v0 }
0x149c   :  { %vm4402_vm1 = vcmp.eq.f32.partialorder %v4401_v41, 8.507059e+37  ;;  %v4595_v7 = vmul.f32 %v4579_v36, %v8527_v17 }
0x149d   :  { %v4514_v29 = vadd.f32 -0.28449672, %v4498_v38  ;;  %v4451_v28 = vadd.f32 -1.4531521, %v4435_v46  ;;  %v4395_v26 = vmul.f32 %v5975_v61, %v4394_v25  ;;  %v4404_v38 = vor.u32 1.1754944e-38, %v4403_v43 }
0x149e   :  { %v4657_v30 = vsub.f32 1.0, %v4641_v18  ;;  %v4129_v43 = vsel %vm4113_vm2, 1.0, %v9019_v22 }
0x149f   :  { %v4530_v48 = vmul.f32 %v4514_v29, %v4375_v34  ;;  %v4467_v15 = vmul.f32 %v4451_v28, %v8545_v13  ;;  %v4396_v62 = vadd.f32 %v5975_v61, %v4395_v26  ;;  %v4580_v29 = vsub.f32 0.0, %v8538_v11 }
0x14a0   :  { %v4082_v26 = vmul.f32 0.5, %v8511_v4  ;;  %v4673_v18 = vmul.f32 %v4657_v30, %v4129_v43 }
0x14a1   :  { %v4546_v35 = vadd.f32 0.2548296, %v4530_v48  ;;  %v4483_v42 = vadd.f32 1.4214138, %v4467_v15  ;;  %v4400_v8 = vsel %vm4399_vm0, %v5975_v61, %v4396_v62  ;;  %v4130_v48 = vsel %vm4114_vm11, 1.0, %v9019_v22  ;;  %v4717_v61 = vpop.xlane.xlu1 %4716 }
0x14a2   :  { %v8554_v59 = vsel %vm4402_vm1, %v4404_v38, %v4400_v8  ;;  %v4596_v15 = vmul.f32 %v4580_v29, %v8538_v11  ;;  %v4761_v30 = vmul.f32 %v4717_v61, %v7302_v57 }
0x14a3   :  { %v4562_v47 = vmul.f32 %v4546_v35, %v4375_v34  ;;  %v4499_v53 = vmul.f32 %v4483_v42, %v8545_v13  ;;  %v4726_v34 = vpop.xlane.xlu0 %4725  ;;  %v4436_v25 = vmul.f32 1.0614054, %v8554_v59  ;;  %v4624_v35 = vmul.f32 1.442695, %v4595_v7 }
0x14a4   :  { %v4764_v17 = vmul.f32 %v4726_v34, %v7302_v57  ;;  %v4626_v11 = vmul.f32 1.442695, %v4596_v15 }
0x14a5   :  { %v4642_v52 = vmul.f32 %v5979_v12, %v4562_v47  ;;  %v4515_v0 = vadd.f32 -0.28449672, %v4499_v53  ;;  %v4452_v28 = vadd.f32 -1.4531521, %v4436_v25  ;;  %5980 = vpow2.f32 %v4624_v35 }
0x14a6   :  { %v8576_v7 = vsub.f32 %v8262_v49, %v4764_v17  ;;  %v4689_v25 = vadd.f32 1.0, %v4673_v18  ;;  %5982 = vpow2.f32 %v4626_v11 }
0x14a7   :  { %v4658_v46 = vsub.f32 1.0, %v4642_v52  ;;  %v4714_v41 = vpop.xlane.xlu2 %4713  ;;  %v4531_v36 = vmul.f32 %v4515_v0, %v8545_v13  ;;  %v4468_v62 = vmul.f32 %v4452_v28, %v8554_v59  ;;  %v4081_v0 = vmul.f32 0.5, %v8481_v56 }
0x14a8   :  { %v4760_v50 = vmul.f32 %v4714_v41, %v7302_v57 }
0x14a9   :  { %v4674_v16 = vmul.f32 %v4658_v46, %v4130_v48  ;;  %v4547_v38 = vadd.f32 0.2548296, %v4531_v36  ;;  %v4484_v8 = vadd.f32 1.4214138, %v4468_v62  ;;  %v4723_v29 = vpop.xlane.xlu1 %4722  ;;  %v8604_v61 = vmul.f32 %v4689_v25, %v4081_v0 }
0x14aa   :  { %v8568_v42 = vsub.f32 %v8416_v40, %v4760_v50  ;;  %v4763_v41 = vmul.f32 %v4723_v29, %v7302_v57 }
0x14ab   :  { %v4690_v47 = vadd.f32 1.0, %v4674_v16  ;;  %v4563_v48 = vmul.f32 %v4547_v38, %v8545_v13  ;;  %v5981_v35 = vpop.eup %5980  ;;  %v4720_v38 = vpop.xlane.xlu0 %4719 }
0x14ac   :  { %v4067_v12 = vpop.f32.mrf.mxu2  ;;  %v4792_v34 = vmul.f32 %v8568_v42, %v8568_v42  ;;  %v8614_v18 = vsub.f32 %v8217_v58, %v4763_v41 }
0x14ad   :  { %v8571_v52 = vadd.f32 %v8294_v55, %v4067_v12  ;;  %v8573_v4 = vmul.f32 %v4690_v47, %v4082_v26  ;;  %v4500_v55 = vmul.f32 %v4484_v8, %v8554_v59  ;;  %v4796_v26 = vmul.f32 %v8576_v7, %v8576_v7  ;;  %v5983_v8 = vpop.eup %5982 }
0x14ae   :  { %v4808_v49 = vsel %vm2630_vm7, %v4792_v34, 0.0  ;;  %v4643_v15 = vmul.f32 %v5981_v35, %v4563_v48  ;;  %v8607_v47 = vsub.f32 %v8106_v54, %v4761_v30  ;;  %v4745_v54 = vsel %vm2630_vm7, %v8604_v61, 0.0 }
0x14af   :  { %v8579_v53 = vmul.f32 0.70710677, %v8571_v52  ;;  %v4748_v40 = vsel %vm2630_vm7, %v8573_v4, 0.0  ;;  %4809 = vadd.xlane.f32.xlu0 %v4808_v49  ;;  %v4729_v43 = vpop.xlane.xlu2 %4728  ;;  %v4516_v16 = vadd.f32 -0.28449672, %v4500_v55  ;;  %v4820_v12 = vsel %vm2630_vm7, %v4796_v26, 0.0 }
0x14b0   :  { %4749 = vadd.xlane.f32.xlu2 %v4748_v40  ;;  %v4765_v17 = vmul.f32 %v4729_v43, %v7302_v57  ;;  %v4659_v34 = vsub.f32 1.0, %v4643_v15  ;;  %v4762_v55 = vmul.f32 %v4720_v38, %v7302_v57  ;;  %v4795_v49 = vmul.f32 %v8614_v18, %v8614_v18 }
0x14b1   :  { %v8587_v46 = vand.u32 2147483647, %v8579_v53  ;;  %v4532_v13 = vmul.f32 %v4516_v16, %v8554_v59  ;;  %v4084_v38 = vmul.f32 0.5, %v8532_v39  ;;  %vm4117_vm4 = vcmp.ge.f32.partialorder %v8579_v53, 0.0 }
0x14b2   :  { %v8602_v56 = vsub.f32 %v8434_v21, %v4765_v17  ;;  %v4675_v0 = vmul.f32 %v4659_v34, %v4131_v44  ;;  %v4817_v41 = vsel %vm2630_vm7, %v4795_v49, 0.0 }
0x14b3   :  { %v4165_v28 = vmul.f32 0.3275911, %v8587_v46  ;;  %v4548_v50 = vadd.f32 0.2548296, %v4532_v13 }
0x14b4   :  { %v4797_v62 = vmul.f32 %v8602_v56, %v8602_v56  ;;  %v4691_v15 = vadd.f32 1.0, %v4675_v0 }
0x14b5   :  { %v8599_v36 = vadd.f32 1.0, %v4165_v28  ;;  %v4564_v21 = vmul.f32 %v4548_v50, %v8554_v59  ;;  %v4793_v59 = vmul.f32 %v8607_v47, %v8607_v47  ;;  %v8635_v28 = vsub.f32 %v8278_v10, %v4762_v55 }
0x14b6   :  { %v4823_v11 = vsel %vm2630_vm7, %v4797_v62, 0.0 }
0x14b7   :  { %5984 = vrcp.f32 %v8599_v36  ;;  %4746 = vadd.xlane.f32.xlu0 %v4745_v54  ;;  %4824 = vadd.xlane.f32.xlu1 %v4823_v11  ;;  %v4732_v40 = vpop.xlane.xlu2 %4731  ;;  %v4644_v58 = vmul.f32 %v5983_v8, %v4564_v21  ;;  %v4811_v26 = vsel %vm2630_vm7, %v4793_v59, 0.0  ;;  %v4418_v50 = vand.u32 2147483648, %v8599_v36 }
0x14b8   :  { %4821 = vadd.xlane.f32.xlu2 %v4820_v12  ;;  %v4766_v29 = vmul.f32 %v4732_v40, %v7302_v57  ;;  %v4416_v10 = vand.u32 2147483647, %v8599_v36  ;;  %v4083_v12 = vmul.f32 0.5, %v8521_v27  ;;  %v4794_v21 = vmul.f32 %v8635_v28, %v8635_v28 }
0x14b9   :  { %v4660_v25 = vsub.f32 1.0, %v4644_v58  ;;  %vm4412_vm8 = vweird.f32 %v8599_v36  ;;  %v4419_v40 = vor.u32 1.1754944e-38, %v4418_v50  ;;  %v4581_v27 = vsub.f32 0.0, %v8587_v46 }
0x14ba   :  { %v8631_v30 = vsub.f32 %v8457_v3, %v4766_v29  ;;  %v8651_v34 = vmul.f32 %v4691_v15, %v4083_v12  ;;  %vm4417_vm10 = vcmp.eq.f32.partialorder %v4416_v10, 8.507059e+37  ;;  %v4814_v39 = vsel %vm2630_vm7, %v4794_v21, 0.0 }
0x14bb   :  { %v4676_v16 = vmul.f32 %v4660_v25, %v4132_v31 }
0x14bc   :  { %v4798_v17 = vmul.f32 %v8631_v30, %v8631_v30  ;;  %v4751_v49 = vsel %vm2630_vm7, %v8651_v34, 0.0 }
0x14bd   :  { %v5985_v48 = vpop.eup %5984  ;;  %v4692_v3 = vadd.f32 1.0, %v4676_v16 }
0x14be   :  { %v4408_v43 = vmul.f32 %v5985_v48, %v8599_v36  ;;  %v4826_v13 = vsel %vm2630_vm7, %v4798_v17, 0.0  ;;  %vm4413_vm6 = vweird.f32 %v5985_v48 }
0x14bf   :  { %4827 = vadd.xlane.f32.xlu1 %v4826_v13  ;;  %4818 = vadd.xlane.f32.xlu0 %v4817_v41  ;;  %v8649_v11 = vmul.f32 %v4692_v3, %v4084_v38  ;;  %vm4414_vm9 = vmor %vm4412_vm8, %vm4413_vm6 }
0x14c0   :  { %v4409_v35 = vsub.f32 1.0, %v4408_v43  ;;  %4812 = vadd.xlane.f32.xlu2 %v4811_v26 }
0x14c1   :  { %v4754_v44 = vsel %vm2630_vm7, %v8649_v11, 0.0 }
0x14c2   :  { %v4410_v62 = vmul.f32 %v5985_v48, %v4409_v35  ;;  %v4735_v54 = vpop.xlane.xlu0 %4734 }
0x14c3   :  { %v4767_v58 = vmul.f32 %v4735_v54, %v7302_v57 }
0x14c4   :  { %v4411_v8 = vadd.f32 %v5985_v48, %v4410_v62 }
0x14c5   :  { %v8657_v59 = vsub.f32 %v8472_v1, %v4767_v58 }
0x14c6   :  { %v4415_v55 = vsel %vm4414_vm9, %v5985_v48, %v4411_v8  ;;  %v4597_v48 = vmul.f32 %v4581_v27, %v8587_v46  ;;  %v4133_v8 = vsel %vm4117_vm4, 1.0, %v9019_v22 }
0x14c7   :  { %v4420_v29 = vsel %vm4417_vm10, %v4419_v40, %v4415_v55  ;;  %4755 = vadd.xlane.f32.xlu1 %v4754_v44  ;;  %4752 = vadd.xlane.f32.xlu0 %v4751_v49  ;;  %v4799_v31 = vmul.f32 %v8657_v59, %v8657_v59  ;;  %v4085_v40 = vmul.f32 0.5, %v8571_v52 }
0x14c8   :  { %4815 = vadd.xlane.f32.xlu2 %v4814_v39  ;;  %v4437_v36 = vmul.f32 1.0614054, %v4420_v29  ;;  %v4628_v1 = vmul.f32 1.442695, %v4597_v48 }
0x14c9   :  { %v4829_v16 = vsel %vm2630_vm7, %v4799_v31, 0.0 }
0x14ca   :  { %v4453_v25 = vadd.f32 -1.4531521, %v4437_v36  ;;  %5986 = vpow2.f32 %v4628_v1  ;;  %v4738_v12 = vpop.xlane.xlu1 %4737 }
0x14cc   :  { %v4469_v0 = vmul.f32 %v4453_v25, %v4420_v29 }
0x14ce   :  { %v4485_v43 = vadd.f32 1.4214138, %v4469_v0 }
0x14d0   :  { %4830 = vadd.xlane.f32.xlu2 %v4829_v16  ;;  %v4501_v17 = vmul.f32 %v4485_v43, %v4420_v29  ;;  %v5987_v50 = vpop.eup %5986 }
0x14d2   :  { %v4517_v26 = vadd.f32 -0.28449672, %v4501_v17  ;;  %v4741_v41 = vpop.xlane.xlu2 %4740 }
0x14d3   :  { %v4769_v13 = vmul.f32 %v4741_v41, %v7302_v57 }
0x14d4   :  { %v4533_v35 = vmul.f32 %v4517_v26, %v4420_v29 }
0x14d5   :  { %v8669_v15 = vsub.f32 %v8499_v51, %v4769_v13  ;;  %v4768_v51 = vmul.f32 %v4738_v12, %v7302_v57 }
0x14d6   :  { %v4549_v3 = vadd.f32 0.2548296, %v4533_v35 }
0x14d7   :  { %v4801_v62 = vmul.f32 %v8669_v15, %v8669_v15  ;;  %v8681_v27 = vsub.f32 %v8491_v9, %v4768_v51 }
0x14d8   :  { %v4565_v46 = vmul.f32 %v4549_v3, %v4420_v29 }
0x14d9   :  { %v4835_v38 = vsel %vm2630_vm7, %v4801_v62, 0.0  ;;  %v4800_v36 = vmul.f32 %v8681_v27, %v8681_v27 }
0x14da   :  { %v4645_v10 = vmul.f32 %v5987_v50, %v4565_v46  ;;  %4836 = vadd.xlane.f32.xlu1 %v4835_v38 }
0x14db   :  { %v4832_v9 = vsel %vm2630_vm7, %v4800_v36, 0.0 }
0x14dc   :  { %v4661_v21 = vsub.f32 1.0, %v4645_v10 }
0x14de   :  { %v4677_v54 = vmul.f32 %v4661_v21, %v4133_v8 }
0x14e0   :  { %v4693_v58 = vadd.f32 1.0, %v4677_v54 }
0x14e1   :  { %v4744_v53 = vpop.xlane.xlu1 %4743 }
0x14e2   :  { %v8678_v55 = vmul.f32 %v4693_v58, %v4085_v40  ;;  %v4770_v39 = vmul.f32 %v4744_v53, %v7302_v57 }
0x14e4   :  { %v4757_v29 = vsel %vm2630_vm7, %v8678_v55, 0.0  ;;  %v8687_v22 = vsub.f32 %v8506_v24, %v4770_v39 }
0x14e5   :  { %4758 = vadd.xlane.f32.xlu0 %v4757_v29 }
0x14e6   :  { %v4802_v52 = vmul.f32 %v8687_v22, %v8687_v22 }
0x14e8   :  { %v4838_v44 = vsel %vm2630_vm7, %v4802_v52, 0.0 }
0x14e9   :  { %4839 = vadd.xlane.f32.xlu2 %v4838_v44 }
0x14ed   :  { %4833 = vadd.xlane.f32.xlu0 %v4832_v9 }
0x1522   :  { %v4810_v48 = vpop.xlane.xlu0 %4809 }
0x1523   :  { %v4750_v49 = vpop.xlane.xlu2 %4749  ;;  %v4856_v1 = vmul.f32 %v4810_v48, %v7302_v57 }
0x1524   :  { %v4772_v25 = vmul.f32 %v4750_v49, %v7302_v57 }
0x1526   :  { %v8697_v31 = vsub.f32 %v8573_v4, %v4772_v25  ;;  %v8706_v4 = vadd.f32 1e-05, %v4856_v1 }
0x1528   :  { %v4804_v24 = vmul.f32 %v8697_v31, %v8697_v31  ;;  %vm4894_vm10 = vweird.f32 %v8706_v4 }
0x152a   :  { %v4844_v0 = vsel %vm2630_vm7, %v4804_v24, 0.0  ;;  %v4747_v17 = vpop.xlane.xlu0 %4746  ;;  %v4825_v26 = vpop.xlane.xlu1 %4824 }
0x152b   :  { %4845 = vadd.xlane.f32.xlu1 %v4844_v0  ;;  %v4822_v43 = vpop.xlane.xlu2 %4821  ;;  %v4771_v35 = vmul.f32 %v4747_v17, %v7302_v57  ;;  %v4861_v41 = vmul.f32 %v4825_v26, %v7302_v57 }
0x152c   :  { %v4860_v16 = vmul.f32 %v4822_v43, %v7302_v57 }
0x152d   :  { %v8709_v3 = vsub.f32 %v8604_v61, %v4771_v35  ;;  %v8711_v46 = vadd.f32 1e-05, %v4861_v41 }
0x152e   :  { %v4876_v13 = vadd.f32 1e-05, %v4860_v16 }
0x152f   :  { %v4803_v50 = vmul.f32 %v8709_v3, %v8709_v3  ;;  %vm4944_vm2 = vweird.f32 %v8711_v46 }
0x1530   :  { %5988 = vrsqrt.f32 %v4876_v13  ;;  %vm4934_vm13 = vweird.f32 %v4876_v13 }
0x1531   :  { %5990 = vrsqrt.f32 %v8711_v46  ;;  %v4841_v10 = vsel %vm2630_vm7, %v4803_v50, 0.0 }
0x1532   :  { %5992 = vrsqrt.f32 %v8706_v4  ;;  %v8719_v38 = vpop.xlane.xlu0 %4818  ;;  %4842 = vadd.xlane.f32.xlu0 %v4841_v10  ;;  %v4828_v61 = vpop.xlane.xlu1 %4827 }
0x1533   :  { %v4813_v62 = vpop.xlane.xlu2 %4812  ;;  %v4862_v8 = vmul.f32 %v4828_v61, %v7302_v57 }
0x1534   :  { %v4857_v12 = vmul.f32 %v4813_v62, %v7302_v57 }
0x1535   :  { %v8724_v58 = vadd.f32 1e-05, %v4862_v8 }
0x1536   :  { %v5989_v21 = vpop.eup %5988  ;;  %v4873_v54 = vadd.f32 1e-05, %v4857_v12 }
0x1537   :  { %v4929_v40 = vmul.f32 %v5989_v21, %v4876_v13  ;;  %v8722_v51 = vpop.eup %5990  ;;  %vm4935_vm12 = vweird.f32 %v5989_v21  ;;  %vm4954_vm6 = vweird.f32 %v8724_v58 }
0x1538   :  { %5994 = vrsqrt.f32 %v4873_v54  ;;  %v4939_v53 = vmul.f32 %v8722_v51, %v8711_v46  ;;  %v8728_v29 = vpop.eup %5992  ;;  %vm4936_vm14 = vmor %vm4934_vm13, %vm4935_vm12  ;;  %vm4904_vm15 = vweird.f32 %v4873_v54  ;;  %vm4945_vm11 = vweird.f32 %v8722_v51 }
0x1539   :  { %v4930_v39 = vmul.f32 %v5989_v21, %v4929_v40  ;;  %5996 = vrsqrt.f32 %v8724_v58  ;;  %v4889_v49 = vmul.f32 %v8728_v29, %v8706_v4  ;;  %vm4946_vm5 = vmor %vm4944_vm2, %vm4945_vm11  ;;  %vm4895_vm9 = vweird.f32 %v8728_v29 }
0x153a   :  { %v4940_v52 = vmul.f32 %v8722_v51, %v4939_v53  ;;  %v4753_v48 = vpop.xlane.xlu0 %4752  ;;  %vm4896_vm4 = vmor %vm4894_vm10, %vm4895_vm9 }
0x153b   :  { %v4931_v36 = vmul.f32 0.5, %v4930_v39  ;;  %v4816_v44 = vpop.xlane.xlu2 %4815  ;;  %v4773_v0 = vmul.f32 %v4753_v48, %v7302_v57  ;;  %v4890_v41 = vmul.f32 %v8728_v29, %v4889_v49 }
0x153c   :  { %v4858_v9 = vmul.f32 %v4816_v44, %v7302_v57  ;;  %v4941_v1 = vmul.f32 0.5, %v4940_v52 }
0x153d   :  { %v4932_v25 = vsub.f32 1.5, %v4931_v36  ;;  %v8739_v26 = vsub.f32 %v8651_v34, %v4773_v0  ;;  %v8750_v34 = vld [vmem:[%s8996_s11] ss:$0 sm:$0xff] }
0x153e   :  { %v5995_v24 = vpop.eup %5994  ;;  %v8736_v43 = vadd.f32 1e-05, %v4858_v9  ;;  %v4942_v61 = vsub.f32 1.5, %v4941_v1  ;;  %v8758_v36 = vld [vmem:[%s8997_s12] ss:$0 sm:$0xff] }
0x153f   :  { %v4933_v16 = vmul.f32 %v5989_v21, %v4932_v25  ;;  %v4899_v17 = vmul.f32 %v5995_v24, %v4873_v54  ;;  %v5997_v35 = vpop.eup %5996  ;;  %v4805_v13 = vmul.f32 %v8739_v26, %v8739_v26  ;;  %vm4905_vm0 = vweird.f32 %v5995_v24 }
0x1540   :  { %5998 = vrsqrt.f32 %v8736_v43  ;;  %v4949_v10 = vmul.f32 %v5997_v35, %v8724_v58  ;;  %v4943_v48 = vmul.f32 %v8722_v51, %v4942_v61  ;;  %vm4955_vm1 = vweird.f32 %v5997_v35  ;;  %vm4906_vm3 = vmor %vm4904_vm15, %vm4905_vm0 }
0x1541   :  { %v4937_v50 = vsel %vm4936_vm14, %v5989_v21, %v4933_v16  ;;  %v4900_v12 = vmul.f32 %v5995_v24, %v4899_v17  ;;  %v4891_v21 = vmul.f32 0.5, %v4890_v41  ;;  %vm4956_vm8 = vmor %vm4954_vm6, %vm4955_vm1  ;;  %vm4914_vm13 = vweird.f32 %v8736_v43 }
0x1542   :  { %v5052_v62 = vmul.f32 %v4937_v50, %v8576_v7  ;;  %v4950_v40 = vmul.f32 %v5997_v35, %v4949_v10  ;;  %v4847_v7 = vsel %vm2630_vm7, %v4805_v13, 0.0  ;;  %v4947_v61 = vsel %vm4946_vm5, %v8722_v51, %v4943_v48 }
0x1543   :  { %v4831_v8 = vpop.xlane.xlu2 %4830  ;;  %v4901_v53 = vmul.f32 0.5, %v4900_v12  ;;  %4848 = vadd.xlane.f32.xlu2 %v4847_v7  ;;  %v4892_v41 = vsub.f32 1.5, %v4891_v21  ;;  %v5053_v58 = vmul.f32 %v4947_v61, %v8602_v56 }
0x1544   :  { %v4863_v39 = vmul.f32 %v4831_v8, %v7302_v57  ;;  %v5071_v52 = vmul.f32 %v8750_v34, %v5052_v62  ;;  %v4951_v9 = vmul.f32 0.5, %v4950_v40 }
0x1545   :  { %v4902_v49 = vsub.f32 1.5, %v4901_v53  ;;  %v4893_v46 = vmul.f32 %v8728_v29, %v4892_v41  ;;  %v5072_v7 = vmul.f32 %v8750_v34, %v5053_v58 }
0x1546   :  { %v5999_v44 = vpop.eup %5998  ;;  %v4879_v25 = vadd.f32 1e-05, %v4863_v39  ;;  %v5090_v1 = vadd.f32 %v8758_v36, %v5071_v52  ;;  %v4952_v16 = vsub.f32 1.5, %v4951_v9 }
0x1547   :  { %v4909_v0 = vmul.f32 %v5999_v44, %v8736_v43  ;;  %v4903_v17 = vmul.f32 %v5995_v24, %v4902_v49  ;;  %v4897_v51 = vsel %vm4896_vm4, %v8728_v29, %v4893_v46  ;;  %vm4915_vm12 = vweird.f32 %v5999_v44 }
0x1548   :  { %6000 = vrsqrt.f32 %v4879_v25  ;;  %5193 = vrot.lane.b32.xlu1 %v5090_v1, %s6073_s5  ;;  %v4953_v62 = vmul.f32 %v5997_v35, %v4952_v16  ;;  %v5048_v4 = vmul.f32 %v4897_v51, %v8568_v42  ;;  %v5091_v9 = vadd.f32 %v8758_v36, %v5072_v7  ;;  %vm4916_vm14 = vmor %vm4914_vm13, %vm4915_vm12 }
0x1549   :  { %v4910_v50 = vmul.f32 %v5999_v44, %v4909_v0  ;;  %v4907_v10 = vsel %vm4906_vm3, %v5995_v24, %v4903_v17  ;;  %vm4964_vm0 = vweird.f32 %v4879_v25 }
0x154a   :  { %v5049_v12 = vmul.f32 %v4907_v10, %v8607_v47  ;;  %v4957_v13 = vsel %vm4956_vm8, %v5997_v35, %v4953_v62  ;;  %v5067_v29 = vmul.f32 %v8750_v34, %v5048_v4  ;;  %v4756_v10 = vpop.xlane.xlu1 %4755 }
0x154b   :  { %v5054_v54 = vmul.f32 %v4957_v13, %v8631_v30  ;;  %v4911_v8 = vmul.f32 0.5, %v4910_v50  ;;  %v4859_v50 = vmul.f32 %v8719_v38, %v7302_v57 }
0x154c   :  { %v5068_v40 = vmul.f32 %v8750_v34, %v5049_v12  ;;  %v5086_v42 = vadd.f32 %v8758_v36, %v5067_v29 }
0x154d   :  { %v5073_v39 = vmul.f32 %v8750_v34, %v5054_v54  ;;  %v4912_v35 = vsub.f32 1.5, %v4911_v8  ;;  %v4875_v62 = vadd.f32 1e-05, %v4859_v50 }
0x154e   :  { %v6001_v53 = vpop.eup %6000  ;;  %v5087_v47 = vadd.f32 %v8758_v36, %v5068_v40 }
0x154f   :  { %v4959_v24 = vmul.f32 %v6001_v53, %v4879_v25  ;;  %v5092_v30 = vadd.f32 %v8758_v36, %v5073_v39  ;;  %v4913_v56 = vmul.f32 %v5999_v44, %v4912_v35  ;;  %vm4965_vm15 = vweird.f32 %v6001_v53 }
0x1550   :  { %5175 = vrot.lane.b32.xlu0 %v5087_v47, %s6072_s2  ;;  %vm4966_vm11 = vmor %vm4964_vm0, %vm4965_vm15  ;;  %6002 = vrsqrt.f32 %v4875_v62  ;;  %vm4924_vm2 = vweird.f32 %v4875_v62 }
0x1551   :  { %v4960_v21 = vmul.f32 %v6001_v53, %v4959_v24  ;;  %5197 = vrot.lane.b32.xlu1 %v5092_v30, %s6073_s5  ;;  %v4917_v49 = vsel %vm4916_vm14, %v5999_v44, %v4913_v56 }
0x1552   :  { %v5050_v0 = vmul.f32 %v4917_v49, %v8635_v28  ;;  %v4837_v46 = vpop.xlane.xlu1 %4836 }
0x1553   :  { %v4961_v52 = vmul.f32 0.5, %v4960_v21  ;;  %v4865_v38 = vmul.f32 %v4837_v46, %v7302_v57 }
0x1554   :  { %v5069_v16 = vmul.f32 %v8750_v34, %v5050_v0 }
0x1555   :  { %v4962_v48 = vsub.f32 1.5, %v4961_v52  ;;  %v4881_v58 = vadd.f32 1e-05, %v4865_v38 }
0x1556   :  { %v5088_v44 = vadd.f32 %v8758_v36, %v5069_v16  ;;  %v6003_v54 = vpop.eup %6002 }
0x1557   :  { %v4963_v1 = vmul.f32 %v6001_v53, %v4962_v48  ;;  %v4919_v40 = vmul.f32 %v6003_v54, %v4875_v62  ;;  %vm4925_vm1 = vweird.f32 %v6003_v54  ;;  %vm4984_vm10 = vweird.f32 %v4881_v58 }
0x1558   :  { %5195 = vrot.lane.b32.xlu0 %v5091_v9, %s6073_s5  ;;  %v4759_v43 = vpop.xlane.xlu0 %4758  ;;  %vm4926_vm3 = vmor %vm4924_vm2, %vm4925_vm1 }
0x1559   :  { %v4967_v17 = vsel %vm4966_vm11, %v6001_v53, %v4963_v1  ;;  %v4774_v53 = vmul.f32 %v4756_v10, %v7302_v57  ;;  %v4920_v47 = vmul.f32 %v6003_v54, %v4919_v40 }
0x155a   :  { %v5055_v41 = vmul.f32 %v4967_v17, %v8657_v59  ;;  %v4775_v59 = vmul.f32 %v4759_v43, %v7302_v57 }
0x155b   :  { %5173 = vrot.lane.b32.xlu2 %v5086_v42, %s6072_s2  ;;  %v8810_v39 = vsub.f32 %v8649_v11, %v4774_v53  ;;  %v4921_v21 = vmul.f32 0.5, %v4920_v47 }
0x155c   :  { %v5074_v28 = vmul.f32 %v8750_v34, %v5055_v41  ;;  %v8804_v8 = vsub.f32 %v8678_v55, %v4775_v59  ;;  %v4840_v53 = vpop.xlane.xlu2 %4839 }
0x155d   :  { %v4806_v55 = vmul.f32 %v8810_v39, %v8810_v39  ;;  %v4922_v7 = vsub.f32 1.5, %v4921_v21 }
0x155e   :  { %v5093_v25 = vadd.f32 %v8758_v36, %v5074_v28  ;;  %v4807_v24 = vmul.f32 %v8804_v8, %v8804_v8 }
0x155f   :  { %v4850_v56 = vsel %vm2630_vm7, %v4806_v55, 0.0  ;;  %v4923_v9 = vmul.f32 %v6003_v54, %v4922_v7 }
0x1560   :  { %v4834_v12 = vpop.xlane.xlu0 %4833  ;;  %v4853_v35 = vsel %vm2630_vm7, %v4807_v24, 0.0  ;;  %v4866_v24 = vmul.f32 %v4840_v53, %v7302_v57 }
0x1561   :  { %v4864_v61 = vmul.f32 %v4834_v12, %v7302_v57  ;;  %v4927_v49 = vsel %vm4926_vm3, %v6003_v54, %v4923_v9 }
0x1562   :  { %v5051_v42 = vmul.f32 %v4927_v49, %v8614_v18  ;;  %v4882_v21 = vadd.f32 1e-05, %v4866_v24 }
0x1563   :  { %5177 = vrot.lane.b32.xlu2 %v5088_v44, %s6072_s2  ;;  %v4880_v13 = vadd.f32 1e-05, %v4864_v61 }
0x1564   :  { %v5070_v16 = vmul.f32 %v8750_v34, %v5051_v42  ;;  %vm4994_vm2 = vweird.f32 %v4882_v21 }
0x1565   :  { %6004 = vrsqrt.f32 %v4880_v13  ;;  %vm4974_vm6 = vweird.f32 %v4880_v13 }
0x1566   :  { %6006 = vrsqrt.f32 %v4881_v58  ;;  %v5089_v50 = vadd.f32 %v8758_v36, %v5070_v16 }
0x156b   :  { %5199 = vrot.lane.b32.xlu2 %v5093_v25, %s6073_s5  ;;  %v6005_v51 = vpop.eup %6004 }
0x156c   :  { %v4969_v30 = vmul.f32 %v6005_v51, %v4880_v13  ;;  %v6007_v52 = vpop.eup %6006  ;;  %vm4975_vm5 = vweird.f32 %v6005_v51 }
0x156d   :  { %v4979_v11 = vmul.f32 %v6007_v52, %v4881_v58  ;;  %vm4976_vm8 = vmor %vm4974_vm6, %vm4975_vm5  ;;  %vm4985_vm9 = vweird.f32 %v6007_v52 }
0x156e   :  { %v4970_v4 = vmul.f32 %v6005_v51, %v4969_v30  ;;  %vm4986_vm4 = vmor %vm4984_vm10, %vm4985_vm9 }
0x156f   :  { %v4980_v48 = vmul.f32 %v6007_v52, %v4979_v11 }
0x1570   :  { %v4971_v29 = vmul.f32 0.5, %v4970_v4 }
0x1571   :  { %v4981_v1 = vmul.f32 0.5, %v4980_v48 }
0x1572   :  { %v4972_v0 = vsub.f32 1.5, %v4971_v29 }
0x1573   :  { %v4982_v17 = vsub.f32 1.5, %v4981_v1 }
0x1574   :  { %v4973_v43 = vmul.f32 %v6005_v51, %v4972_v0 }
0x1575   :  { %v4983_v28 = vmul.f32 %v6007_v52, %v4982_v17 }
0x1576   :  { %v4977_v41 = vsel %vm4976_vm8, %v6005_v51, %v4973_v43 }
0x1577   :  { %v5056_v44 = vmul.f32 %v4977_v41, %v8681_v27  ;;  %v4987_v62 = vsel %vm4986_vm4, %v6007_v52, %v4983_v28 }
0x1578   :  { %v5057_v10 = vmul.f32 %v4987_v62, %v8669_v15 }
0x1579   :  { %v5075_v18 = vmul.f32 %v8750_v34, %v5056_v44 }
0x157a   :  { %v5076_v59 = vmul.f32 %v8750_v34, %v5057_v10 }
0x157b   :  { %4854 = vadd.xlane.f32.xlu1 %v4853_v35  ;;  %v5094_v12 = vadd.f32 %v8758_v36, %v5075_v18 }
0x157c   :  { %v5095_v13 = vadd.f32 %v8758_v36, %v5076_v59 }
0x1582   :  { %4851 = vadd.xlane.f32.xlu0 %v4850_v56 }
0x1596   :  { %5179 = vrot.lane.b32.xlu0 %v5089_v50, %s6072_s2 }
0x159e   :  { %v4846_v25 = vpop.xlane.xlu1 %4845  ;;  %5311 = vrot.lane.b32.xlu0 %v5094_v12, %s6068_s30 }
0x159f   :  { %v4868_v27 = vmul.f32 %v4846_v25, %v7302_v57 }
0x15a1   :  { %v4884_v61 = vadd.f32 1e-05, %v4868_v27 }
0x15a3   :  { %6008 = vrsqrt.f32 %v4884_v61  ;;  %vm5014_vm13 = vweird.f32 %v4884_v61 }
0x15a4   :  { %6010 = vrsqrt.f32 %v4882_v21 }
0x15a5   :  { %v4843_v4 = vpop.xlane.xlu0 %4842 }
0x15a6   :  { %5313 = vrot.lane.b32.xlu0 %v5095_v13, %s6068_s30 }
0x15a9   :  { %v6009_v46 = vpop.eup %6008 }
0x15aa   :  { %v5009_v54 = vmul.f32 %v6009_v46, %v4884_v61  ;;  %vm5015_vm12 = vweird.f32 %v6009_v46  ;;  %v6011_v9 = vpop.eup %6010 }
0x15ab   :  { %vm5016_vm14 = vmor %vm5014_vm13, %vm5015_vm12  ;;  %v4989_v48 = vmul.f32 %v6011_v9, %v4882_v21  ;;  %vm4995_vm1 = vweird.f32 %v6011_v9 }
0x15ac   :  { %v5010_v38 = vmul.f32 %v6009_v46, %v5009_v54  ;;  %vm4996_vm3 = vmor %vm4994_vm2, %vm4995_vm1 }
0x15ad   :  { %v4990_v1 = vmul.f32 %v6011_v9, %v4989_v48 }
0x15ae   :  { %v5011_v40 = vmul.f32 0.5, %v5010_v38 }
0x15af   :  { %v4991_v17 = vmul.f32 0.5, %v4990_v1 }
0x15b0   :  { %v5012_v15 = vsub.f32 1.5, %v5011_v40 }
0x15b1   :  { %v4992_v50 = vsub.f32 1.5, %v4991_v17 }
0x15b2   :  { %v5013_v58 = vmul.f32 %v6009_v46, %v5012_v15 }
0x15b3   :  { %v4993_v18 = vmul.f32 %v6011_v9, %v4992_v50 }
0x15b4   :  { %v5017_v47 = vsel %vm5016_vm14, %v6009_v46, %v5013_v58 }
0x15b5   :  { %v5060_v51 = vmul.f32 %v5017_v47, %v8697_v31  ;;  %v4997_v62 = vsel %vm4996_vm3, %v6011_v9, %v4993_v18 }
0x15b6   :  { %v4849_v30 = vpop.xlane.xlu2 %4848  ;;  %v5058_v12 = vmul.f32 %v4997_v62, %v8687_v22  ;;  %v4867_v22 = vmul.f32 %v4843_v4, %v7302_v57 }
0x15b7   :  { %v5079_v35 = vmul.f32 %v8750_v34, %v5060_v51  ;;  %v4869_v7 = vmul.f32 %v4849_v30, %v7302_v57 }
0x15b8   :  { %v4883_v38 = vadd.f32 1e-05, %v4867_v22 }
0x15b9   :  { %v5098_v55 = vadd.f32 %v8758_v36, %v5079_v35  ;;  %v4885_v56 = vadd.f32 1e-05, %v4869_v7 }
0x15ba   :  { %v5194_v10 = vpop.permute.xlu1 %5193  ;;  %vm5004_vm13 = vweird.f32 %v4883_v38 }
0x15bb   :  { %5384 = vrot.lane.b32.xlu1 %v5098_v55, %s6053_s17  ;;  %6012 = vrsqrt.f32 %v4885_v56  ;;  %vm5024_vm0 = vweird.f32 %v4885_v56  ;;  %v5205_v25 = vadd.f32 %v5194_v10, %v7583_v2 }
0x15be   :  { %v5174_v52 = vpop.permute.xlu2 %5173 }
0x15bf   :  { %v5185_v11 = vadd.f32 %v5174_v52, %v7592_v20 }
0x15c1   :  { %v6013_v31 = vpop.eup %6012 }
0x15c2   :  { %v5176_v29 = vpop.permute.xlu0 %5175  ;;  %v5019_v0 = vmul.f32 %v6013_v31, %v4885_v56  ;;  %vm5025_vm15 = vweird.f32 %v6013_v31 }
0x15c3   :  { %v5186_v49 = vadd.f32 %v5176_v29, %v7618_v63  ;;  %5262 = vrot.lane.b32.xlu1 %v5185_v11, %s6053_s17  ;;  %vm5026_vm11 = vmor %vm5024_vm0, %vm5025_vm15  ;;  %v5198_v61 = vpop.permute.xlu1 %5197 }
0x15c4   :  { %v5020_v42 = vmul.f32 %v6013_v31, %v5019_v0 }
0x15c5   :  { %5264 = vrot.lane.b32.xlu0 %v5186_v49, %s6053_s17 }
0x15c6   :  { %v5021_v43 = vmul.f32 0.5, %v5020_v42  ;;  %v5178_v59 = vpop.permute.xlu2 %5177 }
0x15c7   :  { %v5187_v13 = vadd.f32 %v5178_v59, %v7633_v37 }
0x15c8   :  { %v5022_v16 = vsub.f32 1.5, %v5021_v43 }
0x15ca   :  { %v5023_v41 = vmul.f32 %v6013_v31, %v5022_v16  ;;  %v8850_v46 = vpop.permute.xlu0 %5195 }
0x15cc   :  { %v5027_v20 = vsel %vm5026_vm11, %v6013_v31, %v5023_v41 }
0x15cd   :  { %v5061_v44 = vmul.f32 %v5027_v20, %v8739_v26  ;;  %v5077_v26 = vmul.f32 %v8750_v34, %v5058_v12  ;;  %v5102_v20 = vlaneseq }
0x15ce   :  { %v5200_v59 = vpop.permute.xlu2 %5199 }
0x15cf   :  { %v5080_v63 = vmul.f32 %v8750_v34, %v5061_v44  ;;  %v5096_v27 = vadd.f32 %v8758_v36, %v5077_v26  ;;  %v8868_v50 = vand.u32 127, %v5102_v20 }
0x15d1   :  { %v5099_v28 = vadd.f32 %v8758_v36, %v5080_v63  ;;  %v5207_v63 = vadd.f32 %v5198_v61, %v7626_v33 }
0x15d3   :  { %5386 = vrot.lane.b32.xlu2 %v5099_v28, %s6053_s17 }
0x15db   :  { %5213 = vrot.lane.b32.xlu2 %v5205_v25, %s6068_s30  ;;  %v9020_v25 = vmov 1.0  }
0x15e3   :  { %5315 = vrot.lane.b32.xlu2 %v5096_v27, %s6068_s30  ;;  %v5206_v27 = vadd.f32 %v8850_v46, %v7608_v19 }
0x15eb   :  { %5266 = vrot.lane.b32.xlu2 %v5187_v13, %s6053_s17  ;;  %v5208_v13 = vadd.f32 %v5200_v59, %v7661_v45 }
0x15ee   :  { %v4855_v54 = vpop.xlane.xlu1 %4854 }
0x15ef   :  { %v4871_v2 = vmul.f32 %v4855_v54, %v7302_v57 }
0x15f1   :  { %v4887_v40 = vadd.f32 1e-05, %v4871_v2 }
0x15f3   :  { %6014 = vrsqrt.f32 %v4887_v40  ;;  %vm5044_vm6 = vweird.f32 %v4887_v40 }
0x15f4   :  { %6016 = vrsqrt.f32 %v4883_v38 }
0x15f5   :  { %v4852_v15 = vpop.xlane.xlu0 %4851 }
0x15f6   :  { %v4870_v53 = vmul.f32 %v4852_v15, %v7302_v57 }
0x15f8   :  { %v4886_v58 = vadd.f32 1e-05, %v4870_v53 }
0x15f9   :  { %v6015_v24 = vpop.eup %6014 }
0x15fa   :  { %6018 = vrsqrt.f32 %v4886_v58  ;;  %v5039_v37 = vmul.f32 %v6015_v24, %v4887_v40  ;;  %v6017_v47 = vpop.eup %6016  ;;  %vm5045_vm5 = vweird.f32 %v6015_v24  ;;  %vm5034_vm10 = vweird.f32 %v4886_v58 }
0x15fb   :  { %v4999_v21 = vmul.f32 %v6017_v47, %v4883_v38  ;;  %vm5046_vm8 = vmor %vm5044_vm6, %vm5045_vm5  ;;  %vm5005_vm12 = vweird.f32 %v6017_v47 }
0x15fc   :  { %v5040_v51 = vmul.f32 %v6015_v24, %v5039_v37  ;;  %vm5006_vm14 = vmor %vm5004_vm13, %vm5005_vm12 }
0x15fd   :  { %v5000_v56 = vmul.f32 %v6017_v47, %v4999_v21 }
0x15fe   :  { %v5041_v30 = vmul.f32 0.5, %v5040_v51 }
0x15ff   :  { %v5001_v31 = vmul.f32 0.5, %v5000_v56 }
0x1600   :  { %v6019_v35 = vpop.eup %6018  ;;  %v5042_v7 = vsub.f32 1.5, %v5041_v30 }
0x1601   :  { %v5029_v55 = vmul.f32 %v6019_v35, %v4886_v58  ;;  %vm5035_vm9 = vweird.f32 %v6019_v35  ;;  %v5002_v17 = vsub.f32 1.5, %v5001_v31  ;;  %v9022_v58 = vld [vmem:[#allocation3_spill] sm:$0xff] }
0x1602   :  { %v5043_v52 = vmul.f32 %v6015_v24, %v5042_v7  ;;  %vm5036_vm4 = vmor %vm5034_vm10, %vm5035_vm9 }
0x1603   :  { %v5030_v4 = vmul.f32 %v6019_v35, %v5029_v55  ;;  %v5003_v44 = vmul.f32 %v6017_v47, %v5002_v17 }
0x1604   :  { %v5047_v57 = vsel %vm5046_vm8, %v6015_v24, %v5043_v52  ;;  %v9023_v52 = vld [vmem:[#allocation4_spill] sm:$0xff] }
0x1605   :  { %v5031_v9 = vmul.f32 0.5, %v5030_v4  ;;  %v5063_v11 = vmul.f32 %v5047_v57, %v8804_v8  ;;  %v5007_v10 = vsel %vm5006_vm14, %v6017_v47, %v5003_v44  ;;  %v9024_v57 = vld [vmem:[#allocation6_spill] sm:$0xff] }
0x1606   :  { %v5059_v26 = vmul.f32 %v5007_v10, %v8709_v3 }
0x1607   :  { %v5032_v29 = vsub.f32 1.5, %v5031_v9  ;;  %v5082_v42 = vmul.f32 %v8750_v34, %v5063_v11 }
0x1608   :  { %v5180_v49 = vpop.permute.xlu0 %5179  ;;  %v5078_v19 = vmul.f32 %v8750_v34, %v5059_v26 }
0x1609   :  { %v5033_v48 = vmul.f32 %v6019_v35, %v5032_v29  ;;  %v5188_v0 = vadd.f32 %v5180_v49, %v7656_v23  ;;  %v5101_v43 = vadd.f32 %v8758_v36, %v5082_v42  ;;  %v8866_v23 = vshrl.u32 %v5102_v20, 7  ;;  %v9025_v49 = vld [vmem:[#allocation7_spill] sm:$0xff] }
0x160a   :  { %v5097_v3 = vadd.f32 %v8758_v36, %v5078_v19 }
0x160b   :  { %v5037_v1 = vsel %vm5036_vm4, %v6019_v35, %v5033_v48  ;;  %5268 = vrot.lane.b32.xlu2 %v5188_v0, %s6053_s17  ;;  %5390 = vrot.lane.b32.xlu0 %v5101_v43, %s6053_s17  ;;  %v5109_v28 = vadd.s32 48, %v8866_v23  ;;  %v5106_v18 = vadd.s32 24, %v8866_v23  ;;  %v5108_v62 = vadd.s32 40, %v8866_v23  ;;  %v9026_v0 = vld [vmem:[#allocation8_spill] sm:$0xff] }
0x160c   :  { %v5062_v16 = vmul.f32 %v5037_v1, %v8810_v39  ;;  %v5110_v39 = vadd.s32 56, %v8866_v23  ;;  %v5105_v12 = vadd.s32 16, %v8866_v23  ;;  %v5107_v33 = vadd.s32 32, %v8866_v23 }
0x160d   :  { %vm5127_vm0 = vcmp.eq.s32.totalorder %v5109_v28, %v8868_v50  ;;  %vm5124_vm11 = vcmp.eq.s32.totalorder %v5106_v18, %v8868_v50  ;;  %vm5126_vm2 = vcmp.eq.s32.totalorder %v5108_v62, %v8868_v50  ;;  %v5104_v61 = vadd.s32 8, %v8866_v23 }
0x160e   :  { %v5081_v8 = vmul.f32 %v8750_v34, %v5062_v16  ;;  %vm5128_vm15 = vcmp.eq.s32.totalorder %v5110_v39, %v8868_v50  ;;  %5695 = vmatpush.msk.msrb.mxu3 %vm5124_vm11, %v9020_v25  ;;  %vm5123_vm1 = vcmp.eq.s32.totalorder %v5105_v12, %v8868_v50  ;;  %vm5125_vm3 = vcmp.eq.s32.totalorder %v5107_v33, %v8868_v50  ;;  %v9027_v16 = vld [vmem:[#allocation5_spill] sm:$0xff] }
0x160f   :  { %5687 = vmatpush.msk.msrb.mxu0 %vm5128_vm15, %v9020_v25  ;;  %vm5122_vm5 = vcmp.eq.s32.totalorder %v5104_v61, %v8868_v50  ;;  %vm5121_vm6 = vcmp.eq.s32.totalorder %v8866_v23, %v8868_v50  ;;  %v5118_v47 = vadd.s32 120, %v8866_v23  ;;  %v5114_v51 = vadd.s32 88, %v8866_v23 }
0x1610   :  { %v5100_v41 = vadd.f32 %v8758_v36, %v5081_v8  ;;  %5696 = vmatpush.msk.msrb.mxu3 %vm5123_vm1, %v9020_v25  ;;  %v5312_v46 = vpop.permute.xlu0 %5311  ;;  %v5117_v35 = vadd.s32 112, %v8866_v23  ;;  %v5113_v21 = vadd.s32 80, %v8866_v23  ;;  %v5116_v30 = vadd.s32 104, %v8866_v23 }
0x1611   :  { %5688 = vmatpush.msk.msrb.mxu0 %vm5127_vm0, %v9020_v25  ;;  %v5323_v36 = vadd.f32 %v5312_v46, %v7668_v32  ;;  %v5112_v55 = vadd.s32 72, %v8866_v23  ;;  %vm5136_vm8 = vcmp.eq.s32.totalorder %v5118_v47, %v8868_v50  ;;  %vm5132_vm9 = vcmp.eq.s32.totalorder %v5114_v51, %v8868_v50 }
0x1612   :  { %5388 = vrot.lane.b32.xlu1 %v5100_v41, %s6053_s17  ;;  %5697 = vmatpush.msk.msrb.mxu3 %vm5122_vm5, %v9020_v25  ;;  %vm5135_vm10 = vcmp.eq.s32.totalorder %v5117_v35, %v8868_v50  ;;  %vm5131_vm4 = vcmp.eq.s32.totalorder %v5113_v21, %v8868_v50  ;;  %vm5134_vm12 = vcmp.eq.s32.totalorder %v5116_v30, %v8868_v50  ;;  %v5115_v7 = vadd.s32 96, %v8866_v23 }
0x1613   :  { %5217 = vrot.lane.b32.xlu0 %v5207_v63, %s6068_s30  ;;  %5689 = vmatpush.msk.msrb.mxu0 %vm5126_vm2, %v9020_v25  ;;  %vm5130_vm13 = vcmp.eq.s32.totalorder %v5112_v55, %v8868_v50  ;;  %v5111_v4 = vadd.s32 64, %v8866_v23  ;;  %vm5428_vm0 = vcmask 130048  }
0x1614   :  { %5698 = vmatpush.msk.msrb.mxu3 %vm5121_vm6, %v9020_v25  ;;  %vm5133_vm14 = vcmp.eq.s32.totalorder %v5115_v7, %v8868_v50 }
0x1615   :  { %5690 = vmatpush.msk.msrb.mxu0 %vm5125_vm3, %v9020_v25  ;;  %vm5129_vm15 = vcmp.eq.s32.totalorder %v5111_v4, %v8868_v50 }
0x1616   :  { %5711 = vmatpush.msk.msra.mxu3 %vm5136_vm8, %v9020_v25 }
0x1617   :  { %5703 = vmatpush.msk.msra.mxu0 %vm5132_vm9, %v9020_v25 }
0x1618   :  { %v5314_v38 = vpop.permute.xlu0 %5313  ;;  %5712 = vmatpush.msk.msra.mxu3 %vm5135_vm10, %v9020_v25 }
0x1619   :  { %5704 = vmatpush.msk.msra.mxu0 %vm5131_vm4, %v9020_v25 }
0x161a   :  { %5215 = vrot.lane.b32.xlu1 %v5206_v27, %s6068_s30  ;;  %5713 = vmatpush.msk.msra.mxu3 %vm5134_vm12, %v9020_v25 }
0x161b   :  { %5705 = vmatpush.msk.msra.mxu0 %vm5130_vm13, %v9020_v25 }
0x161c   :  { %5714 = vmatpush.msk.msra.mxu3 %vm5133_vm14, %v9020_v25 }
0x161d   :  { %5706 = vmatpush.msk.msra.mxu0 %vm5129_vm15, %v9020_v25 }
0x1622   :  { %5317 = vrot.lane.b32.xlu1 %v5097_v3, %s6068_s30 }
0x162a   :  { %5219 = vrot.lane.b32.xlu1 %v5208_v13, %s6068_s30 }
0x162d   :  { %v5385_v22 = vpop.permute.xlu1 %5384  ;;  %v5387_v34 = vpop.permute.xlu2 %5386 }
0x162e   :  { %v5396_v54 = vadd.f32 %v5385_v22, %v7687_v60  ;;  %v5397_v2 = vadd.f32 %v5385_v22, %v7713_v5  ;;  %v5398_v45 = vadd.f32 %v5387_v34, %v7693_v6  ;;  %v5399_v40 = vadd.f32 %v5387_v34, %v7720_v14  ;;  %v9021_v5 = vld [vmem:[#allocation2_spill] sm:$0xff] }
0x162f   :  { %v5324_v53 = vadd.f32 %v5314_v38, %v9021_v5 }
0x1630   :  { %5414 = vrot.lane.b32.xlu2 %v5397_v2, %s6072_s2  ;;  %5412 = vrot.lane.b32.xlu0 %v5396_v54, %s6072_s2 }
0x1632   :  { %5331 = vrot.lane.b32.xlu1 %v5323_v36, %s6073_s5 }
0x1635   :  { %v5263_v15 = vpop.permute.xlu1 %5262  ;;  %v5214_v60 = vpop.permute.xlu2 %5213 }
0x1636   :  { %5699 = vmatmul.msk.f32.vlgmr.msrb.gmra.mxu3 %vm2630_vm7, %v5263_v15  ;;  %5691 = vmatmul.msk.f32.vlgmr.msrb.gmra.mxu0 %vm2630_vm7, %v5214_v60 }
0x1637   :  { %v5265_v32 = vpop.permute.xlu0 %5264 }
0x1638   :  { %5418 = vrot.lane.b32.xlu2 %v5399_v40, %s6072_s2  ;;  %5416 = vrot.lane.b32.xlu0 %v5398_v45, %s6072_s2 }
0x163a   :  { %5333 = vrot.lane.b32.xlu1 %v5324_v53, %s6073_s5 }
0x163d   :  { %v5316_v6 = vpop.permute.xlu2 %5315 }
0x163e   :  { %5700 = vmatmul.msk.f32.gmra.mxu3 %vm2630_vm7, %v5265_v32  ;;  %v5325_v14 = vadd.f32 %v5316_v6, %v9022_v58 }
0x1642   :  { %5335 = vrot.lane.b32.xlu1 %v5325_v14, %s6073_s5 }
0x1645   :  { %v5267_v24 = vpop.permute.xlu2 %5266 }
0x1646   :  { %5701 = vmatmul.msk.f32.gmra.mxu3 %vm2630_vm7, %v5267_v24 }
0x1665   :  { %v5269_v37 = vpop.permute.xlu2 %5268 }
0x1666   :  { %5702 = vmatmul.msk.f32.gmra.mxu3 %vm2630_vm7, %v5269_v37 }
0x167d   :  { %v5391_v29 = vpop.permute.xlu0 %5390 }
0x167e   :  { %v5402_v48 = vadd.f32 %v5391_v29, %v9025_v49  ;;  %v5403_v42 = vadd.f32 %v5391_v29, %v9026_v0 }
0x1684   :  { %v5389_v56 = vpop.permute.xlu1 %5388 }
0x1685   :  { %v5400_v9 = vadd.f32 %v5389_v56, %v9023_v52  ;;  %v5401_v11 = vadd.f32 %v5389_v56, %v9024_v57  ;;  %v5218_v1 = vpop.permute.xlu0 %5217 }
0x1687   :  { %5422 = vrot.lane.b32.xlu2 %v5401_v11, %s6072_s2  ;;  %5420 = vrot.lane.b32.xlu0 %v5400_v9, %s6072_s2 }
0x168a   :  { %v5415_v41 = vpop.permute.xlu2 %5414 }
0x168c   :  { %v5216_v31 = vpop.permute.xlu1 %5215 }
0x168d   :  { %5692 = vmatmul.msk.f32.gmra.mxu0 %vm2630_vm7, %v5216_v31 }
0x168f   :  { %5426 = vrot.lane.b32.xlu2 %v5403_v42, %s6072_s2  ;;  %5424 = vrot.lane.b32.xlu0 %v5402_v48, %s6072_s2 }
0x1692   :  { %v5419_v50 = vpop.permute.xlu2 %5418 }
0x1694   :  { %v5318_v43 = vpop.permute.xlu1 %5317 }
0x1695   :  { %v5326_v17 = vadd.f32 %v5318_v43, %v9027_v16  ;;  %5693 = vmatmul.msk.f32.gmra.mxu0 %vm2630_vm7, %v5218_v1 }
0x1697   :  { %5337 = vrot.lane.b32.xlu1 %v5326_v17, %s6073_s5 }
0x169c   :  { %v5220_v8 = vpop.permute.xlu1 %5219 }
0x169d   :  { %5694 = vmatmul.msk.f32.gmra.mxu0 %vm2630_vm7, %v5220_v8 }
0x16a2   :  { %v5413_v20 = vpop.permute.xlu0 %5412 }
0x16a3   :  { %v5429_v44 = vsel %vm5428_vm0, %v5413_v20, %v5415_v41 }
0x16a4   :  { %5715 = vmatmul.msk.f32.vlgmr.msra.gmra.mxu3 %vm2630_vm7, %v5429_v44  ;;  %v5332_v23 = vpop.permute.xlu1 %5331 }
0x16a5   :  { %5707 = vmatmul.msk.f32.vlgmr.msra.gmra.mxu0 %vm2630_vm7, %v5332_v23 }
0x16aa   :  { %v5417_v63 = vpop.permute.xlu0 %5416 }
0x16ab   :  { %v5430_v39 = vsel %vm5428_vm0, %v5417_v63, %v5419_v50 }
0x16ac   :  { %5716 = vmatmul.msk.f32.gmra.mxu3 %vm2630_vm7, %v5430_v39  ;;  %v5334_v28 = vpop.permute.xlu1 %5333 }
0x16ad   :  { %5708 = vmatmul.msk.f32.gmra.mxu0 %vm2630_vm7, %v5334_v28 }
0x16b3   :  { %v5246_v27 = vpop.f32.mrf.mxu0 }
0x16b4   :  { %v5336_v18 = vpop.permute.xlu1 %5335 }
0x16b5   :  { %5709 = vmatmul.msk.f32.gmra.mxu0 %vm2630_vm7, %v5336_v18 }
0x16b9   :  { %v5295_v33 = vpop.f32.mrf.mxu3 }
0x16ba   :  { %v5296_v38 = vadd.f32 %v5295_v33, %v5246_v27 }
0x16c1   :  { %v5298_v19 = vpop.f32.mrf.mxu3 }
0x16c9   :  { %v5301_v13 = vpop.f32.mrf.mxu3 }
0x16e1   :  { %v5423_v62 = vpop.permute.xlu2 %5422 }
0x16e9   :  { %v5427_v25 = vpop.permute.xlu2 %5426  ;;  %v5304_v54 = vpop.f32.mrf.mxu3 }
0x16f9   :  { %v5421_v10 = vpop.permute.xlu0 %5420 }
0x16fa   :  { %v5431_v12 = vsel %vm5428_vm0, %v5421_v10, %v5423_v62 }
0x16fb   :  { %5717 = vmatmul.msk.f32.gmra.mxu3 %vm2630_vm7, %v5431_v12 }
0x1701   :  { %v5425_v26 = vpop.permute.xlu0 %5424 }
0x1702   :  { %v5432_v61 = vsel %vm5428_vm0, %v5425_v26, %v5427_v25 }
0x1703   :  { %5718 = vmatmul.msk.f32.gmra.mxu3 %vm2630_vm7, %v5432_v61 }
0x1709   :  { %v5338_v3 = vpop.permute.xlu1 %5337 }
0x170a   :  { %v5249_v59 = vpop.f32.mrf.mxu0  ;;  %5710 = vmatmul.msk.f32.gmra.mxu0 %vm2630_vm7, %v5338_v3 }
0x170b   :  { %v5299_v5 = vadd.f32 %v5298_v19, %v5249_v59 }
0x1712   :  { %v5252_v46 = vpop.f32.mrf.mxu0 }
0x1713   :  { %v5302_v22 = vadd.f32 %v5301_v13, %v5252_v46 }
0x171a   :  { %v5255_v2 = vpop.f32.mrf.mxu0 }
0x171b   :  { %v5305_v34 = vadd.f32 %v5304_v54, %v5255_v2 }
0x1722   :  { %v5364_v36 = vpop.f32.mrf.mxu0 }
0x1723   :  { %v5376_v45 = vadd.f32 %v5364_v36, %v5296_v38 }
0x1727   :  { %v5458_v40 = vpop.f32.mrf.mxu3 }
0x1728   :  { %v5470_v15 = vadd.f32 %v5458_v40, %v5376_v45 }
0x172a   :  { %5474 = vst [vmem:[%s8998_s13] sm:$0xff] %v5470_v15  ;;  %v5367_v60 = vpop.f32.mrf.mxu0 }
0x172b   :  { %v5377_v53 = vadd.f32 %v5367_v60, %v5299_v5 }
0x172f   :  { %v5461_v32 = vpop.f32.mrf.mxu3 }
0x1730   :  { %v5471_v6 = vadd.f32 %v5461_v32, %v5377_v53 }
0x1732   :  { %5475 = vst [vmem:[%s8998_s13 + $0x8] sm:$0xff] %v5471_v6  ;;  %v5370_v58 = vpop.f32.mrf.mxu0 }
0x1733   :  { %v5378_v14 = vadd.f32 %v5370_v58, %v5302_v22 }
0x177e   :  { %v5464_v24 = vpop.f32.mrf.mxu3 }
0x177f   :  { %v5472_v37 = vadd.f32 %v5464_v24, %v5378_v14 }
0x1781   :  { %5476 = vst [vmem:[%s8998_s13 + $0x10] sm:$0xff] %v5472_v37 }
0x1786   :  { %v5467_v35 = vpop.f32.mrf.mxu3 }
0x1787   :  { %v5373_v47 = vpop.f32.mrf.mxu0 }
0x1788   :  { %v5379_v51 = vadd.f32 %v5373_v47, %v5305_v34 }
0x178a   :  { %v5473_v21 = vadd.f32 %v5467_v35, %v5379_v51 }
0x178c   :  { %5477 = vst [vmem:[%s8998_s13 + $0x18] sm:$0xff] %v5473_v21 }

</bundles_post_ra>
